<compile_context>
chip_gen: v5e
topology: v5e:2x2
jax: 0.10.0
libtpu: 0.0.40
codegen_flags: <defaults>
</compile_context>

<pallas_src>
import functools

import jax
import jax.numpy as jnp
from jax.experimental import pallas as pl
from jax.experimental.pallas import tpu as pltpu


def _round_up(n, m):
    return ((n + m - 1) // m) * m


# ----------------------------------------------------------------------------
# Fused Pallas kernel: conv3x3+ReLU -> conv3x3+ReLU -> global average pool.
# One grid step per batch element; intermediates never leave VMEM.
# ----------------------------------------------------------------------------
def _encoder_fused_kernel(x_ref, w1_ref, b1_ref, w2_ref, b2_ref, o_ref,
                          pad_scr, *, H, W, C_IN, CP):
    # x_ref  : (1, H, W, C_IN)  bf16  one image (NHWC)
    # w*_ref : (9*CP, CP)       bf16  im2col-flattened conv weights (zero-padded)
    # b*_ref : (1, CP)          f32   bias (zero in padded channels)
    # o_ref  : (1, 1, CP)       f32   pooled features for this image
    # pad_scr: (H+2, W+2, CP)   bf16  zero-padded activation scratch (reused)
    HW = H * W

    def conv3x3_relu(x_hwc, cin, w_ref, b_ref):
        # Fold the 'same' zero padding into the kernel: re-zero the VMEM
        # scratch and write the interior. Channels >= cin stay zero; the
        # matching weight rows are zero, so they contribute nothing.
        pad_scr[...] = jnp.zeros_like(pad_scr)
        pad_scr[1:H + 1, 1:W + 1, :cin] = x_hwc
        # im2col: nine lane-aligned (HW, CP) taps -> one (HW, 9*CP) slab,
        # then a single bf16 MXU matmul with f32 accumulation (replaces the
        # previous 9 tiny matmuls + per-tap strided relayouts).
        taps = [
            pad_scr[kh:kh + H, kw:kw + W, :].reshape(HW, CP)
            for kh in range(3)
            for kw in range(3)
        ]
        slab = jnp.concatenate(taps, axis=-1)                 # (HW, 9*CP) bf16
        acc = jnp.dot(slab, w_ref[...],
                      preferred_element_type=jnp.float32)     # (HW, CP)  f32
        return jnp.maximum(acc + b_ref[...], 0.0)             # f32 bias + ReLU

    a1 = conv3x3_relu(x_ref[0], C_IN, w1_ref, b1_ref)         # (HW, CP) f32
    a1 = a1.reshape(H, W, CP).astype(pad_scr.dtype)           # -> bf16, VMEM only
    a2 = conv3x3_relu(a1, CP, w2_ref, b2_ref)                 # (HW, CP) f32

    # Global average pool over the spatial axis (cross-sublane reduce).
    pooled = jnp.sum(a2, axis=0, keepdims=True) * (1.0 / HW)  # (1, CP) f32
    o_ref[...] = pooled.reshape(1, 1, CP).astype(o_ref.dtype)


# ----------------------------------------------------------------------------
# Wrapper: layout plumbing (NCHW -> NHWC, channel padding, im2col weights).
# ----------------------------------------------------------------------------
def image_encoder_forward(params, x_nchw):
    """Equivalent of ImageEncoder.forward: NCHW image batch -> (B, feature_dim)."""
    B, C_IN, H, W = x_nchw.shape
    C1 = params["b1"].shape[0]
    C2 = params["b2"].shape[0]
    CP = _round_up(max(C_IN, C1, C2, 128), 128)     # lane-dense channel padding

    # NCHW (PyTorch) -> NHWC (channels on lanes); bf16 activations for the MXU.
    x = jnp.transpose(x_nchw, (0, 2, 3, 1)).astype(jnp.bfloat16)

    def prep_w(w):  # (3,3,ci,co) -> (9*CP, CP) bf16, zero-padded channels
        ci, co = w.shape[2], w.shape[3]
        w = jnp.pad(w, ((0, 0), (0, 0), (0, CP - ci), (0, CP - co)))
        return w.reshape(9 * CP, CP).astype(jnp.bfloat16)

    def prep_b(b):  # (co,) -> (1, CP) f32
        return jnp.pad(b, (0, CP - b.shape[0])).reshape(1, CP).astype(jnp.float32)

    w1, b1 = prep_w(params["w1"]), prep_b(params["b1"])
    w2, b2 = prep_w(params["w2"]), prep_b(params["b2"])

    kernel = functools.partial(_encoder_fused_kernel, H=H, W=W, C_IN=C_IN, CP=CP)

    out = pl.pallas_call(
        kernel,
        out_shape=jax.ShapeDtypeStruct((B, 1, CP), jnp.float32),
        grid_spec=pltpu.PrefetchScalarGridSpec(
            num_scalar_prefetch=0,
            grid=(B,),
            in_specs=[
                pl.BlockSpec((1, H, W, C_IN), lambda b: (b, 0, 0, 0)),
                pl.BlockSpec((9 * CP, CP), lambda b: (0, 0)),
                pl.BlockSpec((1, CP), lambda b: (0, 0)),
                pl.BlockSpec((9 * CP, CP), lambda b: (0, 0)),
                pl.BlockSpec((1, CP), lambda b: (0, 0)),
            ],
            out_specs=pl.BlockSpec((1, 1, CP), lambda b: (b, 0, 0)),
            scratch_shapes=[pltpu.VMEM((H + 2, W + 2, CP), jnp.bfloat16)],
        ),
        compiler_params=pltpu.CompilerParams(
            dimension_semantics=("parallel",),     # batch axis -> both TCs on v7x
            vmem_limit_bytes=32 * 1024 * 1024,     # fits v5e/v6e/v7x scoped VMEM
        ),
    )(x, w1, b1, w2, b2)

    return out[:, 0, :C2]   # drop channel padding -> (B, feature_dim) float32


# ----------------------------------------------------------------------------
# Synthetic parameters + pure-XLA reference (same bf16 operand quantization).
# ----------------------------------------------------------------------------
def init_image_encoder_params(key, c_in=3, c1=32, c2=64):
    k1, k2 = jax.random.split(key)
    w1 = jax.random.normal(k1, (3, 3, c_in, c1), jnp.float32) * jnp.sqrt(2.0 / (9 * c_in))
    b1 = jnp.full((c1,), 0.01, jnp.float32)
    w2 = jax.random.normal(k2, (3, 3, c1, c2), jnp.float32) * jnp.sqrt(2.0 / (9 * c1))
    b2 = jnp.full((c2,), 0.01, jnp.float32)
    return {"w1": w1, "b1": b1, "w2": w2, "b2": b2}


def _reference_forward(params, x_nchw):
    x = jnp.transpose(x_nchw, (0, 2, 3, 1)).astype(jnp.float32)

    def conv(h, w, b):
        hq = h.astype(jnp.bfloat16).astype(jnp.float32)
        wq = w.astype(jnp.bfloat16).astype(jnp.float32)
        y = jax.lax.conv_general_dilated(
            hq, wq, window_strides=(1, 1), padding="SAME",
            dimension_numbers=("NHWC", "HWIO", "NHWC"),
            preferred_element_type=jnp.float32)
        return jnp.maximum(y + b, 0.0)

    h = conv(x, params["w1"], params["b1"])
    h = conv(h, params["w2"], params["b2"])
    return jnp.mean(h, axis=(1, 2))


if __name__ == "__main__":
    key = jax.random.PRNGKey(0)
    k_param, k_data = jax.random.split(key)

    B, C_IN, H, W = 2, 3, 16, 16          # small NCHW image batch (like PyTorch)
    x = jax.random.normal(k_data, (B, C_IN, H, W), jnp.float32)
    params = init_image_encoder_params(k_param, c_in=C_IN, c1=32, c2=64)

    feats = jax.block_until_ready(jax.jit(image_encoder_forward)(params, x))

    assert feats.shape == (B, 64), feats.shape
    assert feats.dtype == jnp.float32
    assert bool(jnp.all(jnp.isfinite(feats)))

    # Numerical sanity check vs. a pure-XLA reference using the same bf16
    # operand quantization and f32 accumulation.
    ref = jax.block_until_ready(_reference_forward(params, x))
    assert bool(jnp.allclose(feats, ref, rtol=5e-2, atol=5e-2)), (
        float(jnp.max(jnp.abs(feats - ref))))

    print("KERNEL_OK")
</pallas_src>

<mosaic_0001>
module attributes {stable_mosaic.version = 11 : i64} {
  func.func @_encoder_fused_kernel(%arg0: i32, %arg1: memref<1x16x16x3xbf16, #tpu.memory_space<vmem>>, %arg2: memref<1152x128xbf16, #tpu.memory_space<vmem>>, %arg3: memref<1x128xf32, #tpu.memory_space<vmem>>, %arg4: memref<1152x128xbf16, #tpu.memory_space<vmem>>, %arg5: memref<1x128xf32, #tpu.memory_space<vmem>>, %arg6: memref<1x1x128xf32, #tpu.memory_space<vmem>>, %arg7: memref<18x18x128xbf16, #tpu.memory_space<vmem>>) attributes {dimension_semantics = [#tpu.dimension_semantics<parallel>], iteration_bounds = array<i64: 2>, scalar_prefetch = 0 : i64, scratch_operands = 1 : i64, tpu.core_type = #tpu.core_type<tc>, window_params = [{transform_indices = @transform_0, window_bounds = array<i64: 1, 16, 16, 3>}, {pipeline_mode = #tpu.pipeline_mode<synchronous>, transform_indices = @transform_1, window_bounds = array<i64: 1152, 128>}, {pipeline_mode = #tpu.pipeline_mode<synchronous>, transform_indices = @transform_2, window_bounds = array<i64: 1, 128>}, {pipeline_mode = #tpu.pipeline_mode<synchronous>, transform_indices = @transform_3, window_bounds = array<i64: 1152, 128>}, {pipeline_mode = #tpu.pipeline_mode<synchronous>, transform_indices = @transform_4, window_bounds = array<i64: 1, 128>}, {transform_indices = @transform_5, window_bounds = array<i64: 1, 1, 128>}]} {
    %c0 = arith.constant 0 : index
    %c0_0 = arith.constant 0 : index
    %c0_1 = arith.constant 0 : index
    %c0_2 = arith.constant 0 : index
    %0 = vector.load %arg1[%c0, %c0_0, %c0_1, %c0_2] : memref<1x16x16x3xbf16, #tpu.memory_space<vmem>>, vector<1x16x16x3xbf16>
    %1 = vector.shape_cast %0 : vector<1x16x16x3xbf16> to vector<16x16x3xbf16>
    %cst = arith.constant 0.000000e+00 : bf16
    %2 = vector.broadcast %cst : bf16 to vector<18x18x128xbf16>
    %c0_3 = arith.constant 0 : index
    %c0_4 = arith.constant 0 : index
    %c0_5 = arith.constant 0 : index
    %3 = vector.load %arg7[%c0_3, %c0_4, %c0_5] : memref<18x18x128xbf16, #tpu.memory_space<vmem>>, vector<18x18x128xbf16>
    tpu.vector_store %arg7[%c0_3, %c0_4, %c0_5], %2 {strides = array<i32>} : memref<18x18x128xbf16, #tpu.memory_space<vmem>>, vector<18x18x128xbf16>,
    %c1 = arith.constant 1 : index
    %c1_6 = arith.constant 1 : index
    %c0_7 = arith.constant 0 : index
    %4 = vector.load %arg7[%c1, %c1_6, %c0_7] : memref<18x18x128xbf16, #tpu.memory_space<vmem>>, vector<16x16x3xbf16>
    tpu.vector_store %arg7[%c1, %c1_6, %c0_7], %1 {strides = array<i32>} : memref<18x18x128xbf16, #tpu.memory_space<vmem>>, vector<16x16x3xbf16>,
    %c0_8 = arith.constant 0 : index
    %c0_9 = arith.constant 0 : index
    %c0_10 = arith.constant 0 : index
    %5 = vector.load %arg7[%c0_8, %c0_9, %c0_10] : memref<18x18x128xbf16, #tpu.memory_space<vmem>>, vector<16x16x128xbf16>
    %6 = vector.shape_cast %5 : vector<16x16x128xbf16> to vector<256x128xbf16>
    %c0_11 = arith.constant 0 : index
    %c1_12 = arith.constant 1 : index
    %c0_13 = arith.constant 0 : index
    %7 = vector.load %arg7[%c0_11, %c1_12, %c0_13] : memref<18x18x128xbf16, #tpu.memory_space<vmem>>, vector<16x16x128xbf16>
    %8 = vector.shape_cast %7 : vector<16x16x128xbf16> to vector<256x128xbf16>
    %c0_14 = arith.constant 0 : index
    %c2 = arith.constant 2 : index
    %c0_15 = arith.constant 0 : index
    %9 = vector.load %arg7[%c0_14, %c2, %c0_15] : memref<18x18x128xbf16, #tpu.memory_space<vmem>>, vector<16x16x128xbf16>
    %10 = vector.shape_cast %9 : vector<16x16x128xbf16> to vector<256x128xbf16>
    %c1_16 = arith.constant 1 : index
    %c0_17 = arith.constant 0 : index
    %c0_18 = arith.constant 0 : index
    %11 = vector.load %arg7[%c1_16, %c0_17, %c0_18] : memref<18x18x128xbf16, #tpu.memory_space<vmem>>, vector<16x16x128xbf16>
    %12 = vector.shape_cast %11 : vector<16x16x128xbf16> to vector<256x128xbf16>
    %c1_19 = arith.constant 1 : index
    %c1_20 = arith.constant 1 : index
    %c0_21 = arith.constant 0 : index
    %13 = vector.load %arg7[%c1_19, %c1_20, %c0_21] : memref<18x18x128xbf16, #tpu.memory_space<vmem>>, vector<16x16x128xbf16>
    %14 = vector.shape_cast %13 : vector<16x16x128xbf16> to vector<256x128xbf16>
    %c1_22 = arith.constant 1 : index
    %c2_23 = arith.constant 2 : index
    %c0_24 = arith.constant 0 : index
    %15 = vector.load %arg7[%c1_22, %c2_23, %c0_24] : memref<18x18x128xbf16, #tpu.memory_space<vmem>>, vector<16x16x128xbf16>
    %16 = vector.shape_cast %15 : vector<16x16x128xbf16> to vector<256x128xbf16>
    %c2_25 = arith.constant 2 : index
    %c0_26 = arith.constant 0 : index
    %c0_27 = arith.constant 0 : index
    %17 = vector.load %arg7[%c2_25, %c0_26, %c0_27] : memref<18x18x128xbf16, #tpu.memory_space<vmem>>, vector<16x16x128xbf16>
    %18 = vector.shape_cast %17 : vector<16x16x128xbf16> to vector<256x128xbf16>
    %c2_28 = arith.constant 2 : index
    %c1_29 = arith.constant 1 : index
    %c0_30 = arith.constant 0 : index
    %19 = vector.load %arg7[%c2_28, %c1_29, %c0_30] : memref<18x18x128xbf16, #tpu.memory_space<vmem>>, vector<16x16x128xbf16>
    %20 = vector.shape_cast %19 : vector<16x16x128xbf16> to vector<256x128xbf16>
    %c2_31 = arith.constant 2 : index
    %c2_32 = arith.constant 2 : index
    %c0_33 = arith.constant 0 : index
    %21 = vector.load %arg7[%c2_31, %c2_32, %c0_33] : memref<18x18x128xbf16, #tpu.memory_space<vmem>>, vector<16x16x128xbf16>
    %22 = vector.shape_cast %21 : vector<16x16x128xbf16> to vector<256x128xbf16>
    %23 = tpu.concatenate %6, %8, %10, %12, %14, %16, %18, %20, %22 in 1 : vector<256x128xbf16>, vector<256x128xbf16>, vector<256x128xbf16>, vector<256x128xbf16>, vector<256x128xbf16>, vector<256x128xbf16>, vector<256x128xbf16>, vector<256x128xbf16>, vector<256x128xbf16> -> vector<256x1152xbf16>
    %c0_34 = arith.constant 0 : index
    %c0_35 = arith.constant 0 : index
    %24 = vector.load %arg2[%c0_34, %c0_35] : memref<1152x128xbf16, #tpu.memory_space<vmem>>, vector<1152x128xbf16>
    %cst_36 = arith.constant dense<0.000000e+00> : vector<256x128xf32>
    %25 = tpu.matmul %23, %24, %cst_36 {dimension_numbers = #tpu.dot_dimension_numbers<[1], [0], [0], [1], [0, 0, 1, 1], [], []>} : vector<256x1152xbf16>, vector<1152x128xbf16>, vector<256x128xf32> -> vector<256x128xf32>
    %c0_37 = arith.constant 0 : index
    %c0_38 = arith.constant 0 : index
    %26 = vector.load %arg3[%c0_37, %c0_38] : memref<1x128xf32, #tpu.memory_space<vmem>>, vector<1x128xf32>
    %27 = vector.broadcast %26 : vector<1x128xf32> to vector<256x128xf32>
    %28 = arith.addf %25, %27 : vector<256x128xf32>
    %cst_39 = arith.constant 0.000000e+00 : f32
    %29 = vector.broadcast %cst_39 : f32 to vector<256x128xf32>
    %30 = arith.maximumf %28, %29 : vector<256x128xf32>
    %31 = vector.shape_cast %30 : vector<256x128xf32> to vector<16x16x128xf32>
    %32 = arith.truncf %31 : vector<16x16x128xf32> to vector<16x16x128xbf16>
    %cst_40 = arith.constant 0.000000e+00 : bf16
    %33 = vector.broadcast %cst_40 : bf16 to vector<18x18x128xbf16>
    %c0_41 = arith.constant 0 : index
    %c0_42 = arith.constant 0 : index
    %c0_43 = arith.constant 0 : index
    %34 = vector.load %arg7[%c0_41, %c0_42, %c0_43] : memref<18x18x128xbf16, #tpu.memory_space<vmem>>, vector<18x18x128xbf16>
    tpu.vector_store %arg7[%c0_41, %c0_42, %c0_43], %33 {strides = array<i32>} : memref<18x18x128xbf16, #tpu.memory_space<vmem>>, vector<18x18x128xbf16>,
    %c1_44 = arith.constant 1 : index
    %c1_45 = arith.constant 1 : index
    %c0_46 = arith.constant 0 : index
    %35 = vector.load %arg7[%c1_44, %c1_45, %c0_46] : memref<18x18x128xbf16, #tpu.memory_space<vmem>>, vector<16x16x128xbf16>
    tpu.vector_store %arg7[%c1_44, %c1_45, %c0_46], %32 {strides = array<i32>} : memref<18x18x128xbf16, #tpu.memory_space<vmem>>, vector<16x16x128xbf16>,
    %c0_47 = arith.constant 0 : index
    %c0_48 = arith.constant 0 : index
    %c0_49 = arith.constant 0 : index
    %36 = vector.load %arg7[%c0_47, %c0_48, %c0_49] : memref<18x18x128xbf16, #tpu.memory_space<vmem>>, vector<16x16x128xbf16>
    %37 = vector.shape_cast %36 : vector<16x16x128xbf16> to vector<256x128xbf16>
    %c0_50 = arith.constant 0 : index
    %c1_51 = arith.constant 1 : index
    %c0_52 = arith.constant 0 : index
    %38 = vector.load %arg7[%c0_50, %c1_51, %c0_52] : memref<18x18x128xbf16, #tpu.memory_space<vmem>>, vector<16x16x128xbf16>
    %39 = vector.shape_cast %38 : vector<16x16x128xbf16> to vector<256x128xbf16>
    %c0_53 = arith.constant 0 : index
    %c2_54 = arith.constant 2 : index
    %c0_55 = arith.constant 0 : index
    %40 = vector.load %arg7[%c0_53, %c2_54, %c0_55] : memref<18x18x128xbf16, #tpu.memory_space<vmem>>, vector<16x16x128xbf16>
    %41 = vector.shape_cast %40 : vector<16x16x128xbf16> to vector<256x128xbf16>
    %c1_56 = arith.constant 1 : index
    %c0_57 = arith.constant 0 : index
    %c0_58 = arith.constant 0 : index
    %42 = vector.load %arg7[%c1_56, %c0_57, %c0_58] : memref<18x18x128xbf16, #tpu.memory_space<vmem>>, vector<16x16x128xbf16>
    %43 = vector.shape_cast %42 : vector<16x16x128xbf16> to vector<256x128xbf16>
    %c1_59 = arith.constant 1 : index
    %c1_60 = arith.constant 1 : index
    %c0_61 = arith.constant 0 : index
    %44 = vector.load %arg7[%c1_59, %c1_60, %c0_61] : memref<18x18x128xbf16, #tpu.memory_space<vmem>>, vector<16x16x128xbf16>
    %45 = vector.shape_cast %44 : vector<16x16x128xbf16> to vector<256x128xbf16>
    %c1_62 = arith.constant 1 : index
    %c2_63 = arith.constant 2 : index
    %c0_64 = arith.constant 0 : index
    %46 = vector.load %arg7[%c1_62, %c2_63, %c0_64] : memref<18x18x128xbf16, #tpu.memory_space<vmem>>, vector<16x16x128xbf16>
    %47 = vector.shape_cast %46 : vector<16x16x128xbf16> to vector<256x128xbf16>
    %c2_65 = arith.constant 2 : index
    %c0_66 = arith.constant 0 : index
    %c0_67 = arith.constant 0 : index
    %48 = vector.load %arg7[%c2_65, %c0_66, %c0_67] : memref<18x18x128xbf16, #tpu.memory_space<vmem>>, vector<16x16x128xbf16>
    %49 = vector.shape_cast %48 : vector<16x16x128xbf16> to vector<256x128xbf16>
    %c2_68 = arith.constant 2 : index
    %c1_69 = arith.constant 1 : index
    %c0_70 = arith.constant 0 : index
    %50 = vector.load %arg7[%c2_68, %c1_69, %c0_70] : memref<18x18x128xbf16, #tpu.memory_space<vmem>>, vector<16x16x128xbf16>
    %51 = vector.shape_cast %50 : vector<16x16x128xbf16> to vector<256x128xbf16>
    %c2_71 = arith.constant 2 : index
    %c2_72 = arith.constant 2 : index
    %c0_73 = arith.constant 0 : index
    %52 = vector.load %arg7[%c2_71, %c2_72, %c0_73] : memref<18x18x128xbf16, #tpu.memory_space<vmem>>, vector<16x16x128xbf16>
    %53 = vector.shape_cast %52 : vector<16x16x128xbf16> to vector<256x128xbf16>
    %54 = tpu.concatenate %37, %39, %41, %43, %45, %47, %49, %51, %53 in 1 : vector<256x128xbf16>, vector<256x128xbf16>, vector<256x128xbf16>, vector<256x128xbf16>, vector<256x128xbf16>, vector<256x128xbf16>, vector<256x128xbf16>, vector<256x128xbf16>, vector<256x128xbf16> -> vector<256x1152xbf16>
    %c0_74 = arith.constant 0 : index
    %c0_75 = arith.constant 0 : index
    %55 = vector.load %arg4[%c0_74, %c0_75] : memref<1152x128xbf16, #tpu.memory_space<vmem>>, vector<1152x128xbf16>
    %cst_76 = arith.constant dense<0.000000e+00> : vector<256x128xf32>
    %56 = tpu.matmul %54, %55, %cst_76 {dimension_numbers = #tpu.dot_dimension_numbers<[1], [0], [0], [1], [0, 0, 1, 1], [], []>} : vector<256x1152xbf16>, vector<1152x128xbf16>, vector<256x128xf32> -> vector<256x128xf32>
    %c0_77 = arith.constant 0 : index
    %c0_78 = arith.constant 0 : index
    %57 = vector.load %arg5[%c0_77, %c0_78] : memref<1x128xf32, #tpu.memory_space<vmem>>, vector<1x128xf32>
    %58 = vector.broadcast %57 : vector<1x128xf32> to vector<256x128xf32>
    %59 = arith.addf %56, %58 : vector<256x128xf32>
    %cst_79 = arith.constant 0.000000e+00 : f32
    %60 = vector.broadcast %cst_79 : f32 to vector<256x128xf32>
    %61 = arith.maximumf %59, %60 : vector<256x128xf32>
    %cst_80 = arith.constant dense<0.000000e+00> : vector<128xf32>
    %62 = vector.multi_reduction <add>, %61, %cst_80 [0] : vector<256x128xf32> to vector<128xf32>
    %63 = vector.shape_cast %62 : vector<128xf32> to vector<1x128xf32>
    %cst_81 = arith.constant 3.906250e-03 : f32
    %64 = vector.broadcast %cst_81 : f32 to vector<1x128xf32>
    %65 = arith.mulf %63, %64 : vector<1x128xf32>
    %66 = vector.shape_cast %65 : vector<1x128xf32> to vector<1x1x128xf32>
    %c0_82 = arith.constant 0 : index
    %c0_83 = arith.constant 0 : index
    %c0_84 = arith.constant 0 : index
    %67 = vector.load %arg6[%c0_82, %c0_83, %c0_84] : memref<1x1x128xf32, #tpu.memory_space<vmem>>, vector<1x1x128xf32>
    tpu.vector_store %arg6[%c0_82, %c0_83, %c0_84], %66 {strides = array<i32>} : memref<1x1x128xf32, #tpu.memory_space<vmem>>, vector<1x1x128xf32>,
    return
  }
  func.func @transform_0(%arg0: i32) -> (i32, i32, i32, i32) {
    %c0_i32 = arith.constant 0 : i32
    %c0_i32_0 = arith.constant 0 : i32
    %c0_i32_1 = arith.constant 0 : i32
    %c0_i32_2 = arith.constant 0 : i32
    return %arg0, %c0_i32, %c0_i32_0, %c0_i32_1 : i32, i32, i32, i32
  }
  func.func @transform_1(%arg0: i32) -> (i32, i32) {
    %c0_i32 = arith.constant 0 : i32
    %c0_i32_0 = arith.constant 0 : i32
    %c0_i32_1 = arith.constant 0 : i32
    return %c0_i32, %c0_i32_0 : i32, i32
  }
  func.func @transform_2(%arg0: i32) -> (i32, i32) {
    %c0_i32 = arith.constant 0 : i32
    %c0_i32_0 = arith.constant 0 : i32
    %c0_i32_1 = arith.constant 0 : i32
    return %c0_i32, %c0_i32_0 : i32, i32
  }
  func.func @transform_3(%arg0: i32) -> (i32, i32) {
    %c0_i32 = arith.constant 0 : i32
    %c0_i32_0 = arith.constant 0 : i32
    %c0_i32_1 = arith.constant 0 : i32
    return %c0_i32, %c0_i32_0 : i32, i32
  }
  func.func @transform_4(%arg0: i32) -> (i32, i32) {
    %c0_i32 = arith.constant 0 : i32
    %c0_i32_0 = arith.constant 0 : i32
    %c0_i32_1 = arith.constant 0 : i32
    return %c0_i32, %c0_i32_0 : i32, i32
  }
  func.func @transform_5(%arg0: i32) -> (i32, i32, i32) {
    %c0_i32 = arith.constant 0 : i32
    %c0_i32_0 = arith.constant 0 : i32
    %c0_i32_1 = arith.constant 0 : i32
    return %arg0, %c0_i32, %c0_i32_0 : i32, i32, i32
  }
}

</mosaic_0001>

<bundles_post_ra>
// kernel: image_encoder_forward.1
= control target key start
LH: loop header
LB: loop body
LE: loop exit
PB: predicated region body
PF: predicated region fallthrough
CT: control target
= control target key end

     0   :  { %10 = vsyncpa [#allocation4], 0  ;;  %s14382_s0 = inlined_call_operand.vmem [shape: bf16[2,16,16,3], index: 0, kind: input, shape index: {}]   ;;  %s14383_s1 = inlined_call_operand.vmem [shape: bf16[1152,128], index: 1, kind: input, shape index: {}]   ;;  %s14384_s2 = inlined_call_operand.vmem [shape: f32[1,128], index: 2, kind: input, shape index: {}]   ;;  %s14385_s3 = inlined_call_operand.vmem [shape: bf16[1152,128], index: 3, kind: input, shape index: {}]   ;;  %s14386_s4 = inlined_call_operand.vmem [shape: f32[1,128], index: 4, kind: input, shape index: {}]   ;;  %s14387_s5 = inlined_call_operand.hbm [shape: f32[2,1,128], index: 5, kind: output, shape index: {}]  }
   0x1   :  { %12 = vsyncpa [#allocation4 + $0x1], 0  ;;  %s10627_s18 = smov 0   ;;  %s10629_s19 = smov 0  }
   0x2   :  { %s10631_s20 = smov 0   ;;  %s10633_s21 = smov 0  }
   0x3 LB: > { %s10648_s22 = sadd.s32 4294967295, %s10594_s21   ;;  %s9109_s23 = sadd.s32 4294967294, %s10594_s21   ;;  %s10594_s21 = sphi %s10633_s21, %s14598_s21   ;;  %s10590_s20 = sphi %s10631_s20, %s14597_s20   ;;  %s10586_s19 = sphi %s10629_s19, %s14596_s19   ;;  %s10582_s18 = sphi %s10627_s18, %s14595_s18  }
   0x4   : > { %s10652_s24 = sadd.s32 1, %s10594_s21   ;;  %s135_s25 = sadd.s32 1, %s10590_s20 }
   0x5   : > { %s132_s26 = ssub.s32 %s10594_s21, %s10652_s24  ;;  %p145_p0 = scmp.ne.s32.totalorder %s10590_s20, %s10586_s19 }
   0x6   : > { %p133_p1 = scmp.eq.s32.totalorder %s132_s26, 0  ;;  %p146_p2 = scmp.eq.s32.totalorder %s10648_s22, 1 }
   0x7   : > { %p151_p3 = scmp.ne.s32.totalorder %s10586_s19, %s10582_s18  ;;  %p152_p4 = scmp.eq.s32.totalorder %s9109_s23, 1 }
   0x8   : > { %s10663_s27 = scalar_select %p133_p1, %s10590_s20, %s135_s25  }
   0x9   : > { %p10665_p5 = por %p146_p2, %p145_p0  ;;  %p10669_p6 = por %p152_p4, %p151_p3 }
   0xa   : > { %p9112_p7 = scmp.ge.s32.totalorder %s10594_s21, 1  ;;  %p190_p8 = scmp.lt.s32.totalorder %s10594_s21, 3 }
   0xc   : > { %p191_p9 = pnand %p9112_p7, %p190_p8 }
   0xe   : > { %194 = sbr.rel (%p191_p9) target bundleno = 1539 (0x603), region = 40 }
  0x13   : > { %v10229_v0 = vld [vmem:[%s14383_s1 + $0x38] sm:$0xff]  ;;  %v14388_v2 = vmov 0   ;;  %v10228_v3 = vld [vmem:[%s14383_s1 + $0x30] sm:$0xff]  ;;  %v10227_v5 = vld [vmem:[%s14383_s1 + $0x28] sm:$0xff]  ;;  %p217_p10 = scmp.lt.s32.totalorder %s10648_s22, 1  ;;  %vm633_vm4 = vcmask 19456   ;;  %s9050_s14 = scalar_lea.hbm %s14387_s5, %s10648_s22 }
  0x14   : > { %v10237_v1 = vld [vmem:[%s14383_s1 + $0x78] sm:$0xff]  ;;  %255 = vst [vmem:[#allocation2] sm:$0xf] %v14388_v2  ;;  %3786 = vmatpush.bf16.msra.mxu0 %v10229_v0  ;;  %10414 = vmatpush.bf16.msra.mxu2 %v10229_v0  ;;  %v10236_v4 = vld [vmem:[%s14383_s1 + $0x70] sm:$0xff]  ;;  %v10235_v6 = vld [vmem:[%s14383_s1 + $0x68] sm:$0xff]  ;;  %vm641_vm7 = vcmask 16384  }
  0x15   : > { %256 = vst [vmem:[#allocation2 + $0x4] sm:$0xf] %v14388_v2  ;;  %10422 = vmatpush.bf16.msra.mxu3 %v10237_v1  ;;  %3875 = vmatpush.bf16.msra.mxu1 %v10237_v1  ;;  %v10226_v11 = vld [vmem:[%s14383_s1 + $0x20] sm:$0xff]  ;;  %v10225_v13 = vld [vmem:[%s14383_s1 + $0x18] sm:$0xff]  ;;  %v10224_v15 = vld [vmem:[%s14383_s1 + $0x10] sm:$0xff]  ;;  %s218_s17 = scalar_select %p217_p10, %s10648_s22, 1 }
  0x16   : > { %257 = vst [vmem:[#allocation2 + $0x8] sm:$0x1] %v14388_v2  ;;  %v10234_v12 = vld [vmem:[%s14383_s1 + $0x60] sm:$0xff]  ;;  %v10233_v14 = vld [vmem:[%s14383_s1 + $0x58] sm:$0xff]  ;;  %v10232_v16 = vld [vmem:[%s14383_s1 + $0x50] sm:$0xff]  ;;  %vm1250_vm11 = vcmask 1042432  }
  0x17   : > { %258 = vst [vmem:[#allocation2 + $0xc] sm:$0xf] %v14388_v2  ;;  %v10223_v17 = vld [vmem:[%s14383_s1 + $0x8] sm:$0xff]  ;;  %v10222_v19 = vld [vmem:[%s14383_s1] sm:$0xff]  ;;  %s10173_s6 = sshll.u32 %s218_s17, 7  ;;  %v10245_v22 = vld [vmem:[%s14383_s1 + $0xb8] sm:$0xff] }
  0x18   : > { %259 = vst [vmem:[#allocation2 + $0x10] sm:$0xf] %v14388_v2  ;;  %3787 = vmatpush.bf16.msra.mxu0 %v10228_v3  ;;  %10415 = vmatpush.bf16.msra.mxu2 %v10228_v3  ;;  %v10231_v18 = vld [vmem:[%s14383_s1 + $0x48] sm:$0xff]  ;;  %v10230_v20 = vld [vmem:[%s14383_s1 + $0x40] sm:$0xff]  ;;  %s10766_s9 = scalar_lea.vmem %s14382_s0, %s10173_s6  ;;  %vm309_vm0 = vsmask.f32 256 }
  0x19   : > { %260 = vst [vmem:[#allocation2 + $0x14] sm:$0x1] %v14388_v2  ;;  %10423 = vmatpush.bf16.msra.mxu3 %v10236_v4  ;;  %3876 = vmatpush.bf16.msra.mxu1 %v10236_v4  ;;  %v237_v21 = vld [vmem:[%s10766_s9 + $0x38] sm:$0xf]  ;;  %v10777_v23 = vld [vmem:[%s10766_s9 + $0x3c] sm:$0xf]  ;;  %vm10869_vm10 = vmand %vm641_vm7, %vm309_vm0 }
  0x1a   : > { %261 = vst [vmem:[#allocation2 + $0x18] sm:$0xf] %v14388_v2  ;;  %v432_v27 = vshrl.u32 %v237_v21, 16  ;;  %v440_v32 = vshrl.u32 %v10777_v23, 16  ;;  %v10792_v36 = vld [vmem:[%s10766_s9 + $0x40] sm:$0xf] }
  0x1b   : > { %v10700_v7 = vld [vmem:[#allocation2] sm:$0xf]  ;;  %262 = vst [vmem:[#allocation2 + $0x1c] sm:$0xf] %v14388_v2  ;;  %vm310_vm1 = vsmask.f32 4368 }
  0x1c   : > { %v10702_v8 = vld [vmem:[#allocation2] sm:$0xe]  ;;  %v10705_v9 = vld [vmem:[#allocation2 + $0x4] sm:$0xf]  ;;  %3788 = vmatpush.bf16.msra.mxu0 %v10227_v5  ;;  %10416 = vmatpush.bf16.msra.mxu2 %v10227_v5  ;;  %263 = vst [vmem:[#allocation2 + $0x20] sm:$0x1] %v14388_v2  ;;  %vm10860_vm9 = vmor %vm309_vm0, %vm310_vm1 }
  0x1d   : > { %v10174_v10 = vld [vmem:[#allocation2] sm:$0xff]  ;;  %10424 = vmatpush.bf16.msra.mxu3 %v10235_v6  ;;  %3877 = vmatpush.bf16.msra.mxu1 %v10235_v6  ;;  %264 = vst [vmem:[#allocation2 + $0x24] sm:$0xf] %v14388_v2  ;;  %v803_v24 = vshrl.u32 %v10700_v7, 16  ;;  %v806_v25 = vshll.u32 %v10700_v7, 16  ;;  %v812_v26 = vshll.u32 %v10705_v9, 16 }
  0x1e   : > { %4651 = vst [vmem:[#allocation2] sm:$0xf] %v14388_v2  ;;  %v816_v28 = vshrl.u32 %v10705_v9, 16  ;;  %v10786_v29 = vld [vmem:[#allocation2 + $0x8] sm:$0x1]  ;;  %v10804_v43 = vrot.slane %v432_v27, 7 }
  0x1f   : > { %4652 = vst [vmem:[#allocation2 + $0x4] sm:$0xf] %v14388_v2  ;;  %v805_v30 = vrot.slane %v803_v24, 4  ;;  %v808_v31 = vrot.slane %v806_v25, 5  ;;  %v814_v33 = vrot.slane %v812_v26, 5  ;;  %v822_v35 = vshll.u32 %v10786_v29, 16 }
  0x20   : > { %265 = vst [vmem:[#allocation2 + $0x28] sm:$0xf] %v14388_v2  ;;  %3789 = vmatpush.bf16.msra.mxu0 %v10226_v11  ;;  %10417 = vmatpush.bf16.msra.mxu2 %v10226_v11  ;;  %v818_v34 = vrot.slane %v816_v28, 4  ;;  %vm799_vm2 = vsmask.f32 3328  ;;  %v435_v44 = vshll.u32 %v237_v21, 16 }
  0x21   : > { %266 = vst [vmem:[#allocation2 + $0x2c] sm:$0x1] %v14388_v2  ;;  %10425 = vmatpush.bf16.msra.mxu3 %v10234_v12  ;;  %3878 = vmatpush.bf16.msra.mxu1 %v10234_v12  ;;  %vm800_vm3 = vsmask.f32 7440  ;;  %v809_v37 = vor.u32 %v808_v31, %v805_v30  ;;  %v824_v39 = vrot.slane %v822_v35, 5  ;;  %v10811_v47 = vrot.slane %v440_v32, 7 }
  0x22   : > { %267 = vst [vmem:[#allocation2 + $0x30] sm:$0xf] %v14388_v2  ;;  %v819_v38 = vor.u32 %v818_v34, %v814_v33  ;;  %v10797_v40 = vld [vmem:[%s10766_s9] sm:$0xf]  ;;  %v10801_v42 = vld [vmem:[%s10766_s9 + $0x4] sm:$0xf]  ;;  %vm10806_vm5 = vmor %vm799_vm2, %vm800_vm3  ;;  %v437_v59 = vor.u32 %v435_v44, %v10804_v43 }
  0x23   : > { %268 = vst [vmem:[#allocation2 + $0x34] sm:$0xf] %v14388_v2  ;;  %v810_v41 = vrot.slane %v809_v37, 4  ;;  %v443_v48 = vshll.u32 %v10777_v23, 16  ;;  %v449_v50 = vshrl.u32 %v10792_v36, 16  ;;  %v313_v53 = vshrl.u32 %v10797_v40, 16 }
  0x24   : > { %269 = vst [vmem:[#allocation2 + $0x38] sm:$0x1] %v14388_v2  ;;  %3790 = vmatpush.bf16.msra.mxu0 %v10225_v13  ;;  %10418 = vmatpush.bf16.msra.mxu2 %v10225_v13  ;;  %v820_v46 = vrot.slane %v819_v38, 4  ;;  %v321_v54 = vshrl.u32 %v10801_v42, 16  ;;  %v240_v55 = vld [vmem:[%s10766_s9 + $0x44] sm:$0xf] }
  0x25   : > { %270 = vst [vmem:[#allocation2 + $0x3c] sm:$0xf] %v14388_v2  ;;  %10426 = vmatpush.bf16.msra.mxu3 %v10233_v14  ;;  %3879 = vmatpush.bf16.msra.mxu1 %v10233_v14  ;;  %v815_v49 = vsel %vm10806_vm5, %v810_v41, %v814_v33  ;;  %vm634_vm6 = vsmask.f32 7938  ;;  %v10253_v56 = vld [vmem:[%s14383_s1 + $0xf8] sm:$0xff]  ;;  %v438_v60 = vrot.slane %v10804_v43, 4 }
  0x26   : > { %271 = vst [vmem:[#allocation2 + $0x40] sm:$0xf] %v14388_v2  ;;  %v825_v51 = vsel %vm10806_vm5, %v820_v46, %v824_v39  ;;  %v2662_v52 = vunpack.c.l.b16 %v815_v49  ;;  %v10261_v58 = vld [vmem:[%s14383_s1 + $0x138] sm:$0xff]  ;;  %v447_v61 = vrot.slane %v10811_v47, 4  ;;  %v316_v0 = vshll.u32 %v10797_v40, 16  ;;  %vm10847_vm8 = vmand %vm633_vm4, %vm634_vm6  ;;  %v10244_v14 = vld [vmem:[%s14383_s1 + $0xb0] sm:$0xff] }
  0x27   : > { %272 = vst [vmem:[#allocation2 + $0x44] sm:$0x1] %v14388_v2  ;;  %v2663_v57 = vunpack.c.l.b16 %v825_v51  ;;  %v10836_v1 = vrot.slane %v449_v50, 7  ;;  %v457_v3 = vshrl.u32 %v240_v55, 16  ;;  %v315_v4 = vrot.slane %v313_v53, 7  ;;  %s215_s11 = sand.u32 1, %s10586_s19  }
  0x28   : > { %273 = vst [vmem:[#allocation2 + $0x48] sm:$0xf] %v14388_v2  ;;  %3791 = vmatpush.bf16.msra.mxu0 %v10224_v15  ;;  %10419 = vmatpush.bf16.msra.mxu2 %v10224_v15  ;;  %v10839_v5 = vrot.slane %v321_v54, 7  ;;  %v324_v6 = vshll.u32 %v10801_v42, 16  ;;  %v452_v7 = vshll.u32 %v10792_v36, 16  ;;  %v460_v13 = vshll.u32 %v240_v55, 16 }
  0x29   : > { %274 = vst [vmem:[#allocation2 + $0x4c] sm:$0xf] %v14388_v2  ;;  %10427 = vmatpush.bf16.msra.mxu3 %v10232_v16  ;;  %3880 = vmatpush.bf16.msra.mxu1 %v10232_v16  ;;  %v2694_v63 = vpack.c.b16 %v2663_v57, %v2662_v52  ;;  %v10855_v15 = vld [vmem:[%s10766_s9 + $0x48] sm:$0xf]  ;;  %v318_v24 = vor.u32 %v316_v0, %v315_v4  ;;  %v319_v27 = vrot.slane %v315_v4, 4  ;;  %v455_v34 = vrot.slane %v10836_v1, 4 }
  0x2a   : > { %275 = vst [vmem:[#allocation2 + $0x50] sm:$0x1] %v14388_v2  ;;  %v466_v25 = vshrl.u32 %v10855_v15, 16  ;;  %v326_v28 = vor.u32 %v324_v6, %v10839_v5  ;;  %v636_v30 = vld [vmem:[#allocation2 + $0xc] sm:$0xf]  ;;  %v454_v33 = vor.u32 %v452_v7, %v10836_v1  ;;  %v328_v40 = vrot.slane %v10839_v5, 4 }
  0x2b   : > { %276 = vst [vmem:[#allocation2 + $0x54] sm:$0xf] %v14388_v2  ;;  %v637_v41 = vsel %vm10847_vm8, %v318_v24, %v636_v30  ;;  %v469_v50 = vshll.u32 %v10855_v15, 16  ;;  %v643_v54 = vld [vmem:[#allocation2 + $0x14] sm:$0x1]  ;;  %vm1251_vm12 = vcmask 1046532  }
  0x2c   : > { %277 = vst [vmem:[#allocation2 + $0x58] sm:$0xf] %v14388_v2  ;;  %3792 = vmatpush.bf16.msra.mxu0 %v10223_v17  ;;  %10420 = vmatpush.bf16.msra.mxu2 %v10223_v17  ;;  %v225_v17 = vld [vmem:[%s10766_s9 + $0x8] sm:$0xf]  ;;  %v468_v43 = vrot.slane %v466_v25, 7  ;;  %v327_v44 = vsel %vm10860_vm9, %v319_v27, %v326_v28  ;;  %vm11251_vm13 = vmor %vm1250_vm11, %vm1251_vm12  ;;  %vm5025_vm14 = vcmask 1043456  }
  0x2d   : > { %278 = vst [vmem:[#allocation2 + $0x5c] sm:$0x1] %v14388_v2  ;;  %10428 = vmatpush.bf16.msra.mxu3 %v10231_v18  ;;  %3881 = vmatpush.bf16.msra.mxu1 %v10231_v18  ;;  %v226_v18 = vld [vmem:[%s10766_s9 + $0xc] sm:$0xf]  ;;  %v330_v21 = vshrl.u32 %v225_v17, 16  ;;  %v333_v39 = vshll.u32 %v225_v17, 16  ;;  %vm12319_vm15 = vmand %vm5025_vm14, %vm634_vm6 }
  0x2e   : > { %279 = vst [vmem:[#allocation2 + $0x60] sm:$0xf] %v14388_v2  ;;  %v338_v31 = vshrl.u32 %v226_v18, 16  ;;  %v472_v57 = vrot.slane %v468_v43, 4  ;;  %v471_v4 = vor.u32 %v469_v50, %v468_v43  ;;  %v650_v17 = vld [vmem:[#allocation2 + $0x20] sm:$0x1] }
  0x2f   : > { %280 = vst [vmem:[#allocation2 + $0x64] sm:$0xf] %v14388_v2  ;;  %v332_v38 = vrot.slane %v330_v21, 7  ;;  %vm5031_vm1 = vcmask 1040384   ;;  %s216_s15 = scalar_lea.vmem [#allocation3], %s215_s11  ;;  %s9054_s17 = sshll.u32 %s9050_s14, 4  ;;  %s9055_s17 = int_to_ptr.hbm [resolvable:$true] %s9054_s17 }
  0x30   : > { %281 = vst [vmem:[#allocation2 + $0x68] sm:$0x1] %v14388_v2  ;;  %3793 = vmatpush.bf16.msra.mxu0 %v10222_v19  ;;  %10421 = vmatpush.bf16.msra.mxu2 %v10222_v19  ;;  %vm12349_vm2 = vmand %vm5031_vm1, %vm309_vm0  ;;  %s9052_s16 = sshll.u32 %s216_s15, 4  ;;  %s9042_s23 = scalar_lea.sflag [#allocation4], %s215_s11  ;;  %s9053_s16 = int_to_ptr.vmem [resolvable:$true] %s9052_s16 }
  0x31   : > { %282 = vst [vmem:[#allocation2 + $0x6c] sm:$0xf] %v14388_v2  ;;  %10429 = vmatpush.bf16.msra.mxu3 %v10230_v20  ;;  %3882 = vmatpush.bf16.msra.mxu1 %v10230_v20  ;;  %v459_v20 = vrot.slane %v457_v3, 7  ;;  %v335_v55 = vor.u32 %v333_v39, %v332_v38  ;;  %v644_v3 = vsel %vm10869_vm10, %v328_v40, %v643_v54  ;;  %s10546_s25 = sshra.s32 %s9055_s17, 4  ;;  %s10552_s22 = scalar_lea.hbm %s14387_s5, 2  ;;  %s10547_s25 = int_to_ptr.hbm [resolvable:$true] %s10546_s25 }
  0x32   : > { %283 = vst [vmem:[#allocation2 + $0x70] sm:$0xf] %v14388_v2  ;;  %s10548_s26 = scalar_lea.hbm %s10547_s25, 1  ;;  %p10553_p0 = scmp.lt.s32.totalorder %s10547_s25, %s14387_s5 }
  0x33   : > { %284 = vst [vmem:[#allocation2 + $0x74] sm:$0x1] %v14388_v2  ;;  %3794 = vmatmul.bf16.vlgmr.msra.gmra.mxu0 %v10174_v10  ;;  %v445_v10 = vor.u32 %v443_v48, %v10811_v47  ;;  %v462_v36 = vor.u32 %v460_v13, %v459_v20  ;;  %v464_v46 = vrot.slane %v459_v20, 4  ;;  %v10893_v47 = vrot.slane %v338_v31, 7  ;;  %p10549_p11 = scmp.ne.s32.totalorder %s10547_s25, %s10548_s26  ;;  %p10554_p1 = scmp.lt.s32.totalorder %s10552_s22, %s10548_s26 }
  0x34   : > { %285 = vst [vmem:[#allocation2 + $0x78] sm:$0xf] %v14388_v2  ;;  %3964 = vmatpush.bf16.msrb.mxu2 %v10245_v22  ;;  %4142 = vmatpush.bf16.msrb.mxu0 %v10261_v58  ;;  %v242_v22 = vld [vmem:[%s10766_s9 + $0x4c] sm:$0xf]  ;;  %v341_v48 = vshll.u32 %v226_v18, 16 }
  0x35   : > { %286 = vst [vmem:[#allocation2 + $0x7c] sm:$0xf] %v14388_v2  ;;  %v688_v62 = vld [vmem:[#allocation2 + $0x60] sm:$0xf]  ;;  %4053 = vmatpush.bf16.msrb.mxu3 %v10253_v56  ;;  %3883 = vmatmul.bf16.vlgmr.msra.gmra.mxu1 %v2694_v63  ;;  %v446_v26 = vsel %vm10860_vm9, %v438_v60, %v445_v10  ;;  %v474_v35 = vshrl.u32 %v242_v22, 16  ;;  %v477_v52 = vshll.u32 %v242_v22, 16  ;;  %v463_v53 = vsel %vm10860_vm9, %v455_v34, %v462_v36  ;;  %p10550_p12 = pnand %p10549_p11, %p10665_p5  ;;  %p10555_p2 = por %p10554_p1, %p10553_p0 }
  0x36   : > { %287 = vst [vmem:[#allocation2 + $0x80] sm:$0x1] %v14388_v2  ;;  %v689_v23 = vsel %vm10847_vm8, %v437_v59, %v688_v62  ;;  %v646_v56 = vld [vmem:[#allocation2 + $0x18] sm:$0xf]  ;;  %v10252_v59 = vld [vmem:[%s14383_s1 + $0xf0] sm:$0xff]  ;;  %v343_v62 = vor.u32 %v341_v48, %v10893_v47 }
  0x37   : > { %288 = vst [vmem:[#allocation2 + $0x84] sm:$0xf] %v14388_v2  ;;  %v692_v12 = vld [vmem:[#allocation2 + $0x68] sm:$0x1]  ;;  %v476_v51 = vrot.slane %v474_v35, 7  ;;  %v10260_v60 = vld [vmem:[%s14383_s1 + $0x130] sm:$0xff]  ;;  %v647_v15 = vsel %vm10847_vm8, %v335_v55, %v646_v56  ;;  %p10551_p13 = pneg %p10550_p12 }
  0x38   : > { %289 = vst [vmem:[#allocation2 + $0x88] sm:$0xf] %v14388_v2  ;;  %3965 = vmatpush.bf16.msrb.mxu2 %v10244_v14  ;;  %v693_v32 = vsel %vm10869_vm10, %v447_v61, %v692_v12  ;;  %v695_v37 = vld [vmem:[#allocation2 + $0x6c] sm:$0xf]  ;;  %v336_v61 = vrot.slane %v332_v38, 4  ;;  %4143 = vmatpush.bf16.msrb.mxu0 %v10260_v60  ;;  %v345_v14 = vrot.slane %v10893_v47, 4 }
  0x39   : > { %290 = vst [vmem:[#allocation2 + $0x8c] sm:$0x1] %v14388_v2  ;;  %v696_v49 = vsel %vm10847_vm8, %v454_v33, %v695_v37  ;;  %v481_v63 = vrot.slane %v476_v51, 4  ;;  %v479_v5 = vor.u32 %v477_v52, %v476_v51  ;;  %4054 = vmatpush.bf16.msrb.mxu3 %v10252_v59  ;;  %p10556_p3 = pnand %p10555_p2, %p10551_p13 }
  0x3a   : > { %291 = vst [vmem:[#allocation2 + $0x90] sm:$0xf] %v14388_v2  ;;  %v699_v42 = vld [vmem:[#allocation2 + $0x74] sm:$0x1]  ;;  %v344_v25 = vsel %vm10860_vm9, %v336_v61, %v343_v62  ;;  %v651_v43 = vsel %vm10869_vm10, %v345_v14, %v650_v17 }
  0x3b   : > { %292 = vst [vmem:[#allocation2 + $0x94] sm:$0xf] %v14388_v2  ;;  %v700_v58 = vsel %vm10869_vm10, %v464_v46, %v699_v42  ;;  %v702_v0 = vld [vmem:[#allocation2 + $0x78] sm:$0xf]  ;;  %v480_v31 = vsel %vm10860_vm9, %v472_v57, %v479_v5 }
  0x3c   : > { %293 = vst [vmem:[#allocation2 + $0x98] sm:$0x1] %v14388_v2 }
  0x3d   : > { %294 = vst [vmem:[#allocation2 + $0x9c] sm:$0xf] %v14388_v2  ;;  %v706_v6 = vld [vmem:[#allocation2 + $0x80] sm:$0x1] }
  0x3e   : > { %295 = vst [vmem:[#allocation2 + $0xa0] sm:$0xf] %v14388_v2  ;;  %v707_v38 = vsel %vm10869_vm10, %v481_v63, %v706_v6 }
  0x3f   : > { %296 = vst [vmem:[#allocation2 + $0xa4] sm:$0x1] %v14388_v2 }
  0x40   : > { %297 = vst [vmem:[#allocation2 + $0xa8] sm:$0xf] %v14388_v2 }
  0x41   : > { %298 = vst [vmem:[#allocation2 + $0xac] sm:$0xf] %v14388_v2 }
  0x42   : > { %299 = vst [vmem:[#allocation2 + $0xb0] sm:$0x1] %v14388_v2 }
  0x43   : > { %300 = vst [vmem:[#allocation2 + $0xb4] sm:$0xf] %v14388_v2 }
  0x44   : > { %301 = vst [vmem:[#allocation2 + $0xb8] sm:$0xf] %v14388_v2 }
  0x45   : > { %302 = vst [vmem:[#allocation2 + $0xbc] sm:$0x1] %v14388_v2 }
  0x46   : > { %303 = vst [vmem:[#allocation2 + $0xc0] sm:$0xf] %v14388_v2 }
  0x47   : > { %304 = vst [vmem:[#allocation2 + $0xc4] sm:$0xf] %v14388_v2 }
  0x48   : > { %305 = vst [vmem:[#allocation2 + $0xc8] sm:$0x1] %v14388_v2 }
  0x49   : > { %306 = vst [vmem:[#allocation2 + $0xcc] sm:$0xf] %v14388_v2 }
  0x4a   : > { %307 = vst [vmem:[#allocation2 + $0xd0] sm:$0xf] %v14388_v2 }
  0x4b   : > { %308 = vst [vmem:[#allocation2 + $0xd4] sm:$0x1] %v14388_v2 }
  0x4c   : > { %690 = vst [vmem:[#allocation2 + $0x60] sm:$0xf] %v689_v23 }
  0x4d   : > { %691 = vst.msk [vmem:[#allocation2 + $0x64] sm:$0xf] %vm633_vm4, %v446_v26  ;;  %v10243_v26 = vld [vmem:[%s14383_s1 + $0xa8] sm:$0xff] }
  0x4e   : > { %694 = vst [vmem:[#allocation2 + $0x68] sm:$0x1] %v693_v32  ;;  %v703_v32 = vsel %vm10847_vm8, %v471_v4, %v702_v0  ;;  %3966 = vmatpush.bf16.msrb.mxu2 %v10243_v26 }
  0x4f   : > { %4653 = vst [vmem:[#allocation2 + $0x8] sm:$0x1] %v14388_v2 }
  0x50   : > { %638 = vst [vmem:[#allocation2 + $0xc] sm:$0xf] %v637_v41 }
  0x51   : > { %640 = vst.msk [vmem:[#allocation2 + $0x10] sm:$0xf] %vm633_vm4, %v327_v44 }
  0x52   : > { %697 = vst [vmem:[#allocation2 + $0x6c] sm:$0xf] %v696_v49 }
  0x53   : > { %v767_v1 = vld [vmem:[#allocation2 + $0x60] sm:$0xf]  ;;  %698 = vst.msk [vmem:[#allocation2 + $0x70] sm:$0xf] %vm633_vm4, %v463_v53 }
  0x54   : > { %v10182_v7 = vld [vmem:[#allocation2 + $0x60] sm:$0xff]  ;;  %v995_v12 = vshrl.u32 %v767_v1, 16  ;;  %v998_v13 = vshll.u32 %v767_v1, 16  ;;  %701 = vst [vmem:[#allocation2 + $0x74] sm:$0x1] %v700_v58 }
  0x55   : > { %v768_v10 = vld [vmem:[#allocation2 + $0x64] sm:$0xf]  ;;  %v791_v18 = vld [vmem:[#allocation2 + $0x68] sm:$0x1]  ;;  %3834 = vmatmul.bf16.vlgmr.msra.gmra.mxu2 %v10182_v7  ;;  %645 = vst [vmem:[#allocation2 + $0x14] sm:$0x1] %v644_v3 }
  0x56   : > { %v1004_v20 = vshll.u32 %v768_v10, 16  ;;  %v1008_v21 = vshrl.u32 %v768_v10, 16  ;;  %v997_v22 = vrot.slane %v995_v12, 4  ;;  %v1000_v23 = vrot.slane %v998_v13, 5  ;;  %648 = vst [vmem:[#allocation2 + $0x18] sm:$0xf] %v647_v15 }
  0x57   : > { %v1014_v24 = vshll.u32 %v791_v18, 16  ;;  %v753_v30 = vld [vmem:[#allocation2 + $0xc] sm:$0xf]  ;;  %649 = vst.msk [vmem:[#allocation2 + $0x1c] sm:$0xf] %vm633_vm4, %v344_v25 }
  0x58   : > { %v1006_v27 = vrot.slane %v1004_v20, 5  ;;  %v1010_v28 = vrot.slane %v1008_v21, 4  ;;  %v1001_v33 = vor.u32 %v1000_v23, %v997_v22  ;;  %v10175_v34 = vld [vmem:[#allocation2 + $0xc] sm:$0xff]  ;;  %v827_v36 = vshrl.u32 %v753_v30, 16  ;;  %704 = vst [vmem:[#allocation2 + $0x78] sm:$0xf] %v703_v32 }
  0x59   : > { %v10926_v35 = vld [vmem:[#allocation2 + $0x10] sm:$0xf]  ;;  %v830_v37 = vshll.u32 %v753_v30, 16  ;;  %v1016_v40 = vrot.slane %v1014_v24, 5  ;;  %v769_v41 = vld [vmem:[#allocation2 + $0x6c] sm:$0xf]  ;;  %3799 = vmatmul.bf16.gmra.mxu0 %v10175_v34 }
  0x5a   : > { %v1011_v39 = vor.u32 %v1010_v28, %v1006_v27  ;;  %v836_v42 = vshll.u32 %v10926_v35, 16  ;;  %v1002_v44 = vrot.slane %v1001_v33, 4  ;;  %v770_v46 = vld [vmem:[#allocation2 + $0x70] sm:$0xf]  ;;  %v1019_v47 = vshrl.u32 %v769_v41, 16  ;;  %v10259_v30 = vld [vmem:[%s14383_s1 + $0x128] sm:$0xff] }
  0x5b   : > { %v1022_v48 = vshll.u32 %v769_v41, 16  ;;  %v840_v49 = vshrl.u32 %v10926_v35, 16  ;;  %v1028_v51 = vshll.u32 %v770_v46, 16  ;;  %v1032_v52 = vshrl.u32 %v770_v46, 16  ;;  %v792_v55 = vld [vmem:[#allocation2 + $0x74] sm:$0x1]  ;;  %4144 = vmatpush.bf16.msrb.mxu0 %v10259_v30 }
  0x5c   : > { %v1012_v50 = vrot.slane %v1011_v39, 4  ;;  %v829_v53 = vrot.slane %v827_v36, 4  ;;  %v1007_v54 = vsel %vm10806_vm5, %v1002_v44, %v1006_v27  ;;  %v1021_v56 = vrot.slane %v1019_v47, 4  ;;  %v10939_v63 = vld [vmem:[#allocation2 + $0x14] sm:$0x1]  ;;  %v10183_v20 = vld [vmem:[#allocation2 + $0x6c] sm:$0xff] }
  0x5d   : > { %v1024_v57 = vrot.slane %v1022_v48, 5  ;;  %v832_v58 = vrot.slane %v830_v37, 5  ;;  %v2678_v60 = vunpack.c.l.b16 %v1007_v54  ;;  %v1030_v61 = vrot.slane %v1028_v51, 5  ;;  %705 = vst.msk [vmem:[#allocation2 + $0x7c] sm:$0xf] %vm633_vm4, %v480_v31  ;;  %v10251_v27 = vld [vmem:[%s14383_s1 + $0xe8] sm:$0xff] }
  0x5e   : > { %v1017_v59 = vsel %vm10806_vm5, %v1012_v50, %v1016_v40  ;;  %v1034_v62 = vrot.slane %v1032_v52, 4  ;;  %v1038_v3 = vshll.u32 %v792_v55, 16  ;;  %708 = vst [vmem:[#allocation2 + $0x80] sm:$0x1] %v707_v38  ;;  %v755_v5 = vld [vmem:[#allocation2 + $0x18] sm:$0xf]  ;;  %4055 = vmatpush.bf16.msrb.mxu3 %v10251_v27 }
  0x5f   : > { %v2679_v0 = vunpack.c.l.b16 %v1017_v59  ;;  %v1025_v1 = vor.u32 %v1024_v57, %v1021_v56  ;;  %v833_v4 = vor.u32 %v832_v58, %v829_v53  ;;  %v838_v7 = vrot.slane %v836_v42, 5  ;;  %652 = vst [vmem:[#allocation2 + $0x20] sm:$0x1] %v651_v43  ;;  %v756_v18 = vld [vmem:[#allocation2 + $0x1c] sm:$0xf]  ;;  %v10242_v58 = vld [vmem:[%s14383_s1 + $0xa0] sm:$0xff] }
  0x60   : > { %v1035_v6 = vor.u32 %v1034_v62, %v1030_v61  ;;  %v842_v10 = vrot.slane %v840_v49, 4  ;;  %v846_v12 = vshll.u32 %v10939_v63, 16  ;;  %v1040_v15 = vrot.slane %v1038_v3, 5  ;;  %v771_v26 = vld [vmem:[#allocation2 + $0x78] sm:$0xf]  ;;  %3967 = vmatpush.bf16.msrb.mxu2 %v10242_v58 }
  0x61   : > { %v2702_v13 = vpack.c.b16 %v2679_v0, %v2678_v60  ;;  %v1026_v14 = vrot.slane %v1025_v1, 4  ;;  %v834_v17 = vrot.slane %v833_v4, 4  ;;  %v851_v24 = vshrl.u32 %v755_v5, 16  ;;  %v10176_v49 = vld [vmem:[#allocation2 + $0x18] sm:$0xff]  ;;  %v227_v57 = vld [vmem:[%s10766_s9 + $0x10] sm:$0xf] }
  0x62   : > { %v1036_v21 = vrot.slane %v1035_v6, 4  ;;  %v843_v22 = vor.u32 %v842_v10, %v838_v7  ;;  %v848_v23 = vrot.slane %v846_v12, 5  ;;  %v854_v28 = vshll.u32 %v755_v5, 16  ;;  %v228_v0 = vld [vmem:[%s10766_s9 + $0x14] sm:$0xf] }
  0x63   : > { %3923 = vmatmul.bf16.vlgmr.msra.gmra.mxu3 %v2702_v13  ;;  %v839_v25 = vsel %vm10806_vm5, %v834_v17, %v838_v7  ;;  %v1031_v31 = vsel %vm10806_vm5, %v1026_v14, %v1030_v61  ;;  %v860_v34 = vshll.u32 %v756_v18, 16  ;;  %v1043_v38 = vshrl.u32 %v771_v26, 16  ;;  %v653_v27 = vld [vmem:[#allocation2 + $0x24] sm:$0xf] }
  0x64   : > { %v1041_v32 = vsel %vm10806_vm5, %v1036_v21, %v1040_v15  ;;  %v844_v33 = vrot.slane %v843_v22, 4  ;;  %v2664_v36 = vunpack.c.l.b16 %v839_v25  ;;  %v772_v37 = vld [vmem:[#allocation2 + $0x7c] sm:$0xf]  ;;  %v1046_v39 = vshll.u32 %v771_v26, 16  ;;  %v243_v22 = vld [vmem:[%s10766_s9 + $0x50] sm:$0xf] }
  0x65   : > { %v853_v40 = vrot.slane %v851_v24, 4  ;;  %v793_v42 = vld [vmem:[#allocation2 + $0x80] sm:$0x1]  ;;  %v1052_v43 = vshll.u32 %v772_v37, 16  ;;  %v1056_v44 = vshrl.u32 %v772_v37, 16  ;;  %v856_v46 = vrot.slane %v854_v28, 5  ;;  %3839 = vmatmul.bf16.gmra.mxu2 %v10183_v20 }
  0x66   : > { %v849_v41 = vsel %vm10806_vm5, %v844_v33, %v848_v23  ;;  %v10957_v47 = vunpack.c.l.b16 %v1031_v31  ;;  %v1045_v50 = vrot.slane %v1043_v38, 4  ;;  %v1048_v51 = vrot.slane %v1046_v39, 5  ;;  %v10959_v52 = vld [vmem:[#allocation2 + $0x20] sm:$0x1]  ;;  %v244_v28 = vld [vmem:[%s10766_s9 + $0x54] sm:$0xf] }
  0x67   : > { %v2665_v48 = vunpack.c.l.b16 %v849_v41  ;;  %v1054_v53 = vrot.slane %v1052_v43, 5  ;;  %v1058_v54 = vrot.slane %v1056_v44, 4  ;;  %v1062_v55 = vshll.u32 %v793_v42, 16  ;;  %v10184_v41 = vld [vmem:[#allocation2 + $0x78] sm:$0xff] }
  0x68   : > { %v857_v56 = vor.u32 %v856_v46, %v853_v40  ;;  %v1049_v60 = vor.u32 %v1048_v51, %v1045_v50  ;;  %v862_v61 = vrot.slane %v860_v34, 5  ;;  %v864_v62 = vshrl.u32 %v756_v18, 16  ;;  %v657_v34 = vld [vmem:[#allocation2 + $0x2c] sm:$0x1]  ;;  %v229_v40 = vld [vmem:[%s10766_s9 + $0x18] sm:$0xf] }
  0x69   : > { %v2695_v59 = vpack.c.b16 %v2665_v48, %v2664_v36  ;;  %v2681_v1 = vunpack.c.l.b16 %v1041_v32  ;;  %v1059_v3 = vor.u32 %v1058_v54, %v1054_v53  ;;  %v870_v5 = vshll.u32 %v10959_v52, 16  ;;  %3804 = vmatmul.bf16.gmra.mxu0 %v10176_v49  ;;  %v230_v48 = vld [vmem:[%s10766_s9 + $0x1c] sm:$0xf]  ;;  %v245_v54 = vld [vmem:[%s10766_s9 + $0x58] sm:$0xf] }
  0x6a   : > { %v858_v4 = vrot.slane %v857_v56, 4  ;;  %v1050_v6 = vrot.slane %v1049_v60, 4  ;;  %v866_v7 = vrot.slane %v864_v62, 4  ;;  %v347_v10 = vshrl.u32 %v227_v57, 16 }
  0x6b   : > { %3888 = vmatmul.bf16.gmra.mxu1 %v2695_v59  ;;  %v350_v12 = vshll.u32 %v227_v57, 16  ;;  %v1064_v13 = vrot.slane %v1062_v55, 5  ;;  %v355_v15 = vshrl.u32 %v228_v0, 16  ;;  %v1060_v17 = vrot.slane %v1059_v3, 4  ;;  %v10250_v57 = vld [vmem:[%s14383_s1 + $0xe0] sm:$0xff] }
  0x6c   : > { %v863_v14 = vsel %vm10806_vm5, %v858_v4, %v862_v61  ;;  %v867_v18 = vor.u32 %v866_v7, %v862_v61  ;;  %v872_v20 = vrot.slane %v870_v5, 5  ;;  %v349_v21 = vrot.slane %v347_v10, 7  ;;  %v10258_v59 = vld [vmem:[%s14383_s1 + $0x120] sm:$0xff]  ;;  %4056 = vmatpush.bf16.msrb.mxu3 %v10250_v57 }
  0x6d   : > { %v2703_v23 = vpack.c.b16 %v2681_v1, %v10957_v47  ;;  %v1055_v24 = vsel %vm10806_vm5, %v1050_v6, %v1054_v53  ;;  %v357_v25 = vrot.slane %v355_v15, 7  ;;  %v358_v26 = vshll.u32 %v228_v0, 16  ;;  %v709_v47 = vld [vmem:[#allocation2 + $0x84] sm:$0xf]  ;;  %v713_v1 = vld [vmem:[#allocation2 + $0x8c] sm:$0x1]  ;;  %4145 = vmatpush.bf16.msrb.mxu0 %v10258_v59 }
  0x6e   : > { %v868_v30 = vrot.slane %v867_v18, 4  ;;  %v10974_v31 = vunpack.c.l.b16 %v863_v14  ;;  %v352_v32 = vor.u32 %v350_v12, %v349_v21  ;;  %v353_v33 = vrot.slane %v349_v21, 4  ;;  %v660_v14 = vld [vmem:[#allocation2 + $0x30] sm:$0xf]  ;;  %v246_v15 = vld [vmem:[%s10766_s9 + $0x5c] sm:$0xf] }
  0x6f   : > { %v360_v36 = vor.u32 %v358_v26, %v357_v25  ;;  %v362_v37 = vrot.slane %v357_v25, 4  ;;  %v483_v38 = vshrl.u32 %v243_v22, 16  ;;  %v486_v39 = vshll.u32 %v243_v22, 16 }
  0x70   : > { %v1065_v42 = vsel %vm10806_vm5, %v1060_v17, %v1064_v13  ;;  %v873_v43 = vsel %vm10806_vm5, %v868_v30, %v872_v20  ;;  %v654_v44 = vsel %vm10847_vm8, %v352_v32, %v653_v27  ;;  %v491_v46 = vshrl.u32 %v244_v28, 16  ;;  %v716_v32 = vld [vmem:[#allocation2 + $0x90] sm:$0xf] }
  0x71   : > { %v2667_v49 = vunpack.c.l.b16 %v873_v43  ;;  %v361_v50 = vsel %vm10860_vm9, %v353_v33, %v360_v36  ;;  %655 = vst [vmem:[#allocation2 + $0x24] sm:$0xf] %v654_v44  ;;  %v485_v51 = vrot.slane %v483_v38, 7  ;;  %v494_v53 = vshll.u32 %v244_v28, 16  ;;  %v664_v33 = vld [vmem:[#allocation2 + $0x38] sm:$0x1] }
  0x72   : > { %v10987_v55 = vunpack.c.l.b16 %v1055_v24  ;;  %656 = vst.msk [vmem:[#allocation2 + $0x28] sm:$0xf] %vm633_vm4, %v361_v50  ;;  %v493_v56 = vrot.slane %v491_v46, 7  ;;  %v658_v58 = vsel %vm10869_vm10, %v362_v37, %v657_v34  ;;  %v364_v60 = vshrl.u32 %v229_v40, 16 }
  0x73   : > { %3928 = vmatmul.bf16.gmra.mxu3 %v2703_v23  ;;  %v10998_v61 = vunpack.c.l.b16 %v1065_v42  ;;  %v488_v62 = vor.u32 %v486_v39, %v485_v51  ;;  %v489_v0 = vrot.slane %v485_v51, 4  ;;  %659 = vst [vmem:[#allocation2 + $0x2c] sm:$0x1] %v658_v58  ;;  %v367_v3 = vshll.u32 %v229_v40, 16  ;;  %v10241_v23 = vld [vmem:[%s14383_s1 + $0x98] sm:$0xff] }
  0x74   : > { %v496_v4 = vor.u32 %v494_v53, %v493_v56  ;;  %v498_v5 = vrot.slane %v493_v56, 4  ;;  %v366_v6 = vrot.slane %v364_v60, 7  ;;  %v372_v7 = vshrl.u32 %v230_v48, 16  ;;  %3968 = vmatpush.bf16.msrb.mxu2 %v10241_v23 }
  0x75   : > { %v2696_v10 = vpack.c.b16 %v2667_v49, %v10974_v31  ;;  %v710_v12 = vsel %vm10847_vm8, %v488_v62, %v709_v47  ;;  %v375_v13 = vshll.u32 %v230_v48, 16  ;;  %v500_v17 = vshrl.u32 %v245_v54, 16  ;;  %3844 = vmatmul.bf16.gmra.mxu2 %v10184_v41 }
  0x76   : > { %v497_v18 = vsel %vm10860_vm9, %v489_v0, %v496_v4  ;;  %711 = vst [vmem:[#allocation2 + $0x84] sm:$0xf] %v710_v12  ;;  %v714_v20 = vsel %vm10869_vm10, %v498_v5, %v713_v1  ;;  %v369_v21 = vor.u32 %v367_v3, %v366_v6  ;;  %v503_v22 = vshll.u32 %v245_v54, 16  ;;  %v720_v4 = vld [vmem:[#allocation2 + $0x98] sm:$0x1] }
  0x77   : > { %712 = vst.msk [vmem:[#allocation2 + $0x88] sm:$0xf] %vm633_vm4, %v497_v18  ;;  %v370_v24 = vrot.slane %v366_v6, 4  ;;  %v374_v25 = vrot.slane %v372_v7, 7  ;;  %v502_v26 = vrot.slane %v500_v17, 7  ;;  %v508_v30 = vshrl.u32 %v246_v15, 16 }
  0x78   : > { %715 = vst [vmem:[#allocation2 + $0x8c] sm:$0x1] %v714_v20  ;;  %v757_v27 = vld [vmem:[#allocation2 + $0x24] sm:$0xf]  ;;  %v661_v28 = vsel %vm10847_vm8, %v369_v21, %v660_v14  ;;  %v511_v31 = vshll.u32 %v246_v15, 16  ;;  %v2704_v41 = vpack.c.b16 %v10998_v61, %v10987_v55 }
  0x79   : > { %v10177_v34 = vld [vmem:[#allocation2 + $0x24] sm:$0xff]  ;;  %v875_v37 = vshrl.u32 %v757_v27, 16  ;;  %v878_v38 = vshll.u32 %v757_v27, 16  ;;  %v377_v39 = vor.u32 %v375_v13, %v374_v25  ;;  %v379_v40 = vrot.slane %v374_v25, 4  ;;  %662 = vst [vmem:[#allocation2 + $0x30] sm:$0xf] %v661_v28 }
  0x7a   : > { %v758_v36 = vld [vmem:[#allocation2 + $0x28] sm:$0xf]  ;;  %v786_v42 = vld [vmem:[#allocation2 + $0x2c] sm:$0x1]  ;;  %v505_v46 = vor.u32 %v503_v22, %v502_v26  ;;  %3809 = vmatmul.bf16.gmra.mxu0 %v10177_v34  ;;  %v506_v54 = vrot.slane %v502_v26, 4  ;;  %v510_v56 = vrot.slane %v508_v30, 7 }
  0x7b   : > { %3893 = vmatmul.bf16.gmra.mxu1 %v2696_v10  ;;  %v884_v43 = vshll.u32 %v758_v36, 16  ;;  %v888_v44 = vshrl.u32 %v758_v36, 16  ;;  %v877_v47 = vrot.slane %v875_v37, 4  ;;  %v880_v48 = vrot.slane %v878_v38, 5  ;;  %v231_v18 = vld [vmem:[%s10766_s9 + $0x20] sm:$0xf] }
  0x7c   : > { %v894_v49 = vshll.u32 %v786_v42, 16  ;;  %v378_v50 = vsel %vm10860_vm9, %v370_v24, %v377_v39  ;;  %v717_v59 = vsel %vm10847_vm8, %v505_v46, %v716_v32  ;;  %v665_v60 = vsel %vm10869_vm10, %v379_v40, %v664_v33  ;;  %v10257_v32 = vld [vmem:[%s14383_s1 + $0x118] sm:$0xff] }
  0x7d   : > { %v886_v51 = vrot.slane %v884_v43, 5  ;;  %v890_v53 = vrot.slane %v888_v44, 4  ;;  %663 = vst.msk [vmem:[#allocation2 + $0x34] sm:$0xf] %vm633_vm4, %v378_v50  ;;  %v773_v55 = vld [vmem:[#allocation2 + $0x84] sm:$0xf]  ;;  %v881_v57 = vor.u32 %v880_v48, %v877_v47  ;;  %v513_v3 = vor.u32 %v511_v31, %v510_v56  ;;  %4146 = vmatpush.bf16.msrb.mxu0 %v10257_v32 }
  0x7e   : > { %v896_v58 = vrot.slane %v894_v49, 5  ;;  %v774_v61 = vld [vmem:[#allocation2 + $0x88] sm:$0xf]  ;;  %v1067_v62 = vshrl.u32 %v773_v55, 16  ;;  %v1070_v0 = vshll.u32 %v773_v55, 16  ;;  %v515_v12 = vrot.slane %v510_v56, 4 }
  0x7f   : > { %v891_v1 = vor.u32 %v890_v53, %v886_v51  ;;  %v794_v5 = vld [vmem:[#allocation2 + $0x8c] sm:$0x1]  ;;  %v1076_v6 = vshll.u32 %v774_v61, 16  ;;  %v1080_v7 = vshrl.u32 %v774_v61, 16  ;;  %v882_v10 = vrot.slane %v881_v57, 4  ;;  %v10185_v25 = vld [vmem:[#allocation2 + $0x84] sm:$0xff] }
  0x80   : > { %v1069_v13 = vrot.slane %v1067_v62, 4  ;;  %v1072_v14 = vrot.slane %v1070_v0, 5  ;;  %v1086_v15 = vshll.u32 %v794_v5, 16  ;;  %718 = vst [vmem:[#allocation2 + $0x90] sm:$0xf] %v717_v59  ;;  %v514_v23 = vsel %vm10860_vm9, %v506_v54, %v513_v3  ;;  %v10249_v31 = vld [vmem:[%s14383_s1 + $0xd8] sm:$0xff] }
  0x81   : > { %v892_v17 = vrot.slane %v891_v1, 4  ;;  %v1078_v20 = vrot.slane %v1076_v6, 5  ;;  %v1082_v21 = vrot.slane %v1080_v7, 4  ;;  %v887_v22 = vsel %vm10806_vm5, %v882_v10, %v886_v51  ;;  %666 = vst [vmem:[#allocation2 + $0x38] sm:$0x1] %v665_v60  ;;  %4057 = vmatpush.bf16.msrb.mxu3 %v10249_v31  ;;  %v10240_v53 = vld [vmem:[%s14383_s1 + $0x90] sm:$0xff] }
  0x82   : > { %v759_v24 = vld [vmem:[#allocation2 + $0x30] sm:$0xf]  ;;  %v1073_v26 = vor.u32 %v1072_v14, %v1069_v13  ;;  %v1088_v27 = vrot.slane %v1086_v15, 5  ;;  %v2668_v30 = vunpack.c.l.b16 %v887_v22  ;;  %719 = vst.msk [vmem:[#allocation2 + $0x94] sm:$0xf] %vm633_vm4, %v514_v23  ;;  %v721_v36 = vsel %vm10869_vm10, %v515_v12, %v720_v4  ;;  %3969 = vmatpush.bf16.msrb.mxu2 %v10240_v53 }
  0x83   : > { %3933 = vmatmul.bf16.gmra.mxu3 %v2704_v41  ;;  %v897_v28 = vsel %vm10806_vm5, %v892_v17, %v896_v58  ;;  %v1083_v33 = vor.u32 %v1082_v21, %v1078_v20  ;;  %v899_v38 = vshrl.u32 %v759_v24, 16  ;;  %722 = vst [vmem:[#allocation2 + $0x98] sm:$0x1] %v721_v36  ;;  %v902_v40 = vshll.u32 %v759_v24, 16  ;;  %v232_v6 = vld [vmem:[%s10766_s9 + $0x24] sm:$0xf] }
  0x84   : > { %v2669_v34 = vunpack.c.l.b16 %v897_v28  ;;  %v760_v37 = vld [vmem:[#allocation2 + $0x34] sm:$0xf]  ;;  %v1074_v39 = vrot.slane %v1073_v26, 4  ;;  %v381_v47 = vshrl.u32 %v231_v18, 16  ;;  %v384_v59 = vshll.u32 %v231_v18, 16 }
  0x85   : > { %v908_v41 = vshll.u32 %v760_v37, 16  ;;  %v912_v42 = vshrl.u32 %v760_v37, 16  ;;  %v1084_v43 = vrot.slane %v1083_v33, 4  ;;  %v901_v46 = vrot.slane %v899_v38, 4  ;;  %3849 = vmatmul.bf16.gmra.mxu2 %v10185_v25  ;;  %v10178_v55 = vld [vmem:[#allocation2 + $0x30] sm:$0xff] }
  0x86   : > { %v2697_v44 = vpack.c.b16 %v2669_v34, %v2668_v30  ;;  %v1079_v48 = vsel %vm10806_vm5, %v1074_v39, %v1078_v20  ;;  %v904_v49 = vrot.slane %v902_v40, 5  ;;  %v11046_v58 = vrot.slane %v381_v47, 7  ;;  %v247_v17 = vld [vmem:[%s10766_s9 + $0x60] sm:$0xf]  ;;  %v667_v28 = vld [vmem:[#allocation2 + $0x3c] sm:$0xf] }
  0x87   : > { %v910_v50 = vrot.slane %v908_v41, 5  ;;  %v914_v51 = vrot.slane %v912_v42, 4  ;;  %v1089_v54 = vsel %vm10806_vm5, %v1084_v43, %v1088_v27  ;;  %v2684_v56 = vunpack.c.l.b16 %v1079_v48  ;;  %v775_v57 = vld [vmem:[#allocation2 + $0x90] sm:$0xf]  ;;  %v248_v34 = vld [vmem:[%s10766_s9 + $0x64] sm:$0xf] }
  0x88   : > { %v2685_v60 = vunpack.c.l.b16 %v1089_v54  ;;  %v1091_v61 = vshrl.u32 %v775_v57, 16  ;;  %v1094_v62 = vshll.u32 %v775_v57, 16  ;;  %v787_v0 = vld [vmem:[#allocation2 + $0x38] sm:$0x1]  ;;  %v905_v1 = vor.u32 %v904_v49, %v901_v46  ;;  %v671_v49 = vld [vmem:[#allocation2 + $0x44] sm:$0x1] }
  0x89   : > { %v776_v3 = vld [vmem:[#allocation2 + $0x94] sm:$0xf]  ;;  %v915_v4 = vor.u32 %v914_v51, %v910_v50  ;;  %v918_v5 = vshll.u32 %v787_v0, 16  ;;  %v386_v7 = vor.u32 %v384_v59, %v11046_v58  ;;  %v387_v10 = vrot.slane %v11046_v58, 4 }
  0x8a   : > { %v2705_v12 = vpack.c.b16 %v2685_v60, %v2684_v56  ;;  %v1093_v13 = vrot.slane %v1091_v61, 4  ;;  %v1096_v14 = vrot.slane %v1094_v62, 5  ;;  %v1100_v15 = vshll.u32 %v776_v3, 16  ;;  %3814 = vmatmul.bf16.gmra.mxu0 %v10178_v55  ;;  %v795_v18 = vld [vmem:[#allocation2 + $0x98] sm:$0x1]  ;;  %v10248_v60 = vld [vmem:[%s14383_s1 + $0xd0] sm:$0xff] }
  0x8b   : > { %3898 = vmatmul.bf16.gmra.mxu1 %v2697_v44  ;;  %v1104_v20 = vshrl.u32 %v776_v3, 16  ;;  %v906_v21 = vrot.slane %v905_v1, 4  ;;  %v916_v22 = vrot.slane %v915_v4, 4  ;;  %v920_v23 = vrot.slane %v918_v5, 5  ;;  %v233_v44 = vld [vmem:[%s10766_s9 + $0x28] sm:$0xf]  ;;  %4058 = vmatpush.bf16.msrb.mxu3 %v10248_v60 }
  0x8c   : > { %v1097_v24 = vor.u32 %v1096_v14, %v1093_v13  ;;  %v1102_v25 = vrot.slane %v1100_v15, 5  ;;  %v1110_v26 = vshll.u32 %v795_v18, 16  ;;  %v389_v27 = vshrl.u32 %v232_v6, 16  ;;  %v234_v55 = vld [vmem:[%s10766_s9 + $0x2c] sm:$0xf]  ;;  %v10256_v61 = vld [vmem:[%s14383_s1 + $0x110] sm:$0xff] }
  0x8d   : > { %v1106_v30 = vrot.slane %v1104_v20, 4  ;;  %v911_v31 = vsel %vm10806_vm5, %v906_v21, %v910_v50  ;;  %v921_v32 = vsel %vm10806_vm5, %v916_v22, %v920_v23  ;;  %v392_v33 = vshll.u32 %v232_v6, 16  ;;  %v10186_v50 = vld [vmem:[#allocation2 + $0x90] sm:$0xff]  ;;  %v723_v3 = vld [vmem:[#allocation2 + $0x9c] sm:$0xf]  ;;  %4147 = vmatpush.bf16.msrb.mxu0 %v10256_v61 }
  0x8e   : > { %v1098_v36 = vrot.slane %v1097_v24, 4  ;;  %v1112_v37 = vrot.slane %v1110_v26, 5  ;;  %v11057_v38 = vunpack.c.l.b16 %v911_v31  ;;  %v11059_v39 = vunpack.c.l.b16 %v921_v32  ;;  %v249_v6 = vld [vmem:[%s10766_s9 + $0x68] sm:$0xf]  ;;  %v727_v15 = vld [vmem:[#allocation2 + $0xa4] sm:$0x1] }
  0x8f   : > { %v1107_v40 = vor.u32 %v1106_v30, %v1102_v25  ;;  %v391_v41 = vrot.slane %v389_v27, 7  ;;  %v668_v42 = vsel %vm10847_vm8, %v386_v7, %v667_v28  ;;  %v517_v43 = vshrl.u32 %v247_v17, 16  ;;  %v674_v24 = vld [vmem:[#allocation2 + $0x48] sm:$0xf] }
  0x90   : > { %v1103_v46 = vsel %vm10806_vm5, %v1098_v36, %v1102_v25  ;;  %669 = vst [vmem:[#allocation2 + $0x3c] sm:$0xf] %v668_v42  ;;  %v520_v47 = vshll.u32 %v247_v17, 16  ;;  %v525_v48 = vshrl.u32 %v248_v34, 16  ;;  %v2698_v53 = vpack.c.b16 %v11059_v39, %v11057_v38  ;;  %v250_v25 = vld [vmem:[%s10766_s9 + $0x6c] sm:$0xf] }
  0x91   : > { %v1108_v51 = vrot.slane %v1107_v40, 4  ;;  %v394_v54 = vor.u32 %v392_v33, %v391_v41  ;;  %v396_v56 = vrot.slane %v391_v41, 4  ;;  %v519_v57 = vrot.slane %v517_v43, 7  ;;  %v10239_v27 = vld [vmem:[%s14383_s1 + $0x88] sm:$0xff] }
  0x92   : > { %v527_v58 = vrot.slane %v525_v48, 7  ;;  %v528_v59 = vshll.u32 %v248_v34, 16  ;;  %v398_v62 = vshrl.u32 %v233_v44, 16  ;;  %v401_v5 = vshll.u32 %v233_v44, 16  ;;  %3970 = vmatpush.bf16.msrb.mxu2 %v10239_v27  ;;  %v730_v43 = vld [vmem:[#allocation2 + $0xa8] sm:$0xf] }
  0x93   : > { %3938 = vmatmul.bf16.gmra.mxu3 %v2705_v12  ;;  %v1113_v0 = vsel %vm10806_vm5, %v1108_v51, %v1112_v37  ;;  %v395_v1 = vsel %vm10860_vm9, %v387_v10, %v394_v54  ;;  %v672_v4 = vsel %vm10869_vm10, %v396_v56, %v671_v49  ;;  %v11082_v7 = vunpack.c.l.b16 %v1103_v46  ;;  %v678_v48 = vld [vmem:[#allocation2 + $0x50] sm:$0x1] }
  0x94   : > { %670 = vst.msk [vmem:[#allocation2 + $0x40] sm:$0xf] %vm633_vm4, %v395_v1  ;;  %v522_v12 = vor.u32 %v520_v47, %v519_v57  ;;  %v523_v13 = vrot.slane %v519_v57, 4  ;;  %v530_v14 = vor.u32 %v528_v59, %v527_v58  ;;  %v532_v17 = vrot.slane %v527_v58, 4  ;;  %v734_v1 = vld [vmem:[#allocation2 + $0xb0] sm:$0x1] }
  0x95   : > { %673 = vst [vmem:[#allocation2 + $0x44] sm:$0x1] %v672_v4  ;;  %v400_v10 = vrot.slane %v398_v62, 7  ;;  %v406_v18 = vshrl.u32 %v234_v55, 16  ;;  %v409_v20 = vshll.u32 %v234_v55, 16  ;;  %3854 = vmatmul.bf16.gmra.mxu2 %v10186_v50  ;;  %v11085_v21 = vunpack.c.l.b16 %v1113_v0 }
  0x96   : > { %v531_v22 = vsel %vm10860_vm9, %v523_v13, %v530_v14  ;;  %v724_v23 = vsel %vm10847_vm8, %v522_v12, %v723_v3  ;;  %v534_v26 = vshrl.u32 %v249_v6, 16  ;;  %v728_v28 = vsel %vm10869_vm10, %v532_v17, %v727_v15  ;;  %v11110_v14 = vld [vmem:[%s10766_s9 + $0x30] sm:$0xf] }
  0x97   : > { %725 = vst [vmem:[#allocation2 + $0x9c] sm:$0xf] %v724_v23  ;;  %v761_v30 = vld [vmem:[#allocation2 + $0x3c] sm:$0xf]  ;;  %v403_v31 = vor.u32 %v401_v5, %v400_v10  ;;  %v404_v32 = vrot.slane %v400_v10, 4  ;;  %v408_v33 = vrot.slane %v406_v18, 7  ;;  %v2706_v61 = vpack.c.b16 %v11085_v21, %v11082_v7 }
  0x98   : > { %726 = vst.msk [vmem:[#allocation2 + $0xa0] sm:$0xf] %vm633_vm4, %v531_v22  ;;  %v923_v34 = vshrl.u32 %v761_v30, 16  ;;  %v926_v36 = vshll.u32 %v761_v30, 16  ;;  %v536_v37 = vrot.slane %v534_v26, 7  ;;  %v537_v38 = vshll.u32 %v249_v6, 16 }
  0x99   : > { %729 = vst [vmem:[#allocation2 + $0xa4] sm:$0x1] %v728_v28  ;;  %v411_v39 = vor.u32 %v409_v20, %v408_v33  ;;  %v413_v40 = vrot.slane %v408_v33, 4  ;;  %v675_v41 = vsel %vm10847_vm8, %v403_v31, %v674_v24  ;;  %v542_v42 = vshrl.u32 %v250_v25, 16 }
  0x9a   : > { %v925_v44 = vrot.slane %v923_v34, 4  ;;  %v928_v46 = vrot.slane %v926_v36, 5  ;;  %676 = vst [vmem:[#allocation2 + $0x48] sm:$0xf] %v675_v41  ;;  %v539_v47 = vor.u32 %v537_v38, %v536_v37  ;;  %v540_v54 = vrot.slane %v536_v37, 4  ;;  %v10247_v34 = vld [vmem:[%s14383_s1 + $0xc8] sm:$0xff] }
  0x9b   : > { %3903 = vmatmul.bf16.gmra.mxu1 %v2698_v53  ;;  %v10179_v49 = vld [vmem:[#allocation2 + $0x3c] sm:$0xff]  ;;  %v412_v51 = vsel %vm10860_vm9, %v404_v32, %v411_v39  ;;  %v544_v56 = vrot.slane %v542_v42, 7  ;;  %v545_v55 = vshll.u32 %v250_v25, 16  ;;  %v679_v3 = vsel %vm10869_vm10, %v413_v40, %v678_v48  ;;  %4059 = vmatpush.bf16.msrb.mxu3 %v10247_v34  ;;  %v10255_v48 = vld [vmem:[%s14383_s1 + $0x108] sm:$0xff]  ;;  %v252_v34 = vld [vmem:[%s10766_s9 + $0x74] sm:$0xf] }
  0x9c   : > { %v762_v50 = vld [vmem:[#allocation2 + $0x40] sm:$0xf]  ;;  %v788_v57 = vld [vmem:[#allocation2 + $0x44] sm:$0x1]  ;;  %v929_v58 = vor.u32 %v928_v46, %v925_v44  ;;  %677 = vst.msk [vmem:[#allocation2 + $0x4c] sm:$0xf] %vm633_vm4, %v412_v51  ;;  %v731_v53 = vsel %vm10847_vm8, %v539_v47, %v730_v43  ;;  %3819 = vmatmul.bf16.gmra.mxu0 %v10179_v49 }
  0x9d   : > { %v932_v59 = vshll.u32 %v762_v50, 16  ;;  %v936_v60 = vshrl.u32 %v762_v50, 16  ;;  %v942_v62 = vshll.u32 %v788_v57, 16  ;;  %v547_v0 = vor.u32 %v545_v55, %v544_v56  ;;  %732 = vst [vmem:[#allocation2 + $0xa8] sm:$0xf] %v731_v53  ;;  %v10269_v49 = vld [vmem:[%s14383_s1 + $0x178] sm:$0xff]  ;;  %4148 = vmatpush.bf16.msrb.mxu0 %v10255_v48 }
  0x9e   : > { %v777_v4 = vld [vmem:[#allocation2 + $0x9c] sm:$0xf]  ;;  %v930_v5 = vrot.slane %v929_v58, 4  ;;  %v549_v13 = vrot.slane %v544_v56, 4  ;;  %680 = vst [vmem:[#allocation2 + $0x50] sm:$0x1] %v679_v3  ;;  %4231 = vmatpush.bf16.msrb.mxu1 %v10269_v49 }
  0x9f   : > { %v934_v6 = vrot.slane %v932_v59, 5  ;;  %v938_v12 = vrot.slane %v936_v60, 4  ;;  %v778_v15 = vld [vmem:[#allocation2 + $0xa0] sm:$0xf]  ;;  %v1115_v17 = vshrl.u32 %v777_v4, 16  ;;  %v1118_v10 = vshll.u32 %v777_v4, 16 }
  0xa0   : > { %v944_v18 = vrot.slane %v942_v62, 5  ;;  %v548_v7 = vsel %vm10860_vm9, %v540_v54, %v547_v0  ;;  %v796_v20 = vld [vmem:[#allocation2 + $0xa4] sm:$0x1]  ;;  %v1124_v21 = vshll.u32 %v778_v15, 16  ;;  %v1128_v22 = vshrl.u32 %v778_v15, 16  ;;  %v10187_v25 = vld [vmem:[#allocation2 + $0x9c] sm:$0xff] }
  0xa1   : > { %v935_v23 = vsel %vm10806_vm5, %v930_v5, %v934_v6  ;;  %v939_v24 = vor.u32 %v938_v12, %v934_v6  ;;  %733 = vst.msk [vmem:[#allocation2 + $0xac] sm:$0xf] %vm633_vm4, %v548_v7  ;;  %v1117_v26 = vrot.slane %v1115_v17, 4  ;;  %v1120_v27 = vrot.slane %v1118_v10, 5  ;;  %v763_v36 = vld [vmem:[#allocation2 + $0x48] sm:$0xf] }
  0xa2   : > { %v1134_v28 = vshll.u32 %v796_v20, 16  ;;  %v1126_v30 = vrot.slane %v1124_v21, 5  ;;  %v1130_v31 = vrot.slane %v1128_v22, 4  ;;  %v735_v33 = vsel %vm10869_vm10, %v549_v13, %v734_v1  ;;  %v10238_v1 = vld [vmem:[%s14383_s1 + $0x80] sm:$0xff] }
  0xa3   : > { %3943 = vmatmul.bf16.gmra.mxu3 %v2706_v61  ;;  %v940_v32 = vrot.slane %v939_v24, 4  ;;  %v1121_v37 = vor.u32 %v1120_v27, %v1117_v26  ;;  %v2672_v39 = vunpack.c.l.b16 %v935_v23  ;;  %736 = vst [vmem:[#allocation2 + $0xb0] sm:$0x1] %v735_v33  ;;  %v764_v40 = vld [vmem:[#allocation2 + $0x4c] sm:$0xf]  ;;  %v415_v41 = vshrl.u32 %v11110_v14, 16  ;;  %3971 = vmatpush.bf16.msrb.mxu2 %v10238_v1 }
  0xa4   : > { %v1136_v38 = vrot.slane %v1134_v28, 5  ;;  %v1131_v42 = vor.u32 %v1130_v31, %v1126_v30  ;;  %v779_v44 = vld [vmem:[#allocation2 + $0xa8] sm:$0xf]  ;;  %v947_v46 = vshrl.u32 %v763_v36, 16  ;;  %v950_v47 = vshll.u32 %v763_v36, 16 }
  0xa5   : > { %v945_v43 = vsel %vm10806_vm5, %v940_v32, %v944_v18  ;;  %v1122_v50 = vrot.slane %v1121_v37, 4  ;;  %v1139_v54 = vshrl.u32 %v779_v44, 16  ;;  %v1142_v56 = vshll.u32 %v779_v44, 16  ;;  %3859 = vmatmul.bf16.gmra.mxu2 %v10187_v25  ;;  %v789_v12 = vld [vmem:[#allocation2 + $0x50] sm:$0x1]  ;;  %v10180_v15 = vld [vmem:[#allocation2 + $0x48] sm:$0xff] }
  0xa6   : > { %v2673_v51 = vunpack.c.l.b16 %v945_v43  ;;  %v1132_v55 = vrot.slane %v1131_v42, 4  ;;  %v949_v57 = vrot.slane %v947_v46, 4  ;;  %v952_v58 = vrot.slane %v950_v47, 5  ;;  %v236_v28 = vld [vmem:[%s10766_s9 + $0x34] sm:$0xf] }
  0xa7   : > { %v956_v59 = vshll.u32 %v764_v40, 16  ;;  %v1127_v60 = vsel %vm10806_vm5, %v1122_v50, %v1126_v30  ;;  %v1141_v62 = vrot.slane %v1139_v54, 4  ;;  %v1144_v0 = vrot.slane %v1142_v56, 5  ;;  %v251_v33 = vld [vmem:[%s10766_s9 + $0x70] sm:$0xf] }
  0xa8   : > { %v2699_v53 = vpack.c.b16 %v2673_v51, %v2672_v39  ;;  %v780_v61 = vld [vmem:[#allocation2 + $0xac] sm:$0xf]  ;;  %v1137_v3 = vsel %vm10806_vm5, %v1132_v55, %v1136_v38  ;;  %v2688_v4 = vunpack.c.l.b16 %v1127_v60  ;;  %v953_v10 = vor.u32 %v952_v58, %v949_v57  ;;  %v685_v57 = vld [vmem:[#allocation2 + $0x5c] sm:$0x1] }
  0xa9   : > { %v1148_v5 = vshll.u32 %v780_v61, 16  ;;  %v1152_v6 = vshrl.u32 %v780_v61, 16  ;;  %v2689_v13 = vunpack.c.l.b16 %v1137_v3  ;;  %v1145_v17 = vor.u32 %v1144_v0, %v1141_v62  ;;  %v10188_v50 = vld [vmem:[#allocation2 + $0xa8] sm:$0xff]  ;;  %v10246_v61 = vld [vmem:[%s14383_s1 + $0xc0] sm:$0xff] }
  0xaa   : > { %v958_v18 = vrot.slane %v956_v59, 5  ;;  %v797_v7 = vld [vmem:[#allocation2 + $0xb0] sm:$0x1]  ;;  %v960_v22 = vshrl.u32 %v764_v40, 16  ;;  %v966_v23 = vshll.u32 %v789_v12, 16  ;;  %v954_v25 = vrot.slane %v953_v10, 4  ;;  %4060 = vmatpush.bf16.msrb.mxu3 %v10246_v61 }
  0xab   : > { %3908 = vmatmul.bf16.gmra.mxu1 %v2699_v53  ;;  %v11138_v20 = vrot.slane %v1148_v5, 5  ;;  %v1154_v21 = vrot.slane %v1152_v6, 4  ;;  %v1158_v24 = vshll.u32 %v797_v7, 16  ;;  %v417_v30 = vrot.slane %v415_v41, 7  ;;  %v681_v40 = vld [vmem:[#allocation2 + $0x54] sm:$0xf] }
  0xac   : > { %v962_v27 = vrot.slane %v960_v22, 4  ;;  %v2707_v31 = vpack.c.b16 %v2689_v13, %v2688_v4  ;;  %3824 = vmatmul.bf16.gmra.mxu0 %v10180_v15  ;;  %v418_v32 = vshll.u32 %v11110_v14, 16  ;;  %v11145_v36 = vrot.slane %v1145_v17, 4  ;;  %v10268_v41 = vld [vmem:[%s14383_s1 + $0x170] sm:$0xff]  ;;  %v10267_v62 = vld [vmem:[%s14383_s1 + $0x168] sm:$0xff]  ;;  %v10254_v5 = vld [vmem:[%s14383_s1 + $0x100] sm:$0xff] }
  0xad   : > { %v1155_v26 = vor.u32 %v1154_v21, %v11138_v20  ;;  %v11147_v37 = vrot.slane %v1158_v24, 5  ;;  %v968_v39 = vrot.slane %v966_v23, 5  ;;  %v959_v42 = vsel %vm10806_vm5, %v954_v25, %v958_v18  ;;  %4232 = vmatpush.bf16.msrb.mxu1 %v10268_v41  ;;  %v737_v4 = vld [vmem:[#allocation2 + $0xb4] sm:$0xf]  ;;  %v1365_v17 = vld [vmem:[#allocation2 + $0xc] sm:$0xf]  ;;  %4149 = vmatpush.bf16.msrb.mxu0 %v10254_v5 }
  0xae   : > { %v963_v38 = vor.u32 %v962_v27, %v958_v18  ;;  %v420_v43 = vor.u32 %v418_v32, %v417_v30  ;;  %v423_v44 = vshrl.u32 %v236_v28, 16  ;;  %v426_v46 = vshll.u32 %v236_v28, 16  ;;  %v741_v7 = vld [vmem:[#allocation2 + $0xbc] sm:$0x1]  ;;  %v11181_v22 = vld [vmem:[#allocation2 + $0x10] sm:$0xf] }
  0xaf   : > { %v1156_v14 = vrot.slane %v1155_v26, 4  ;;  %v551_v48 = vshrl.u32 %v251_v33, 16  ;;  %v554_v49 = vshll.u32 %v251_v33, 16  ;;  %v421_v51 = vrot.slane %v417_v30, 4  ;;  %v10277_v27 = vld [vmem:[%s14383_s1 + $0x1b8] sm:$0xff] }
  0xb0   : > { %v964_v47 = vrot.slane %v963_v38, 4  ;;  %v425_v54 = vrot.slane %v423_v44, 7  ;;  %v682_v56 = vsel %vm10847_vm8, %v420_v43, %v681_v40  ;;  %v559_v55 = vshrl.u32 %v252_v34, 16  ;;  %v11193_v32 = vld [vmem:[#allocation2 + $0x14] sm:$0x1]  ;;  %4320 = vmatpush.bf16.msra.mxu2 %v10277_v27 }
  0xb1   : > { %v2674_v59 = vunpack.c.l.b16 %v959_v42  ;;  %683 = vst [vmem:[#allocation2 + $0x54] sm:$0xf] %v682_v56  ;;  %v553_v60 = vrot.slane %v551_v48, 7  ;;  %v562_v53 = vshll.u32 %v252_v34, 16  ;;  %v1151_v6 = vsel %vm10806_vm5, %v11145_v36, %v11138_v20  ;;  %4233 = vmatpush.bf16.msrb.mxu1 %v10267_v62  ;;  %v10266_v20 = vld [vmem:[%s14383_s1 + $0x160] sm:$0xff] }
  0xb2   : > { %v969_v58 = vsel %vm10806_vm5, %v964_v47, %v968_v39  ;;  %v428_v1 = vor.u32 %v426_v46, %v425_v54  ;;  %v430_v3 = vrot.slane %v425_v54, 4  ;;  %v561_v15 = vrot.slane %v559_v55, 7  ;;  %v10265_v39 = vld [vmem:[%s14383_s1 + $0x158] sm:$0xff]  ;;  %v11203_v46 = vld [vmem:[%s14384_s2] ss:$0 sm:$0xff]  ;;  %v11208_v47 = vld [vmem:[#allocation2 + $0xc] sm:$0xff] }
  0xb3   : > { %3948 = vmatmul.bf16.gmra.mxu3 %v2707_v31  ;;  %v2675_v0 = vunpack.c.l.b16 %v969_v58  ;;  %v556_v12 = vor.u32 %v554_v49, %v553_v60  ;;  %v557_v13 = vrot.slane %v553_v60, 4  ;;  %v1161_v10 = vsel %vm10806_vm5, %v1156_v14, %v11147_v37  ;;  %4656 = vst [vmem:[#allocation2 + $0x14] sm:$0x1] %v14388_v2 }
  0xb4   : > { %v429_v18 = vsel %vm10860_vm9, %v421_v51, %v428_v1  ;;  %v686_v21 = vsel %vm10869_vm10, %v430_v3, %v685_v57  ;;  %v564_v24 = vor.u32 %v562_v53, %v561_v15  ;;  %v566_v25 = vrot.slane %v561_v15, 4  ;;  %4655 = vst [vmem:[#allocation2 + $0x10] sm:$0xf] %v14388_v2 }
  0xb5   : > { %3864 = vmatmul.bf16.gmra.mxu2 %v10188_v50  ;;  %v2700_v23 = vpack.c.b16 %v2675_v0, %v2674_v59  ;;  %684 = vst.msk [vmem:[#allocation2 + $0x58] sm:$0xf] %vm633_vm4, %v429_v18  ;;  %v738_v26 = vsel %vm10847_vm8, %v556_v12, %v737_v4  ;;  %v1414_v28 = vshrl.u32 %v1365_v17, 16  ;;  %v1417_v33 = vshll.u32 %v1365_v17, 16  ;;  %4234 = vmatpush.bf16.msrb.mxu1 %v10266_v20  ;;  %v3795_v0 = vpop.f32.mrf.mxu0 }
  0xb6   : > { %739 = vst [vmem:[#allocation2 + $0xb4] sm:$0xf] %v738_v26  ;;  %v565_v30 = vsel %vm10860_vm9, %v557_v13, %v564_v24  ;;  %v742_v31 = vsel %vm10869_vm10, %v566_v25, %v741_v7  ;;  %v1423_v34 = vshll.u32 %v11181_v22, 16  ;;  %v2690_v36 = vunpack.c.l.b16 %v1151_v6  ;;  %v10264_v13 = vld [vmem:[%s14383_s1 + $0x150] sm:$0xff] }
  0xb7   : > { %687 = vst [vmem:[#allocation2 + $0x5c] sm:$0x1] %v686_v21  ;;  %v2691_v37 = vunpack.c.l.b16 %v1161_v10  ;;  %v1416_v40 = vrot.slane %v1414_v28, 4  ;;  %v1419_v44 = vrot.slane %v1417_v33, 5  ;;  %v9115_v41 = vrot.slane %v10702_v8, 9  ;;  %v10285_v33 = vld [vmem:[%s14383_s1 + $0x1f8] sm:$0xff] }
  0xb8   : > { %740 = vst.msk [vmem:[#allocation2 + $0xb8] sm:$0xf] %vm633_vm4, %v565_v30  ;;  %v765_v38 = vld [vmem:[#allocation2 + $0x54] sm:$0xf]  ;;  %v1427_v14 = vshrl.u32 %v11181_v22, 16  ;;  %v1425_v51 = vrot.slane %v1423_v34, 5  ;;  %v3796_v6 = vadd.f32 %v11203_v46, %v3795_v0  ;;  %4409 = vmatpush.bf16.msra.mxu3 %v10285_v33 }
  0xb9   : > { %743 = vst [vmem:[#allocation2 + $0xbc] sm:$0x1] %v742_v31  ;;  %v971_v42 = vshrl.u32 %v765_v38, 16  ;;  %v974_v43 = vshll.u32 %v765_v38, 16  ;;  %v1420_v50 = vor.u32 %v1419_v44, %v1416_v40  ;;  %v2708_v54 = vpack.c.b16 %v2691_v37, %v2690_v36  ;;  %4235 = vmatpush.bf16.msrb.mxu1 %v10265_v39  ;;  %v10263_v39 = vld [vmem:[%s14383_s1 + $0x148] sm:$0xff] }
  0xba   : > { %v1255_v57 = vrot.slane %v10705_v9, 5  ;;  %v1258_v58 = vrot.slane %v10786_v29, 5  ;;  %v1429_v59 = vrot.slane %v1427_v14, 4  ;;  %v1433_v1 = vshll.u32 %v11193_v32, 16 }
  0xbb   : > { %3913 = vmatmul.bf16.gmra.mxu1 %v2700_v23  ;;  %v973_v48 = vrot.slane %v971_v42, 4  ;;  %v976_v49 = vrot.slane %v974_v43, 5  ;;  %v1421_v12 = vrot.slane %v1420_v50, 4  ;;  %v1866_v9 = vrot.slane %v11193_v32, 5 }
  0xbc   : > { %v10181_v56 = vld [vmem:[#allocation2 + $0x54] sm:$0xff]  ;;  %v1430_v7 = vor.u32 %v1429_v59, %v1425_v51  ;;  %v1435_v38 = vrot.slane %v1433_v1, 5  ;;  %v1257_v59 = vrot.slane %v1255_v57, 4 }
  0xbd   : > { %v11211_v55 = vld [vmem:[#allocation2 + $0x58] sm:$0xf]  ;;  %v781_v60 = vld [vmem:[#allocation2 + $0xb4] sm:$0xf]  ;;  %v977_v53 = vor.u32 %v976_v49, %v973_v48  ;;  %3829 = vmatmul.bf16.gmra.mxu0 %v10181_v56  ;;  %4236 = vmatpush.bf16.msrb.mxu1 %v10264_v13  ;;  %v1426_v44 = vsel %vm10806_vm5, %v1421_v12, %v1425_v51  ;;  %v10262_v51 = vld [vmem:[%s14383_s1 + $0x140] sm:$0xff]  ;;  %v1863_v13 = vrot.slane %v11181_v22, 5 }
  0xbe   : > { %v980_v61 = vshll.u32 %v11211_v55, 16  ;;  %v984_v62 = vshrl.u32 %v11211_v55, 16  ;;  %v1163_v3 = vshrl.u32 %v781_v60, 16  ;;  %v1166_v4 = vshll.u32 %v781_v60, 16  ;;  %v11218_v5 = vld [vmem:[#allocation2 + $0x5c] sm:$0x1] }
  0xbf   : > { %v782_v15 = vld [vmem:[#allocation2 + $0xb8] sm:$0xf]  ;;  %v978_v17 = vrot.slane %v977_v53, 4  ;;  %v990_v31 = vshll.u32 %v11218_v5, 16  ;;  %v1431_v50 = vrot.slane %v1430_v7, 4  ;;  %v2870_v60 = vunpack.c.l.b16 %v1426_v44 }
  0xc0   : > { %v982_v10 = vrot.slane %v980_v61, 5  ;;  %v986_v18 = vrot.slane %v984_v62, 4  ;;  %v798_v21 = vld [vmem:[#allocation2 + $0xbc] sm:$0x1]  ;;  %v1165_v20 = vrot.slane %v1163_v3, 4  ;;  %v1168_v23 = vrot.slane %v1166_v4, 5 }
  0xc1   : > { %v1172_v24 = vshll.u32 %v782_v15, 16  ;;  %v1176_v25 = vshrl.u32 %v782_v15, 16  ;;  %v10189_v26 = vld [vmem:[#allocation2 + $0xb4] sm:$0xff]  ;;  %v1182_v27 = vshll.u32 %v798_v21, 16  ;;  %v992_v42 = vrot.slane %v990_v31, 5  ;;  %4237 = vmatpush.bf16.msrb.mxu1 %v10263_v39 }
  0xc2   : > { %v983_v28 = vsel %vm10806_vm5, %v978_v17, %v982_v10  ;;  %v987_v30 = vor.u32 %v986_v18, %v982_v10  ;;  %v1169_v34 = vor.u32 %v1168_v23, %v1165_v20  ;;  %v10293_v61 = vld [vmem:[%s14383_s1 + $0x238] sm:$0xff]  ;;  %v1436_v4 = vsel %vm10806_vm5, %v1431_v50, %v1435_v38  ;;  %v1797_v12 = vld [vmem:[#allocation2 + $0xc] sm:$0xe] }
  0xc3   : > { %3953 = vmatmul.bf16.gmra.mxu3 %v2708_v54  ;;  %v1174_v36 = vrot.slane %v1172_v24, 5  ;;  %v1178_v37 = vrot.slane %v1176_v25, 4  ;;  %v2676_v43 = vunpack.c.l.b16 %v983_v28  ;;  %v1184_v49 = vrot.slane %v1182_v27, 5  ;;  %v3884_v54 = vpop.f32.mrf.mxu1  ;;  %4498 = vmatpush.bf16.msra.mxu0 %v10293_v61  ;;  %v11258_v15 = vld [vmem:[#allocation2 + $0xc] sm:$0xe] }
  0xc4   : > { %v988_v40 = vrot.slane %v987_v30, 4  ;;  %v1170_v14 = vrot.slane %v1169_v34, 4  ;;  %v11239_v53 = vadd.f32 %v3884_v54, %v3796_v6  ;;  %v2871_v6 = vunpack.c.l.b16 %v1436_v4  ;;  %4654 = vst [vmem:[#allocation2 + $0xc] sm:$0xf] %v14388_v2  ;;  %v1367_v20 = vld [vmem:[#allocation2 + $0x18] sm:$0xf]  ;;  %v11278_v30 = vpop.f32.mrf.mxu0 }
  0xc5   : > { %v1179_v48 = vor.u32 %v1178_v37, %v1174_v36  ;;  %3869 = vmatmul.bf16.gmra.mxu2 %v10189_v26  ;;  %4238 = vmatpush.bf16.msrb.mxu1 %v10262_v51  ;;  %v1256_v21 = vsel %vm11251_vm13, %v9115_v41, %v1255_v57  ;;  %v1259_v22 = vsel %vm11251_vm13, %v1257_v59, %v1258_v58  ;;  %v11273_v24 = vld [vmem:[#allocation2 + $0x1c] sm:$0xf]  ;;  %v11275_v25 = vld [vmem:[#allocation2 + $0x20] sm:$0x1]  ;;  %v9131_v26 = vrot.slane %v1797_v12, 9 }
  0xc6   : > { %v993_v56 = vsel %vm10806_vm5, %v988_v40, %v992_v42  ;;  %v1175_v62 = vsel %vm10806_vm5, %v1170_v14, %v1174_v36  ;;  %v2902_v23 = vpack.c.b16 %v2871_v6, %v2870_v60  ;;  %v1865_v27 = vrot.slane %v1863_v13, 4  ;;  %v11283_v34 = vld [vmem:[#allocation2 + $0x20] sm:$0x1]  ;;  %v11291_v59 = vld [vmem:[#allocation2 + $0x28] sm:$0xf] }
  0xc7   : > { %v1180_v0 = vrot.slane %v1179_v48, 4  ;;  %v2677_v1 = vunpack.c.l.b16 %v993_v56  ;;  %v2692_v18 = vunpack.c.l.b16 %v1175_v62  ;;  %v2726_v8 = vunpack.c.l.b16 %v1256_v21  ;;  %4659 = vst [vmem:[#allocation2 + $0x20] sm:$0x1] %v14388_v2 }
  0xc8   : > { %v2727_v28 = vunpack.c.l.b16 %v1259_v22  ;;  %v1438_v41 = vshrl.u32 %v1367_v20, 16  ;;  %v1441_v29 = vshll.u32 %v1367_v20, 16  ;;  %v1447_v58 = vshll.u32 %v11273_v24, 16 }
  0xc9   : > { %v1185_v17 = vsel %vm10806_vm5, %v1180_v0, %v1184_v49  ;;  %v2701_v10 = vpack.c.b16 %v2677_v1, %v2676_v43  ;;  %v1451_v31 = vshrl.u32 %v11273_v24, 16  ;;  %v1457_v33 = vshll.u32 %v11275_v25, 16  ;;  %v1369_v49 = vld [vmem:[#allocation2 + $0x24] sm:$0xf] }
  0xca   : > { %v2693_v7 = vunpack.c.l.b16 %v1185_v17  ;;  %v1440_v36 = vrot.slane %v1438_v41, 4  ;;  %v1443_v37 = vrot.slane %v1441_v29, 5  ;;  %v1864_v32 = vsel %vm11251_vm13, %v9131_v26, %v1863_v13 }
  0xcb   : > { %3918 = vmatmul.bf16.gmra.mxu1 %v2701_v10  ;;  %v1867_v38 = vsel %vm11251_vm13, %v1865_v27, %v1866_v9  ;;  %v1449_v39 = vrot.slane %v1447_v58, 5  ;;  %v1453_v40 = vrot.slane %v1451_v31, 4  ;;  %v1262_v42 = vrot.slane %v10926_v35, 5  ;;  %v11310_v58 = vpop.f32.mrf.mxu1 }
  0xcc   : > { %v2709_v57 = vpack.c.b16 %v2693_v7, %v2692_v18  ;;  %v1444_v43 = vor.u32 %v1443_v37, %v1440_v36  ;;  %v2758_v44 = vpack.c.b16 %v2727_v28, %v2726_v8  ;;  %v1459_v48 = vrot.slane %v1457_v33, 5  ;;  %v1798_v7 = vld [vmem:[#allocation2 + $0x18] sm:$0xe] }
  0xcd   : > { %4150 = vmatmul.bf16.vlgmr.msrb.gmra.mxu0 %v2902_v23  ;;  %v1454_v14 = vor.u32 %v1453_v40, %v1449_v39  ;;  %v2934_v50 = vunpack.c.l.b16 %v1864_v32  ;;  %v2935_v54 = vunpack.c.l.b16 %v1867_v38  ;;  %v1462_v51 = vshrl.u32 %v1369_v49, 16  ;;  %v11302_v23 = vld [vmem:[#allocation2 + $0x2c] sm:$0x1]  ;;  %v10276_v32 = vld [vmem:[%s14383_s1 + $0x1b0] sm:$0xff] }
  0xce   : > { %v1445_v56 = vrot.slane %v1444_v43, 4  ;;  %v1465_v61 = vshll.u32 %v1369_v49, 16  ;;  %v9116_v62 = vrot.slane %v11258_v15, 9  ;;  %v1264_v0 = vrot.slane %v1262_v42, 4  ;;  %4321 = vmatpush.bf16.msra.mxu2 %v10276_v32  ;;  %v10472_v49 = vld [vmem:[#allocation2 + $0x1c] sm:$0xf] }
  0xcf   : > { %v1455_v60 = vrot.slane %v1454_v14, 4  ;;  %v1265_v1 = vrot.slane %v10939_v63, 5  ;;  %v1870_v6 = vrot.slane %v11273_v24, 5  ;;  %v1471_v12 = vshll.u32 %v11291_v59, 16 }
  0xd0   : > { %v1450_v35 = vsel %vm10806_vm5, %v1445_v56, %v1449_v39  ;;  %v2966_v13 = vpack.c.b16 %v2935_v54, %v2934_v50  ;;  %v1475_v15 = vshrl.u32 %v11291_v59, 16  ;;  %v1464_v21 = vrot.slane %v1462_v51, 4  ;;  %v1371_v51 = vld [vmem:[#allocation2 + $0x30] sm:$0xf] }
  0xd1   : > { %v1460_v4 = vsel %vm10806_vm5, %v1455_v60, %v1459_v48  ;;  %v2872_v10 = vunpack.c.l.b16 %v1450_v35  ;;  %v1467_v22 = vrot.slane %v1465_v61, 5  ;;  %v9132_v63 = vrot.slane %v1798_v7, 9  ;;  %v1188_v48 = vld [vmem:[#allocation2 + $0x18] sm:$0xe]  ;;  %v10284_v60 = vld [vmem:[%s14383_s1 + $0x1f0] sm:$0xff] }
  0xd2   : > { %v2873_v18 = vunpack.c.l.b16 %v1460_v4  ;;  %v1872_v26 = vrot.slane %v1870_v6, 4  ;;  %v1873_v27 = vrot.slane %v11275_v25, 5  ;;  %v1473_v9 = vrot.slane %v1471_v12, 5  ;;  %v11324_v61 = vld [vmem:[#allocation2 + $0x34] sm:$0xf]  ;;  %4410 = vmatpush.bf16.msra.mxu3 %v10284_v60 }
  0xd3   : > { %3958 = vmatmul.bf16.gmra.mxu3 %v2709_v57  ;;  %v1263_v24 = vsel %vm11251_vm13, %v9116_v62, %v1262_v42  ;;  %v1266_v8 = vsel %vm11251_vm13, %v1264_v0, %v1265_v1  ;;  %v1477_v41 = vrot.slane %v1475_v15, 4  ;;  %v1468_v29 = vor.u32 %v1467_v22, %v1464_v21 }
  0xd4   : > { %v2903_v28 = vpack.c.b16 %v2873_v18, %v2872_v10  ;;  %v1481_v57 = vshll.u32 %v11302_v23, 16  ;;  %v2728_v33 = vunpack.c.l.b16 %v1263_v24  ;;  %v2729_v36 = vunpack.c.l.b16 %v1266_v8  ;;  %v1799_v24 = vld [vmem:[#allocation2 + $0x24] sm:$0xe] }
  0xd5   : > { %3972 = vmatmul.bf16.vlgmr.msrb.gmra.mxu2 %v2758_v44  ;;  %v1478_v31 = vor.u32 %v1477_v41, %v1473_v9  ;;  %v1871_v25 = vsel %vm11251_vm13, %v9132_v63, %v1870_v6  ;;  %v1874_v37 = vsel %vm11251_vm13, %v1872_v26, %v1873_v27  ;;  %v1469_v39 = vrot.slane %v1468_v29, 4 }
  0xd6   : > { %v3800_v17 = vpop.f32.mrf.mxu0  ;;  %v1483_v42 = vrot.slane %v1481_v57, 5  ;;  %v2936_v44 = vunpack.c.l.b16 %v1871_v25  ;;  %v2937_v14 = vunpack.c.l.b16 %v1874_v37  ;;  %v1269_v50 = vrot.slane %v10472_v49, 5  ;;  %v10191_v49 = vld [vmem:[#allocation2 + $0x18] sm:$0xff] }
  0xd7   : > { %v1479_v40 = vrot.slane %v1478_v31, 4  ;;  %v2759_v56 = vpack.c.b16 %v2729_v36, %v2728_v33  ;;  %v1486_v62 = vshrl.u32 %v1371_v51, 16  ;;  %v1489_v0 = vshll.u32 %v1371_v51, 16 }
  0xd8   : > { %v3835_v20 = vpop.f32.mrf.mxu2  ;;  %v1495_v35 = vshll.u32 %v11324_v61, 16  ;;  %v3801_v1 = vadd.f32 %v11203_v46, %v3800_v17  ;;  %v1474_v4 = vsel %vm10806_vm5, %v1469_v39, %v1473_v9  ;;  %v1499_v6 = vshrl.u32 %v11324_v61, 16  ;;  %v10292_v17 = vld [vmem:[%s14383_s1 + $0x230] sm:$0xff] }
  0xd9   : > { %v3836_v54 = vadd.f32 %v11203_v46, %v3835_v20  ;;  %v9117_v10 = vrot.slane %v1188_v48, 9  ;;  %v1271_v18 = vrot.slane %v1269_v50, 4  ;;  %v1272_v7 = vrot.slane %v10959_v52, 5  ;;  %4499 = vmatpush.bf16.msra.mxu0 %v10292_v17  ;;  %v11342_v52 = vld [vmem:[#allocation2 + $0x38] sm:$0x1] }
  0xda   : > { %v1877_v21 = vrot.slane %v11291_v59, 5  ;;  %v1488_v22 = vrot.slane %v1486_v62, 4  ;;  %v1491_v20 = vrot.slane %v1489_v0, 5  ;;  %v2874_v27 = vunpack.c.l.b16 %v1474_v4  ;;  %v10473_v4 = vld [vmem:[#allocation2 + $0x28] sm:$0xf] }
  0xdb   : > { %4239 = vmatmul.bf16.vlgmr.msrb.gmra.mxu1 %v2966_v13  ;;  %v2967_v13 = vpack.c.b16 %v2937_v14, %v2936_v44  ;;  %v1497_v8 = vrot.slane %v1495_v35, 5  ;;  %v1270_v59 = vsel %vm11251_vm13, %v9117_v10, %v1269_v50  ;;  %v1273_v31 = vsel %vm11251_vm13, %v1271_v18, %v1272_v7  ;;  %v1373_v18 = vld [vmem:[#allocation2 + $0x3c] sm:$0xf]  ;;  %v11363_v7 = vld [vmem:[#allocation2 + $0x40] sm:$0xf] }
  0xdc   : > { %v9133_v33 = vrot.slane %v1799_v24, 9  ;;  %v1879_v36 = vrot.slane %v1877_v21, 4  ;;  %v1880_v25 = vrot.slane %v11302_v23, 5  ;;  %v1492_v37 = vor.u32 %v1491_v20, %v1488_v22 }
  0xdd   : > { %4155 = vmatmul.bf16.gmra.mxu0 %v2903_v28  ;;  %v1501_v28 = vrot.slane %v1499_v6, 4  ;;  %v2730_v44 = vunpack.c.l.b16 %v1270_v59  ;;  %v2731_v14 = vunpack.c.l.b16 %v1273_v31  ;;  %v1513_v22 = vshll.u32 %v1373_v18, 16 }
  0xde   : > { %v3802_v38 = vpop.f32.mrf.mxu0  ;;  %v1878_v50 = vsel %vm11251_vm13, %v9133_v33, %v1877_v21  ;;  %v1881_v23 = vsel %vm11251_vm13, %v1879_v36, %v1880_v25  ;;  %v1510_v21 = vshrl.u32 %v1373_v18, 16  ;;  %v1519_v20 = vshll.u32 %v11363_v7, 16  ;;  %v10275_v18 = vld [vmem:[%s14383_s1 + $0x1a8] sm:$0xff] }
  0xdf   : > { %v1502_v39 = vor.u32 %v1501_v28, %v1497_v8  ;;  %v2938_v35 = vunpack.c.l.b16 %v1878_v50  ;;  %v1884_v36 = vrot.slane %v11324_v61, 5  ;;  %4322 = vmatpush.bf16.msra.mxu2 %v10275_v18  ;;  %v1801_v18 = vld [vmem:[#allocation2 + $0x3c] sm:$0xe] }
  0xe0   : > { %v3837_v43 = vpop.f32.mrf.mxu2 }
  0xe1   : > { %v3838_v29 = vadd.f32 %v11203_v46, %v3837_v43  ;;  %v1503_v51 = vrot.slane %v1502_v39, 4  ;;  %v1515_v39 = vrot.slane %v1513_v22, 5 }
  0xe3   : > { %4061 = vmatmul.bf16.vlgmr.msrb.gmra.mxu3 %v11208_v47  ;;  %v1484_v47 = vsel %vm10806_vm5, %v1479_v40, %v1483_v42  ;;  %v1505_v40 = vshll.u32 %v11342_v52, 16  ;;  %v3803_v42 = vadd.f32 %v11203_v46, %v3802_v38 }
  0xe4   : > { %v2875_v9 = vunpack.c.l.b16 %v1484_v47  ;;  %v1276_v47 = vrot.slane %v10473_v4, 5 }
  0xe5   : > { %3977 = vmatmul.bf16.gmra.mxu2 %v2759_v56  ;;  %v1507_v62 = vrot.slane %v1505_v40, 5 }
  0xe6   : > { %v3924_v12 = vpop.f32.mrf.mxu3  ;;  %v3805_v26 = vpop.f32.mrf.mxu0  ;;  %v2904_v32 = vpack.c.b16 %v2875_v9, %v2874_v27  ;;  %v1523_v27 = vshrl.u32 %v11363_v7, 16 }
  0xe7   : > { %v11334_v15 = vadd.f32 %v3924_v12, %v3836_v54  ;;  %v1493_v54 = vrot.slane %v1492_v37, 4  ;;  %v2760_v12 = vpack.c.b16 %v2731_v14, %v2730_v44  ;;  %v1508_v17 = vsel %vm10806_vm5, %v1503_v51, %v1507_v62  ;;  %v1800_v37 = vld [vmem:[#allocation2 + $0x30] sm:$0xe]  ;;  %v11375_v44 = vld [vmem:[#allocation2 + $0x44] sm:$0x1] }
  0xe8   : > { %v3889_v63 = vpop.f32.mrf.mxu1  ;;  %v3840_v57 = vpop.f32.mrf.mxu2  ;;  %v2877_v33 = vunpack.c.l.b16 %v1508_v17  ;;  %v1525_v40 = vrot.slane %v1523_v27, 4  ;;  %v1887_v51 = vrot.slane %v11342_v52, 5 }
  0xe9   : > { %v11340_v41 = vadd.f32 %v3889_v63, %v3801_v1  ;;  %v2939_v1 = vunpack.c.l.b16 %v1881_v23  ;;  %v3841_v6 = vadd.f32 %v11203_v46, %v3840_v57  ;;  %v1498_v10 = vsel %vm10806_vm5, %v1493_v54, %v1497_v8  ;;  %v10474_v57 = vld [vmem:[#allocation2 + $0x2c] sm:$0x1] }
  0xea   : > { %v3806_v63 = vadd.f32 %v11203_v46, %v3805_v26  ;;  %v1279_v8 = vrot.slane %v10474_v57, 5  ;;  %v2876_v31 = vunpack.c.l.b16 %v1498_v10  ;;  %v1521_v26 = vrot.slane %v1519_v20, 5 }
  0xeb   : > { %4244 = vmatmul.bf16.gmra.mxu1 %v2967_v13  ;;  %v1189_v13 = vld [vmem:[#allocation2 + $0x24] sm:$0xe]  ;;  %v2968_v24 = vpack.c.b16 %v2939_v1, %v2938_v35  ;;  %v9134_v54 = vrot.slane %v1800_v37, 9  ;;  %v1529_v1 = vshll.u32 %v11375_v44, 16 }
  0xec   : > { %v9118_v28 = vrot.slane %v1189_v13, 9  ;;  %v2905_v23 = vpack.c.b16 %v2877_v33, %v2876_v31  ;;  %v1526_v35 = vor.u32 %v1525_v40, %v1521_v26  ;;  %v10283_v33 = vld [vmem:[%s14383_s1 + $0x1e8] sm:$0xff] }
  0xed   : > { %4160 = vmatmul.bf16.gmra.mxu0 %v2904_v32  ;;  %v1512_v32 = vrot.slane %v1510_v21, 4  ;;  %v1531_v22 = vrot.slane %v1529_v1, 5  ;;  %4411 = vmatpush.bf16.msra.mxu3 %v10283_v33  ;;  %v10291_v1 = vld [vmem:[%s14383_s1 + $0x228] sm:$0xff] }
  0xee   : > { %v3926_v43 = vpop.f32.mrf.mxu3  ;;  %v3807_v60 = vpop.f32.mrf.mxu0  ;;  %4500 = vmatpush.bf16.msra.mxu0 %v10291_v1 }
  0xef   : > { %v11352_v48 = vadd.f32 %v3926_v43, %v3838_v29  ;;  %v1278_v29 = vrot.slane %v1276_v47, 4  ;;  %v1516_v62 = vor.u32 %v1515_v39, %v1512_v32  ;;  %v3808_v4 = vadd.f32 %v11203_v46, %v3807_v60 }
  0xf0   : > { %v3891_v56 = vpop.f32.mrf.mxu1  ;;  %v3842_v38 = vpop.f32.mrf.mxu2  ;;  %v1527_v60 = vrot.slane %v1526_v35, 4 }
  0xf1   : > { %v11358_v0 = vadd.f32 %v3891_v56, %v3803_v42  ;;  %v1280_v50 = vsel %vm11251_vm13, %v1278_v29, %v1279_v8  ;;  %v3843_v61 = vadd.f32 %v11203_v46, %v3842_v38  ;;  %v1886_v56 = vrot.slane %v1884_v36, 4 }
  0xf2   : > { %v2733_v10 = vunpack.c.l.b16 %v1280_v50  ;;  %v1885_v38 = vsel %vm11251_vm13, %v9134_v54, %v1884_v36  ;;  %v1517_v21 = vrot.slane %v1516_v62, 4  ;;  %v1375_v36 = vld [vmem:[#allocation2 + $0x48] sm:$0xf]  ;;  %v1532_v32 = vsel %vm10806_vm5, %v1527_v60, %v1531_v22  ;;  %v11417_v60 = vld [vmem:[#allocation2 + $0x50] sm:$0x1] }
  0xf3   : > { %4066 = vmatmul.bf16.gmra.mxu3 %v10191_v49  ;;  %v1277_v49 = vsel %vm11251_vm13, %v9118_v28, %v1276_v47  ;;  %v10192_v47 = vld [vmem:[#allocation2 + $0x24] sm:$0xff]  ;;  %v1888_v17 = vsel %vm11251_vm13, %v1886_v56, %v1887_v51  ;;  %v2940_v8 = vunpack.c.l.b16 %v1885_v38  ;;  %v1534_v39 = vshrl.u32 %v1375_v36, 16  ;;  %v10476_v51 = vld [vmem:[#allocation2 + $0x38] sm:$0x1] }
  0xf4   : > { %v2732_v13 = vunpack.c.l.b16 %v1277_v49  ;;  %v2941_v31 = vunpack.c.l.b16 %v1888_v17  ;;  %v1522_v37 = vsel %vm10806_vm5, %v1517_v21, %v1521_v26  ;;  %v1537_v40 = vshll.u32 %v1375_v36, 16 }
  0xf5   : > { %3982 = vmatmul.bf16.gmra.mxu2 %v2760_v12  ;;  %v1286_v26 = vrot.slane %v10476_v51, 5  ;;  %v2878_v62 = vunpack.c.l.b16 %v1522_v37  ;;  %v2879_v35 = vunpack.c.l.b16 %v1532_v32  ;;  %v1553_v37 = vshll.u32 %v11417_v60, 16 }
  0xf6   : > { %v3929_v9 = vpop.f32.mrf.mxu3  ;;  %v2761_v57 = vpack.c.b16 %v2733_v10, %v2732_v13  ;;  %v1539_v13 = vrot.slane %v1537_v40, 5 }
  0xf7   : > { %v11370_v59 = vadd.f32 %v3929_v9, %v3841_v6  ;;  %v3810_v43 = vpop.f32.mrf.mxu0  ;;  %v1190_v9 = vld [vmem:[#allocation2 + $0x30] sm:$0xe] }
  0xf8   : > { %v3894_v25 = vpop.f32.mrf.mxu1  ;;  %v3845_v14 = vpop.f32.mrf.mxu2 }
  0xf9   : > { %14404 = vst [vmem:[#allocation6_spill] sm:$0xff] %v11370_v59  ;;  %v11373_v42 = vadd.f32 %v3894_v25, %v3806_v63  ;;  %v3846_v29 = vadd.f32 %v11203_v46, %v3845_v14  ;;  %v11400_v25 = vld [vmem:[#allocation2 + $0x4c] sm:$0xf]  ;;  %v3811_v14 = vadd.f32 %v11203_v46, %v3810_v43 }
  0xfa   : > { %v1543_v49 = vshll.u32 %v11400_v25, 16  ;;  %v1547_v50 = vshrl.u32 %v11400_v25, 16 }
  0xfb   : > { %4249 = vmatmul.bf16.gmra.mxu1 %v2968_v24  ;;  %v10475_v24 = vld [vmem:[#allocation2 + $0x34] sm:$0xf] }
  0xfc   : > { %v1283_v28 = vrot.slane %v10475_v24, 5  ;;  %v1549_v17 = vrot.slane %v1547_v50, 4  ;;  %v2906_v24 = vpack.c.b16 %v2879_v35, %v2878_v62 }
  0xfd   : > { %4165 = vmatmul.bf16.gmra.mxu0 %v2905_v23  ;;  %v9119_v23 = vrot.slane %v1190_v9, 9 }
  0xfe   : > { %v3931_v6 = vpop.f32.mrf.mxu3  ;;  %v1285_v54 = vrot.slane %v1283_v28, 4 }
  0xff   : > { %v11385_v12 = vadd.f32 %v3931_v6, %v3843_v61  ;;  %v3812_v63 = vpop.f32.mrf.mxu0  ;;  %v1891_v6 = vrot.slane %v11363_v7, 5  ;;  %v1284_v9 = vsel %vm11251_vm13, %v9119_v23, %v1283_v28 }
 0x100   : > { %v3896_v52 = vpop.f32.mrf.mxu1  ;;  %v3847_v27 = vpop.f32.mrf.mxu2  ;;  %v1287_v7 = vsel %vm11251_vm13, %v1285_v54, %v1286_v26  ;;  %v3813_v33 = vadd.f32 %v11203_v46, %v3812_v63  ;;  %v2734_v28 = vunpack.c.l.b16 %v1284_v9  ;;  %v1555_v54 = vrot.slane %v1553_v37, 5  ;;  %v10477_v26 = vld [vmem:[#allocation2 + $0x40] sm:$0xf] }
 0x101   : > { %14405 = vst [vmem:[#allocation7_spill] sm:$0xff] %v11385_v12  ;;  %v11394_v20 = vadd.f32 %v3896_v52, %v3808_v4  ;;  %v2969_v4 = vpack.c.b16 %v2941_v31, %v2940_v8  ;;  %v1545_v52 = vrot.slane %v1543_v49, 5  ;;  %v3848_v22 = vadd.f32 %v11203_v46, %v3847_v27 }
 0x102   : > { %v1894_v8 = vrot.slane %v11375_v44, 5  ;;  %v2735_v40 = vunpack.c.l.b16 %v1287_v7  ;;  %v1290_v62 = vrot.slane %v10477_v26, 5 }
 0x103   : > { %4071 = vmatmul.bf16.gmra.mxu3 %v10192_v47  ;;  %v1536_v47 = vrot.slane %v1534_v39, 4  ;;  %v1550_v36 = vor.u32 %v1549_v17, %v1545_v52  ;;  %v10193_v39 = vld [vmem:[#allocation2 + $0x30] sm:$0xff] }
 0x104   : > { %v2762_v1 = vpack.c.b16 %v2735_v40, %v2734_v28 }
 0x105   : > { %3987 = vmatmul.bf16.gmra.mxu2 %v2761_v57  ;;  %v1893_v57 = vrot.slane %v1891_v6, 4  ;;  %v1540_v31 = vor.u32 %v1539_v13, %v1536_v47  ;;  %v1551_v23 = vrot.slane %v1550_v36, 4  ;;  %v1191_v47 = vld [vmem:[#allocation2 + $0x3c] sm:$0xe]  ;;  %v11436_v13 = vld [vmem:[#allocation2 + $0x58] sm:$0xf] }
 0x106   : > { %v3934_v61 = vpop.f32.mrf.mxu3 }
 0x107   : > { %v11409_v56 = vadd.f32 %v3934_v61, %v3846_v29  ;;  %v3815_v38 = vpop.f32.mrf.mxu0  ;;  %v9135_v29 = vrot.slane %v1801_v18, 9  ;;  %v1895_v44 = vsel %vm11251_vm13, %v1893_v57, %v1894_v8  ;;  %v1541_v50 = vrot.slane %v1540_v31, 4 }
 0x108   : > { %v3899_v43 = vpop.f32.mrf.mxu1  ;;  %v3850_v21 = vpop.f32.mrf.mxu2  ;;  %v3816_v18 = vadd.f32 %v11203_v46, %v3815_v38  ;;  %v1556_v9 = vsel %vm10806_vm5, %v1551_v23, %v1555_v54  ;;  %v9120_v57 = vrot.slane %v1191_v47, 9  ;;  %v10478_v38 = vld [vmem:[#allocation2 + $0x44] sm:$0x1]  ;;  %v11452_v54 = vld [vmem:[#allocation2 + $0x5c] sm:$0x1] }
 0x109   : > { %14406 = vst [vmem:[#allocation8_spill] sm:$0xff] %v11409_v56  ;;  %v11415_v10 = vadd.f32 %v3899_v43, %v3811_v14  ;;  %v1892_v49 = vsel %vm11251_vm13, %v9135_v29, %v1891_v6  ;;  %v3851_v35 = vadd.f32 %v11203_v46, %v3850_v21  ;;  %v1377_v6 = vld [vmem:[#allocation2 + $0x54] sm:$0xf]  ;;  %v1546_v17 = vsel %vm10806_vm5, %v1541_v50, %v1545_v52 }
 0x10a   : > { %v2942_v43 = vunpack.c.l.b16 %v1892_v49  ;;  %v1561_v7 = vshll.u32 %v1377_v6, 16  ;;  %v1571_v21 = vshrl.u32 %v11436_v13, 16  ;;  %v1293_v36 = vrot.slane %v10478_v38, 5 }
 0x10b   : > { %4254 = vmatmul.bf16.gmra.mxu1 %v2969_v4  ;;  %v2943_v4 = vunpack.c.l.b16 %v1895_v44  ;;  %v2880_v52 = vunpack.c.l.b16 %v1546_v17 }
 0x10c   : > { %v1563_v49 = vrot.slane %v1561_v7, 5  ;;  %v1573_v50 = vrot.slane %v1571_v21, 4 }
 0x10d   : > { %4170 = vmatmul.bf16.gmra.mxu0 %v2906_v24  ;;  %v1567_v24 = vshll.u32 %v11436_v13, 16  ;;  %v2970_v31 = vpack.c.b16 %v2943_v4, %v2942_v43 }
 0x10e   : > { %v3936_v32 = vpop.f32.mrf.mxu3 }
 0x10f   : > { %v11427_v27 = vadd.f32 %v3936_v32, %v3848_v22  ;;  %v3817_v63 = vpop.f32.mrf.mxu0  ;;  %v1558_v22 = vshrl.u32 %v1377_v6, 16  ;;  %v2881_v32 = vunpack.c.l.b16 %v1556_v9  ;;  %v11450_v44 = vrot.slane %v1567_v24, 5 }
 0x110   : > { %v3901_v14 = vpop.f32.mrf.mxu1  ;;  %v3852_v51 = vpop.f32.mrf.mxu2  ;;  %v1901_v6 = vrot.slane %v11417_v60, 5 }
 0x111   : > { %14407 = vst [vmem:[#allocation9_spill] sm:$0xff] %v11427_v27  ;;  %v11433_v61 = vadd.f32 %v3901_v14, %v3813_v33  ;;  %v1292_v33 = vrot.slane %v1290_v62, 4  ;;  %v1560_v28 = vrot.slane %v1558_v22, 4  ;;  %v1802_v14 = vld [vmem:[#allocation2 + $0x48] sm:$0xe]  ;;  %v3853_v26 = vadd.f32 %v11203_v46, %v3852_v51 }
 0x112   : > { %v2907_v43 = vpack.c.b16 %v2881_v32, %v2880_v52  ;;  %v9136_v4 = vrot.slane %v1802_v14, 9  ;;  %v1574_v22 = vor.u32 %v1573_v50, %v11450_v44  ;;  %v1577_v51 = vshll.u32 %v11452_v54, 16  ;;  %v1192_v52 = vld [vmem:[#allocation2 + $0x48] sm:$0xe]  ;;  %v10479_v32 = vld [vmem:[#allocation2 + $0x4c] sm:$0xf] }
 0x113   : > { %4076 = vmatmul.bf16.gmra.mxu3 %v10193_v39  ;;  %v1898_v39 = vrot.slane %v11400_v25, 5  ;;  %v1294_v25 = vsel %vm11251_vm13, %v1292_v33, %v1293_v36  ;;  %v1564_v17 = vor.u32 %v1563_v49, %v1560_v28  ;;  %v1297_v28 = vrot.slane %v10479_v32, 5 }
 0x114   : > { %v2737_v21 = vunpack.c.l.b16 %v1294_v25  ;;  %v1575_v38 = vrot.slane %v1574_v22, 4  ;;  %v1579_v36 = vrot.slane %v1577_v51, 5  ;;  %v1379_v25 = vld [vmem:[#allocation2 + $0x60] sm:$0xf] }
 0x115   : > { %3992 = vmatmul.bf16.gmra.mxu2 %v2762_v1  ;;  %v1291_v1 = vsel %vm11251_vm13, %v9120_v57, %v1290_v62  ;;  %v1900_v47 = vrot.slane %v1898_v39, 4  ;;  %v10194_v62 = vld [vmem:[#allocation2 + $0x3c] sm:$0xff]  ;;  %v1899_v60 = vsel %vm11251_vm13, %v9136_v4, %v1898_v39  ;;  %v1565_v33 = vrot.slane %v1564_v17, 4 }
 0x116   : > { %v3939_v29 = vpop.f32.mrf.mxu3  ;;  %v2736_v24 = vunpack.c.l.b16 %v1291_v1  ;;  %v10282_v1 = vld [vmem:[%s14383_s1 + $0x1e0] sm:$0xff] }
 0x117   : > { %v11445_v8 = vadd.f32 %v3939_v29, %v3851_v35  ;;  %v10274_v29 = vld [vmem:[%s14383_s1 + $0x1a0] sm:$0xff]  ;;  %4412 = vmatpush.bf16.msra.mxu3 %v10282_v1 }
 0x118   : > { %v3904_v37 = vpop.f32.mrf.mxu1  ;;  %v3855_v23 = vpop.f32.mrf.mxu2  ;;  %4323 = vmatpush.bf16.msra.mxu2 %v10274_v29  ;;  %v2763_v49 = vpack.c.b16 %v2737_v21, %v2736_v24  ;;  %v10480_v24 = vld [vmem:[#allocation2 + $0x50] sm:$0x1] }
 0x119   : > { %14408 = vst [vmem:[#allocation10_spill] sm:$0xff] %v11445_v8  ;;  %v11448_v40 = vadd.f32 %v3904_v37, %v3816_v18  ;;  %v3820_v35 = vpop.f32.mrf.mxu0  ;;  %v3818_v18 = vadd.f32 %v11203_v46, %v3817_v63  ;;  %v1902_v63 = vsel %vm11251_vm13, %v1900_v47, %v1901_v6  ;;  %v3856_v14 = vadd.f32 %v11203_v46, %v3855_v23 }
 0x11a   : > { %v2945_v39 = vunpack.c.l.b16 %v1902_v63  ;;  %v3821_v4 = vadd.f32 %v11203_v46, %v3820_v35  ;;  %v1582_v47 = vshrl.u32 %v1379_v25, 16  ;;  %v1585_v6 = vshll.u32 %v1379_v25, 16  ;;  %v11496_v25 = vld [vmem:[#allocation2 + $0x68] sm:$0x1] }
 0x11b   : > { %4259 = vmatmul.bf16.gmra.mxu1 %v2970_v31  ;;  %v1580_v23 = vsel %vm10806_vm5, %v1575_v38, %v1579_v36  ;;  %v1300_v21 = vrot.slane %v10480_v24, 5  ;;  %v1908_v24 = vrot.slane %v11452_v54, 5 }
 0x11c   : > { %v2883_v38 = vunpack.c.l.b16 %v1580_v23 }
 0x11d   : > { %4175 = vmatmul.bf16.gmra.mxu0 %v2907_v43  ;;  %v11478_v43 = vld [vmem:[#allocation2 + $0x64] sm:$0xf] }
 0x11e   : > { %v3941_v9 = vpop.f32.mrf.mxu3  ;;  %v1591_v17 = vshll.u32 %v11478_v43, 16  ;;  %v1595_v22 = vshrl.u32 %v11478_v43, 16 }
 0x11f   : > { %v11463_v7 = vadd.f32 %v3941_v9, %v3853_v26  ;;  %v2944_v26 = vunpack.c.l.b16 %v1899_v60  ;;  %v9121_v9 = vrot.slane %v1192_v52, 9  ;;  %v1587_v60 = vrot.slane %v1585_v6, 5  ;;  %v1803_v52 = vld [vmem:[#allocation2 + $0x54] sm:$0xe] }
 0x120   : > { %v3906_v57 = vpop.f32.mrf.mxu1  ;;  %v3857_v37 = vpop.f32.mrf.mxu2  ;;  %v1593_v36 = vrot.slane %v1591_v17, 5  ;;  %v1597_v32 = vrot.slane %v1595_v22, 4  ;;  %v9137_v23 = vrot.slane %v1803_v52, 9  ;;  %v1601_v22 = vshll.u32 %v11496_v25, 16 }
 0x121   : > { %14409 = vst [vmem:[#allocation11_spill] sm:$0xff] %v11463_v7  ;;  %v11472_v31 = vadd.f32 %v3906_v57, %v3818_v18  ;;  %v3822_v50 = vpop.f32.mrf.mxu0  ;;  %v1570_v18 = vsel %vm10806_vm5, %v1565_v33, %v11450_v44  ;;  %v2971_v29 = vpack.c.b16 %v2945_v39, %v2944_v26  ;;  %v10290_v44 = vld [vmem:[%s14383_s1 + $0x220] sm:$0xff]  ;;  %v1584_v57 = vrot.slane %v1582_v47, 4 }
 0x122   : > { %v2882_v33 = vunpack.c.l.b16 %v1570_v18  ;;  %4501 = vmatpush.bf16.msra.mxu0 %v10290_v44  ;;  %v3858_v26 = vadd.f32 %v11203_v46, %v3857_v37  ;;  %v1298_v47 = vsel %vm11251_vm13, %v9121_v9, %v1297_v28  ;;  %v1598_v17 = vor.u32 %v1597_v32, %v1593_v36  ;;  %v11575_v7 = vld [vmem:[#allocation2 + $0x80] sm:$0x1] }
 0x123   : > { %4081 = vmatmul.bf16.gmra.mxu3 %v10194_v62  ;;  %v1299_v62 = vrot.slane %v1297_v28, 4  ;;  %v1588_v18 = vor.u32 %v1587_v60, %v1584_v57  ;;  %v2738_v28 = vunpack.c.l.b16 %v1298_v47  ;;  %v1603_v57 = vrot.slane %v1601_v22, 5  ;;  %v1193_v47 = vld [vmem:[#allocation2 + $0x54] sm:$0xe] }
 0x125   : > { %3997 = vmatmul.bf16.gmra.mxu2 %v2763_v49  ;;  %v1301_v6 = vsel %vm11251_vm13, %v1299_v62, %v1300_v21  ;;  %v1589_v2 = vrot.slane %v1588_v18, 4  ;;  %v11518_v18 = vld [vmem:[#allocation2 + $0x70] sm:$0xf] }
 0x126   : > { %v3944_v51 = vpop.f32.mrf.mxu3  ;;  %v2739_v9 = vunpack.c.l.b16 %v1301_v6  ;;  %v1381_v6 = vld [vmem:[#allocation2 + $0x6c] sm:$0xf] }
 0x127   : > { %v11488_v35 = vadd.f32 %v3944_v51, %v3856_v14  ;;  %v1905_v14 = vrot.slane %v11436_v13, 5  ;;  %v3823_v13 = vadd.f32 %v11203_v46, %v3822_v50  ;;  %v1609_v22 = vshll.u32 %v1381_v6, 16 }
 0x128   : > { %v3909_v63 = vpop.f32.mrf.mxu1  ;;  %v3860_v49 = vpop.f32.mrf.mxu2  ;;  %v2764_v32 = vpack.c.b16 %v2739_v9, %v2738_v28 }
 0x129   : > { %14410 = vst [vmem:[#allocation12_spill] sm:$0xff] %v11488_v35  ;;  %v11493_v1 = vadd.f32 %v3909_v63, %v3821_v4  ;;  %v3825_v39 = vpop.f32.mrf.mxu0  ;;  %v2908_v4 = vpack.c.b16 %v2883_v38, %v2882_v33  ;;  %v1907_v51 = vrot.slane %v1905_v14, 4  ;;  %v10195_v63 = vld [vmem:[#allocation2 + $0x48] sm:$0xff]  ;;  %v1906_v21 = vsel %vm11251_vm13, %v9137_v23, %v1905_v14 }
 0x12a   : > { %v1304_v33 = vrot.slane %v11211_v55, 5  ;;  %v3861_v38 = vadd.f32 %v11203_v46, %v3860_v49  ;;  %v1594_v14 = vsel %vm10806_vm5, %v1589_v2, %v1593_v36  ;;  %v11525_v46 = vld [vmem:[%s14384_s2] ss:$0 sm:$0xff]  ;;  %v1615_v49 = vshll.u32 %v11518_v18, 16 }
 0x12b   : > { %4264 = vmatmul.bf16.gmra.mxu1 %v2971_v29  ;;  %v1599_v29 = vrot.slane %v1598_v17, 4  ;;  %v1909_v50 = vsel %vm11251_vm13, %v1907_v51, %v1908_v24  ;;  %v1606_v17 = vshrl.u32 %v1381_v6, 16  ;;  %v3826_v55 = vadd.f32 %v11525_v46, %v3825_v39 }
 0x12c   : > { %v1619_v2 = vshrl.u32 %v11518_v18, 16  ;;  %v1306_v51 = vrot.slane %v1304_v33, 4  ;;  %v1307_v24 = vrot.slane %v11218_v5, 5  ;;  %v1912_v39 = vrot.slane %v11478_v43, 5 }
 0x12d   : > { %4180 = vmatmul.bf16.gmra.mxu0 %v2908_v4  ;;  %v2947_v4 = vunpack.c.l.b16 %v1909_v50  ;;  %v1604_v23 = vsel %vm10806_vm5, %v1599_v29, %v1603_v57  ;;  %v1608_v9 = vrot.slane %v1606_v17, 4  ;;  %v1804_v57 = vld [vmem:[#allocation2 + $0x60] sm:$0xe]  ;;  %v1617_v50 = vrot.slane %v1615_v49, 5 }
 0x12e   : > { %v3946_v37 = vpop.f32.mrf.mxu3  ;;  %v2885_v28 = vunpack.c.l.b16 %v1604_v23  ;;  %v1621_v6 = vrot.slane %v1619_v2, 4  ;;  %v1914_v43 = vrot.slane %v1912_v39, 4  ;;  %v1915_v23 = vrot.slane %v11496_v25, 5 }
 0x12f   : > { %v11506_v44 = vadd.f32 %v3946_v37, %v3858_v26  ;;  %v2946_v26 = vunpack.c.l.b16 %v1906_v21  ;;  %v2884_v37 = vunpack.c.l.b16 %v1594_v14 }
 0x130   : > { %v3911_v62 = vpop.f32.mrf.mxu1  ;;  %v3862_v54 = vpop.f32.mrf.mxu2  ;;  %v1622_v17 = vor.u32 %v1621_v6, %v1617_v50  ;;  %v10482_v6 = vld [vmem:[#allocation2 + $0x64] sm:$0xf] }
 0x131   : > { %14411 = vst [vmem:[#allocation13_spill] sm:$0xff] %v11506_v44  ;;  %v11510_v60 = vadd.f32 %v3911_v62, %v3823_v13  ;;  %v3827_v52 = vpop.f32.mrf.mxu0  ;;  %v9122_v13 = vrot.slane %v1193_v47, 9  ;;  %v1611_v62 = vrot.slane %v1609_v22, 5  ;;  %v2972_v29 = vpack.c.b16 %v2947_v4, %v2946_v26  ;;  %v11536_v47 = vld [vmem:[#allocation2 + $0x74] sm:$0x1] }
 0x132   : > { %v2909_v14 = vpack.c.b16 %v2885_v28, %v2884_v37  ;;  %v9138_v26 = vrot.slane %v1804_v57, 9  ;;  %v1625_v22 = vshll.u32 %v11536_v47, 16  ;;  %v1623_v28 = vrot.slane %v1622_v17, 4  ;;  %v1194_v57 = vld [vmem:[#allocation2 + $0x60] sm:$0xe] }
 0x133   : > { %4086 = vmatmul.bf16.gmra.mxu3 %v10195_v63  ;;  %v1305_v5 = vsel %vm11251_vm13, %v9122_v13, %v1304_v33  ;;  %v1612_v4 = vor.u32 %v1611_v62, %v1608_v9 }
 0x134   : > { %v2740_v33 = vunpack.c.l.b16 %v1305_v5  ;;  %v1913_v25 = vsel %vm11251_vm13, %v9138_v26, %v1912_v39  ;;  %v1627_v9 = vrot.slane %v1625_v22, 5  ;;  %v1311_v5 = vrot.slane %v10482_v6, 5  ;;  %v10281_v26 = vld [vmem:[%s14383_s1 + $0x1d8] sm:$0xff] }
 0x135   : > { %4002 = vmatmul.bf16.gmra.mxu2 %v2764_v32  ;;  %v3863_v32 = vadd.f32 %v11525_v46, %v3862_v54  ;;  %v1613_v54 = vrot.slane %v1612_v4, 4  ;;  %v1383_v4 = vld [vmem:[#allocation2 + $0x78] sm:$0xf]  ;;  %4413 = vmatpush.bf16.msra.mxu3 %v10281_v26 }
 0x136   : > { %v3949_v36 = vpop.f32.mrf.mxu3  ;;  %v1630_v17 = vshrl.u32 %v1383_v4, 16  ;;  %v1633_v22 = vshll.u32 %v1383_v4, 16 }
 0x137   : > { %v11531_v63 = vadd.f32 %v3949_v36, %v3861_v38  ;;  %v1308_v38 = vsel %vm11251_vm13, %v1306_v51, %v1307_v24  ;;  %v10196_v51 = vld [vmem:[#allocation2 + $0x54] sm:$0xff]  ;;  %v1618_v39 = vsel %vm10806_vm5, %v1613_v54, %v1617_v50  ;;  %v10483_v54 = vld [vmem:[#allocation2 + $0x68] sm:$0x1] }
 0x138   : > { %v3914_v21 = vpop.f32.mrf.mxu1  ;;  %v3865_v35 = vpop.f32.mrf.mxu2  ;;  %v2741_v36 = vunpack.c.l.b16 %v1308_v38  ;;  %v10273_v24 = vld [vmem:[%s14383_s1 + $0x198] sm:$0xff]  ;;  %v1635_v6 = vrot.slane %v1633_v22, 5 }
 0x139   : > { %14412 = vst [vmem:[#allocation14_spill] sm:$0xff] %v11531_v63  ;;  %v11534_v44 = vadd.f32 %v3914_v21, %v3826_v55  ;;  %v3828_v55 = vadd.f32 %v11525_v46, %v3827_v52  ;;  %v1916_v52 = vsel %vm11251_vm13, %v1914_v43, %v1915_v23  ;;  %4324 = vmatpush.bf16.msra.mxu2 %v10273_v24  ;;  %v11563_v43 = vld [vmem:[#allocation2 + $0x7c] sm:$0xf]  ;;  %v1314_v24 = vrot.slane %v10483_v54, 5  ;;  %v1805_v54 = vld [vmem:[#allocation2 + $0x6c] sm:$0xe] }
 0x13a   : > { %v3830_v49 = vpop.f32.mrf.mxu0  ;;  %v3866_v38 = vadd.f32 %v11525_v46, %v3865_v35  ;;  %v1628_v23 = vsel %vm10806_vm5, %v1623_v28, %v1627_v9  ;;  %v1632_v9 = vrot.slane %v1630_v17, 4  ;;  %v1919_v63 = vrot.slane %v11518_v18, 5 }
 0x13b   : > { %4269 = vmatmul.bf16.gmra.mxu1 %v2972_v29  ;;  %v2765_v29 = vpack.c.b16 %v2741_v36, %v2740_v33  ;;  %v3831_v50 = vadd.f32 %v11525_v46, %v3830_v49  ;;  %v9123_v36 = vrot.slane %v1194_v57, 9  ;;  %v2887_v28 = vunpack.c.l.b16 %v1628_v23 }
 0x13c   : > { %v1649_v23 = vshll.u32 %v11575_v7, 16  ;;  %v1921_v22 = vrot.slane %v1919_v63, 4 }
 0x13d   : > { %4185 = vmatmul.bf16.gmra.mxu0 %v2909_v14  ;;  %v2949_v14 = vunpack.c.l.b16 %v1916_v52  ;;  %v2886_v52 = vunpack.c.l.b16 %v1618_v39  ;;  %v1636_v39 = vor.u32 %v1635_v6, %v1632_v9 }
 0x13e   : > { %v3951_v2 = vpop.f32.mrf.mxu3 }
 0x13f   : > { %v11546_v13 = vadd.f32 %v3951_v2, %v3863_v32  ;;  %v2948_v32 = vunpack.c.l.b16 %v1913_v25  ;;  %v1643_v2 = vshrl.u32 %v11563_v43, 16  ;;  %v2910_v18 = vpack.c.b16 %v2887_v28, %v2886_v52 }
 0x140   : > { %v3916_v37 = vpop.f32.mrf.mxu1  ;;  %v3867_v21 = vpop.f32.mrf.mxu2  ;;  %v1651_v52 = vrot.slane %v1649_v23, 5 }
 0x141   : > { %14413 = vst [vmem:[#allocation15_spill] sm:$0xff] %v11546_v13  ;;  %v11555_v62 = vadd.f32 %v3916_v37, %v3828_v55  ;;  %v1639_v55 = vshll.u32 %v11563_v43, 16  ;;  %v2973_v25 = vpack.c.b16 %v2949_v14, %v2948_v32  ;;  %v1645_v26 = vrot.slane %v1643_v2, 4  ;;  %v10289_v14 = vld [vmem:[%s14383_s1 + $0x218] sm:$0xff] }
 0x142   : > { %v3832_v35 = vpop.f32.mrf.mxu0  ;;  %4502 = vmatpush.bf16.msra.mxu0 %v10289_v14  ;;  %v11602_v14 = vld [vmem:[#allocation2 + $0x88] sm:$0xf] }
 0x143   : > { %4091 = vmatmul.bf16.gmra.mxu3 %v10196_v51  ;;  %v1313_v51 = vrot.slane %v1311_v5, 4  ;;  %v11572_v4 = vrot.slane %v1639_v55, 5  ;;  %v3833_v2 = vadd.f32 %v11525_v46, %v3832_v35 }
 0x145   : > { %4007 = vmatmul.bf16.gmra.mxu2 %v2765_v29  ;;  %v1312_v29 = vsel %vm11251_vm13, %v9123_v36, %v1311_v5  ;;  %v1315_v32 = vsel %vm11251_vm13, %v1313_v51, %v1314_v24  ;;  %v1922_v5 = vrot.slane %v11536_v47, 5  ;;  %v1637_v24 = vrot.slane %v1636_v39, 4 }
 0x146   : > { %v3954_v33 = vpop.f32.mrf.mxu3  ;;  %v2742_v36 = vunpack.c.l.b16 %v1312_v29  ;;  %v2743_v51 = vunpack.c.l.b16 %v1315_v32  ;;  %v1385_v32 = vld [vmem:[#allocation2 + $0x84] sm:$0xf] }
 0x147   : > { %v11570_v37 = vadd.f32 %v3954_v33, %v3866_v38  ;;  %v3868_v38 = vadd.f32 %v11525_v46, %v3867_v21  ;;  %v9139_v21 = vrot.slane %v1805_v54, 9  ;;  %v1923_v6 = vsel %vm11251_vm13, %v1921_v22, %v1922_v5 }
 0x148   : > { %v3919_v13 = vpop.f32.mrf.mxu1  ;;  %v3870_v57 = vpop.f32.mrf.mxu2  ;;  %v2766_v54 = vpack.c.b16 %v2743_v51, %v2742_v36  ;;  %v2951_v39 = vunpack.c.l.b16 %v1923_v6  ;;  %v1654_v22 = vshrl.u32 %v1385_v32, 16  ;;  %v1663_v5 = vshll.u32 %v11602_v14, 16 }
 0x149   : > { %14414 = vst [vmem:[#allocation16_spill] sm:$0xff] %v11570_v37  ;;  %v11577_v49 = vadd.f32 %v3919_v13, %v3831_v50  ;;  %v1646_v13 = vor.u32 %v1645_v26, %v11572_v4  ;;  %v10197_v50 = vld [vmem:[#allocation2 + $0x60] sm:$0xff]  ;;  %v1920_v9 = vsel %vm11251_vm13, %v9139_v21, %v1919_v63  ;;  %v3871_v35 = vadd.f32 %v11525_v46, %v3870_v57 }
 0x14a   : > { %v11589_v17 = vpop.f32.mrf.mxu0  ;;  %v1642_v63 = vsel %vm10806_vm5, %v1637_v24, %v11572_v4  ;;  %v1657_v57 = vshll.u32 %v1385_v32, 16  ;;  %v10349_v4 = vld [vmem:[%s14385_s3 + $0x38] sm:$0xff]  ;;  %v1926_v6 = vrot.slane %v11563_v43, 5 }
 0x14b   : > { %4274 = vmatmul.bf16.gmra.mxu1 %v2973_v25  ;;  %v1647_v25 = vrot.slane %v1646_v13, 4  ;;  %v1195_v13 = vld [vmem:[#allocation2 + $0x6c] sm:$0xe]  ;;  %v1806_v32 = vld [vmem:[#allocation2 + $0x78] sm:$0xe] }
 0x14c   : > { %v9124_v36 = vrot.slane %v1195_v13, 9  ;;  %8169 = vmatpush.bf16.msra.mxu1 %v10349_v4 }
 0x14d   : > { %4190 = vmatmul.bf16.gmra.mxu0 %v2910_v18  ;;  %v2950_v18 = vunpack.c.l.b16 %v1920_v9  ;;  %v1652_v23 = vsel %vm10806_vm5, %v1647_v25, %v1651_v52  ;;  %v2888_v25 = vunpack.c.l.b16 %v1642_v63 }
 0x14e   : > { %v3956_v55 = vpop.f32.mrf.mxu3  ;;  %v2889_v52 = vunpack.c.l.b16 %v1652_v23  ;;  %v9140_v23 = vrot.slane %v1806_v32, 9 }
 0x14f   : > { %v11593_v33 = vadd.f32 %v3956_v55, %v3868_v38  ;;  %v10484_v38 = vld [vmem:[#allocation2 + $0x70] sm:$0xf]  ;;  %v1667_v55 = vshrl.u32 %v11602_v14, 16  ;;  %v2974_v24 = vpack.c.b16 %v2951_v39, %v2950_v18 }
 0x150   : > { %v3921_v28 = vpop.f32.mrf.mxu1  ;;  %v3872_v26 = vpop.f32.mrf.mxu2  ;;  %v1318_v29 = vrot.slane %v10484_v38, 5  ;;  %v2911_v63 = vpack.c.b16 %v2889_v52, %v2888_v25  ;;  %v10486_v25 = vld [vmem:[#allocation2 + $0x7c] sm:$0xf] }
 0x151   : > { %14415 = vst [vmem:[#allocation17_spill] sm:$0xff] %v11593_v33  ;;  %v11599_v47 = vadd.f32 %v3921_v28, %v3833_v2  ;;  %v10485_v28 = vld [vmem:[#allocation2 + $0x74] sm:$0x1]  ;;  %v1669_v13 = vrot.slane %v1667_v55, 4  ;;  %v3873_v33 = vadd.f32 %v11525_v46, %v3872_v26  ;;  %v1325_v52 = vrot.slane %v10486_v25, 5 }
 0x152   : > { %v11609_v21 = vpop.f32.mrf.mxu0  ;;  %v1320_v51 = vrot.slane %v1318_v29, 4  ;;  %v1321_v9 = vrot.slane %v10485_v28, 5  ;;  %v11623_v28 = vld [vmem:[#allocation2 + $0x8c] sm:$0x1]  ;;  %v1319_v39 = vsel %vm11251_vm13, %v9124_v36, %v1318_v29 }
 0x153   : > { %4096 = vmatmul.bf16.gmra.mxu3 %v10197_v50  ;;  %v1673_v26 = vshll.u32 %v11623_v28, 16  ;;  %v10198_v29 = vld [vmem:[#allocation2 + $0x6c] sm:$0xff]  ;;  %v2744_v36 = vunpack.c.l.b16 %v1319_v39 }
 0x154   : > { %v1322_v43 = vsel %vm11251_vm13, %v1320_v51, %v1321_v9  ;;  %v10272_v51 = vld [vmem:[%s14383_s1 + $0x190] sm:$0xff] }
 0x155   : > { %4012 = vmatmul.bf16.gmra.mxu2 %v2766_v54  ;;  %v11621_v54 = vrot.slane %v1663_v5, 5  ;;  %v2745_v37 = vunpack.c.l.b16 %v1322_v43 }
 0x156   : > { %v3959_v2 = vpop.f32.mrf.mxu3  ;;  %4325 = vmatpush.bf16.msra.mxu2 %v10272_v51 }
 0x157   : > { %v11613_v50 = vadd.f32 %v3959_v2, %v3871_v35  ;;  %v1656_v35 = vrot.slane %v1654_v22, 4  ;;  %v1659_v2 = vrot.slane %v1657_v57, 5  ;;  %v1928_v22 = vrot.slane %v1926_v6, 4 }
 0x158   : > { %v11619_v38 = vpop.f32.mrf.mxu1  ;;  %v1929_v57 = vrot.slane %v11575_v7, 5  ;;  %v1670_v4 = vor.u32 %v1669_v13, %v11621_v54  ;;  %v1927_v7 = vsel %vm11251_vm13, %v9140_v23, %v1926_v6  ;;  %v3798_v13 = vadd.f32 %v11525_v46, %v11278_v30  ;;  %v10487_v30 = vld [vmem:[#allocation2 + $0x80] sm:$0x1] }
 0x159   : > { %14416 = vst [vmem:[#allocation18_spill] sm:$0xff] %v11613_v50  ;;  %v3973_v50 = vpop.f32.mrf.mxu2  ;;  %v1660_v55 = vor.u32 %v1659_v2, %v1656_v35  ;;  %v1675_v2 = vrot.slane %v1673_v26, 5  ;;  %v2767_v43 = vpack.c.b16 %v2745_v37, %v2744_v36  ;;  %v1328_v46 = vrot.slane %v10487_v30, 5  ;;  %v11665_v30 = vld [vmem:[#allocation2 + $0x98] sm:$0x1] }
 0x15a   : > { %v3974_v18 = vadd.f32 %v3973_v50, %v11239_v53  ;;  %v11632_v5 = vpop.f32.mrf.mxu0  ;;  %v1930_v9 = vsel %vm11251_vm13, %v1928_v22, %v1929_v57  ;;  %v1671_v35 = vrot.slane %v1670_v4, 4  ;;  %v10280_v22 = vld [vmem:[%s14383_s1 + $0x1d0] sm:$0xff] }
 0x15b   : > { %4279 = vmatmul.bf16.gmra.mxu1 %v2974_v24  ;;  %v1196_v24 = vld [vmem:[#allocation2 + $0x78] sm:$0xe]  ;;  %v2953_v6 = vunpack.c.l.b16 %v1930_v9  ;;  %v1387_v57 = vld [vmem:[#allocation2 + $0x90] sm:$0xf]  ;;  %4414 = vmatpush.bf16.msra.mxu3 %v10280_v22 }
 0x15c   : > { %v9125_v23 = vrot.slane %v1196_v24, 9  ;;  %v1678_v4 = vshrl.u32 %v1387_v57, 16  ;;  %v1681_v26 = vshll.u32 %v1387_v57, 16  ;;  %v1807_v24 = vld [vmem:[#allocation2 + $0x84] sm:$0xe]  ;;  %v1933_v57 = vrot.slane %v11602_v14, 5 }
 0x15d   : > { %4195 = vmatmul.bf16.gmra.mxu0 %v2911_v63  ;;  %v2952_v63 = vunpack.c.l.b16 %v1927_v7  ;;  %v3887_v7 = vadd.f32 %v11310_v58, %v3798_v13  ;;  %v9141_v13 = vrot.slane %v1807_v24, 9 }
 0x15e   : > { %v3961_v53 = vpop.f32.mrf.mxu3  ;;  %v1683_v27 = vrot.slane %v1681_v26, 5  ;;  %v1326_v58 = vsel %vm11251_vm13, %v9125_v23, %v1325_v52 }
 0x15f   : > { %v11636_v50 = vadd.f32 %v3961_v53, %v3873_v33  ;;  %v1661_v33 = vrot.slane %v1660_v55, 4  ;;  %v11652_v53 = vld [vmem:[#allocation2 + $0x94] sm:$0xf]  ;;  %v1327_v55 = vrot.slane %v1325_v52, 4 }
 0x160   : > { %v11645_v32 = vpop.f32.mrf.mxu1  ;;  %v1687_v51 = vshll.u32 %v11652_v53, 16  ;;  %v1691_v36 = vshrl.u32 %v11652_v53, 16 }
 0x161   : > { %14417 = vst [vmem:[#allocation19_spill] sm:$0xff] %v11636_v50  ;;  %v3975_v39 = vpop.f32.mrf.mxu2  ;;  %v1666_v37 = vsel %vm10806_vm5, %v1661_v33, %v11621_v54  ;;  %v1680_v50 = vrot.slane %v1678_v4, 4  ;;  %v2975_v33 = vpack.c.b16 %v2953_v6, %v2952_v63  ;;  %v1329_v14 = vsel %vm11251_vm13, %v1327_v55, %v1328_v46 }
 0x162   : > { %v11655_v25 = vpop.f32.mrf.mxu0  ;;  %v1689_v56 = vrot.slane %v1687_v51, 5  ;;  %v1693_v54 = vrot.slane %v1691_v36, 4  ;;  %v2890_v12 = vunpack.c.l.b16 %v1666_v37  ;;  %v3976_v22 = vadd.f32 %v3975_v39, %v3887_v7  ;;  %v10199_v37 = vld [vmem:[#allocation2 + $0x78] sm:$0xff] }
 0x163   : > { %4101 = vmatmul.bf16.gmra.mxu3 %v10198_v29  ;;  %v1676_v29 = vsel %vm10806_vm5, %v1671_v35, %v1675_v2  ;;  %v1936_v4 = vrot.slane %v11623_v28, 5  ;;  %v1697_v63 = vshll.u32 %v11665_v30, 16  ;;  %v1684_v52 = vor.u32 %v1683_v27, %v1680_v50 }
 0x164   : > { %v2891_v35 = vunpack.c.l.b16 %v1676_v29  ;;  %v1694_v39 = vor.u32 %v1693_v54, %v1689_v56  ;;  %v2746_v28 = vunpack.c.l.b16 %v1326_v58  ;;  %v2747_v51 = vunpack.c.l.b16 %v1329_v14  ;;  %v1389_v14 = vld [vmem:[#allocation2 + $0x9c] sm:$0xf] }
 0x165   : > { %4017 = vmatmul.bf16.gmra.mxu2 %v2767_v43  ;;  %v1935_v43 = vrot.slane %v1933_v57, 4  ;;  %v1685_v29 = vrot.slane %v1684_v52, 4  ;;  %v1699_v27 = vrot.slane %v1697_v63, 5 }
 0x166   : > { %v4062_v9 = vpop.f32.mrf.mxu3  ;;  %v2912_v23 = vpack.c.b16 %v2891_v35, %v2890_v12  ;;  %v1695_v36 = vrot.slane %v1694_v39, 4  ;;  %v10488_v35 = vld [vmem:[#allocation2 + $0x88] sm:$0xf]  ;;  %v10489_v39 = vld [vmem:[#allocation2 + $0x8c] sm:$0x1] }
 0x167   : > { %v4063_v8 = vadd.f32 %v4062_v9, %v3974_v18  ;;  %v2768_v9 = vpack.c.b16 %v2747_v51, %v2746_v28  ;;  %v1690_v58 = vsel %vm10806_vm5, %v1685_v29, %v1689_v56 }
 0x168   : > { %v11668_v59 = vpop.f32.mrf.mxu1  ;;  %v2892_v56 = vunpack.c.l.b16 %v1690_v58 }
 0x169   : > { %v4152_v2 = vadd.f32 %v11589_v17, %v4063_v8  ;;  %v3978_v18 = vpop.f32.mrf.mxu2  ;;  %v10288_v17 = vld [vmem:[%s14383_s1 + $0x210] sm:$0xff] }
 0x16a   : > { %v3979_v8 = vadd.f32 %v3978_v18, %v11340_v41  ;;  %v11683_v55 = vpop.f32.mrf.mxu0  ;;  %4503 = vmatpush.bf16.msra.mxu0 %v10288_v17  ;;  %v1937_v41 = vsel %vm11251_vm13, %v1935_v43, %v1936_v4  ;;  %v11700_v18 = vld [vmem:[#allocation2 + $0xa0] sm:$0xf]  ;;  %v1705_v43 = vshll.u32 %v1389_v14, 16 }
 0x16b   : > { %v11677_v6 = vadd.f32 %v11619_v38, %v4152_v2  ;;  %4284 = vmatmul.bf16.gmra.mxu1 %v2975_v33  ;;  %v1934_v38 = vsel %vm11251_vm13, %v9141_v13, %v1933_v57  ;;  %v2955_v54 = vunpack.c.l.b16 %v1937_v41  ;;  %v1197_v33 = vld [vmem:[#allocation2 + $0x84] sm:$0xe]  ;;  %v1332_v57 = vrot.slane %v10488_v35, 5 }
 0x16c   : > { %v2954_v24 = vunpack.c.l.b16 %v1934_v38  ;;  %v1702_v13 = vshrl.u32 %v1389_v14, 16  ;;  %v1711_v4 = vshll.u32 %v11700_v18, 16  ;;  %v9126_v17 = vrot.slane %v1197_v33, 9  ;;  %v10348_v38 = vld [vmem:[%s14385_s3 + $0x30] sm:$0xff] }
 0x16d   : > { %4200 = vmatmul.bf16.gmra.mxu0 %v2912_v23  ;;  %v1335_v23 = vrot.slane %v10489_v39, 5  ;;  %v1940_v41 = vrot.slane %v11652_v53, 5  ;;  %v1707_v29 = vrot.slane %v1705_v43, 5  ;;  %8170 = vmatpush.bf16.msra.mxu1 %v10348_v38  ;;  %v1198_v38 = vld [vmem:[#allocation2 + $0x90] sm:$0xe] }
 0x16e   : > { %v4064_v26 = vpop.f32.mrf.mxu3  ;;  %v2976_v51 = vpack.c.b16 %v2955_v54, %v2954_v24  ;;  %v1333_v24 = vsel %vm11251_vm13, %v9126_v17, %v1332_v57 }
 0x16f   : > { %v4065_v46 = vadd.f32 %v4064_v26, %v3976_v22  ;;  %v2748_v17 = vunpack.c.l.b16 %v1333_v24  ;;  %v11747_v24 = vld [vmem:[#allocation2 + $0xac] sm:$0xf] }
 0x170   : > { %v11690_v50 = vpop.f32.mrf.mxu1 }
 0x171   : > { %v4154_v12 = vadd.f32 %v11609_v21, %v4065_v46  ;;  %v3980_v7 = vpop.f32.mrf.mxu2  ;;  %v1700_v21 = vsel %vm10806_vm5, %v1695_v36, %v1699_v27  ;;  %v1808_v46 = vld [vmem:[#allocation2 + $0x90] sm:$0xe]  ;;  %v11710_v36 = vrot.slane %v1711_v4, 5 }
 0x172   : > { %v3981_v22 = vadd.f32 %v3980_v7, %v11358_v0  ;;  %v11703_v63 = vpop.f32.mrf.mxu0  ;;  %v1334_v0 = vrot.slane %v1332_v57, 4  ;;  %v2893_v26 = vunpack.c.l.b16 %v1700_v21  ;;  %v9142_v58 = vrot.slane %v1808_v46, 9 }
 0x173   : > { %4106 = vmatmul.bf16.gmra.mxu3 %v10199_v37  ;;  %v11693_v2 = vadd.f32 %v11645_v32, %v4154_v12  ;;  %v1715_v32 = vshrl.u32 %v11700_v18, 16  ;;  %v1704_v37 = vrot.slane %v1702_v13, 4  ;;  %v1943_v21 = vrot.slane %v11665_v30, 5 }
 0x174   : > { %v1336_v53 = vsel %vm11251_vm13, %v1334_v0, %v1335_v23  ;;  %v2913_v54 = vpack.c.b16 %v2893_v26, %v2892_v56  ;;  %v10271_v0 = vld [vmem:[%s14383_s1 + $0x188] sm:$0xff] }
 0x175   : > { %4022 = vmatmul.bf16.gmra.mxu2 %v2768_v9  ;;  %v1717_v27 = vrot.slane %v1715_v32, 4  ;;  %v1708_v14 = vor.u32 %v1707_v29, %v1704_v37  ;;  %v2749_v32 = vunpack.c.l.b16 %v1336_v53 }
 0x176   : > { %v4067_v52 = vpop.f32.mrf.mxu3  ;;  %4326 = vmatpush.bf16.msra.mxu2 %v10271_v0 }
 0x177   : > { %v4068_v28 = vadd.f32 %v4067_v52, %v3979_v8  ;;  %v11715_v8 = vld [vmem:[#allocation2 + $0xa4] sm:$0x1]  ;;  %v1718_v13 = vor.u32 %v1717_v27, %v11710_v36  ;;  %v1709_v39 = vrot.slane %v1708_v14, 4 }
 0x178   : > { %v11713_v7 = vpop.f32.mrf.mxu1  ;;  %v1721_v43 = vshll.u32 %v11715_v8, 16 }
 0x179   : > { %v4157_v12 = vadd.f32 %v11632_v5, %v4068_v28  ;;  %v3983_v9 = vpop.f32.mrf.mxu2  ;;  %v1942_v5 = vrot.slane %v1940_v41, 4  ;;  %v1719_v23 = vrot.slane %v1718_v13, 4  ;;  %v1714_v53 = vsel %vm10806_vm5, %v1709_v39, %v11710_v36 }
 0x17a   : > { %v3984_v35 = vadd.f32 %v3983_v9, %v11373_v42  ;;  %v11728_v57 = vpop.f32.mrf.mxu0  ;;  %v1941_v42 = vsel %vm11251_vm13, %v9142_v58, %v1940_v41  ;;  %v1723_v56 = vrot.slane %v1721_v43, 5  ;;  %v10490_v41 = vld [vmem:[#allocation2 + $0x94] sm:$0xf]  ;;  %v1391_v9 = vld [vmem:[#allocation2 + $0xa8] sm:$0xf]  ;;  %v9127_v13 = vrot.slane %v1198_v38, 9 }
 0x17b   : > { %v11722_v33 = vadd.f32 %v11668_v59, %v4157_v12  ;;  %4289 = vmatmul.bf16.gmra.mxu1 %v2976_v51  ;;  %v10200_v59 = vld [vmem:[#allocation2 + $0x84] sm:$0xff]  ;;  %v1944_v30 = vsel %vm11251_vm13, %v1942_v5, %v1943_v21  ;;  %v2769_v51 = vpack.c.b16 %v2749_v32, %v2748_v17  ;;  %v1339_v46 = vrot.slane %v10490_v41, 5  ;;  %v10491_v17 = vld [vmem:[#allocation2 + $0x98] sm:$0x1] }
 0x17c   : > { %v2956_v27 = vunpack.c.l.b16 %v1941_v42  ;;  %v2957_v12 = vunpack.c.l.b16 %v1944_v30  ;;  %v1729_v58 = vshll.u32 %v1391_v9, 16  ;;  %v1739_v21 = vshrl.u32 %v11747_v24, 16 }
 0x17d   : > { %4205 = vmatmul.bf16.gmra.mxu0 %v2913_v54  ;;  %v1724_v54 = vsel %vm10806_vm5, %v1719_v23, %v1723_v56  ;;  %v1341_v43 = vrot.slane %v1339_v46, 4  ;;  %v1342_v32 = vrot.slane %v10491_v17, 5  ;;  %v2894_v36 = vunpack.c.l.b16 %v1714_v53  ;;  %v1809_v56 = vld [vmem:[#allocation2 + $0x9c] sm:$0xe] }
 0x17e   : > { %v4069_v4 = vpop.f32.mrf.mxu3  ;;  %v1947_v42 = vrot.slane %v11700_v18, 5  ;;  %v1731_v30 = vrot.slane %v1729_v58, 5 }
 0x17f   : > { %v4070_v52 = vadd.f32 %v4069_v4, %v3981_v22 }
 0x180   : > { %v11738_v28 = vpop.f32.mrf.mxu1 }
 0x181   : > { %v4159_v26 = vadd.f32 %v11655_v25, %v4070_v52  ;;  %v3985_v22 = vpop.f32.mrf.mxu2  ;;  %v10279_v25 = vld [vmem:[%s14383_s1 + $0x1c8] sm:$0xff]  ;;  %v2895_v52 = vunpack.c.l.b16 %v1724_v54 }
 0x182   : > { %v3986_v29 = vadd.f32 %v3985_v22, %v11394_v20  ;;  %v11754_v5 = vpop.f32.mrf.mxu0  ;;  %4415 = vmatpush.bf16.msra.mxu3 %v10279_v25  ;;  %v1735_v20 = vshll.u32 %v11747_v24, 16  ;;  %v1741_v22 = vrot.slane %v1739_v21, 4  ;;  %v9143_v25 = vrot.slane %v1809_v56, 9 }
 0x183   : > { %4111 = vmatmul.bf16.gmra.mxu3 %v10200_v59  ;;  %v11741_v37 = vadd.f32 %v11690_v50, %v4159_v26  ;;  %v1726_v50 = vshrl.u32 %v1391_v9, 16  ;;  %v2977_v59 = vpack.c.b16 %v2957_v12, %v2956_v27  ;;  %v2914_v27 = vpack.c.b16 %v2895_v52, %v2894_v36  ;;  %v10287_v12 = vld [vmem:[%s14383_s1 + $0x208] sm:$0xff] }
 0x184   : > { %v11762_v26 = vrot.slane %v1735_v20, 5  ;;  %v1949_v9 = vrot.slane %v1947_v42, 4  ;;  %4504 = vmatpush.bf16.msra.mxu0 %v10287_v12 }
 0x185   : > { %4027 = vmatmul.bf16.gmra.mxu2 %v2769_v51  ;;  %v1728_v0 = vrot.slane %v1726_v50, 4  ;;  %v11766_v51 = vld [vmem:[#allocation2 + $0xb0] sm:$0x1] }
 0x186   : > { %v4072_v14 = vpop.f32.mrf.mxu3 }
 0x187   : > { %v4073_v4 = vadd.f32 %v4072_v14, %v3984_v35  ;;  %v1340_v35 = vsel %vm11251_vm13, %v9127_v13, %v1339_v46  ;;  %v1950_v46 = vrot.slane %v11715_v8, 5  ;;  %v1732_v53 = vor.u32 %v1731_v30, %v1728_v0  ;;  %v10201_v14 = vld [vmem:[#allocation2 + $0x90] sm:$0xff]  ;;  %v10492_v0 = vld [vmem:[#allocation2 + $0xa0] sm:$0xf] }
 0x188   : > { %v11760_v23 = vpop.f32.mrf.mxu1  ;;  %v2750_v58 = vunpack.c.l.b16 %v1340_v35  ;;  %v1948_v13 = vsel %vm11251_vm13, %v9143_v25, %v1947_v42  ;;  %v1346_v30 = vrot.slane %v10492_v0, 5 }
 0x189   : > { %v4162_v39 = vadd.f32 %v11683_v55, %v4073_v4  ;;  %v3988_v38 = vpop.f32.mrf.mxu2  ;;  %v1343_v55 = vsel %vm11251_vm13, %v1341_v43, %v1342_v32  ;;  %v1951_v8 = vsel %vm11251_vm13, %v1949_v9, %v1950_v46  ;;  %v1733_v43 = vrot.slane %v1732_v53, 4  ;;  %v253_v9 = vld [vmem:[%s10766_s9 + $0x78] sm:$0xf] }
 0x18a   : > { %v3989_v18 = vadd.f32 %v3988_v38, %v11415_v10  ;;  %v11778_v54 = vpop.f32.mrf.mxu0  ;;  %v1745_v10 = vshll.u32 %v11766_v51, 16  ;;  %v2751_v20 = vunpack.c.l.b16 %v1343_v55  ;;  %v2959_v56 = vunpack.c.l.b16 %v1951_v8  ;;  %v1393_v38 = vld [vmem:[#allocation2 + $0xb4] sm:$0xf] }
 0x18b   : > { %v11769_v41 = vadd.f32 %v11713_v7, %v4162_v39  ;;  %4294 = vmatmul.bf16.gmra.mxu1 %v2977_v59  ;;  %v1742_v7 = vor.u32 %v1741_v22, %v11762_v26  ;;  %v2958_v39 = vunpack.c.l.b16 %v1948_v13  ;;  %v1199_v22 = vld [vmem:[#allocation2 + $0x9c] sm:$0xe]  ;;  %v1738_v35 = vsel %vm10806_vm5, %v1733_v43, %v11762_v26 }
 0x18c   : > { %v1747_v36 = vrot.slane %v1745_v10, 5  ;;  %v2770_v59 = vpack.c.b16 %v2751_v20, %v2750_v58  ;;  %v1750_v55 = vshrl.u32 %v1393_v38, 16  ;;  %v9128_v53 = vrot.slane %v1199_v22, 9  ;;  %v10493_v58 = vld [vmem:[#allocation2 + $0xa4] sm:$0x1]  ;;  %v10347_v20 = vld [vmem:[%s14385_s3 + $0x28] sm:$0xff] }
 0x18d   : > { %4210 = vmatmul.bf16.gmra.mxu0 %v2914_v27  ;;  %v1743_v32 = vrot.slane %v1742_v7, 4  ;;  %v1348_v7 = vrot.slane %v1346_v30, 4  ;;  %v1349_v26 = vrot.slane %v10493_v58, 5  ;;  %v2896_v13 = vunpack.c.l.b16 %v1738_v35  ;;  %8171 = vmatpush.bf16.msra.mxu1 %v10347_v20 }
 0x18e   : > { %v4074_v50 = vpop.f32.mrf.mxu3  ;;  %v1752_v43 = vrot.slane %v1750_v55, 4  ;;  %v1957_v35 = vrot.slane %v11766_v51, 5  ;;  %v254_v55 = vld [vmem:[%s10766_s9 + $0x7c] sm:$0xf] }
 0x18f   : > { %v4075_v21 = vadd.f32 %v4074_v50, %v3986_v29  ;;  %v1748_v12 = vsel %vm10806_vm5, %v1743_v32, %v1747_v36  ;;  %v2978_v50 = vpack.c.b16 %v2959_v56, %v2958_v39  ;;  %v1347_v39 = vsel %vm11251_vm13, %v9128_v53, %v1346_v30  ;;  %v10202_v51 = vld [vmem:[#allocation2 + $0x9c] sm:$0xff] }
 0x190   : > { %v11787_v17 = vpop.f32.mrf.mxu1  ;;  %v2897_v8 = vunpack.c.l.b16 %v1748_v12  ;;  %v1350_v12 = vsel %vm11251_vm13, %v1348_v7, %v1349_v26  ;;  %v576_v58 = vshrl.u32 %v254_v55, 16  ;;  %v10270_v26 = vld [vmem:[%s14383_s1 + $0x180] sm:$0xff] }
 0x191   : > { %v4164_v4 = vadd.f32 %v11703_v63, %v4075_v21  ;;  %v3990_v52 = vpop.f32.mrf.mxu2  ;;  %v11793_v63 = vld [vmem:[#allocation2 + $0xb8] sm:$0xf]  ;;  %v1810_v21 = vld [vmem:[#allocation2 + $0xa8] sm:$0xe]  ;;  %4327 = vmatpush.bf16.msra.mxu2 %v10270_v26 }
 0x192   : > { %v3991_v42 = vadd.f32 %v3990_v52, %v11433_v61  ;;  %v11798_v27 = vpop.f32.mrf.mxu0  ;;  %v1759_v25 = vshll.u32 %v11793_v63, 16  ;;  %v1763_v61 = vshrl.u32 %v11793_v63, 16  ;;  %v9144_v56 = vrot.slane %v1810_v21, 9 }
 0x193   : > { %4116 = vmatmul.bf16.gmra.mxu3 %v10201_v14  ;;  %v11790_v29 = vadd.f32 %v11738_v28, %v4164_v4  ;;  %v1753_v28 = vshll.u32 %v1393_v38, 16  ;;  %v1954_v14 = vrot.slane %v11747_v24, 5  ;;  %v568_v4 = vshrl.u32 %v253_v9, 16  ;;  %v11816_v24 = vld [vmem:[#allocation2 + $0xbc] sm:$0x1] }
 0x194   : > { %v11812_v52 = vrot.slane %v1759_v25, 5  ;;  %v2753_v21 = vunpack.c.l.b16 %v1350_v12 }
 0x195   : > { %4032 = vmatmul.bf16.gmra.mxu2 %v2770_v59  ;;  %v1765_v59 = vrot.slane %v1763_v61, 4 }
 0x196   : > { %v4077_v46 = vpop.f32.mrf.mxu3 }
 0x197   : > { %v4078_v10 = vadd.f32 %v4077_v46, %v3989_v18  ;;  %v1755_v18 = vrot.slane %v1753_v28, 5  ;;  %v2915_v28 = vpack.c.b16 %v2897_v8, %v2896_v13  ;;  %v1766_v61 = vor.u32 %v1765_v59, %v11812_v52  ;;  %v744_v13 = vld [vmem:[#allocation2 + $0xc0] sm:$0xf] }
 0x198   : > { %v11810_v36 = vpop.f32.mrf.mxu1  ;;  %v1769_v46 = vshll.u32 %v11816_v24, 16 }
 0x199   : > { %v4167_v32 = vadd.f32 %v11728_v57, %v4078_v10  ;;  %v3993_v0 = vpop.f32.mrf.mxu2  ;;  %v1956_v57 = vrot.slane %v1954_v14, 4  ;;  %v1756_v30 = vor.u32 %v1755_v18, %v1752_v43  ;;  %v2752_v10 = vunpack.c.l.b16 %v1347_v39 }
 0x19a   : > { %v3994_v38 = vadd.f32 %v3993_v0, %v11448_v40  ;;  %v11826_v25 = vpop.f32.mrf.mxu0  ;;  %v571_v40 = vshll.u32 %v253_v9, 16  ;;  %v579_v9 = vshll.u32 %v254_v55, 16  ;;  %v1767_v59 = vrot.slane %v1766_v61, 4  ;;  %v748_v0 = vld [vmem:[#allocation2 + $0xc8] sm:$0x1] }
 0x19b   : > { %v11819_v22 = vadd.f32 %v11760_v23, %v4167_v32  ;;  %4299 = vmatmul.bf16.gmra.mxu1 %v2978_v50  ;;  %v570_v23 = vrot.slane %v568_v4, 7  ;;  %v1955_v50 = vsel %vm11251_vm13, %v9144_v56, %v1954_v14  ;;  %v1958_v7 = vsel %vm11251_vm13, %v1956_v57, %v1957_v35 }
 0x19c   : > { %v578_v4 = vrot.slane %v576_v58, 7  ;;  %v1757_v18 = vrot.slane %v1756_v30, 4  ;;  %v1771_v14 = vrot.slane %v1769_v46, 5  ;;  %v10278_v30 = vld [vmem:[%s14383_s1 + $0x1c0] sm:$0xff]  ;;  %v2960_v61 = vunpack.c.l.b16 %v1955_v50  ;;  %v10495_v50 = vld [vmem:[#allocation2 + $0xb0] sm:$0x1] }
 0x19d   : > { %4215 = vmatmul.bf16.gmra.mxu0 %v2915_v28  ;;  %v573_v8 = vor.u32 %v571_v40, %v570_v23  ;;  %v574_v43 = vrot.slane %v570_v23, 4  ;;  %v10494_v28 = vld [vmem:[#allocation2 + $0xac] sm:$0xf]  ;;  %v2961_v46 = vunpack.c.l.b16 %v1958_v7  ;;  %4416 = vmatpush.bf16.msra.mxu3 %v10278_v30  ;;  %v1356_v7 = vrot.slane %v10495_v50, 5 }
 0x19e   : > { %v4079_v53 = vpop.f32.mrf.mxu3  ;;  %v581_v56 = vor.u32 %v579_v9, %v578_v4  ;;  %v583_v57 = vrot.slane %v578_v4, 4  ;;  %v1353_v23 = vrot.slane %v10494_v28, 5  ;;  %v1961_v4 = vrot.slane %v11793_v63, 5 }
 0x19f   : > { %v4080_v20 = vadd.f32 %v4079_v53, %v3991_v42  ;;  %v745_v35 = vsel %vm10847_vm8, %v573_v8, %v744_v13  ;;  %v1200_v53 = vld [vmem:[#allocation2 + $0xa8] sm:$0xe]  ;;  %v2979_v19 = vpack.c.b16 %v2961_v46, %v2960_v61 }
 0x1a0   : > { %v11838_v32 = vpop.f32.mrf.mxu1  ;;  %746 = vst [vmem:[#allocation2 + $0xc0] sm:$0xf] %v745_v35  ;;  %v582_v11 = vsel %vm10860_vm9, %v574_v43, %v581_v56  ;;  %v1811_v43 = vld [vmem:[#allocation2 + $0xb4] sm:$0xe]  ;;  %v1964_v35 = vrot.slane %v11816_v24, 5 }
 0x1a1   : > { %v4169_v42 = vadd.f32 %v11754_v5, %v4080_v20  ;;  %v3995_v39 = vpop.f32.mrf.mxu2  ;;  %v2771_v5 = vpack.c.b16 %v2753_v21, %v2752_v10  ;;  %v1772_v10 = vsel %vm10806_vm5, %v1767_v59, %v1771_v14  ;;  %747 = vst.msk [vmem:[#allocation2 + $0xc4] sm:$0xf] %vm633_vm4, %v582_v11  ;;  %v1355_v21 = vrot.slane %v1353_v23, 4  ;;  %v10286_v14 = vld [vmem:[%s14383_s1 + $0x200] sm:$0xff] }
 0x1a2   : > { %v3996_v55 = vadd.f32 %v3995_v39, %v11472_v31  ;;  %v11853_v40 = vpop.f32.mrf.mxu0  ;;  %v1762_v31 = vsel %vm10806_vm5, %v1757_v18, %v11812_v52  ;;  %v2899_v13 = vunpack.c.l.b16 %v1772_v10  ;;  %v9145_v39 = vrot.slane %v1811_v43, 9  ;;  %4505 = vmatpush.bf16.msra.mxu0 %v10286_v14  ;;  %v1201_v14 = vld [vmem:[#allocation2 + $0xb4] sm:$0xe] }
 0x1a3   : > { %4121 = vmatmul.bf16.gmra.mxu3 %v10202_v51  ;;  %v11843_v12 = vadd.f32 %v11787_v17, %v4169_v42  ;;  %v749_v17 = vsel %vm10869_vm10, %v583_v57, %v748_v0  ;;  %v9129_v51 = vrot.slane %v1200_v53, 9  ;;  %v2898_v26 = vunpack.c.l.b16 %v1762_v31 }
 0x1a4   : > { %750 = vst [vmem:[#allocation2 + $0xc8] sm:$0x1] %v749_v17  ;;  %v1357_v0 = vsel %vm11251_vm13, %v1355_v21, %v1356_v7  ;;  %v10203_v17 = vld [vmem:[#allocation2 + $0xa8] sm:$0xff] }
 0x1a5   : > { %4037 = vmatmul.bf16.gmra.mxu2 %v2771_v5  ;;  %v1354_v59 = vsel %vm11251_vm13, %v9129_v51, %v1353_v23  ;;  %v2916_v63 = vpack.c.b16 %v2899_v13, %v2898_v26  ;;  %v2755_v10 = vunpack.c.l.b16 %v1357_v0 }
 0x1a6   : > { %v4082_v58 = vpop.f32.mrf.mxu3  ;;  %v2754_v31 = vunpack.c.l.b16 %v1354_v59 }
 0x1a7   : > { %v4083_v20 = vadd.f32 %v4082_v58, %v3994_v38  ;;  %v1395_v42 = vld [vmem:[#allocation2 + $0xc0] sm:$0xf] }
 0x1a8   : > { %v11862_v52 = vpop.f32.mrf.mxu1  ;;  %v11876_v56 = vld [vmem:[#allocation2 + $0xc4] sm:$0xf]  ;;  %v2772_v43 = vpack.c.b16 %v2755_v10, %v2754_v31  ;;  %v1812_v31 = vld [vmem:[#allocation2 + $0xc0] sm:$0xe]  ;;  %v1974_v10 = vld [vmem:[#allocation2 + $0x18] sm:$0xf] }
 0x1a9   : > { %v4172_v8 = vadd.f32 %v11778_v54, %v4083_v20  ;;  %v3998_v9 = vpop.f32.mrf.mxu2  ;;  %v1774_v54 = vshrl.u32 %v1395_v42, 16  ;;  %v1783_v23 = vshll.u32 %v11876_v56, 16  ;;  %v1787_v46 = vshrl.u32 %v11876_v56, 16 }
 0x1aa   : > { %v3999_v38 = vadd.f32 %v3998_v9, %v11493_v1  ;;  %v11878_v57 = vpop.f32.mrf.mxu0  ;;  %v1963_v1 = vrot.slane %v1961_v4, 4  ;;  %v10496_v9 = vld [vmem:[#allocation2 + $0xb8] sm:$0xf] }
 0x1ab   : > { %v11866_v18 = vadd.f32 %v11810_v36, %v4172_v8  ;;  %4304 = vmatmul.bf16.gmra.mxu1 %v2979_v19  ;;  %v1777_v36 = vshll.u32 %v1395_v42, 16  ;;  %v11881_v5 = vld [vmem:[#allocation2 + $0xc8] sm:$0x1]  ;;  %v1776_v28 = vrot.slane %v1774_v54, 4  ;;  %v1785_v58 = vrot.slane %v1783_v23, 5  ;;  %v10346_v23 = vld [vmem:[%s14385_s3 + $0x20] sm:$0xff] }
 0x1ac   : > { %v1793_v53 = vshll.u32 %v11881_v5, 16  ;;  %v1789_v51 = vrot.slane %v1787_v46, 4  ;;  %v1962_v19 = vsel %vm11251_vm13, %v9145_v39, %v1961_v4  ;;  %v1965_v50 = vsel %vm11251_vm13, %v1963_v1, %v1964_v35  ;;  %v10497_v35 = vld [vmem:[#allocation2 + $0xbc] sm:$0x1]  ;;  %8172 = vmatpush.bf16.msra.mxu1 %v10346_v23 }
 0x1ad   : > { %v1779_v61 = vrot.slane %v1777_v36, 5  ;;  %4220 = vmatmul.bf16.gmra.mxu0 %v2916_v63  ;;  %v1360_v42 = vrot.slane %v10496_v9, 5  ;;  %v2963_v59 = vunpack.c.l.b16 %v1965_v50  ;;  %v9130_v1 = vrot.slane %v1201_v14, 9 }
 0x1ae   : > { %v4084_v30 = vpop.f32.mrf.mxu3  ;;  %v1790_v26 = vor.u32 %v1789_v51, %v1785_v58  ;;  %v1795_v13 = vrot.slane %v1793_v53, 5  ;;  %v1968_v53 = vrot.slane %v11876_v56, 5 }
 0x1af   : > { %v4085_v11 = vadd.f32 %v4084_v30, %v3996_v55  ;;  %v1780_v20 = vor.u32 %v1779_v61, %v1776_v28  ;;  %v1363_v28 = vrot.slane %v10497_v35, 5  ;;  %v1361_v50 = vsel %vm11251_vm13, %v9130_v1, %v1360_v42 }
 0x1b0   : > { %v11889_v21 = vpop.f32.mrf.mxu1  ;;  %v1791_v54 = vrot.slane %v1790_v26, 4  ;;  %v1971_v26 = vrot.slane %v11881_v5, 5 }
 0x1b1   : > { %v11887_v24 = vadd.f32 %v11798_v27, %v4085_v11  ;;  %v4000_v7 = vpop.f32.mrf.mxu2  ;;  %v1781_v55 = vrot.slane %v1780_v20, 4  ;;  %v2962_v27 = vunpack.c.l.b16 %v1962_v19  ;;  %v14418_v20 = vmov 0  }
 0x1b2   : > { %v4001_v8 = vadd.f32 %v4000_v7, %v11510_v60  ;;  %v11896_v0 = vpop.f32.mrf.mxu0  ;;  %v1796_v39 = vsel %vm10806_vm5, %v1791_v54, %v1795_v13  ;;  %v1362_v60 = vrot.slane %v1360_v42, 4  ;;  %v9146_v7 = vrot.slane %v1812_v31, 9  ;;  %v1975_v13 = vld [vmem:[#allocation2 + $0x1c] sm:$0xf] }
 0x1b3   : > { %4126 = vmatmul.bf16.gmra.mxu3 %v10203_v17  ;;  %v1786_v4 = vsel %vm10806_vm5, %v1781_v55, %v1785_v58  ;;  %v2980_v30 = vpack.c.b16 %v2963_v59, %v2962_v27  ;;  %v2901_v46 = vunpack.c.l.b16 %v1796_v39  ;;  %v1970_v55 = vrot.slane %v1968_v53, 4  ;;  %v10204_v59 = vld [vmem:[#allocation2 + $0xb4] sm:$0xff] }
 0x1b4   : > { %v2900_v61 = vunpack.c.l.b16 %v1786_v4  ;;  %v1364_v56 = vsel %vm11251_vm13, %v1362_v60, %v1363_v28  ;;  %v2472_v9 = vrot.slane %v1975_v13, 5  ;;  %v1969_v42 = vsel %vm11251_vm13, %v9146_v7, %v1968_v53 }
 0x1b5   : > { %4042 = vmatmul.bf16.gmra.mxu2 %v2772_v43  ;;  %v2757_v14 = vunpack.c.l.b16 %v1364_v56  ;;  %v1972_v4 = vsel %vm11251_vm13, %v1970_v55, %v1971_v26  ;;  %v2964_v28 = vunpack.c.l.b16 %v1969_v42  ;;  %v2026_v53 = vshll.u32 %v1974_v10, 16 }
 0x1b6   : > { %v4087_v63 = vpop.f32.mrf.mxu3  ;;  %v2474_v39 = vrot.slane %v2472_v9, 4  ;;  %v2965_v23 = vunpack.c.l.b16 %v1972_v4 }
 0x1b7   : > { %v4088_v36 = vadd.f32 %v4087_v63, %v3999_v38  ;;  %v2406_v38 = vld [vmem:[#allocation2 + $0x18] sm:$0xe]  ;;  %v2028_v26 = vrot.slane %v2026_v53, 5 }
 0x1b8   : > { %v4270_v17 = vpop.f32.mrf.mxu1  ;;  %4657 = vst [vmem:[#allocation2 + $0x18] sm:$0xf] %v14418_v20 }
 0x1b9   : > { %v4177_v11 = vadd.f32 %v11826_v25, %v4088_v36  ;;  %v4003_v58 = vpop.f32.mrf.mxu2  ;;  %v2917_v25 = vpack.c.b16 %v2901_v46, %v2900_v61  ;;  %v2475_v36 = vrot.slane %v11283_v34, 5  ;;  %v2023_v46 = vshrl.u32 %v1974_v10, 16  ;;  %v1976_v10 = vld [vmem:[#allocation2 + $0x24] sm:$0xf] }
 0x1ba   : > { %v4004_v19 = vadd.f32 %v4003_v58, %v11534_v44  ;;  %v11917_v43 = vpop.f32.mrf.mxu0  ;;  %v2756_v44 = vunpack.c.l.b16 %v1361_v50  ;;  %v2036_v58 = vshrl.u32 %v1975_v13, 16  ;;  %v2981_v50 = vpack.c.b16 %v2965_v23, %v2964_v28 }
 0x1bb   : > { %v11909_v51 = vadd.f32 %v11862_v52, %v4177_v11  ;;  %4309 = vmatmul.bf16.gmra.mxu1 %v2980_v30  ;;  %v2025_v55 = vrot.slane %v2023_v46, 4 }
 0x1bc   : > { %v2773_v35 = vpack.c.b16 %v2757_v14, %v2756_v44  ;;  %v2038_v44 = vrot.slane %v2036_v58, 4  ;;  %v1977_v14 = vld [vmem:[#allocation2 + $0x28] sm:$0xf] }
 0x1bd   : > { %4225 = vmatmul.bf16.gmra.mxu0 %v2917_v25  ;;  %v2479_v4 = vrot.slane %v1977_v14, 5 }
 0x1be   : > { %v4089_v52 = vpop.f32.mrf.mxu3 }
 0x1bf   : > { %v4090_v27 = vadd.f32 %v4089_v52, %v4001_v8  ;;  %v11919_v54 = vld [vmem:[#allocation2 + $0x18] sm:$0xff]  ;;  %v9147_v8 = vrot.slane %v2406_v38, 9  ;;  %v2032_v38 = vshll.u32 %v1975_v13, 16 }
 0x1c0   : > { %4658 = vst [vmem:[#allocation2 + $0x1c] sm:$0xf] %v14418_v20  ;;  %v11929_v63 = vpop.f32.mrf.mxu1 }
 0x1c1   : > { %v11927_v5 = vadd.f32 %v11853_v40, %v4090_v27  ;;  %v4005_v1 = vpop.f32.mrf.mxu2  ;;  %v2473_v61 = vsel %vm11251_vm13, %v9147_v8, %v2472_v9  ;;  %v2476_v40 = vsel %vm11251_vm13, %v2474_v39, %v2475_v36  ;;  %v11942_v9 = vld [vmem:[#allocation2 + $0x2c] sm:$0x1]  ;;  %v2407_v27 = vld [vmem:[#allocation2 + $0x24] sm:$0xe]  ;;  %v2029_v39 = vor.u32 %v2028_v26, %v2025_v55 }
 0x1c2   : > { %v4006_v60 = vadd.f32 %v4005_v1, %v11555_v62  ;;  %v11933_v30 = vpop.f32.mrf.mxu0  ;;  %v3142_v62 = vunpack.c.l.b16 %v2473_v61  ;;  %v3143_v56 = vunpack.c.l.b16 %v2476_v40  ;;  %4662 = vst [vmem:[#allocation2 + $0x2c] sm:$0x1] %v14418_v20  ;;  %v10205_v1 = vld [vmem:[#allocation2 + $0xc0] sm:$0xff]  ;;  %v9148_v61 = vrot.slane %v2407_v27, 9  ;;  %v10345_v27 = vld [vmem:[%s14385_s3 + $0x18] sm:$0xff] }
 0x1c3   : > { %4131 = vmatmul.bf16.gmra.mxu3 %v10204_v59  ;;  %v2034_v59 = vrot.slane %v2032_v38, 5  ;;  %4660 = vst [vmem:[#allocation2 + $0x24] sm:$0xf] %v14418_v20  ;;  %v2481_v40 = vrot.slane %v2479_v4, 4  ;;  %v2482_v46 = vrot.slane %v11942_v9, 5  ;;  %v2056_v26 = vshll.u32 %v1977_v14, 16  ;;  %8173 = vmatpush.bf16.msra.mxu1 %v10345_v27 }
 0x1c4   : > { %v2480_v58 = vsel %vm11251_vm13, %v9148_v61, %v2479_v4 }
 0x1c5   : > { %4047 = vmatmul.bf16.gmra.mxu2 %v2773_v35  ;;  %v2039_v35 = vor.u32 %v2038_v44, %v2034_v59  ;;  %v3144_v44 = vunpack.c.l.b16 %v2480_v58 }
 0x1c6   : > { %v4092_v11 = vpop.f32.mrf.mxu3 }
 0x1c7   : > { %v4093_v31 = vadd.f32 %v4092_v11, %v4004_v19 }
 0x1c8   : > { %v11940_v7 = vpop.f32.mrf.mxu1 }
 0x1c9   : > { %v4182_v25 = vadd.f32 %v11878_v57, %v4093_v31  ;;  %v4008_v52 = vpop.f32.mrf.mxu2  ;;  %v3174_v57 = vpack.c.b16 %v3143_v56, %v3142_v62  ;;  %v2050_v62 = vshll.u32 %v1976_v10, 16 }
 0x1ca   : > { %v4009_v13 = vadd.f32 %v4008_v52, %v11577_v49  ;;  %v11949_v42 = vpop.f32.mrf.mxu0  ;;  %v11952_v28 = vld [vmem:[#allocation2 + $0x24] sm:$0xff]  ;;  %v2060_v52 = vshrl.u32 %v1977_v14, 16  ;;  %v1978_v14 = vld [vmem:[#allocation2 + $0x30] sm:$0xf] }
 0x1cb   : > { %v11945_v19 = vadd.f32 %v4270_v17, %v4182_v25  ;;  %4314 = vmatmul.bf16.gmra.mxu1 %v2981_v50  ;;  %v2042_v17 = vshll.u32 %v11283_v34, 16  ;;  %4661 = vst [vmem:[#allocation2 + $0x28] sm:$0xf] %v14418_v20  ;;  %v2040_v34 = vrot.slane %v2039_v35, 4  ;;  %v2047_v50 = vshrl.u32 %v1976_v10, 16 }
 0x1cc   : > { %v2062_v61 = vrot.slane %v2060_v52, 4 }
 0x1cd   : > { %4506 = vmatmul.bf16.vlgmr.msra.gmra.mxu0 %v3174_v57  ;;  %v2044_v31 = vrot.slane %v2042_v17, 5 }
 0x1ce   : > { %v4094_v8 = vpop.f32.mrf.mxu3 }
 0x1cf   : > { %v4095_v36 = vadd.f32 %v4094_v8, %v4006_v60  ;;  %v2030_v60 = vrot.slane %v2029_v39, 4  ;;  %v2049_v8 = vrot.slane %v2047_v50, 4 }
 0x1d0   : > { %v11958_v23 = vpop.f32.mrf.mxu1 }
 0x1d1   : > { %v11956_v49 = vadd.f32 %v11896_v0, %v4095_v36  ;;  %v4010_v53 = vpop.f32.mrf.mxu2  ;;  %v2483_v0 = vsel %vm11251_vm13, %v2481_v40, %v2482_v46  ;;  %v2035_v25 = vsel %vm10806_vm5, %v2030_v60, %v2034_v59  ;;  %v2052_v59 = vrot.slane %v2050_v62, 5  ;;  %v1979_v46 = vld [vmem:[#allocation2 + $0x34] sm:$0xf] }
 0x1d2   : > { %v4011_v11 = vadd.f32 %v4010_v53, %v11599_v47  ;;  %v11962_v38 = vpop.f32.mrf.mxu0  ;;  %v2045_v47 = vsel %vm10806_vm5, %v2040_v34, %v2044_v31  ;;  %v3145_v57 = vunpack.c.l.b16 %v2483_v0  ;;  %v2486_v60 = vrot.slane %v1979_v46, 5 }
 0x1d3   : > { %4136 = vmatmul.bf16.gmra.mxu3 %v10205_v1  ;;  %v3079_v39 = vunpack.c.l.b16 %v2045_v47  ;;  %v2408_v1 = vld [vmem:[#allocation2 + $0x30] sm:$0xe]  ;;  %v2053_v31 = vor.u32 %v2052_v59, %v2049_v8  ;;  %v2066_v62 = vshll.u32 %v11942_v9, 16  ;;  %v2074_v8 = vshll.u32 %v1978_v14, 16 }
 0x1d4   : > { %4663 = vst [vmem:[#allocation2 + $0x30] sm:$0xf] %v14418_v20  ;;  %v3175_v40 = vpack.c.b16 %v3145_v57, %v3144_v44 }
 0x1d5   : > { %4328 = vmatmul.bf16.vlgmr.msra.gmra.mxu2 %v11919_v54  ;;  %v3078_v54 = vunpack.c.l.b16 %v2035_v25  ;;  %v9149_v25 = vrot.slane %v2408_v1, 9  ;;  %v2068_v27 = vrot.slane %v2066_v62, 5  ;;  %v2084_v1 = vshrl.u32 %v1979_v46, 16 }
 0x1d6   : > { %v4097_v56 = vpop.f32.mrf.mxu3 }
 0x1d7   : > { %v4098_v55 = vadd.f32 %v4097_v56, %v4009_v13  ;;  %v11979_v13 = vld [vmem:[#allocation2 + $0x38] sm:$0x1]  ;;  %v3110_v0 = vpack.c.b16 %v3079_v39, %v3078_v54  ;;  %v2487_v57 = vsel %vm11251_vm13, %v9149_v25, %v2486_v60 }
 0x1d8   : > { %v11977_v4 = vpop.f32.mrf.mxu1  ;;  %4665 = vst [vmem:[#allocation2 + $0x38] sm:$0x1] %v14418_v20  ;;  %v2489_v47 = vrot.slane %v11979_v13, 5 }
 0x1d9   : > { %v4187_v10 = vadd.f32 %v11917_v43, %v4098_v55  ;;  %v4013_v36 = vpop.f32.mrf.mxu2  ;;  %v2058_v43 = vrot.slane %v2056_v26, 5  ;;  %v2488_v55 = vrot.slane %v2486_v60, 4 }
 0x1da   : > { %v4014_v17 = vadd.f32 %v4013_v36, %v11334_v15  ;;  %v11987_v53 = vpop.f32.mrf.mxu0  ;;  %v2080_v36 = vshll.u32 %v1979_v46, 16  ;;  %v14419_v46 = vld [vmem:[#allocation6_spill] sm:$0xff] }
 0x1db   : > { %v11983_v35 = vadd.f32 %v11940_v7, %v4187_v10  ;;  %v2063_v50 = vor.u32 %v2062_v61, %v2058_v43  ;;  %v11990_v7 = vld [vmem:[#allocation2 + $0x30] sm:$0xff]  ;;  %v2071_v10 = vshrl.u32 %v1978_v14, 16  ;;  %v3146_v61 = vunpack.c.l.b16 %v2487_v57 }
 0x1dc   : > { %4664 = vst [vmem:[#allocation2 + $0x34] sm:$0xf] %v14418_v20  ;;  %v2076_v14 = vrot.slane %v2074_v8, 5 }
 0x1dd   : > { %4511 = vmatmul.bf16.gmra.mxu0 %v3175_v40  ;;  %v2064_v9 = vrot.slane %v2063_v50, 4  ;;  %v2409_v50 = vld [vmem:[#allocation2 + $0x3c] sm:$0xe] }
 0x1de   : > { %v4099_v34 = vpop.f32.mrf.mxu3 }
 0x1df   : > { %v4100_v58 = vadd.f32 %v4099_v34, %v4011_v11  ;;  %v2054_v11 = vrot.slane %v2053_v31, 4  ;;  %v2073_v31 = vrot.slane %v2071_v10, 4 }
 0x1e0   : > { %v11996_v56 = vpop.f32.mrf.mxu1 }
 0x1e1   : > { %v11994_v15 = vadd.f32 %v11933_v30, %v4100_v58  ;;  %v4015_v26 = vpop.f32.mrf.mxu2  ;;  %v2490_v30 = vsel %vm11251_vm13, %v2488_v55, %v2489_v47  ;;  %v2059_v54 = vsel %vm10806_vm5, %v2054_v11, %v2058_v43  ;;  %v12014_v58 = vld [vmem:[#allocation2 + $0x44] sm:$0x1]  ;;  %v2082_v55 = vrot.slane %v2080_v36, 5 }
 0x1e2   : > { %v4016_v52 = vadd.f32 %v4015_v26, %v11352_v48  ;;  %v12000_v44 = vpop.f32.mrf.mxu0  ;;  %v2069_v48 = vsel %vm10806_vm5, %v2064_v9, %v2068_v27  ;;  %v3147_v40 = vunpack.c.l.b16 %v2490_v30  ;;  %4668 = vst [vmem:[#allocation2 + $0x44] sm:$0x1] %v14418_v20  ;;  %v1981_v26 = vld [vmem:[#allocation2 + $0x40] sm:$0xf]  ;;  %v2077_v57 = vor.u32 %v2076_v14, %v2073_v31 }
 0x1e3   : > { %4417 = vmatmul.bf16.vlgmr.msra.gmra.mxu3 %v3110_v0  ;;  %v3080_v0 = vunpack.c.l.b16 %v2059_v54  ;;  %v3081_v43 = vunpack.c.l.b16 %v2069_v48  ;;  %v2493_v9 = vrot.slane %v1981_v26, 5  ;;  %v9150_v48 = vrot.slane %v2409_v50, 9 }
 0x1e4   : > { %v3176_v47 = vpack.c.b16 %v3147_v40, %v3146_v61  ;;  %v14421_v40 = vld [vmem:[#allocation7_spill] sm:$0xff] }
 0x1e5   : > { %4333 = vmatmul.bf16.gmra.mxu2 %v11952_v28  ;;  %v1980_v28 = vld [vmem:[#allocation2 + $0x3c] sm:$0xf]  ;;  %v3111_v10 = vpack.c.b16 %v3081_v43, %v3080_v0  ;;  %v2495_v36 = vrot.slane %v2493_v9, 4  ;;  %v2494_v0 = vsel %vm11251_vm13, %v9150_v48, %v2493_v9  ;;  %v10344_v9 = vld [vmem:[%s14385_s3 + $0x10] sm:$0xff] }
 0x1e6   : > { %v4102_v59 = vpop.f32.mrf.mxu3  ;;  %4666 = vst [vmem:[#allocation2 + $0x3c] sm:$0xf] %v14418_v20  ;;  %v2095_v43 = vshrl.u32 %v1980_v28, 16  ;;  %8174 = vmatpush.bf16.msra.mxu1 %v10344_v9  ;;  %v2114_v9 = vshll.u32 %v12014_v58, 16 }
 0x1e7   : > { %v4103_v39 = vadd.f32 %v4102_v59, %v4014_v17  ;;  %v2090_v59 = vshll.u32 %v11979_v13, 16 }
 0x1e8   : > { %v12012_v34 = vpop.f32.mrf.mxu1 }
 0x1e9   : > { %v4192_v60 = vadd.f32 %v11949_v42, %v4103_v39  ;;  %v4018_v17 = vpop.f32.mrf.mxu2  ;;  %v2086_v42 = vrot.slane %v2084_v1, 4  ;;  %v2496_v1 = vrot.slane %v12014_v58, 5  ;;  %v2092_v31 = vrot.slane %v2090_v59, 5 }
 0x1ea   : > { %v4019_v25 = vadd.f32 %v4018_v17, %v14419_v46  ;;  %v12022_v11 = vpop.f32.mrf.mxu0  ;;  %v2098_v17 = vshll.u32 %v1980_v28, 16  ;;  %v2097_v59 = vrot.slane %v2095_v43, 4 }
 0x1eb   : > { %v12018_v62 = vadd.f32 %v11977_v4, %v4192_v60  ;;  %v2087_v8 = vor.u32 %v2086_v42, %v2082_v55 }
 0x1ed   : > { %v12025_v4 = vld [vmem:[#allocation2 + $0x3c] sm:$0xff]  ;;  %4516 = vmatmul.bf16.gmra.mxu0 %v3176_v47  ;;  %v2088_v13 = vrot.slane %v2087_v8, 4 }
 0x1ee   : > { %v4104_v27 = vpop.f32.mrf.mxu3  ;;  %4667 = vst [vmem:[#allocation2 + $0x40] sm:$0xf] %v14418_v20 }
 0x1ef   : > { %v4105_v30 = vadd.f32 %v4104_v27, %v4016_v52  ;;  %v2078_v52 = vrot.slane %v2077_v57, 4  ;;  %v2093_v47 = vsel %vm10806_vm5, %v2088_v13, %v2092_v31  ;;  %v2104_v27 = vshll.u32 %v1981_v26, 16 }
 0x1f0   : > { %v12031_v39 = vpop.f32.mrf.mxu1  ;;  %v2108_v57 = vshrl.u32 %v1981_v26, 16  ;;  %v3083_v48 = vunpack.c.l.b16 %v2093_v47  ;;  %v1982_v26 = vld [vmem:[#allocation2 + $0x48] sm:$0xf] }
 0x1f1   : > { %v12029_v54 = vadd.f32 %v11962_v38, %v4105_v30  ;;  %14420 = vst [vmem:[#allocation6_spill] sm:$0xff] %v12031_v39  ;;  %v4020_v61 = vpop.f32.mrf.mxu2  ;;  %v2497_v38 = vsel %vm11251_vm13, %v2495_v36, %v2496_v1  ;;  %v2083_v46 = vsel %vm10806_vm5, %v2078_v52, %v2082_v55  ;;  %v3148_v30 = vunpack.c.l.b16 %v2494_v0  ;;  %v2410_v1 = vld [vmem:[#allocation2 + $0x48] sm:$0xe]  ;;  %v1983_v0 = vld [vmem:[#allocation2 + $0x4c] sm:$0xf] }
 0x1f2   : > { %v4021_v60 = vadd.f32 %v4020_v61, %v14421_v40  ;;  %v12035_v14 = vpop.f32.mrf.mxu0  ;;  %v2100_v55 = vrot.slane %v2098_v17, 5  ;;  %v14422_v52 = vld [vmem:[#allocation8_spill] sm:$0xff]  ;;  %v2110_v13 = vrot.slane %v2108_v57, 4  ;;  %4669 = vst [vmem:[#allocation2 + $0x48] sm:$0xf] %v14418_v20  ;;  %v2500_v43 = vrot.slane %v1983_v0, 5 }
 0x1f3   : > { %4422 = vmatmul.bf16.gmra.mxu3 %v3111_v10  ;;  %v3149_v10 = vunpack.c.l.b16 %v2497_v38 }
 0x1f5   : > { %4338 = vmatmul.bf16.gmra.mxu2 %v11990_v7  ;;  %v3082_v7 = vunpack.c.l.b16 %v2083_v46  ;;  %v3177_v31 = vpack.c.b16 %v3149_v10, %v3148_v30  ;;  %v9151_v30 = vrot.slane %v2410_v1, 9  ;;  %v2502_v10 = vrot.slane %v2500_v43, 4 }
 0x1f6   : > { %v4107_v50 = vpop.f32.mrf.mxu3  ;;  %v2122_v1 = vshll.u32 %v1982_v26, 16 }
 0x1f7   : > { %v4108_v42 = vadd.f32 %v4107_v50, %v4019_v25  ;;  %v12052_v25 = vld [vmem:[#allocation2 + $0x50] sm:$0x1]  ;;  %v2101_v50 = vor.u32 %v2100_v55, %v2097_v59  ;;  %v14425_v55 = vld [vmem:[#allocation9_spill] sm:$0xff] }
 0x1f8   : > { %v12050_v8 = vpop.f32.mrf.mxu1  ;;  %4671 = vst [vmem:[#allocation2 + $0x50] sm:$0x1] %v14418_v20 }
 0x1f9   : > { %v4197_v28 = vadd.f32 %v11987_v53, %v4108_v42  ;;  %v4023_v36 = vpop.f32.mrf.mxu2  ;;  %v2106_v53 = vrot.slane %v2104_v27, 5  ;;  %v3112_v42 = vpack.c.b16 %v3083_v48, %v3082_v7  ;;  %v2116_v48 = vrot.slane %v2114_v9, 5 }
 0x1fa   : > { %v4024_v40 = vadd.f32 %v4023_v36, %v14422_v52  ;;  %v12060_v38 = vpop.f32.mrf.mxu0  ;;  %v2501_v52 = vsel %vm11251_vm13, %v9151_v30, %v2500_v43 }
 0x1fb   : > { %v12056_v61 = vadd.f32 %v12012_v34, %v4197_v28  ;;  %v2111_v47 = vor.u32 %v2110_v13, %v2106_v53  ;;  %v12063_v34 = vld [vmem:[#allocation2 + $0x48] sm:$0xff]  ;;  %v2503_v28 = vrot.slane %v12052_v25, 5  ;;  %v2119_v13 = vshrl.u32 %v1982_v26, 16 }
 0x1fc   : > { %4670 = vst [vmem:[#allocation2 + $0x4c] sm:$0xf] %v14418_v20  ;;  %v3150_v9 = vunpack.c.l.b16 %v2501_v52  ;;  %v2124_v26 = vrot.slane %v2122_v1, 5 }
 0x1fd   : > { %4521 = vmatmul.bf16.gmra.mxu0 %v3177_v31  ;;  %v2112_v58 = vrot.slane %v2111_v47, 4  ;;  %v2132_v47 = vshrl.u32 %v1983_v0, 16 }
 0x1fe   : > { %v4109_v17 = vpop.f32.mrf.mxu3 }
 0x1ff   : > { %v4110_v46 = vadd.f32 %v4109_v17, %v4021_v60  ;;  %v2102_v60 = vrot.slane %v2101_v50, 4 }
 0x200   : > { %v12069_v57 = vpop.f32.mrf.mxu1 }
 0x201   : > { %v12067_v27 = vadd.f32 %v12000_v44, %v4110_v46  ;;  %14424 = vst [vmem:[#allocation8_spill] sm:$0xff] %v12069_v57  ;;  %v4025_v59 = vpop.f32.mrf.mxu2  ;;  %v2504_v44 = vsel %vm11251_vm13, %v2502_v10, %v2503_v28  ;;  %v2107_v17 = vsel %vm10806_vm5, %v2102_v60, %v2106_v53  ;;  %v2117_v46 = vsel %vm10806_vm5, %v2112_v58, %v2116_v48  ;;  %v12087_v28 = vld [vmem:[#allocation2 + $0x5c] sm:$0x1]  ;;  %v2411_v60 = vld [vmem:[#allocation2 + $0x54] sm:$0xe] }
 0x202   : > { %v4026_v7 = vadd.f32 %v4025_v59, %v14425_v55  ;;  %v12073_v36 = vpop.f32.mrf.mxu0  ;;  %v3151_v59 = vunpack.c.l.b16 %v2504_v44  ;;  %v2121_v10 = vrot.slane %v2119_v13, 4  ;;  %v3084_v55 = vunpack.c.l.b16 %v2107_v17  ;;  %4674 = vst [vmem:[#allocation2 + $0x5c] sm:$0x1] %v14418_v20  ;;  %v1985_v13 = vld [vmem:[#allocation2 + $0x58] sm:$0xf] }
 0x203   : > { %14423 = vst [vmem:[#allocation7_spill] sm:$0xff] %v12067_v27  ;;  %4427 = vmatmul.bf16.gmra.mxu3 %v3112_v42  ;;  %v2128_v42 = vshll.u32 %v1983_v0, 16  ;;  %v3085_v53 = vunpack.c.l.b16 %v2117_v46  ;;  %v14427_v0 = vld [vmem:[#allocation10_spill] sm:$0xff]  ;;  %v2138_v27 = vshll.u32 %v12052_v25, 16 }
 0x204   : > { %v3178_v44 = vpack.c.b16 %v3151_v59, %v3150_v9  ;;  %v2510_v59 = vrot.slane %v12087_v28, 5 }
 0x205   : > { %4343 = vmatmul.bf16.gmra.mxu2 %v12025_v4  ;;  %v1984_v4 = vld [vmem:[#allocation2 + $0x54] sm:$0xf]  ;;  %v2130_v52 = vrot.slane %v2128_v42, 5  ;;  %v3113_v57 = vpack.c.b16 %v3085_v53, %v3084_v55  ;;  %v2140_v55 = vrot.slane %v2138_v27, 5 }
 0x206   : > { %v4112_v31 = vpop.f32.mrf.mxu3  ;;  %4672 = vst [vmem:[#allocation2 + $0x54] sm:$0xf] %v14418_v20  ;;  %v2146_v27 = vshll.u32 %v1984_v4, 16 }
 0x207   : > { %v4113_v50 = vadd.f32 %v4112_v31, %v4024_v40  ;;  %v2507_v31 = vrot.slane %v1985_v13, 5 }
 0x208   : > { %v12085_v30 = vpop.f32.mrf.mxu1 }
 0x209   : > { %v4202_v43 = vadd.f32 %v12022_v11, %v4113_v50  ;;  %v4028_v40 = vpop.f32.mrf.mxu2  ;;  %v2134_v11 = vrot.slane %v2132_v47, 4  ;;  %v2125_v50 = vor.u32 %v2124_v26, %v2121_v10  ;;  %v9152_v47 = vrot.slane %v2411_v60, 9  ;;  %v14430_v10 = vld [vmem:[#allocation11_spill] sm:$0xff] }
 0x20a   : > { %v4029_v48 = vadd.f32 %v4028_v40, %v14427_v0  ;;  %v12095_v1 = vpop.f32.mrf.mxu0  ;;  %v2509_v9 = vrot.slane %v2507_v31, 4 }
 0x20b   : > { %v12091_v58 = vadd.f32 %v12050_v8, %v4202_v43  ;;  %v2135_v39 = vor.u32 %v2134_v11, %v2130_v52  ;;  %v2508_v0 = vsel %vm11251_vm13, %v9152_v47, %v2507_v31  ;;  %v2156_v47 = vshrl.u32 %v1985_v13, 16 }
 0x20c   : > { %v3152_v31 = vunpack.c.l.b16 %v2508_v0  ;;  %v2148_v0 = vrot.slane %v2146_v27, 5 }
 0x20d   : > { %14426 = vst [vmem:[#allocation9_spill] sm:$0xff] %v12091_v58  ;;  %v12098_v8 = vld [vmem:[#allocation2 + $0x54] sm:$0xff]  ;;  %4526 = vmatmul.bf16.gmra.mxu0 %v3178_v44  ;;  %v2136_v25 = vrot.slane %v2135_v39, 4  ;;  %v2143_v39 = vshrl.u32 %v1984_v4, 16  ;;  %v1986_v4 = vld [vmem:[#allocation2 + $0x60] sm:$0xf] }
 0x20e   : > { %v4114_v17 = vpop.f32.mrf.mxu3  ;;  %4673 = vst [vmem:[#allocation2 + $0x58] sm:$0xf] %v14418_v20 }
 0x20f   : > { %v4115_v46 = vadd.f32 %v4114_v17, %v4026_v7  ;;  %v2126_v7 = vrot.slane %v2125_v50, 4  ;;  %v10343_v17 = vld [vmem:[%s14385_s3 + $0x8] sm:$0xff] }
 0x210   : > { %v12105_v40 = vpop.f32.mrf.mxu1  ;;  %8175 = vmatpush.bf16.msra.mxu1 %v10343_v17 }
 0x211   : > { %v12102_v42 = vadd.f32 %v12035_v14, %v4115_v46  ;;  %v4030_v43 = vpop.f32.mrf.mxu2  ;;  %14429 = vst [vmem:[#allocation20_spill] sm:$0xff] %v12105_v40  ;;  %v2511_v14 = vsel %vm11251_vm13, %v2509_v9, %v2510_v59  ;;  %v2131_v11 = vsel %vm10806_vm5, %v2126_v7, %v2130_v52  ;;  %v2152_v46 = vshll.u32 %v1985_v13, 16  ;;  %v12123_v52 = vld [vmem:[#allocation2 + $0x68] sm:$0x1] }
 0x212   : > { %v4031_v26 = vadd.f32 %v4030_v43, %v14430_v10  ;;  %v12108_v53 = vpop.f32.mrf.mxu0  ;;  %v3153_v50 = vunpack.c.l.b16 %v2511_v14  ;;  %v2412_v43 = vld [vmem:[#allocation2 + $0x60] sm:$0xe]  ;;  %4677 = vst [vmem:[#allocation2 + $0x68] sm:$0x1] %v14418_v20  ;;  %v14431_v10 = vld [vmem:[#allocation12_spill] sm:$0xff] }
 0x213   : > { %14428 = vst [vmem:[#allocation10_spill] sm:$0xff] %v12102_v42  ;;  %4432 = vmatmul.bf16.gmra.mxu3 %v3113_v57  ;;  %v2141_v57 = vsel %vm10806_vm5, %v2136_v25, %v2140_v55  ;;  %v2145_v55 = vrot.slane %v2143_v39, 4  ;;  %v2154_v14 = vrot.slane %v2152_v46, 5  ;;  %v2162_v39 = vshll.u32 %v12087_v28, 16 }
 0x214   : > { %4675 = vst [vmem:[#allocation2 + $0x60] sm:$0xf] %v14418_v20  ;;  %v3179_v13 = vpack.c.b16 %v3153_v50, %v3152_v31  ;;  %v9153_v31 = vrot.slane %v2412_v43, 9  ;;  %v2517_v46 = vrot.slane %v12123_v52, 5 }
 0x215   : > { %4348 = vmatmul.bf16.gmra.mxu2 %v12063_v34  ;;  %v3087_v34 = vunpack.c.l.b16 %v2141_v57  ;;  %v2149_v58 = vor.u32 %v2148_v0, %v2145_v55  ;;  %v2167_v55 = vshrl.u32 %v1986_v4, 16  ;;  %v2170_v0 = vshll.u32 %v1986_v4, 16 }
 0x216   : > { %v4117_v60 = vpop.f32.mrf.mxu3 }
 0x217   : > { %v4118_v44 = vadd.f32 %v4117_v60, %v4029_v48  ;;  %v3086_v48 = vunpack.c.l.b16 %v2131_v11  ;;  %v2158_v60 = vrot.slane %v2156_v47, 4  ;;  %v1987_v11 = vld [vmem:[#allocation2 + $0x64] sm:$0xf] }
 0x218   : > { %v2514_v57 = vrot.slane %v1987_v11, 5  ;;  %v2180_v43 = vshrl.u32 %v1987_v11, 16 }
 0x219   : > { %v4207_v9 = vadd.f32 %v12060_v38, %v4118_v44  ;;  %v4033_v59 = vpop.f32.mrf.mxu2  ;;  %v4300_v38 = vpop.f32.mrf.mxu1  ;;  %v3114_v42 = vpack.c.b16 %v3087_v34, %v3086_v48  ;;  %v2150_v34 = vrot.slane %v2149_v58, 4 }
 0x21a   : > { %v4034_v25 = vadd.f32 %v4033_v59, %v14431_v10  ;;  %v12131_v44 = vpop.f32.mrf.mxu0  ;;  %v2516_v50 = vrot.slane %v2514_v57, 4  ;;  %v2164_v10 = vrot.slane %v2162_v39, 5  ;;  %v2515_v28 = vsel %vm11251_vm13, %v9153_v31, %v2514_v57 }
 0x21b   : > { %v12127_v7 = vadd.f32 %v12085_v30, %v4207_v9  ;;  %v12133_v30 = vld [vmem:[#allocation2 + $0x60] sm:$0xff]  ;;  %v2159_v9 = vor.u32 %v2158_v60, %v2154_v14  ;;  %v2155_v58 = vsel %vm10806_vm5, %v2150_v34, %v2154_v14  ;;  %v2169_v57 = vrot.slane %v2167_v55, 4  ;;  %v1989_v55 = vld [vmem:[#allocation2 + $0x70] sm:$0xf] }
 0x21c   : > { %4676 = vst [vmem:[#allocation2 + $0x64] sm:$0xf] %v14418_v20  ;;  %v3088_v34 = vunpack.c.l.b16 %v2155_v58 }
 0x21d   : > { %4531 = vmatmul.bf16.gmra.mxu0 %v3179_v13  ;;  %v2160_v59 = vrot.slane %v2159_v9, 4  ;;  %v3154_v9 = vunpack.c.l.b16 %v2515_v28 }
 0x21e   : > { %v4119_v17 = vpop.f32.mrf.mxu3 }
 0x21f   : > { %v4120_v40 = vadd.f32 %v4119_v17, %v4031_v26  ;;  %v14433_v26 = vld [vmem:[#allocation13_spill] sm:$0xff]  ;;  %v2165_v4 = vsel %vm10806_vm5, %v2160_v59, %v2164_v10  ;;  %v14436_v10 = vld [vmem:[#allocation14_spill] sm:$0xff] }
 0x220   : > { %v3089_v59 = vunpack.c.l.b16 %v2165_v4 }
 0x221   : > { %v12138_v27 = vadd.f32 %v12073_v36, %v4120_v40  ;;  %v4035_v47 = vpop.f32.mrf.mxu2  ;;  %v2518_v36 = vsel %vm11251_vm13, %v2516_v50, %v2517_v46  ;;  %v2176_v40 = vshll.u32 %v1987_v11, 16  ;;  %v12148_v17 = vpop.f32.mrf.mxu1  ;;  %v2172_v50 = vrot.slane %v2170_v0, 5 }
 0x222   : > { %v4036_v48 = vadd.f32 %v4035_v47, %v14433_v26  ;;  %v12142_v13 = vpop.f32.mrf.mxu0  ;;  %14434 = vst [vmem:[#allocation12_spill] sm:$0xff] %v12148_v17  ;;  %v3155_v39 = vunpack.c.l.b16 %v2518_v36  ;;  %v2182_v11 = vrot.slane %v2180_v43, 4  ;;  %v12158_v47 = vld [vmem:[#allocation2 + $0x74] sm:$0x1]  ;;  %v2413_v26 = vld [vmem:[#allocation2 + $0x6c] sm:$0xe]  ;;  %v3115_v17 = vpack.c.b16 %v3089_v59, %v3088_v34 }
 0x223   : > { %14432 = vst [vmem:[#allocation11_spill] sm:$0xff] %v12138_v27  ;;  %4437 = vmatmul.bf16.gmra.mxu3 %v3114_v42  ;;  %v12156_v46 = vrot.slane %v2176_v40, 5  ;;  %v2521_v36 = vrot.slane %v1989_v55, 5  ;;  %v2173_v43 = vor.u32 %v2172_v50, %v2169_v57 }
 0x224   : > { %4680 = vst [vmem:[#allocation2 + $0x74] sm:$0x1] %v14418_v20 }
 0x225   : > { %4353 = vmatmul.bf16.gmra.mxu2 %v12098_v8  ;;  %v1988_v8 = vld [vmem:[#allocation2 + $0x6c] sm:$0xf]  ;;  %v2174_v50 = vrot.slane %v2173_v43, 4 }
 0x226   : > { %v4122_v60 = vpop.f32.mrf.mxu3  ;;  %4678 = vst [vmem:[#allocation2 + $0x6c] sm:$0xf] %v14418_v20  ;;  %v2191_v59 = vshrl.u32 %v1988_v8, 16 }
 0x227   : > { %v4123_v42 = vadd.f32 %v4122_v60, %v4034_v25  ;;  %v2183_v60 = vor.u32 %v2182_v11, %v12156_v46 }
 0x229   : > { %v4212_v31 = vadd.f32 %v12095_v1, %v4123_v42  ;;  %v4038_v25 = vpop.f32.mrf.mxu2  ;;  %v3180_v1 = vpack.c.b16 %v3155_v39, %v3154_v9  ;;  %v4305_v58 = vpop.f32.mrf.mxu1  ;;  %v9154_v9 = vrot.slane %v2413_v26, 9  ;;  %v2523_v39 = vrot.slane %v2521_v36, 4 }
 0x22a   : > { %v4039_v28 = vadd.f32 %v4038_v25, %v14436_v10  ;;  %v12165_v0 = vpop.f32.mrf.mxu0  ;;  %v2524_v25 = vrot.slane %v12158_v47, 5  ;;  %v2184_v11 = vrot.slane %v2183_v60, 4  ;;  %v2194_v10 = vshll.u32 %v1988_v8, 16 }
 0x22b   : > { %v12161_v14 = vadd.f32 %v4300_v38, %v4212_v31  ;;  %v2186_v38 = vshll.u32 %v12123_v52, 16 }
 0x22c   : > { %v2525_v26 = vsel %vm11251_vm13, %v2523_v39, %v2524_v25  ;;  %v2196_v60 = vrot.slane %v2194_v10, 5  ;;  %v14441_v10 = vld [vmem:[#allocation16_spill] sm:$0xff] }
 0x22d   : > { %14435 = vst [vmem:[#allocation13_spill] sm:$0xff] %v12161_v14  ;;  %v12169_v31 = vld [vmem:[#allocation2 + $0x6c] sm:$0xff]  ;;  %4536 = vmatmul.bf16.gmra.mxu0 %v3180_v1  ;;  %v2188_v52 = vrot.slane %v2186_v38, 5  ;;  %v2204_v1 = vshrl.u32 %v1989_v55, 16 }
 0x22e   : > { %v4124_v40 = vpop.f32.mrf.mxu3  ;;  %4679 = vst [vmem:[#allocation2 + $0x70] sm:$0xf] %v14418_v20 }
 0x22f   : > { %v4125_v42 = vadd.f32 %v4124_v40, %v4036_v48  ;;  %v14438_v48 = vld [vmem:[#allocation15_spill] sm:$0xff]  ;;  %v2200_v40 = vshll.u32 %v1989_v55, 16  ;;  %v2189_v8 = vsel %vm10806_vm5, %v2184_v11, %v2188_v52  ;;  %v2193_v55 = vrot.slane %v2191_v59, 4  ;;  %v1990_v11 = vld [vmem:[#allocation2 + $0x78] sm:$0xf] }
 0x230   : > { %v2206_v25 = vrot.slane %v2204_v1, 4  ;;  %v3091_v59 = vunpack.c.l.b16 %v2189_v8 }
 0x231   : > { %v12173_v4 = vadd.f32 %v12108_v53, %v4125_v42  ;;  %v4040_v57 = vpop.f32.mrf.mxu2  ;;  %v2522_v53 = vsel %vm11251_vm13, %v9154_v9, %v2521_v36  ;;  %v10342_v36 = vld [vmem:[%s14385_s3] sm:$0xff]  ;;  %v3157_v9 = vunpack.c.l.b16 %v2525_v26  ;;  %v2202_v39 = vrot.slane %v2200_v40, 5 }
 0x232   : > { %v4041_v34 = vadd.f32 %v4040_v57, %v14438_v48  ;;  %v12177_v14 = vpop.f32.mrf.mxu0  ;;  %v3156_v38 = vunpack.c.l.b16 %v2522_v53  ;;  %8176 = vmatpush.bf16.msra.mxu1 %v10342_v36  ;;  %v2210_v26 = vshll.u32 %v12158_v47, 16 }
 0x233   : > { %14437 = vst [vmem:[#allocation14_spill] sm:$0xff] %v12173_v4  ;;  %4442 = vmatmul.bf16.gmra.mxu3 %v3115_v17  ;;  %v2179_v17 = vsel %vm10806_vm5, %v2174_v50, %v12156_v46  ;;  %v12193_v46 = vld [vmem:[#allocation2 + $0x80] sm:$0x1]  ;;  %v2414_v50 = vld [vmem:[#allocation2 + $0x78] sm:$0xe]  ;;  %v2207_v1 = vor.u32 %v2206_v25, %v2202_v39 }
 0x234   : > { %4683 = vst [vmem:[#allocation2 + $0x80] sm:$0x1] %v14418_v20  ;;  %v3090_v52 = vunpack.c.l.b16 %v2179_v17  ;;  %v3181_v40 = vpack.c.b16 %v3157_v9, %v3156_v38  ;;  %v2531_v38 = vrot.slane %v12193_v46, 5  ;;  %v14443_v25 = vld [vmem:[#allocation17_spill] sm:$0xff] }
 0x235   : > { %4358 = vmatmul.bf16.gmra.mxu2 %v12133_v30  ;;  %4681 = vst [vmem:[#allocation2 + $0x78] sm:$0xf] %v14418_v20  ;;  %v2208_v8 = vrot.slane %v2207_v1, 4 }
 0x236   : > { %v4127_v42 = vpop.f32.mrf.mxu3  ;;  %v3116_v27 = vpack.c.b16 %v3091_v59, %v3090_v52 }
 0x237   : > { %v4128_v43 = vadd.f32 %v4127_v42, %v4039_v28  ;;  %v12195_v28 = vpop.f32.mrf.mxu1  ;;  %v1991_v42 = vld [vmem:[#allocation2 + $0x7c] sm:$0xf] }
 0x238   : > { %14439 = vst [vmem:[#allocation15_spill] sm:$0xff] %v12195_v28  ;;  %v2528_v36 = vrot.slane %v1991_v42, 5 }
 0x239   : > { %v4217_v57 = vadd.f32 %v12131_v44, %v4128_v43  ;;  %v4043_v30 = vpop.f32.mrf.mxu2  ;;  %v2197_v44 = vor.u32 %v2196_v60, %v2193_v55  ;;  %v9155_v60 = vrot.slane %v2414_v50, 9 }
 0x23a   : > { %v4044_v53 = vadd.f32 %v4043_v30, %v14441_v10  ;;  %v12203_v43 = vpop.f32.mrf.mxu0  ;;  %v2530_v47 = vrot.slane %v2528_v36, 4  ;;  %v2215_v10 = vshrl.u32 %v1990_v11, 16 }
 0x23b   : > { %v12198_v48 = vadd.f32 %v4305_v58, %v4217_v57  ;;  %v2198_v17 = vrot.slane %v2197_v44, 4  ;;  %v2212_v57 = vrot.slane %v2210_v26, 5  ;;  %v2228_v44 = vshrl.u32 %v1991_v42, 16 }
 0x23c   : > { %v12205_v58 = vld [vmem:[#allocation2 + $0x78] sm:$0xff] }
 0x23d   : > { %14440 = vst [vmem:[#allocation21_spill] sm:$0xff] %v12198_v48  ;;  %4541 = vmatmul.bf16.gmra.mxu0 %v3181_v40  ;;  %v2203_v30 = vsel %vm10806_vm5, %v2198_v17, %v2202_v39  ;;  %v2213_v52 = vsel %vm10806_vm5, %v2208_v8, %v2212_v57  ;;  %v2224_v40 = vshll.u32 %v1991_v42, 16 }
 0x23e   : > { %v4129_v28 = vpop.f32.mrf.mxu3  ;;  %4682 = vst [vmem:[#allocation2 + $0x7c] sm:$0xf] %v14418_v20  ;;  %v3092_v8 = vunpack.c.l.b16 %v2203_v30  ;;  %v3093_v57 = vunpack.c.l.b16 %v2213_v52 }
 0x23f   : > { %v4130_v4 = vadd.f32 %v4129_v28, %v4041_v34  ;;  %v4310_v28 = vpop.f32.mrf.mxu1 }
 0x241   : > { %v12209_v55 = vadd.f32 %v12142_v13, %v4130_v4  ;;  %v4045_v9 = vpop.f32.mrf.mxu2  ;;  %v2529_v13 = vsel %vm11251_vm13, %v9155_v60, %v2528_v36  ;;  %v2532_v4 = vsel %vm11251_vm13, %v2530_v47, %v2531_v38  ;;  %v2226_v60 = vrot.slane %v2224_v40, 5  ;;  %v12225_v47 = vld [vmem:[#allocation2 + $0x8c] sm:$0x1] }
 0x242   : > { %v4046_v34 = vadd.f32 %v4045_v9, %v14443_v25  ;;  %v12217_v59 = vpop.f32.mrf.mxu0  ;;  %v3158_v39 = vunpack.c.l.b16 %v2529_v13  ;;  %v3159_v26 = vunpack.c.l.b16 %v2532_v4  ;;  %v2217_v25 = vrot.slane %v2215_v10, 4  ;;  %4686 = vst [vmem:[#allocation2 + $0x8c] sm:$0x1] %v14418_v20  ;;  %v1993_v4 = vld [vmem:[#allocation2 + $0x88] sm:$0xf] }
 0x243   : > { %14442 = vst [vmem:[#allocation16_spill] sm:$0xff] %v12209_v55  ;;  %4447 = vmatmul.bf16.gmra.mxu3 %v3116_v27  ;;  %v2218_v27 = vshll.u32 %v1990_v11, 16  ;;  %v2230_v55 = vrot.slane %v2228_v44, 4  ;;  %v14445_v11 = vld [vmem:[#allocation18_spill] sm:$0xff]  ;;  %v2535_v30 = vrot.slane %v1993_v4, 5  ;;  %v3117_v10 = vpack.c.b16 %v3093_v57, %v3092_v8 }
 0x244   : > { %v3182_v13 = vpack.c.b16 %v3159_v26, %v3158_v39 }
 0x245   : > { %4363 = vmatmul.bf16.gmra.mxu2 %v12169_v31  ;;  %v2220_v36 = vrot.slane %v2218_v27, 5  ;;  %v1992_v31 = vld [vmem:[#allocation2 + $0x84] sm:$0xf]  ;;  %v2231_v44 = vor.u32 %v2230_v55, %v2226_v60 }
 0x246   : > { %v4132_v50 = vpop.f32.mrf.mxu3  ;;  %v10294_v27 = vld [vmem:[#allocation2] sm:$0xff] }
 0x247   : > { %v4133_v1 = vadd.f32 %v4132_v50, %v4044_v53  ;;  %v2415_v53 = vld [vmem:[#allocation2 + $0x84] sm:$0xe]  ;;  %v12234_v50 = vpop.f32.mrf.mxu1  ;;  %v2221_v40 = vor.u32 %v2220_v36, %v2217_v25  ;;  %8177 = vmatmul.bf16.vlgmr.msra.gmra.mxu1 %v10294_v27  ;;  %v2232_v25 = vrot.slane %v2231_v44, 4  ;;  %v2239_v27 = vshrl.u32 %v1992_v31, 16 }
 0x248   : > { %4684 = vst [vmem:[#allocation2 + $0x84] sm:$0xf] %v14418_v20  ;;  %v9156_v26 = vrot.slane %v2415_v53, 9 }
 0x249   : > { %v4222_v17 = vadd.f32 %v12165_v0, %v4133_v1  ;;  %v4048_v9 = vpop.f32.mrf.mxu2  ;;  %14446 = vst [vmem:[#allocation18_spill] sm:$0xff] %v12234_v50  ;;  %v2234_v1 = vshll.u32 %v12193_v46, 16  ;;  %v2222_v55 = vrot.slane %v2221_v40, 4  ;;  %v2241_v50 = vrot.slane %v2239_v27, 4 }
 0x24a   : > { %v4049_v42 = vadd.f32 %v4048_v9, %v14445_v11  ;;  %v12232_v0 = vpop.f32.mrf.mxu0  ;;  %v2537_v9 = vrot.slane %v2535_v30, 4  ;;  %v2538_v11 = vrot.slane %v12225_v47, 5 }
 0x24b   : > { %v12227_v38 = vadd.f32 %v4310_v28, %v4222_v17  ;;  %v2236_v46 = vrot.slane %v2234_v1, 5  ;;  %v2227_v40 = vsel %vm10806_vm5, %v2222_v55, %v2226_v60  ;;  %v2416_v55 = vld [vmem:[#allocation2 + $0x90] sm:$0xe] }
 0x24d   : > { %14444 = vst [vmem:[#allocation17_spill] sm:$0xff] %v12227_v38  ;;  %4546 = vmatmul.bf16.gmra.mxu0 %v3182_v13  ;;  %v2536_v13 = vsel %vm11251_vm13, %v9156_v26, %v2535_v30  ;;  %v2237_v44 = vsel %vm10806_vm5, %v2232_v25, %v2236_v46  ;;  %v1994_v25 = vld [vmem:[#allocation2 + $0x90] sm:$0xf] }
 0x24e   : > { %v4134_v52 = vpop.f32.mrf.mxu3  ;;  %v3160_v1 = vunpack.c.l.b16 %v2536_v13  ;;  %v3095_v60 = vunpack.c.l.b16 %v2237_v44  ;;  %4687 = vst [vmem:[#allocation2 + $0x90] sm:$0xf] %v14418_v20 }
 0x24f   : > { %v4135_v28 = vadd.f32 %v4134_v52, %v4046_v34  ;;  %v12237_v17 = vld [vmem:[#allocation2 + $0x84] sm:$0xff]  ;;  %v10357_v52 = vld [vmem:[%s14385_s3 + $0x78] sm:$0xff]  ;;  %v4315_v30 = vpop.f32.mrf.mxu1 }
 0x250   : > { %4685 = vst [vmem:[#allocation2 + $0x88] sm:$0xf] %v14418_v20  ;;  %v14448_v34 = vld [vmem:[#allocation19_spill] sm:$0xff]  ;;  %8258 = vmatpush.bf16.msrb.mxu2 %v10357_v52  ;;  %v1995_v52 = vld [vmem:[#allocation2 + $0x94] sm:$0xf] }
 0x251   : > { %v12240_v39 = vadd.f32 %v12177_v14, %v4135_v28  ;;  %v4050_v8 = vpop.f32.mrf.mxu2  ;;  %v2539_v14 = vsel %vm11251_vm13, %v2537_v9, %v2538_v11  ;;  %v2248_v9 = vshll.u32 %v1993_v4, 16  ;;  %v2252_v11 = vshrl.u32 %v1993_v4, 16 }
 0x252   : > { %v4051_v57 = vadd.f32 %v4050_v8, %v14448_v34  ;;  %v12245_v36 = vpop.f32.mrf.mxu0  ;;  %v3161_v26 = vunpack.c.l.b16 %v2539_v14  ;;  %v2542_v4 = vrot.slane %v1995_v52, 5 }
 0x253   : > { %14447 = vst [vmem:[#allocation22_spill] sm:$0xff] %v12240_v39  ;;  %4452 = vmatmul.bf16.gmra.mxu3 %v3117_v10  ;;  %v2242_v10 = vshll.u32 %v1992_v31, 16  ;;  %v2250_v13 = vrot.slane %v2248_v9, 5  ;;  %v2254_v14 = vrot.slane %v2252_v11, 4  ;;  %v9157_v11 = vrot.slane %v2416_v55, 9 }
 0x254   : > { %v3183_v46 = vpack.c.b16 %v3161_v26, %v3160_v1  ;;  %v2258_v1 = vshll.u32 %v12225_v47, 16  ;;  %v2263_v47 = vshrl.u32 %v1994_v25, 16 }
 0x255   : > { %4368 = vmatmul.bf16.gmra.mxu2 %v12205_v58  ;;  %v2244_v31 = vrot.slane %v2242_v10, 5  ;;  %v12272_v26 = vld [vmem:[#allocation2 + $0x90] sm:$0xff] }
 0x256   : > { %v4137_v53 = vpop.f32.mrf.mxu3  ;;  %4688 = vst [vmem:[#allocation2 + $0x94] sm:$0xf] %v14418_v20 }
 0x257   : > { %v4138_v28 = vadd.f32 %v4137_v53, %v4049_v42  ;;  %v12260_v42 = vld [vmem:[#allocation2 + $0x98] sm:$0x1]  ;;  %v3094_v53 = vunpack.c.l.b16 %v2227_v40  ;;  %v2245_v44 = vor.u32 %v2244_v31, %v2241_v50 }
 0x258   : > { %4689 = vst [vmem:[#allocation2 + $0x98] sm:$0x1] %v14418_v20  ;;  %v10365_v40 = vld [vmem:[%s14385_s3 + $0xb8] sm:$0xff] }
 0x259   : > { %v4227_v8 = vadd.f32 %v12203_v43, %v4138_v28  ;;  %v4329_v34 = vpop.f32.mrf.mxu2  ;;  %v3118_v28 = vpack.c.b16 %v3095_v60, %v3094_v53  ;;  %8347 = vmatpush.bf16.msrb.mxu3 %v10365_v40  ;;  %v2246_v31 = vrot.slane %v2245_v44, 4  ;;  %v2276_v40 = vshrl.u32 %v1995_v52, 16 }
 0x25a   : > { %v12266_v43 = vpop.f32.mrf.mxu0  ;;  %v4330_v50 = vadd.f32 %v4329_v34, %v11677_v6  ;;  %v10373_v6 = vld [vmem:[%s14385_s3 + $0xf8] sm:$0xff] }
 0x25b   : > { %v12262_v58 = vadd.f32 %v4315_v30, %v4227_v8  ;;  %v2255_v30 = vor.u32 %v2254_v14, %v2250_v13  ;;  %v2544_v8 = vrot.slane %v2542_v4, 4  ;;  %v2266_v14 = vshll.u32 %v1994_v25, 16  ;;  %v10381_v34 = vld [vmem:[%s14385_s3 + $0x138] sm:$0xff]  ;;  %8436 = vmatpush.bf16.msrb.mxu0 %v10373_v6 }
 0x25c   : > { %8525 = vmatpush.bf16.msrb.mxu1 %v10381_v34  ;;  %v2282_v34 = vshll.u32 %v12260_v42, 16 }
 0x25d   : > { %14449 = vst [vmem:[#allocation19_spill] sm:$0xff] %v12262_v58  ;;  %4551 = vmatmul.bf16.gmra.mxu0 %v3183_v46  ;;  %v2256_v60 = vrot.slane %v2255_v30, 4  ;;  %v2260_v46 = vrot.slane %v2258_v1, 5  ;;  %v2265_v30 = vrot.slane %v2263_v47, 4  ;;  %v12302_v58 = vld [vmem:[#allocation2 + $0x9c] sm:$0xf] }
 0x25e   : > { %v4139_v27 = vpop.f32.mrf.mxu3 }
 0x25f   : > { %v4140_v10 = vadd.f32 %v4139_v27, %v4051_v57  ;;  %v2545_v57 = vrot.slane %v12260_v42, 5 }
 0x261   : > { %v12275_v9 = vadd.f32 %v12217_v59, %v4140_v10  ;;  %v4331_v53 = vpop.f32.mrf.mxu2  ;;  %v2543_v59 = vsel %vm11251_vm13, %v9157_v11, %v2542_v4  ;;  %v2546_v55 = vsel %vm11251_vm13, %v2544_v8, %v2545_v57  ;;  %v2272_v10 = vshll.u32 %v1995_v52, 16 }
 0x262   : > { %v12280_v27 = vpop.f32.mrf.mxu0  ;;  %v2251_v4 = vsel %vm10806_vm5, %v2246_v31, %v2250_v13  ;;  %v3162_v52 = vunpack.c.l.b16 %v2543_v59  ;;  %v3163_v44 = vunpack.c.l.b16 %v2546_v55  ;;  %v2268_v11 = vrot.slane %v2266_v14, 5  ;;  %v2417_v59 = vld [vmem:[#allocation2 + $0x9c] sm:$0xe] }
 0x263   : > { %14450 = vst [vmem:[#allocation23_spill] sm:$0xff] %v12275_v9  ;;  %4457 = vmatmul.bf16.gmra.mxu3 %v3118_v28  ;;  %v2261_v28 = vsel %vm10806_vm5, %v2256_v60, %v2260_v46  ;;  %v12298_v8 = vrot.slane %v2272_v10, 5  ;;  %v2278_v57 = vrot.slane %v2276_v40, 4  ;;  %v4332_v31 = vadd.f32 %v4331_v53, %v11693_v2 }
 0x264   : > { %v3096_v60 = vunpack.c.l.b16 %v2251_v4  ;;  %v3097_v46 = vunpack.c.l.b16 %v2261_v28  ;;  %v3184_v47 = vpack.c.b16 %v3163_v44, %v3162_v52  ;;  %4690 = vst [vmem:[#allocation2 + $0x9c] sm:$0xf] %v14418_v20  ;;  %v2269_v40 = vor.u32 %v2268_v11, %v2265_v30  ;;  %v5027_v11 = vld [vmem:[#allocation2 + $0xc] sm:$0xf] }
 0x265   : > { %4373 = vmatmul.bf16.gmra.mxu2 %v12237_v17  ;;  %v12300_v17 = vld [vmem:[#allocation2 + $0xa4] sm:$0x1]  ;;  %v2279_v6 = vor.u32 %v2278_v57, %v12298_v8  ;;  %v9158_v28 = vrot.slane %v2417_v59, 9 }
 0x266   : > { %v4418_v9 = vpop.f32.mrf.mxu3  ;;  %4692 = vst [vmem:[#allocation2 + $0xa4] sm:$0x1] %v14418_v20  ;;  %v3119_v53 = vpack.c.b16 %v3097_v46, %v3096_v60  ;;  %v2552_v30 = vrot.slane %v12300_v17, 5  ;;  %v2284_v46 = vrot.slane %v2282_v34, 5 }
 0x267   : > { %v4419_v25 = vadd.f32 %v4418_v9, %v4330_v50  ;;  %v1997_v50 = vld [vmem:[#allocation2 + $0xa0] sm:$0xf]  ;;  %v2280_v60 = vrot.slane %v2279_v6, 4 }
 0x268   : > { %v2296_v59 = vshll.u32 %v1997_v50, 16 }
 0x269   : > { %v4508_v1 = vadd.f32 %v12232_v0, %v4419_v25  ;;  %v4334_v9 = vpop.f32.mrf.mxu2  ;;  %v2549_v0 = vrot.slane %v1997_v50, 5 }
 0x26a   : > { %v12307_v55 = vpop.f32.mrf.mxu0 }
 0x26b   : > { %v4587_v13 = vmax.f32 %v4508_v1, 0.0  ;;  %v12311_v4 = vld [vmem:[#allocation2 + $0x9c] sm:$0xff]  ;;  %v2551_v52 = vrot.slane %v2549_v0, 4 }
 0x26c   : > { %4691 = vst [vmem:[#allocation2 + $0xa0] sm:$0xf] %v14418_v20 }
 0x26d   : > { %v4619_v14 = vpack.c.bf16 %v4587_v13, %v4587_v13  ;;  %4556 = vmatmul.bf16.gmra.mxu0 %v3184_v47  ;;  %v2553_v6 = vsel %vm11251_vm13, %v2551_v52, %v2552_v30 }
 0x26e   : > { %v4420_v10 = vpop.f32.mrf.mxu3  ;;  %v3165_v52 = vunpack.c.l.b16 %v2553_v6 }
 0x26f   : > { %v4706_v25 = vshrl.u32 %v4619_v14, 16  ;;  %v4421_v2 = vadd.f32 %v4420_v10, %v4332_v31  ;;  %v4709_v1 = vshll.u32 %v4619_v14, 16  ;;  %v2270_v31 = vrot.slane %v2269_v40, 4 }
 0x270   : > { %v2300_v10 = vshrl.u32 %v1997_v50, 16  ;;  %v2550_v40 = vsel %vm11251_vm13, %v9158_v28, %v2549_v0  ;;  %v10356_v50 = vld [vmem:[%s14385_s3 + $0x70] sm:$0xff]  ;;  %v12344_v0 = vrot.slane %v2296_v59, 5 }
 0x271   : > { %v12313_v44 = vrot.slane %v4706_v25, 7  ;;  %v4510_v13 = vadd.f32 %v12245_v36, %v4421_v2  ;;  %v4336_v57 = vpop.f32.mrf.mxu2  ;;  %v4335_v36 = vadd.f32 %v4334_v9, %v11722_v33  ;;  %v2287_v25 = vshrl.u32 %v12302_v58, 16  ;;  %8259 = vmatpush.bf16.msrb.mxu2 %v10356_v50 }
 0x272   : > { %v2290_v2 = vshll.u32 %v12302_v58, 16  ;;  %v12329_v48 = vpop.f32.mrf.mxu0  ;;  %v2275_v9 = vsel %vm10806_vm5, %v2270_v31, %v12298_v8  ;;  %v2285_v58 = vsel %vm10806_vm5, %v2280_v60, %v2284_v46  ;;  %v3164_v28 = vunpack.c.l.b16 %v2550_v40  ;;  %v5033_v60 = vld [vmem:[#allocation2 + $0x14] sm:$0x1]  ;;  %v2418_v40 = vld [vmem:[#allocation2 + $0xa8] sm:$0xe] }
 0x273   : > { %v4711_v47 = vor.u32 %v4709_v1, %v12313_v44  ;;  %v4588_v14 = vmax.f32 %v4510_v13, 0.0  ;;  %4462 = vmatmul.bf16.gmra.mxu3 %v3119_v53  ;;  %v2289_v1 = vrot.slane %v2287_v25, 4  ;;  %v4712_v8 = vrot.slane %v12313_v44, 4 }
 0x274   : > { %v2292_v13 = vrot.slane %v2290_v2, 5  ;;  %v3098_v46 = vunpack.c.l.b16 %v2275_v9  ;;  %v3099_v59 = vunpack.c.l.b16 %v2285_v58  ;;  %v4337_v2 = vadd.f32 %v4336_v57, %v11741_v37 }
 0x275   : > { %v5028_v39 = vsel %vm12319_vm15, %v4711_v47, %v5027_v11  ;;  %v4620_v38 = vpack.c.bf16 %v4588_v14, %v4588_v14  ;;  %4378 = vmatmul.bf16.gmra.mxu2 %v12272_v26  ;;  %v12354_v14 = vld [vmem:[#allocation2 + $0xac] sm:$0xf]  ;;  %v3185_v6 = vpack.c.b16 %v3165_v52, %v3164_v28 }
 0x276   : > { %5029 = vst [vmem:[#allocation2 + $0xc] sm:$0xf] %v5028_v39  ;;  %v4423_v33 = vpop.f32.mrf.mxu3  ;;  %v2302_v39 = vrot.slane %v2300_v10, 4  ;;  %v12358_v10 = vld [vmem:[#allocation2 + $0xa8] sm:$0xf]  ;;  %v2293_v37 = vor.u32 %v2292_v13, %v2289_v1 }
 0x277   : > { %v4714_v34 = vshrl.u32 %v4620_v38, 16  ;;  %v4424_v53 = vadd.f32 %v4423_v33, %v4335_v36  ;;  %v4717_v11 = vshll.u32 %v4620_v38, 16  ;;  %v12356_v36 = vld [vmem:[#allocation2 + $0xb0] sm:$0x1]  ;;  %4693 = vst [vmem:[#allocation2 + $0xa8] sm:$0xf] %v14418_v20 }
 0x278   : > { %4695 = vst [vmem:[#allocation2 + $0xb0] sm:$0x1] %v14418_v20  ;;  %v2303_v57 = vor.u32 %v2302_v39, %v12344_v0  ;;  %v5036_v13 = vld [vmem:[#allocation2 + $0x18] sm:$0xf] }
 0x279   : > { %v4716_v30 = vrot.slane %v4714_v34, 7  ;;  %v4513_v26 = vadd.f32 %v12266_v43, %v4424_v53  ;;  %v4339_v47 = vpop.f32.mrf.mxu2  ;;  %v2556_v43 = vrot.slane %v12354_v14, 5  ;;  %v2306_v53 = vshll.u32 %v12300_v17, 16 }
 0x27a   : > { %v12368_v50 = vpop.f32.mrf.mxu0  ;;  %v2559_v17 = vrot.slane %v12356_v36, 5 }
 0x27b   : > { %v4719_v44 = vor.u32 %v4717_v11, %v4716_v30  ;;  %v4721_v38 = vrot.slane %v4716_v30, 4  ;;  %v4589_v25 = vmax.f32 %v4513_v26, 0.0  ;;  %v3120_v30 = vpack.c.b16 %v3099_v59, %v3098_v46 }
 0x27c   : > { %v2558_v26 = vrot.slane %v2556_v43, 4  ;;  %v2294_v59 = vrot.slane %v2293_v37, 4 }
 0x27d   : > { %v4720_v33 = vsel %vm10860_vm9, %v4712_v8, %v4719_v44  ;;  %v5034_v9 = vsel %vm12349_vm2, %v4721_v38, %v5033_v60  ;;  %v4621_v58 = vpack.c.bf16 %v4589_v25, %v4589_v25  ;;  %v10364_v8 = vld [vmem:[%s14385_s3 + $0xb0] sm:$0xff]  ;;  %4561 = vmatmul.bf16.gmra.mxu0 %v3185_v6  ;;  %v9159_v60 = vrot.slane %v2418_v40, 9 }
 0x27e   : > { %5030 = vst [vmem:[#allocation2 + $0x10] sm:$0xf] %v4720_v33  ;;  %v4425_v34 = vpop.f32.mrf.mxu3  ;;  %v12375_v11 = vld [vmem:[#allocation2 + $0xa8] sm:$0xff]  ;;  %8348 = vmatpush.bf16.msrb.mxu3 %v10364_v8  ;;  %v2304_v38 = vrot.slane %v2303_v57, 4  ;;  %v2308_v25 = vrot.slane %v2306_v53, 5  ;;  %v4340_v33 = vadd.f32 %v4339_v47, %v11769_v41  ;;  %v2299_v47 = vsel %vm10806_vm5, %v2294_v59, %v12344_v0 }
 0x27f   : > { %5035 = vst [vmem:[#allocation2 + $0x14] sm:$0x1] %v5034_v9  ;;  %v4723_v28 = vshrl.u32 %v4621_v58, 16  ;;  %v4426_v52 = vadd.f32 %v4425_v34, %v4337_v2  ;;  %v4726_v1 = vshll.u32 %v4621_v58, 16  ;;  %v2320_v2 = vshll.u32 %v12354_v14, 16 }
 0x280   : > { %4694 = vst [vmem:[#allocation2 + $0xac] sm:$0xf] %v14418_v20  ;;  %v2314_v9 = vshll.u32 %v12358_v10, 16  ;;  %v2324_v58 = vshrl.u32 %v12354_v14, 16  ;;  %v2309_v14 = vsel %vm10806_vm5, %v2304_v38, %v2308_v25  ;;  %v5040_v25 = vld [vmem:[#allocation2 + $0x20] sm:$0x1] }
 0x281   : > { %v12377_v44 = vrot.slane %v4723_v28, 7  ;;  %v4515_v39 = vadd.f32 %v12280_v27, %v4426_v52  ;;  %v4341_v46 = vpop.f32.mrf.mxu2  ;;  %v2311_v27 = vshrl.u32 %v12358_v10, 16  ;;  %v2557_v28 = vsel %vm11251_vm13, %v9159_v60, %v2556_v43  ;;  %v10372_v10 = vld [vmem:[%s14385_s3 + $0xf0] sm:$0xff] }
 0x282   : > { %v12390_v53 = vpop.f32.mrf.mxu0  ;;  %v2560_v52 = vsel %vm11251_vm13, %v2558_v26, %v2559_v17  ;;  %v10380_v43 = vld [vmem:[%s14385_s3 + $0x130] sm:$0xff]  ;;  %v12408_v26 = vrot.slane %v2320_v2, 5  ;;  %8437 = vmatpush.bf16.msrb.mxu0 %v10372_v10  ;;  %v3166_v0 = vunpack.c.l.b16 %v2557_v28  ;;  %v2326_v17 = vrot.slane %v2324_v58, 4  ;;  %v12414_v2 = vld [vmem:[#allocation2 + $0xbc] sm:$0x1] }
 0x283   : > { %v4728_v40 = vor.u32 %v4726_v1, %v12377_v44  ;;  %v4590_v6 = vmax.f32 %v4515_v39, 0.0  ;;  %4467 = vmatmul.bf16.gmra.mxu3 %v3120_v30  ;;  %v2313_v60 = vrot.slane %v2311_v27, 4  ;;  %8526 = vmatpush.bf16.msrb.mxu1 %v10380_v43  ;;  %v3167_v1 = vunpack.c.l.b16 %v2560_v52  ;;  %v2000_v27 = vld [vmem:[#allocation2 + $0xb4] sm:$0xf]  ;;  %4698 = vst [vmem:[#allocation2 + $0xbc] sm:$0x1] %v14418_v20 }
 0x284   : > { %v2316_v39 = vrot.slane %v2314_v9, 5  ;;  %v4342_v9 = vadd.f32 %v4341_v46, %v11790_v29  ;;  %v2419_v58 = vld [vmem:[#allocation2 + $0xb4] sm:$0xe]  ;;  %v2327_v46 = vor.u32 %v2326_v17, %v12408_v26  ;;  %v2330_v43 = vshll.u32 %v12356_v36, 16 }
 0x285   : > { %v5037_v34 = vsel %vm12319_vm15, %v4728_v40, %v5036_v13  ;;  %v4622_v37 = vpack.c.bf16 %v4590_v6, %v4590_v6  ;;  %v10295_v57 = vld [vmem:[#allocation2 + $0xc] sm:$0xff]  ;;  %4383 = vmatmul.bf16.gmra.mxu2 %v12311_v4  ;;  %v4729_v13 = vrot.slane %v12377_v44, 4  ;;  %v3100_v6 = vunpack.c.l.b16 %v2299_v47  ;;  %v12412_v4 = vld [vmem:[#allocation2 + $0xb8] sm:$0xf]  ;;  %4696 = vst [vmem:[#allocation2 + $0xb4] sm:$0xf] %v14418_v20 }
 0x286   : > { %5038 = vst [vmem:[#allocation2 + $0x18] sm:$0xf] %v5037_v34  ;;  %v4428_v41 = vpop.f32.mrf.mxu3  ;;  %8182 = vmatmul.bf16.gmra.mxu1 %v10295_v57  ;;  %v3186_v44 = vpack.c.b16 %v3167_v1, %v3166_v0  ;;  %v2317_v29 = vor.u32 %v2316_v39, %v2313_v60  ;;  %v5043_v60 = vld [vmem:[#allocation2 + $0x24] sm:$0xf]  ;;  %v2328_v17 = vrot.slane %v2327_v46, 4 }
 0x287   : > { %v4731_v30 = vshrl.u32 %v4622_v37, 16  ;;  %v4429_v8 = vadd.f32 %v4428_v41, %v4340_v33  ;;  %v4734_v38 = vshll.u32 %v4622_v37, 16  ;;  %v3101_v33 = vunpack.c.l.b16 %v2309_v14 }
 0x288   : > { %v2563_v37 = vrot.slane %v12412_v4, 5  ;;  %v2318_v36 = vrot.slane %v2317_v29, 4 }
 0x289   : > { %v4733_v59 = vrot.slane %v4731_v30, 7  ;;  %v4518_v40 = vadd.f32 %v12307_v55, %v4429_v8  ;;  %v4344_v34 = vpop.f32.mrf.mxu2  ;;  %v3121_v0 = vpack.c.b16 %v3101_v33, %v3100_v6 }
 0x28a   : > { %v12424_v14 = vpop.f32.mrf.mxu0 }
 0x28b   : > { %v4736_v57 = vor.u32 %v4734_v38, %v4733_v59  ;;  %v4738_v28 = vrot.slane %v4733_v59, 4  ;;  %v4591_v52 = vmax.f32 %v4518_v40, 0.0  ;;  %v2565_v59 = vrot.slane %v2563_v37, 4 }
 0x28c   : > { %v12428_v1 = vld [vmem:[#allocation2 + $0xb4] sm:$0xff] }
 0x28d   : > { %v4737_v55 = vsel %vm10860_vm9, %v4729_v13, %v4736_v57  ;;  %v5041_v41 = vsel %vm12349_vm2, %v4738_v28, %v5040_v25  ;;  %v4623_v47 = vpack.c.bf16 %v4591_v52, %v4591_v52  ;;  %4566 = vmatmul.bf16.gmra.mxu0 %v3186_v44  ;;  %v9160_v13 = vrot.slane %v2419_v58, 9  ;;  %4697 = vst [vmem:[#allocation2 + $0xb8] sm:$0xf] %v14418_v20 }
 0x28e   : > { %5039 = vst [vmem:[#allocation2 + $0x1c] sm:$0xf] %v4737_v55  ;;  %v4430_v10 = vpop.f32.mrf.mxu3  ;;  %v2566_v57 = vrot.slane %v12414_v2, 5  ;;  %v2332_v28 = vrot.slane %v2330_v43, 5  ;;  %v2335_v52 = vshrl.u32 %v2000_v27, 16  ;;  %v2338_v58 = vshll.u32 %v2000_v27, 16 }
 0x28f   : > { %5042 = vst [vmem:[#allocation2 + $0x20] sm:$0x1] %v5041_v41  ;;  %v4740_v30 = vshrl.u32 %v4623_v47, 16  ;;  %v4431_v8 = vadd.f32 %v4430_v10, %v4342_v9  ;;  %v4743_v25 = vshll.u32 %v4623_v47, 16  ;;  %v4345_v9 = vadd.f32 %v4344_v34, %v11819_v22  ;;  %v10355_v27 = vld [vmem:[%s14385_s3 + $0x68] sm:$0xff] }
 0x290   : > { %v2344_v44 = vshll.u32 %v12412_v4, 16  ;;  %v2564_v29 = vsel %vm11251_vm13, %v9160_v13, %v2563_v37  ;;  %v2567_v46 = vsel %vm11251_vm13, %v2565_v59, %v2566_v57  ;;  %v2323_v34 = vsel %vm10806_vm5, %v2318_v36, %v12408_v26  ;;  %8260 = vmatpush.bf16.msrb.mxu2 %v10355_v27 }
 0x291   : > { %v4742_v38 = vrot.slane %v4740_v30, 7  ;;  %v4520_v40 = vadd.f32 %v12329_v48, %v4431_v8  ;;  %v4346_v39 = vpop.f32.mrf.mxu2  ;;  %v2348_v48 = vshrl.u32 %v12412_v4, 16  ;;  %v2333_v4 = vsel %vm10806_vm5, %v2328_v17, %v2332_v28 }
 0x292   : > { %v12438_v10 = vpop.f32.mrf.mxu0  ;;  %v2337_v37 = vrot.slane %v2335_v52, 4  ;;  %v2340_v8 = vrot.slane %v2338_v58, 5  ;;  %v3169_v13 = vunpack.c.l.b16 %v2567_v46  ;;  %v12453_v59 = vrot.slane %v2344_v44, 5  ;;  %v12460_v52 = vld [vmem:[#allocation2 + $0xc0] sm:$0xf] }
 0x293   : > { %v4745_v6 = vor.u32 %v4743_v25, %v4742_v38  ;;  %v4592_v33 = vmax.f32 %v4520_v40, 0.0  ;;  %4472 = vmatmul.bf16.gmra.mxu3 %v3121_v0  ;;  %v3168_v0 = vunpack.c.l.b16 %v2564_v29  ;;  %v2350_v26 = vrot.slane %v2348_v48, 4 }
 0x294   : > { %v4746_v25 = vrot.slane %v4742_v38, 4  ;;  %v3102_v17 = vunpack.c.l.b16 %v2323_v34  ;;  %v3103_v28 = vunpack.c.l.b16 %v2333_v4  ;;  %v4347_v48 = vadd.f32 %v4346_v39, %v11843_v12  ;;  %v2420_v38 = vld [vmem:[#allocation2 + $0xc0] sm:$0xe] }
 0x295   : > { %v5044_v55 = vsel %vm12319_vm15, %v4745_v6, %v5043_v60  ;;  %v4624_v41 = vpack.c.bf16 %v4592_v33, %v4592_v33  ;;  %v10296_v47 = vld [vmem:[#allocation2 + $0x18] sm:$0xff]  ;;  %4388 = vmatmul.bf16.gmra.mxu2 %v12375_v11  ;;  %v5047_v60 = vld [vmem:[#allocation2 + $0x2c] sm:$0x1]  ;;  %v12456_v33 = vld [vmem:[#allocation2 + $0xc4] sm:$0xf]  ;;  %v2341_v12 = vor.u32 %v2340_v8, %v2337_v37  ;;  %v2351_v39 = vor.u32 %v2350_v26, %v12453_v59 }
 0x296   : > { %5045 = vst [vmem:[#allocation2 + $0x24] sm:$0xf] %v5044_v55  ;;  %v4433_v22 = vpop.f32.mrf.mxu3  ;;  %8187 = vmatmul.bf16.gmra.mxu1 %v10296_v47  ;;  %v12458_v11 = vld [vmem:[#allocation2 + $0xc8] sm:$0x1]  ;;  %v3187_v55 = vpack.c.b16 %v3169_v13, %v3168_v0  ;;  %v2354_v34 = vshll.u32 %v12414_v2, 16  ;;  %v9161_v13 = vrot.slane %v2420_v38, 9 }
 0x297   : > { %v4748_v43 = vshrl.u32 %v4624_v41, 16  ;;  %v4434_v30 = vadd.f32 %v4433_v22, %v4345_v9  ;;  %v4751_v57 = vshll.u32 %v4624_v41, 16  ;;  %4701 = vst [vmem:[#allocation2 + $0xc8] sm:$0x1] %v14418_v20  ;;  %v2573_v2 = vrot.slane %v12458_v11, 5 }
 0x298   : > { %4699 = vst [vmem:[#allocation2 + $0xc0] sm:$0xf] %v14418_v20  ;;  %v5050_v26 = vld [vmem:[#allocation2 + $0x30] sm:$0xf]  ;;  %v2372_v38 = vshrl.u32 %v12456_v33, 16 }
 0x299   : > { %v4750_v40 = vrot.slane %v4748_v43, 7  ;;  %v4523_v36 = vadd.f32 %v12368_v50, %v4434_v30  ;;  %v4349_v6 = vpop.f32.mrf.mxu2  ;;  %v2570_v50 = vrot.slane %v12456_v33, 5  ;;  %v3122_v43 = vpack.c.b16 %v3103_v28, %v3102_v17  ;;  %v10363_v30 = vld [vmem:[%s14385_s3 + $0xa8] sm:$0xff] }
 0x29a   : > { %v12470_v46 = vpop.f32.mrf.mxu0  ;;  %8349 = vmatpush.bf16.msrb.mxu3 %v10363_v30  ;;  %v2356_v17 = vrot.slane %v2354_v34, 5  ;;  %v2359_v28 = vshrl.u32 %v12460_v52, 16 }
 0x29b   : > { %v4753_v9 = vor.u32 %v4751_v57, %v4750_v40  ;;  %v4755_v58 = vrot.slane %v4750_v40, 4  ;;  %v4593_v44 = vmax.f32 %v4523_v36, 0.0  ;;  %v2352_v36 = vrot.slane %v2351_v39, 4 }
 0x29d   : > { %v4754_v41 = vsel %vm10860_vm9, %v4746_v25, %v4753_v9  ;;  %v5048_v47 = vsel %vm12349_vm2, %v4755_v58, %v5047_v60  ;;  %v4625_v29 = vpack.c.bf16 %v4593_v44, %v4593_v44  ;;  %4571 = vmatmul.bf16.gmra.mxu0 %v3187_v55  ;;  %v2572_v25 = vrot.slane %v2570_v50, 4 }
 0x29e   : > { %5046 = vst [vmem:[#allocation2 + $0x28] sm:$0xf] %v4754_v41  ;;  %v4435_v22 = vpop.f32.mrf.mxu3  ;;  %v2342_v60 = vrot.slane %v2341_v12, 4  ;;  %v4350_v44 = vadd.f32 %v4349_v6, %v11866_v18 }
 0x29f   : > { %5049 = vst [vmem:[#allocation2 + $0x2c] sm:$0x1] %v5048_v47  ;;  %v4757_v4 = vshrl.u32 %v4625_v29, 16  ;;  %v4436_v27 = vadd.f32 %v4435_v22, %v4347_v48  ;;  %v12477_v0 = vld [vmem:[#allocation2 + $0xc0] sm:$0xff]  ;;  %v4760_v37 = vshll.u32 %v4625_v29, 16  ;;  %v2368_v48 = vshll.u32 %v12456_v33, 16 }
 0x2a0   : > { %4700 = vst [vmem:[#allocation2 + $0xc4] sm:$0xf] %v14418_v20  ;;  %v2571_v22 = vsel %vm11251_vm13, %v9161_v13, %v2570_v50  ;;  %v2574_v12 = vsel %vm11251_vm13, %v2572_v25, %v2573_v2  ;;  %v2347_v6 = vsel %vm10806_vm5, %v2342_v60, %v12453_v59  ;;  %v2357_v33 = vsel %vm10806_vm5, %v2352_v36, %v2356_v17  ;;  %v10379_v50 = vld [vmem:[%s14385_s3 + $0x128] sm:$0xff]  ;;  %v5054_v2 = vld [vmem:[#allocation2 + $0x38] sm:$0x1] }
 0x2a1   : > { %v12479_v40 = vrot.slane %v4757_v4, 7  ;;  %v4525_v8 = vadd.f32 %v12390_v53, %v4436_v27  ;;  %v4351_v57 = vpop.f32.mrf.mxu2  ;;  %v2362_v53 = vshll.u32 %v12460_v52, 16  ;;  %v10371_v52 = vld [vmem:[%s14385_s3 + $0xe8] sm:$0xff]  ;;  %v2361_v4 = vrot.slane %v2359_v28, 4  ;;  %8527 = vmatpush.bf16.msrb.mxu1 %v10379_v50  ;;  %v12515_v60 = vld [vmem:[#allocation2 + $0xd0] sm:$0xf] }
 0x2a2   : > { %v12492_v29 = vpop.f32.mrf.mxu0  ;;  %8438 = vmatpush.bf16.msrb.mxu0 %v10371_v52  ;;  %v3170_v59 = vunpack.c.l.b16 %v2571_v22  ;;  %v12510_v30 = vrot.slane %v2368_v48, 5  ;;  %v2374_v13 = vrot.slane %v2372_v38, 4  ;;  %v4263_v25 = vadd.f32 %v11838_v32, %v11887_v24  ;;  %v12522_v38 = vld [vmem:[#allocation2 + $0xd4] sm:$0x1] }
 0x2a3   : > { %v4762_v9 = vor.u32 %v4760_v37, %v12479_v40  ;;  %v4594_v58 = vmax.f32 %v4525_v8, 0.0  ;;  %4477 = vmatmul.bf16.gmra.mxu3 %v3122_v43  ;;  %v2364_v27 = vrot.slane %v2362_v53, 5  ;;  %v3171_v43 = vunpack.c.l.b16 %v2574_v12  ;;  %4704 = vst [vmem:[#allocation2 + $0xd4] sm:$0x1] %v14418_v20 }
 0x2a4   : > { %v3104_v36 = vunpack.c.l.b16 %v2347_v6  ;;  %v3105_v17 = vunpack.c.l.b16 %v2357_v33  ;;  %v4352_v24 = vadd.f32 %v4351_v57, %v4263_v25  ;;  %v10370_v6 = vld [vmem:[%s14385_s3 + $0xe0] sm:$0xff] }
 0x2a5   : > { %v5051_v55 = vsel %vm12319_vm15, %v4762_v9, %v5050_v26  ;;  %v4626_v41 = vpack.c.bf16 %v4594_v58, %v4594_v58  ;;  %v10297_v47 = vld [vmem:[#allocation2 + $0x24] sm:$0xff]  ;;  %4393 = vmatmul.bf16.gmra.mxu2 %v12428_v1  ;;  %v4763_v1 = vrot.slane %v12479_v40, 4  ;;  %v12518_v9 = vld [vmem:[#allocation2 + $0xcc] sm:$0xf]  ;;  %v2375_v40 = vor.u32 %v2374_v13, %v12510_v30 }
 0x2a6   : > { %5052 = vst [vmem:[#allocation2 + $0x30] sm:$0xf] %v5051_v55  ;;  %v4438_v18 = vpop.f32.mrf.mxu3  ;;  %8192 = vmatmul.bf16.gmra.mxu1 %v10297_v47  ;;  %v2421_v58 = vld [vmem:[#allocation2 + $0xcc] sm:$0xe]  ;;  %v2365_v55 = vor.u32 %v2364_v27, %v2361_v4  ;;  %v3123_v33 = vpack.c.b16 %v3105_v17, %v3104_v36  ;;  %8439 = vmatpush.bf16.msrb.mxu0 %v10370_v6  ;;  %v2580_v27 = vrot.slane %v12522_v38, 5  ;;  %v2396_v6 = vshrl.u32 %v12515_v60, 16 }
 0x2a7   : > { %v4765_v39 = vshrl.u32 %v4626_v41, 16  ;;  %v4439_v34 = vadd.f32 %v4438_v18, %v4350_v44  ;;  %v4768_v8 = vshll.u32 %v4626_v41, 16  ;;  %v2577_v44 = vrot.slane %v12515_v60, 5  ;;  %4702 = vst [vmem:[#allocation2 + $0xcc] sm:$0xf] %v14418_v20  ;;  %v10354_v18 = vld [vmem:[%s14385_s3 + $0x60] sm:$0xff] }
 0x2a8   : > { %v2378_v41 = vshll.u32 %v12458_v11, 16  ;;  %v9162_v52 = vrot.slane %v2421_v58, 9  ;;  %8261 = vmatpush.bf16.msrb.mxu2 %v10354_v18  ;;  %v5057_v36 = vld [vmem:[#allocation2 + $0x3c] sm:$0xf] }
 0x2a9   : > { %v4767_v37 = vrot.slane %v4765_v39, 7  ;;  %v4528_v26 = vadd.f32 %v12424_v14, %v4439_v34  ;;  %v4354_v28 = vpop.f32.mrf.mxu2  ;;  %v3188_v14 = vpack.c.b16 %v3171_v43, %v3170_v59  ;;  %v10362_v34 = vld [vmem:[%s14385_s3 + $0xa0] sm:$0xff]  ;;  %v2579_v4 = vrot.slane %v2577_v44, 4 }
 0x2aa   : > { %v12531_v57 = vpop.f32.mrf.mxu0  ;;  %v2366_v59 = vrot.slane %v2365_v55, 4  ;;  %v2376_v43 = vrot.slane %v2375_v40, 4  ;;  %v2380_v13 = vrot.slane %v2378_v41, 5  ;;  %8350 = vmatpush.bf16.msrb.mxu3 %v10362_v34  ;;  %v4355_v17 = vadd.f32 %v4354_v28, %v11909_v51 }
 0x2ab   : > { %v4770_v53 = vor.u32 %v4768_v8, %v4767_v37  ;;  %v4772_v48 = vrot.slane %v4767_v37, 4  ;;  %v4595_v32 = vmax.f32 %v4528_v26, 0.0  ;;  %v10353_v26 = vld [vmem:[%s14385_s3 + $0x58] sm:$0xff]  ;;  %v2386_v51 = vshll.u32 %v12518_v9, 16 }
 0x2ac   : > { %8262 = vmatpush.bf16.msrb.mxu2 %v10353_v26  ;;  %v2381_v40 = vsel %vm10806_vm5, %v2376_v43, %v2380_v13 }
 0x2ad   : > { %v4771_v47 = vsel %vm10860_vm9, %v4763_v1, %v4770_v53  ;;  %v5055_v22 = vsel %vm12349_vm2, %v4772_v48, %v5054_v2  ;;  %v4627_v12 = vpack.c.bf16 %v4595_v32, %v4595_v32  ;;  %4576 = vmatmul.bf16.gmra.mxu0 %v3188_v14  ;;  %v10369_v1 = vld [vmem:[%s14385_s3 + $0xd8] sm:$0xff]  ;;  %v3107_v13 = vunpack.c.l.b16 %v2381_v40  ;;  %v10366_v40 = vld [vmem:[%s14385_s3 + $0xc0] sm:$0xff] }
 0x2ae   : > { %5053 = vst [vmem:[#allocation2 + $0x34] sm:$0xf] %v4771_v47  ;;  %v4440_v11 = vpop.f32.mrf.mxu3  ;;  %v12543_v25 = vld [vmem:[#allocation2 + $0xcc] sm:$0xff]  ;;  %v10361_v32 = vld [vmem:[%s14385_s3 + $0x98] sm:$0xff]  ;;  %8440 = vmatpush.bf16.msrb.mxu0 %v10369_v1 }
 0x2af   : > { %5056 = vst [vmem:[#allocation2 + $0x38] sm:$0x1] %v5055_v22  ;;  %v4774_v50 = vshrl.u32 %v4627_v12, 16  ;;  %v4441_v39 = vadd.f32 %v4440_v11, %v4352_v24  ;;  %v4777_v8 = vshll.u32 %v4627_v12, 16  ;;  %v2383_v24 = vshrl.u32 %v12518_v9, 16  ;;  %8351 = vmatpush.bf16.msrb.mxu3 %v10361_v32  ;;  %v10352_v9 = vld [vmem:[%s14385_s3 + $0x50] sm:$0xff] }
 0x2b0   : > { %4703 = vst [vmem:[#allocation2 + $0xd0] sm:$0xf] %v14418_v20  ;;  %v2581_v20 = vsel %vm11251_vm13, %v2579_v4, %v2580_v27  ;;  %v10368_v47 = vld [vmem:[%s14385_s3 + $0xd0] sm:$0xff]  ;;  %v2388_v4 = vrot.slane %v2386_v51, 5  ;;  %8263 = vmatpush.bf16.msrb.mxu2 %v10352_v9  ;;  %v5141_v27 = vld [vmem:[#allocation2] sm:$0xf] }
 0x2b1   : > { %v12545_v37 = vrot.slane %v4774_v50, 7  ;;  %v4530_v2 = vadd.f32 %v12438_v10, %v4441_v39  ;;  %v4356_v58 = vpop.f32.mrf.mxu2  ;;  %v2578_v10 = vsel %vm11251_vm13, %v9162_v52, %v2577_v44  ;;  %v2371_v44 = vsel %vm10806_vm5, %v2366_v59, %v12510_v30  ;;  %v10360_v52 = vld [vmem:[%s14385_s3 + $0x90] sm:$0xff] }
 0x2b2   : > { %v12573_v41 = vpop.f32.mrf.mxu0  ;;  %v3172_v12 = vunpack.c.l.b16 %v2578_v10  ;;  %v3173_v18 = vunpack.c.l.b16 %v2581_v20  ;;  %v2392_v30 = vshll.u32 %v12515_v60, 16  ;;  %v4268_v50 = vadd.f32 %v11889_v21, %v11927_v5  ;;  %8441 = vmatpush.bf16.msrb.mxu0 %v10368_v47  ;;  %v10367_v21 = vld [vmem:[%s14385_s3 + $0xc8] sm:$0xff]  ;;  %v12598_v5 = vld [vmem:[#allocation2 + $0x4] sm:$0xf] }
 0x2b3   : > { %v4779_v53 = vor.u32 %v4777_v8, %v12545_v37  ;;  %v4596_v48 = vmax.f32 %v4530_v2, 0.0  ;;  %4482 = vmatmul.bf16.gmra.mxu3 %v3123_v33  ;;  %v12589_v39 = vunpack.c.l.b16 %v2371_v44  ;;  %v2385_v34 = vrot.slane %v2383_v24, 4  ;;  %v5061_v2 = vld [vmem:[#allocation2 + $0x44] sm:$0x1]  ;;  %v10359_v20 = vld [vmem:[%s14385_s3 + $0x88] sm:$0xff] }
 0x2b4   : > { %8352 = vmatpush.bf16.msrb.mxu3 %v10360_v52  ;;  %v4780_v8 = vrot.slane %v12545_v37, 4  ;;  %v3189_v1 = vpack.c.b16 %v3173_v18, %v3172_v12  ;;  %v4357_v10 = vadd.f32 %v4356_v58, %v4268_v50  ;;  %v5190_v32 = vshrl.u32 %v5141_v27, 16  ;;  %v10350_v44 = vld [vmem:[%s14385_s3 + $0x40] sm:$0xff] }
 0x2b5   : > { %v5058_v28 = vsel %vm12319_vm15, %v4779_v53, %v5057_v36  ;;  %v4628_v14 = vpack.c.bf16 %v4596_v48, %v4596_v48  ;;  %v10298_v55 = vld [vmem:[#allocation2 + $0x30] sm:$0xff]  ;;  %4398 = vmatmul.bf16.gmra.mxu2 %v12477_v0  ;;  %v10351_v0 = vld [vmem:[%s14385_s3 + $0x48] sm:$0xff]  ;;  %v12601_v36 = vrot.slane %v2392_v30, 5  ;;  %v5193_v24 = vshll.u32 %v5141_v27, 16 }
 0x2b6   : > { %5059 = vst [vmem:[#allocation2 + $0x3c] sm:$0xf] %v5058_v28  ;;  %v4443_v22 = vpop.f32.mrf.mxu3  ;;  %8197 = vmatmul.bf16.gmra.mxu1 %v10298_v55  ;;  %8264 = vmatpush.bf16.msrb.mxu2 %v10351_v0  ;;  %v5199_v37 = vshll.u32 %v12598_v5, 16  ;;  %v5203_v51 = vshrl.u32 %v12598_v5, 16  ;;  %v2389_v47 = vor.u32 %v2388_v4, %v2385_v34  ;;  %v3124_v30 = vpack.c.b16 %v3107_v13, %v12589_v39  ;;  %v12629_v39 = vld [vmem:[#allocation2 + $0x8] sm:$0x1] }
 0x2b7   : > { %v4782_v11 = vshrl.u32 %v4628_v14, 16  ;;  %v4444_v33 = vadd.f32 %v4443_v22, %v4355_v17  ;;  %v4785_v59 = vshll.u32 %v4628_v14, 16  ;;  %8442 = vmatpush.bf16.msrb.mxu0 %v10367_v21  ;;  %v5195_v52 = vrot.slane %v5193_v24, 5 }
 0x2b8   : > { %8353 = vmatpush.bf16.msrb.mxu3 %v10359_v20  ;;  %v12626_v50 = vrot.slane %v5199_v37, 5  ;;  %v5205_v34 = vrot.slane %v5203_v51, 4 }
 0x2b9   : > { %v4784_v60 = vrot.slane %v4782_v11, 7  ;;  %v4533_v43 = vadd.f32 %v12470_v46, %v4444_v33  ;;  %v4359_v26 = vpop.f32.mrf.mxu2  ;;  %v2398_v46 = vrot.slane %v2396_v6, 4  ;;  %v2402_v6 = vshll.u32 %v12522_v38, 16  ;;  %v10358_v11 = vld [vmem:[%s14385_s3 + $0x80] sm:$0xff]  ;;  %v5064_v38 = vld [vmem:[#allocation2 + $0x48] sm:$0xf] }
 0x2ba   : > { %v12612_v58 = vpop.f32.mrf.mxu0  ;;  %8265 = vmatpush.bf16.msrb.mxu2 %v10350_v44  ;;  %v5192_v33 = vrot.slane %v5190_v32, 4  ;;  %v10378_v32 = vld [vmem:[%s14385_s3 + $0x120] sm:$0xff] }
 0x2bb   : > { %v4787_v17 = vor.u32 %v4785_v59, %v4784_v60  ;;  %v4789_v53 = vrot.slane %v4784_v60, 4  ;;  %v4597_v48 = vmax.f32 %v4533_v43, 0.0  ;;  %v2399_v22 = vor.u32 %v2398_v46, %v12601_v36  ;;  %8443 = vmatpush.bf16.msrb.mxu0 %v10366_v40  ;;  %8528 = vmatpush.bf16.msrb.mxu1 %v10378_v32  ;;  %v5071_v32 = vld [vmem:[#allocation2 + $0x54] sm:$0xf] }
 0x2bc   : > { %8354 = vmatpush.bf16.msrb.mxu3 %v10358_v11  ;;  %v2390_v43 = vrot.slane %v2389_v47, 4  ;;  %v5206_v46 = vor.u32 %v5205_v34, %v12626_v50 }
 0x2bd   : > { %v4788_v28 = vsel %vm10860_vm9, %v4780_v8, %v4787_v17  ;;  %v5062_v14 = vsel %vm12349_vm2, %v4789_v53, %v5061_v2  ;;  %v4629_v55 = vpack.c.bf16 %v4597_v48, %v4597_v48  ;;  %4581 = vmatmul.bf16.gmra.mxu0 %v3189_v1  ;;  %v2400_v13 = vrot.slane %v2399_v22, 4 }
 0x2be   : > { %5060 = vst [vmem:[#allocation2 + $0x40] sm:$0xf] %v4788_v28  ;;  %v4445_v9 = vpop.f32.mrf.mxu3  ;;  %v4360_v8 = vadd.f32 %v4359_v26, %v11945_v19  ;;  %v2404_v2 = vrot.slane %v2402_v6, 5  ;;  %v5196_v1 = vor.u32 %v5195_v52, %v5192_v33  ;;  %v5209_v17 = vshll.u32 %v12629_v39, 16 }
 0x2bf   : > { %5063 = vst [vmem:[#allocation2 + $0x44] sm:$0x1] %v5062_v14  ;;  %v4791_v12 = vshrl.u32 %v4629_v55, 16  ;;  %v4446_v18 = vadd.f32 %v4445_v9, %v4357_v10  ;;  %v4794_v27 = vshll.u32 %v4629_v55, 16  ;;  %v2395_v24 = vsel %vm10806_vm5, %v2390_v43, %v12601_v36  ;;  %v12650_v36 = vld [vmem:[#allocation2 + $0x10] sm:$0xf] }
 0x2c0   : > { %v2405_v37 = vsel %vm10806_vm5, %v2400_v13, %v2404_v2  ;;  %v5197_v51 = vrot.slane %v5196_v1, 4  ;;  %v5207_v28 = vrot.slane %v5206_v46, 4  ;;  %v5211_v14 = vrot.slane %v5209_v17, 5  ;;  %v10310_v43 = vld [vmem:[#allocation2 + $0xc] sm:$0xff]  ;;  %v5573_v1 = vld [vmem:[#allocation2] sm:$0xe] }
 0x2c1   : > { %v4793_v4 = vrot.slane %v4791_v12, 7  ;;  %v4535_v60 = vadd.f32 %v12492_v29, %v4446_v18  ;;  %v4361_v59 = vpop.f32.mrf.mxu2  ;;  %v4273_v55 = vadd.f32 %v11929_v63, %v11956_v49  ;;  %v3108_v22 = vunpack.c.l.b16 %v2395_v24 }
 0x2c2   : > { %v12636_v10 = vpop.f32.mrf.mxu0  ;;  %v3109_v12 = vunpack.c.l.b16 %v2405_v37  ;;  %v5202_v52 = vsel %vm10806_vm5, %v5197_v51, %v12626_v50  ;;  %v5212_v63 = vsel %vm10806_vm5, %v5207_v28, %v5211_v14  ;;  %v5639_v50 = vrot.slane %v12598_v5, 5 }
 0x2c3   : > { %v4796_v0 = vor.u32 %v4794_v27, %v4793_v4  ;;  %v4598_v21 = vmax.f32 %v4535_v60, 0.0  ;;  %4487 = vmatmul.bf16.gmra.mxu3 %v3124_v30  ;;  %v4797_v47 = vrot.slane %v4793_v4, 4  ;;  %v4362_v33 = vadd.f32 %v4361_v59, %v4273_v55  ;;  %v5143_v27 = vld [vmem:[#allocation2 + $0xc] sm:$0xf] }
 0x2c4   : > { %v5223_v60 = vshll.u32 %v12650_v36, 16  ;;  %v3125_v59 = vpack.c.b16 %v3109_v12, %v3108_v22  ;;  %v5227_v13 = vshrl.u32 %v12650_v36, 16  ;;  %v7046_v2 = vunpack.c.l.b16 %v5212_v63 }
 0x2c5   : > { %v5065_v29 = vsel %vm12319_vm15, %v4796_v0, %v5064_v38  ;;  %v4630_v53 = vpack.c.bf16 %v4598_v21, %v4598_v21  ;;  %v10299_v48 = vld [vmem:[#allocation2 + $0x3c] sm:$0xff]  ;;  %4403 = vmatmul.bf16.gmra.mxu2 %v12543_v25  ;;  %v5068_v25 = vld [vmem:[#allocation2 + $0x50] sm:$0x1]  ;;  %v5214_v46 = vshrl.u32 %v5143_v27, 16  ;;  %v5217_v17 = vshll.u32 %v5143_v27, 16 }
 0x2c6   : > { %5066 = vst [vmem:[#allocation2 + $0x48] sm:$0xf] %v5065_v29  ;;  %v4448_v20 = vpop.f32.mrf.mxu3  ;;  %8202 = vmatmul.bf16.gmra.mxu1 %v10299_v48  ;;  %v9643_v5 = vrot.slane %v5573_v1, 9  ;;  %v5642_v24 = vrot.slane %v12629_v39, 5  ;;  %v5229_v37 = vrot.slane %v5227_v13, 4 }
 0x2c7   : > { %v4799_v19 = vshrl.u32 %v4630_v53, 16  ;;  %v4449_v26 = vadd.f32 %v4448_v20, %v4360_v8  ;;  %v4802_v40 = vshll.u32 %v4630_v53, 16  ;;  %v7045_v8 = vunpack.c.l.b16 %v5202_v52  ;;  %v5075_v27 = vld [vmem:[#allocation2 + $0x5c] sm:$0x1] }
 0x2c8   : > { %v12667_v20 = vrot.slane %v5223_v60, 5  ;;  %v5219_v22 = vrot.slane %v5217_v17, 5 }
 0x2c9   : > { %v4801_v44 = vrot.slane %v4799_v19, 7  ;;  %v4538_v9 = vadd.f32 %v12531_v57, %v4449_v26  ;;  %v4364_v18 = vpop.f32.mrf.mxu2  ;;  %v5641_v26 = vrot.slane %v5639_v50, 4  ;;  %v7077_v55 = vpack.c.b16 %v7046_v2, %v7045_v8  ;;  %v12686_v8 = vld [vmem:[#allocation2 + $0x1c] sm:$0xf] }
 0x2ca   : > { %v12661_v4 = vpop.f32.mrf.mxu0  ;;  %v4365_v14 = vadd.f32 %v4364_v18, %v11983_v35  ;;  %v5230_v12 = vor.u32 %v5229_v37, %v12667_v20  ;;  %v5640_v35 = vsel %vm11251_vm13, %v9643_v5, %v5639_v50 }
 0x2cb   : > { %v4804_v30 = vor.u32 %v4802_v40, %v4801_v44  ;;  %v4806_v6 = vrot.slane %v4801_v44, 4  ;;  %v4599_v11 = vmax.f32 %v4538_v9, 0.0  ;;  %v5643_v18 = vsel %vm11251_vm13, %v5641_v26, %v5642_v24  ;;  %v5145_v24 = vld [vmem:[#allocation2 + $0x18] sm:$0xf] }
 0x2cc   : > { %v7109_v60 = vunpack.c.l.b16 %v5640_v35 }
 0x2cd   : > { %v4805_v49 = vsel %vm10860_vm9, %v4797_v47, %v4804_v30  ;;  %v5069_v57 = vsel %vm12349_vm2, %v4806_v6, %v5068_v25  ;;  %v4631_v34 = vpack.c.bf16 %v4599_v11, %v4599_v11  ;;  %8444 = vmatmul.bf16.vlgmr.msrb.gmra.mxu0 %v10310_v43  ;;  %v12675_v47 = vld [vmem:[#allocation2 + $0x14] sm:$0x1]  ;;  %v5216_v25 = vrot.slane %v5214_v46, 4 }
 0x2ce   : > { %5067 = vst [vmem:[#allocation2 + $0x4c] sm:$0xf] %v4805_v49  ;;  %v4450_v38 = vpop.f32.mrf.mxu3  ;;  %v4278_v11 = vadd.f32 %v11958_v23, %v11994_v15  ;;  %v5231_v43 = vrot.slane %v5230_v12, 4 }
 0x2cf   : > { %5070 = vst [vmem:[#allocation2 + $0x50] sm:$0x1] %v5069_v57  ;;  %v4808_v0 = vshrl.u32 %v4631_v34, 16  ;;  %v4451_v21 = vadd.f32 %v4450_v38, %v4362_v33  ;;  %v4811_v53 = vshll.u32 %v4631_v34, 16  ;;  %v5233_v33 = vshll.u32 %v12675_v47, 16 }
 0x2d0   : > { %v5220_v57 = vor.u32 %v5219_v22, %v5216_v25  ;;  %v7110_v38 = vunpack.c.l.b16 %v5643_v18  ;;  %v5238_v25 = vshrl.u32 %v5145_v24, 16  ;;  %v5241_v22 = vshll.u32 %v5145_v24, 16 }
 0x2d1   : > { %v4810_v29 = vrot.slane %v4808_v0, 7  ;;  %v4540_v48 = vadd.f32 %v12573_v41, %v4451_v21  ;;  %v4366_v19 = vpop.f32.mrf.mxu2  ;;  %v5235_v23 = vrot.slane %v5233_v33, 5  ;;  %v5574_v33 = vld [vmem:[#allocation2 + $0xc] sm:$0xe] }
 0x2d2   : > { %v12673_v9 = vpop.f32.mrf.mxu0  ;;  %v4367_v21 = vadd.f32 %v4366_v19, %v4278_v11  ;;  %v5221_v17 = vrot.slane %v5220_v57, 4  ;;  %v7141_v26 = vpack.c.b16 %v7110_v38, %v7109_v60  ;;  %v10377_v57 = vld [vmem:[%s14385_s3 + $0x118] sm:$0xff] }
 0x2d3   : > { %v4813_v51 = vor.u32 %v4811_v53, %v4810_v29  ;;  %v4600_v28 = vmax.f32 %v4540_v48, 0.0  ;;  %4492 = vmatmul.bf16.gmra.mxu3 %v3125_v59  ;;  %v4814_v34 = vrot.slane %v4810_v29, 4  ;;  %v5236_v29 = vsel %vm10806_vm5, %v5231_v43, %v5235_v23  ;;  %v10311_v53 = vld [vmem:[#allocation2 + $0x18] sm:$0xff]  ;;  %8529 = vmatpush.bf16.msrb.mxu1 %v10377_v57 }
 0x2d4   : > { %v5247_v48 = vshll.u32 %v12686_v8, 16  ;;  %v5226_v37 = vsel %vm10806_vm5, %v5221_v17, %v12667_v20 }
 0x2d5   : > { %v5072_v44 = vsel %vm12319_vm15, %v4813_v51, %v5071_v32  ;;  %v4632_v40 = vpack.c.bf16 %v4600_v28, %v4600_v28  ;;  %v10300_v41 = vld [vmem:[#allocation2 + $0x48] sm:$0xff]  ;;  %8266 = vmatmul.bf16.vlgmr.msrb.gmra.mxu2 %v7077_v55  ;;  %v5251_v32 = vshrl.u32 %v12686_v8, 16  ;;  %v5646_v51 = vrot.slane %v12650_v36, 5 }
 0x2d6   : > { %5073 = vst [vmem:[#allocation2 + $0x54] sm:$0xf] %v5072_v44  ;;  %v4453_v39 = vpop.f32.mrf.mxu3  ;;  %8207 = vmatmul.bf16.gmra.mxu1 %v10300_v41  ;;  %v7048_v44 = vunpack.c.l.b16 %v5236_v29  ;;  %v7047_v35 = vunpack.c.l.b16 %v5226_v37 }
 0x2d7   : > { %v4816_v30 = vshrl.u32 %v4632_v40, 16  ;;  %v4454_v6 = vadd.f32 %v4453_v39, %v4365_v14  ;;  %v4819_v63 = vshll.u32 %v4632_v40, 16  ;;  %v5078_v40 = vld [vmem:[#allocation2 + $0x60] sm:$0xf]  ;;  %v12703_v39 = vrot.slane %v5247_v48, 5 }
 0x2d8   : > { %v5253_v12 = vrot.slane %v5251_v32, 4 }
 0x2d9   : > { %v4818_v52 = vrot.slane %v4816_v30, 7  ;;  %v4543_v49 = vadd.f32 %v12612_v58, %v4454_v6  ;;  %v4369_v59 = vpop.f32.mrf.mxu2 }
 0x2da   : > { %v12692_v1 = vpop.f32.mrf.mxu0  ;;  %v4370_v20 = vadd.f32 %v4369_v59, %v12018_v62  ;;  %v5254_v62 = vor.u32 %v5253_v12, %v12703_v39  ;;  %v5649_v59 = vrot.slane %v12675_v47, 5  ;;  %v5082_v47 = vld [vmem:[#allocation2 + $0x68] sm:$0x1] }
 0x2db   : > { %v4821_v50 = vor.u32 %v4819_v63, %v4818_v52  ;;  %v4823_v13 = vrot.slane %v4818_v52, 4  ;;  %v4601_v0 = vmax.f32 %v4543_v49, 0.0  ;;  %v5648_v52 = vrot.slane %v5646_v51, 4  ;;  %v12708_v63 = vld [vmem:[#allocation2 + $0x20] sm:$0x1] }
 0x2dd   : > { %v4822_v15 = vsel %vm10860_vm9, %v4814_v34, %v4821_v50  ;;  %v5076_v58 = vsel %vm12349_vm2, %v4823_v13, %v5075_v27  ;;  %v4633_v2 = vpack.c.bf16 %v4601_v0, %v4601_v0  ;;  %8449 = vmatmul.bf16.gmra.mxu0 %v10311_v53  ;;  %v5240_v34 = vrot.slane %v5238_v25, 4 }
 0x2de   : > { %5074 = vst [vmem:[#allocation2 + $0x58] sm:$0xf] %v4822_v15  ;;  %v4455_v46 = vpop.f32.mrf.mxu3  ;;  %v5243_v27 = vrot.slane %v5241_v22, 5  ;;  %v4283_v50 = vadd.f32 %v11996_v56, %v12029_v54  ;;  %v9644_v13 = vrot.slane %v5574_v33, 9  ;;  %v5257_v0 = vshll.u32 %v12708_v63, 16 }
 0x2df   : > { %5077 = vst [vmem:[#allocation2 + $0x5c] sm:$0x1] %v5076_v58  ;;  %v4825_v19 = vshrl.u32 %v4633_v2, 16  ;;  %v4456_v5 = vadd.f32 %v4455_v46, %v4367_v21  ;;  %v4828_v14 = vshll.u32 %v4633_v2, 16  ;;  %v5650_v58 = vsel %vm11251_vm13, %v5648_v52, %v5649_v59  ;;  %v12723_v2 = vpop.f32.mrf.mxu1  ;;  %v5085_v52 = vld [vmem:[#allocation2 + $0x6c] sm:$0xf] }
 0x2e0   : > { %v5647_v17 = vsel %vm11251_vm13, %v9644_v13, %v5646_v51  ;;  %v5244_v56 = vor.u32 %v5243_v27, %v5240_v34  ;;  %v5255_v54 = vrot.slane %v5254_v62, 4 }
 0x2e1   : > { %v4827_v28 = vrot.slane %v4825_v19, 7  ;;  %v4545_v55 = vadd.f32 %v12636_v10, %v4456_v5  ;;  %v4371_v41 = vpop.f32.mrf.mxu2  ;;  %v7078_v10 = vpack.c.b16 %v7048_v44, %v7047_v35  ;;  %v12727_v5 = vld [vmem:[#allocation2 + $0x28] sm:$0xf] }
 0x2e2   : > { %v12715_v43 = vpop.f32.mrf.mxu0  ;;  %v4372_v19 = vadd.f32 %v4371_v41, %v4283_v50  ;;  %v5271_v41 = vshll.u32 %v12727_v5, 16  ;;  %v5275_v25 = vshrl.u32 %v12727_v5, 16 }
 0x2e3   : > { %v4830_v30 = vor.u32 %v4828_v14, %v4827_v28  ;;  %v4602_v6 = vmax.f32 %v4545_v55, 0.0  ;;  %8355 = vmatmul.bf16.vlgmr.msrb.gmra.mxu3 %v7141_v26  ;;  %v4831_v46 = vrot.slane %v4827_v28, 4  ;;  %v5259_v26 = vrot.slane %v5257_v0, 5 }
 0x2e4   : > { %v7111_v14 = vunpack.c.l.b16 %v5647_v17  ;;  %v5245_v55 = vrot.slane %v5244_v56, 4  ;;  %v12746_v62 = vrot.slane %v5271_v41, 5 }
 0x2e5   : > { %v5079_v36 = vsel %vm12319_vm15, %v4830_v30, %v5078_v40  ;;  %v4634_v18 = vpack.c.bf16 %v4602_v6, %v4602_v6  ;;  %v10301_v11 = vld [vmem:[#allocation2 + $0x54] sm:$0xff]  ;;  %8271 = vmatmul.bf16.gmra.mxu2 %v7078_v10  ;;  %v5260_v44 = vsel %vm10806_vm5, %v5255_v54, %v5259_v26  ;;  %v10312_v40 = vld [vmem:[#allocation2 + $0x24] sm:$0xff] }
 0x2e6   : > { %5080 = vst [vmem:[#allocation2 + $0x60] sm:$0xf] %v5079_v36  ;;  %v4458_v49 = vpop.f32.mrf.mxu3  ;;  %8212 = vmatmul.bf16.gmra.mxu1 %v10301_v11  ;;  %v5147_v6 = vld [vmem:[#allocation2 + $0x24] sm:$0xf]  ;;  %v5250_v35 = vsel %vm10806_vm5, %v5245_v55, %v12703_v39  ;;  %v5653_v36 = vrot.slane %v12686_v8, 5  ;;  %v7050_v33 = vunpack.c.l.b16 %v5260_v44 }
 0x2e7   : > { %v4833_v60 = vshrl.u32 %v4634_v18, 16  ;;  %v4459_v38 = vadd.f32 %v4458_v49, %v4370_v20  ;;  %v4836_v23 = vshll.u32 %v4634_v18, 16  ;;  %v12744_v49 = vpop.f32.mrf.mxu1  ;;  %v5262_v34 = vshrl.u32 %v5147_v6, 16 }
 0x2e8   : > { %v5265_v27 = vshll.u32 %v5147_v6, 16  ;;  %v7049_v8 = vunpack.c.l.b16 %v5250_v35  ;;  %v12765_v6 = vld [vmem:[#allocation2 + $0x34] sm:$0xf] }
 0x2e9   : > { %v4835_v21 = vrot.slane %v4833_v60, 7  ;;  %v4548_v15 = vadd.f32 %v12661_v4, %v4459_v38  ;;  %v4374_v29 = vpop.f32.mrf.mxu2  ;;  %v7112_v4 = vunpack.c.l.b16 %v5650_v58  ;;  %v5277_v60 = vrot.slane %v5275_v25, 4 }
 0x2ea   : > { %v12737_v30 = vpop.f32.mrf.mxu0  ;;  %v4375_v39 = vadd.f32 %v4374_v29, %v12056_v61  ;;  %v7079_v0 = vpack.c.b16 %v7050_v33, %v7049_v8  ;;  %v5656_v61 = vrot.slane %v12708_v63, 5  ;;  %v5149_v8 = vld [vmem:[#allocation2 + $0x30] sm:$0xf] }
 0x2eb   : > { %v4838_v53 = vor.u32 %v4836_v23, %v4835_v21  ;;  %v4840_v48 = vrot.slane %v4835_v21, 4  ;;  %v4603_v32 = vmax.f32 %v4548_v15, 0.0  ;;  %v7142_v20 = vpack.c.b16 %v7112_v4, %v7111_v14  ;;  %v5575_v21 = vld [vmem:[#allocation2 + $0x18] sm:$0xe]  ;;  %v12751_v15 = vld [vmem:[#allocation2 + $0x2c] sm:$0x1] }
 0x2ec   : > { %v5655_v23 = vrot.slane %v5653_v36, 4  ;;  %v5278_v17 = vor.u32 %v5277_v60, %v12746_v62  ;;  %v5281_v4 = vshll.u32 %v12751_v15, 16  ;;  %v5299_v60 = vshrl.u32 %v12765_v6, 16 }
 0x2ed   : > { %v4839_v24 = vsel %vm10860_vm9, %v4831_v46, %v4838_v53  ;;  %v5083_v37 = vsel %vm12349_vm2, %v4840_v48, %v5082_v47  ;;  %v4635_v28 = vpack.c.bf16 %v4603_v32, %v4603_v32  ;;  %8454 = vmatmul.bf16.gmra.mxu0 %v10312_v40  ;;  %v5264_v46 = vrot.slane %v5262_v34, 4  ;;  %v14455_v53 = vld [vmem:[#allocation7_spill] sm:$0xff]  ;;  %v14456_v48 = vld [vmem:[#allocation6_spill] sm:$0xff]  ;;  %v10313_v34 = vld [vmem:[#allocation2 + $0x30] sm:$0xff] }
 0x2ee   : > { %5081 = vst [vmem:[#allocation2 + $0x64] sm:$0xf] %v4839_v24  ;;  %v4460_v51 = vpop.f32.mrf.mxu3  ;;  %v5267_v47 = vrot.slane %v5265_v27, 5  ;;  %v4288_v32 = vadd.f32 %v14456_v48, %v14455_v53  ;;  %v5279_v40 = vrot.slane %v5278_v17, 4  ;;  %v5283_v35 = vrot.slane %v5281_v4, 5 }
 0x2ef   : > { %5084 = vst [vmem:[#allocation2 + $0x68] sm:$0x1] %v5083_v37  ;;  %v4842_v22 = vshrl.u32 %v4635_v28, 16  ;;  %v4461_v12 = vadd.f32 %v4460_v51, %v4372_v19  ;;  %v4845_v11 = vshll.u32 %v4635_v28, 16  ;;  %v9645_v19 = vrot.slane %v5575_v21, 9 }
 0x2f0   : > { %v5657_v28 = vsel %vm11251_vm13, %v5655_v23, %v5656_v61  ;;  %v5089_v51 = vld [vmem:[#allocation2 + $0x74] sm:$0x1]  ;;  %v5268_v44 = vor.u32 %v5267_v47, %v5264_v46  ;;  %v5295_v27 = vshll.u32 %v12765_v6, 16  ;;  %v5092_v46 = vld [vmem:[#allocation2 + $0x78] sm:$0xf]  ;;  %v5286_v17 = vshrl.u32 %v5149_v8, 16 }
 0x2f1   : > { %v4844_v18 = vrot.slane %v4842_v22, 7  ;;  %v4550_v10 = vadd.f32 %v12673_v9, %v4461_v12  ;;  %v4376_v57 = vpop.f32.mrf.mxu2  ;;  %v5654_v63 = vsel %vm11251_vm13, %v9645_v19, %v5653_v36  ;;  %v5301_v61 = vrot.slane %v5299_v60, 4 }
 0x2f2   : > { %v12755_v29 = vpop.f32.mrf.mxu0  ;;  %v4377_v12 = vadd.f32 %v4376_v57, %v4288_v32  ;;  %v5284_v57 = vsel %vm10806_vm5, %v5279_v40, %v5283_v35  ;;  %v14457_v32 = vld [vmem:[#allocation9_spill] sm:$0xff]  ;;  %v14459_v35 = vld [vmem:[#allocation8_spill] sm:$0xff] }
 0x2f3   : > { %v4847_v38 = vor.u32 %v4845_v11, %v4844_v18  ;;  %v4604_v59 = vmax.f32 %v4550_v10, 0.0  ;;  %8360 = vmatmul.bf16.gmra.mxu3 %v7142_v20  ;;  %v4848_v14 = vrot.slane %v4844_v18, 4  ;;  %v12767_v20 = vpop.f32.mrf.mxu1  ;;  %v7113_v10 = vunpack.c.l.b16 %v5654_v63  ;;  %v10376_v63 = vld [vmem:[%s14385_s3 + $0x110] sm:$0xff] }
 0x2f4   : > { %8530 = vmatpush.bf16.msrb.mxu1 %v10376_v63 }
 0x2f5   : > { %v5086_v50 = vsel %vm12319_vm15, %v4847_v38, %v5085_v52  ;;  %v4636_v9 = vpack.c.bf16 %v4604_v59, %v4604_v59  ;;  %v10302_v13 = vld [vmem:[#allocation2 + $0x60] sm:$0xff]  ;;  %8276 = vmatmul.bf16.gmra.mxu2 %v7079_v0  ;;  %v5269_v52 = vrot.slane %v5268_v44, 4 }
 0x2f6   : > { %5087 = vst [vmem:[#allocation2 + $0x6c] sm:$0xf] %v5086_v50  ;;  %v4463_v58 = vpop.f32.mrf.mxu3  ;;  %8217 = vmatmul.bf16.gmra.mxu1 %v10302_v13  ;;  %v5660_v13 = vrot.slane %v12727_v5, 5 }
 0x2f7   : > { %v4850_v56 = vshrl.u32 %v4636_v9, 16  ;;  %v4464_v54 = vadd.f32 %v4463_v58, %v4375_v39  ;;  %v4853_v24 = vshll.u32 %v4636_v9, 16  ;;  %v5274_v9 = vsel %vm10806_vm5, %v5269_v52, %v12746_v62 }
 0x2f8   : > { %v7052_v58 = vunpack.c.l.b16 %v5284_v57  ;;  %v7051_v19 = vunpack.c.l.b16 %v5274_v9 }
 0x2f9   : > { %v4852_v26 = vrot.slane %v4850_v56, 7  ;;  %v4553_v37 = vadd.f32 %v12692_v1, %v4464_v54  ;;  %v4379_v55 = vpop.f32.mrf.mxu2  ;;  %v7114_v1 = vunpack.c.l.b16 %v5657_v28  ;;  %v5289_v56 = vshll.u32 %v5149_v8, 16 }
 0x2fa   : > { %v12777_v39 = vpop.f32.mrf.mxu0  ;;  %v12784_v54 = vrot.slane %v5295_v27, 5  ;;  %v4380_v62 = vadd.f32 %v4379_v55, %v14457_v32  ;;  %v5662_v28 = vrot.slane %v5660_v13, 4  ;;  %v5288_v55 = vrot.slane %v5286_v17, 4  ;;  %v5096_v27 = vld [vmem:[#allocation2 + $0x80] sm:$0x1] }
 0x2fb   : > { %v4855_v41 = vor.u32 %v4853_v24, %v4852_v26  ;;  %v4857_v25 = vrot.slane %v4852_v26, 4  ;;  %v4605_v22 = vmax.f32 %v4553_v37, 0.0  ;;  %v7143_v50 = vpack.c.b16 %v7114_v1, %v7113_v10  ;;  %v5576_v37 = vld [vmem:[#allocation2 + $0x24] sm:$0xe]  ;;  %v14458_v1 = vld [vmem:[#allocation10_spill] sm:$0xff] }
 0x2fc   : > { %v7080_v24 = vpack.c.b16 %v7052_v58, %v7051_v19  ;;  %v5291_v44 = vrot.slane %v5289_v56, 5  ;;  %v5302_v40 = vor.u32 %v5301_v61, %v12784_v54 }
 0x2fd   : > { %v4856_v18 = vsel %vm10860_vm9, %v4848_v14, %v4855_v41  ;;  %v5090_v11 = vsel %vm12349_vm2, %v4857_v25, %v5089_v51  ;;  %v4637_v36 = vpack.c.bf16 %v4605_v22, %v4605_v22  ;;  %8459 = vmatmul.bf16.gmra.mxu0 %v10313_v34  ;;  %v12791_v14 = vld [vmem:[#allocation2 + $0x38] sm:$0x1]  ;;  %v5663_v22 = vrot.slane %v12751_v15, 5 }
 0x2fe   : > { %5088 = vst [vmem:[#allocation2 + $0x70] sm:$0xf] %v4856_v18  ;;  %v4465_v33 = vpop.f32.mrf.mxu3  ;;  %v4293_v18 = vadd.f32 %v14459_v35, %v14458_v1 }
 0x2ff   : > { %5091 = vst [vmem:[#allocation2 + $0x74] sm:$0x1] %v5090_v11  ;;  %v4859_v38 = vshrl.u32 %v4637_v36, 16  ;;  %v4466_v59 = vadd.f32 %v4465_v33, %v4377_v12  ;;  %v4862_v21 = vshll.u32 %v4637_v36, 16  ;;  %v9646_v11 = vrot.slane %v5576_v37, 9 }
 0x300   : > { %v5305_v36 = vshll.u32 %v12791_v14, 16  ;;  %v5664_v57 = vsel %vm11251_vm13, %v5662_v28, %v5663_v22  ;;  %v5667_v28 = vrot.slane %v12765_v6, 5 }
 0x301   : > { %v4861_v0 = vrot.slane %v4859_v38, 7  ;;  %v4555_v23 = vadd.f32 %v12715_v43, %v4466_v59  ;;  %v4381_v47 = vpop.f32.mrf.mxu2  ;;  %v5661_v15 = vsel %vm11251_vm13, %v9646_v11, %v5660_v13  ;;  %v5292_v38 = vor.u32 %v5291_v44, %v5288_v55 }
 0x302   : > { %v12798_v12 = vpop.f32.mrf.mxu0  ;;  %v5303_v59 = vrot.slane %v5302_v40, 4  ;;  %v7115_v56 = vunpack.c.l.b16 %v5661_v15  ;;  %v5099_v40 = vld [vmem:[#allocation2 + $0x84] sm:$0xf] }
 0x303   : > { %v4864_v53 = vor.u32 %v4862_v21, %v4861_v0  ;;  %v4606_v48 = vmax.f32 %v4555_v23, 0.0  ;;  %8365 = vmatmul.bf16.gmra.mxu3 %v7143_v50  ;;  %v12787_v4 = vpop.f32.mrf.mxu1  ;;  %v4865_v34 = vrot.slane %v4861_v0, 4  ;;  %v4382_v21 = vadd.f32 %v4381_v47, %v4293_v18  ;;  %v12808_v23 = vld [vmem:[#allocation2 + $0x40] sm:$0xf] }
 0x304   : > { %v5319_v32 = vshll.u32 %v12808_v23, 16 }
 0x305   : > { %v5093_v5 = vsel %vm12319_vm15, %v4864_v53, %v5092_v46  ;;  %v4638_v43 = vpack.c.bf16 %v4606_v48, %v4606_v48  ;;  %v10303_v26 = vld [vmem:[#allocation2 + $0x6c] sm:$0xff]  ;;  %8281 = vmatmul.bf16.gmra.mxu2 %v7080_v24  ;;  %v5307_v46 = vrot.slane %v5305_v36, 5  ;;  %v5293_v53 = vrot.slane %v5292_v38, 4  ;;  %v10314_v48 = vld [vmem:[#allocation2 + $0x3c] sm:$0xff] }
 0x306   : > { %5094 = vst [vmem:[#allocation2 + $0x78] sm:$0xf] %v5093_v5  ;;  %v4468_v51 = vpop.f32.mrf.mxu3  ;;  %8222 = vmatmul.bf16.gmra.mxu1 %v10303_v26  ;;  %v5151_v26 = vld [vmem:[#allocation2 + $0x3c] sm:$0xf]  ;;  %v12827_v1 = vrot.slane %v5319_v32, 5 }
 0x307   : > { %v4867_v41 = vshrl.u32 %v4638_v43, 16  ;;  %v4469_v25 = vadd.f32 %v4468_v51, %v4380_v62  ;;  %v4870_v33 = vshll.u32 %v4638_v43, 16  ;;  %v5308_v47 = vsel %vm10806_vm5, %v5303_v59, %v5307_v46 }
 0x308   : > { %v5323_v62 = vshrl.u32 %v12808_v23, 16  ;;  %v5298_v37 = vsel %vm10806_vm5, %v5293_v53, %v12784_v54  ;;  %v7054_v44 = vunpack.c.l.b16 %v5308_v47  ;;  %v5313_v22 = vshll.u32 %v5151_v26, 16 }
 0x309   : > { %v4869_v10 = vrot.slane %v4867_v41, 7  ;;  %v4558_v52 = vadd.f32 %v12737_v30, %v4469_v25  ;;  %v4384_v60 = vpop.f32.mrf.mxu2  ;;  %v7116_v30 = vunpack.c.l.b16 %v5664_v57  ;;  %v5310_v25 = vshrl.u32 %v5151_v26, 16  ;;  %v5577_v57 = vld [vmem:[#allocation2 + $0x30] sm:$0xe] }
 0x30a   : > { %v12820_v43 = vpop.f32.mrf.mxu0  ;;  %v5325_v35 = vrot.slane %v5323_v62, 4  ;;  %v4385_v54 = vadd.f32 %v4384_v60, %v12127_v7  ;;  %v7053_v36 = vunpack.c.l.b16 %v5298_v37  ;;  %v5315_v59 = vrot.slane %v5313_v22, 5 }
 0x30b   : > { %v4872_v8 = vor.u32 %v4870_v33, %v4869_v10  ;;  %v4874_v50 = vrot.slane %v4869_v10, 4  ;;  %v4607_v9 = vmax.f32 %v4558_v52, 0.0  ;;  %v12810_v58 = vpop.f32.mrf.mxu1  ;;  %v7144_v24 = vpack.c.b16 %v7116_v30, %v7115_v56  ;;  %v14461_v30 = vld [vmem:[#allocation20_spill] sm:$0xff] }
 0x30c   : > { %v7081_v52 = vpack.c.b16 %v7054_v44, %v7053_v36  ;;  %v5312_v38 = vrot.slane %v5310_v25, 4 }
 0x30d   : > { %v4873_v0 = vsel %vm10860_vm9, %v4865_v34, %v4872_v8  ;;  %v5097_v17 = vsel %vm12349_vm2, %v4874_v50, %v5096_v27  ;;  %v4639_v13 = vpack.c.bf16 %v4607_v9, %v4607_v9  ;;  %8464 = vmatmul.bf16.gmra.mxu0 %v10314_v48  ;;  %v5669_v34 = vrot.slane %v5667_v28, 4  ;;  %v12834_v27 = vld [vmem:[#allocation2 + $0x44] sm:$0x1]  ;;  %v5103_v48 = vld [vmem:[#allocation2 + $0x8c] sm:$0x1] }
 0x30e   : > { %5095 = vst [vmem:[#allocation2 + $0x7c] sm:$0xf] %v4873_v0  ;;  %v4470_v61 = vpop.f32.mrf.mxu3  ;;  %v5326_v8 = vor.u32 %v5325_v35, %v12827_v1  ;;  %v5670_v50 = vrot.slane %v12791_v14, 5  ;;  %v9647_v0 = vrot.slane %v5577_v57, 9  ;;  %v5316_v62 = vor.u32 %v5315_v59, %v5312_v38 }
 0x30f   : > { %5098 = vst [vmem:[#allocation2 + $0x80] sm:$0x1] %v5097_v17  ;;  %v4876_v19 = vshrl.u32 %v4639_v13, 16  ;;  %v4471_v5 = vadd.f32 %v4470_v61, %v4382_v21  ;;  %v4879_v63 = vshll.u32 %v4639_v13, 16  ;;  %v14460_v21 = vld [vmem:[#allocation11_spill] sm:$0xff]  ;;  %v5329_v17 = vshll.u32 %v12834_v27, 16 }
 0x310   : > { %v4298_v46 = vadd.f32 %v14461_v30, %v14460_v21  ;;  %v5671_v53 = vsel %vm11251_vm13, %v5669_v34, %v5670_v50  ;;  %v5668_v14 = vsel %vm11251_vm13, %v9647_v0, %v5667_v28 }
 0x311   : > { %v4878_v51 = vrot.slane %v4876_v19, 7  ;;  %v4560_v55 = vadd.f32 %v12755_v29, %v4471_v5  ;;  %v4386_v41 = vpop.f32.mrf.mxu2  ;;  %v5327_v19 = vrot.slane %v5326_v8, 4  ;;  %v5331_v44 = vrot.slane %v5329_v17, 5 }
 0x312   : > { %v12838_v9 = vpop.f32.mrf.mxu0  ;;  %v4387_v37 = vadd.f32 %v4386_v41, %v4298_v46  ;;  %v7117_v22 = vunpack.c.l.b16 %v5668_v14 }
 0x313   : > { %v4881_v18 = vor.u32 %v4879_v63, %v4878_v51  ;;  %v4608_v11 = vmax.f32 %v4560_v55, 0.0  ;;  %8370 = vmatmul.bf16.gmra.mxu3 %v7144_v24  ;;  %v12830_v10 = vpop.f32.mrf.mxu1  ;;  %v4882_v47 = vrot.slane %v4878_v51, 4  ;;  %v12848_v63 = vld [vmem:[#allocation2 + $0x4c] sm:$0xf]  ;;  %v5332_v41 = vsel %vm10806_vm5, %v5327_v19, %v5331_v44 }
 0x314   : > { %v5347_v36 = vshrl.u32 %v12848_v63, 16  ;;  %v5677_v19 = vrot.slane %v12834_v27, 5 }
 0x315   : > { %v5100_v6 = vsel %vm12319_vm15, %v4881_v18, %v5099_v40  ;;  %v4640_v29 = vpack.c.bf16 %v4608_v11, %v4608_v11  ;;  %v10304_v33 = vld [vmem:[#allocation2 + $0x78] sm:$0xff]  ;;  %8286 = vmatmul.bf16.gmra.mxu2 %v7081_v52  ;;  %v5674_v40 = vrot.slane %v12808_v23, 5  ;;  %v5317_v18 = vrot.slane %v5316_v62, 4  ;;  %v10315_v11 = vld [vmem:[#allocation2 + $0x48] sm:$0xff] }
 0x316   : > { %5101 = vst [vmem:[#allocation2 + $0x84] sm:$0xf] %v5100_v6  ;;  %v4473_v15 = vpop.f32.mrf.mxu3  ;;  %8227 = vmatmul.bf16.gmra.mxu1 %v10304_v33  ;;  %v5153_v52 = vld [vmem:[#allocation2 + $0x48] sm:$0xf]  ;;  %v5349_v0 = vrot.slane %v5347_v36, 4 }
 0x317   : > { %v4884_v7 = vshrl.u32 %v4640_v29, 16  ;;  %v4474_v60 = vadd.f32 %v4473_v15, %v4385_v54  ;;  %v4887_v56 = vshll.u32 %v4640_v29, 16  ;;  %v5343_v54 = vshll.u32 %v12848_v63, 16 }
 0x318   : > { %v5322_v34 = vsel %vm10806_vm5, %v5317_v18, %v12827_v1  ;;  %v5676_v15 = vrot.slane %v5674_v40, 4  ;;  %v5334_v21 = vshrl.u32 %v5153_v52, 16  ;;  %v5337_v30 = vshll.u32 %v5153_v52, 16  ;;  %v14462_v1 = vld [vmem:[#allocation13_spill] sm:$0xff] }
 0x319   : > { %v4886_v13 = vrot.slane %v4884_v7, 7  ;;  %v4563_v61 = vadd.f32 %v12777_v39, %v4474_v60  ;;  %v4389_v32 = vpop.f32.mrf.mxu2  ;;  %v7118_v39 = vunpack.c.l.b16 %v5671_v53  ;;  %v7056_v7 = vunpack.c.l.b16 %v5332_v41  ;;  %v5106_v60 = vld [vmem:[#allocation2 + $0x90] sm:$0xf]  ;;  %v5110_v52 = vld [vmem:[#allocation2 + $0x98] sm:$0x1] }
 0x31a   : > { %v12861_v33 = vpop.f32.mrf.mxu0  ;;  %v12869_v46 = vrot.slane %v5343_v54, 5  ;;  %v5678_v27 = vsel %vm11251_vm13, %v5676_v15, %v5677_v19 }
 0x31b   : > { %v4889_v5 = vor.u32 %v4887_v56, %v4886_v13  ;;  %v4891_v26 = vrot.slane %v4886_v13, 4  ;;  %v4609_v24 = vmax.f32 %v4563_v61, 0.0  ;;  %v12850_v55 = vpop.f32.mrf.mxu1  ;;  %v7145_v57 = vpack.c.b16 %v7118_v39, %v7117_v22  ;;  %v14463_v22 = vld [vmem:[#allocation14_spill] sm:$0xff] }
 0x31c   : > { %v4390_v56 = vadd.f32 %v4389_v32, %v14462_v1  ;;  %v7055_v61 = vunpack.c.l.b16 %v5322_v34  ;;  %v10375_v32 = vld [vmem:[%s14385_s3 + $0x108] sm:$0xff]  ;;  %v5350_v39 = vor.u32 %v5349_v0, %v12869_v46 }
 0x31d   : > { %v4890_v51 = vsel %vm10860_vm9, %v4882_v47, %v4889_v5  ;;  %v5104_v28 = vsel %vm12349_vm2, %v4891_v26, %v5103_v48  ;;  %v4641_v25 = vpack.c.bf16 %v4609_v24, %v4609_v24  ;;  %8469 = vmatmul.bf16.gmra.mxu0 %v10315_v11  ;;  %v5578_v47 = vld [vmem:[#allocation2 + $0x3c] sm:$0xe]  ;;  %v12877_v5 = vld [vmem:[#allocation2 + $0x50] sm:$0x1]  ;;  %v5336_v24 = vrot.slane %v5334_v21, 4  ;;  %8531 = vmatpush.bf16.msrb.mxu1 %v10375_v32 }
 0x31e   : > { %5102 = vst [vmem:[#allocation2 + $0x88] sm:$0xf] %v4890_v51  ;;  %v4475_v35 = vpop.f32.mrf.mxu3  ;;  %v7082_v62 = vpack.c.b16 %v7056_v7, %v7055_v61  ;;  %v5353_v41 = vshll.u32 %v12877_v5, 16  ;;  %v10316_v61 = vld [vmem:[#allocation2 + $0x54] sm:$0xff]  ;;  %v5681_v32 = vrot.slane %v12848_v63, 5 }
 0x31f   : > { %5105 = vst [vmem:[#allocation2 + $0x8c] sm:$0x1] %v5104_v28  ;;  %v4893_v6 = vshrl.u32 %v4641_v25, 16  ;;  %v4476_v29 = vadd.f32 %v4475_v35, %v4387_v37  ;;  %v4896_v59 = vshll.u32 %v4641_v25, 16  ;;  %v5339_v37 = vrot.slane %v5337_v30, 5  ;;  %v14464_v35 = vld [vmem:[#allocation12_spill] sm:$0xff] }
 0x320   : > { %v9648_v28 = vrot.slane %v5578_v47, 9  ;;  %v4303_v18 = vadd.f32 %v14464_v35, %v14463_v22  ;;  %v12895_v30 = vld [vmem:[#allocation2 + $0x58] sm:$0xf]  ;;  %v5683_v63 = vrot.slane %v5681_v32, 4 }
 0x321   : > { %v4895_v38 = vrot.slane %v4893_v6, 7  ;;  %v4565_v8 = vadd.f32 %v12798_v12, %v4476_v29  ;;  %v4391_v50 = vpop.f32.mrf.mxu2  ;;  %v5340_v15 = vor.u32 %v5339_v37, %v5336_v24  ;;  %v5367_v47 = vshll.u32 %v12895_v30, 16 }
 0x322   : > { %v12885_v25 = vpop.f32.mrf.mxu0  ;;  %v5675_v6 = vsel %vm11251_vm13, %v9648_v28, %v5674_v40  ;;  %v4392_v21 = vadd.f32 %v4391_v50, %v4303_v18 }
 0x323   : > { %v4898_v17 = vor.u32 %v4896_v59, %v4895_v38  ;;  %v4610_v13 = vmax.f32 %v4565_v8, 0.0  ;;  %8375 = vmatmul.bf16.gmra.mxu3 %v7145_v57  ;;  %v12872_v53 = vpop.f32.mrf.mxu1  ;;  %v4899_v29 = vrot.slane %v4895_v38, 4  ;;  %v7120_v57 = vunpack.c.l.b16 %v5678_v27  ;;  %v5113_v27 = vld [vmem:[#allocation2 + $0x9c] sm:$0xf] }
 0x324   : > { %v5351_v59 = vrot.slane %v5350_v39, 4  ;;  %v12914_v35 = vrot.slane %v5367_v47, 5 }
 0x325   : > { %v5107_v12 = vsel %vm12319_vm15, %v4898_v17, %v5106_v60  ;;  %v4642_v48 = vpack.c.bf16 %v4610_v13, %v4610_v13  ;;  %v10305_v14 = vld [vmem:[#allocation2 + $0x84] sm:$0xff]  ;;  %8291 = vmatmul.bf16.gmra.mxu2 %v7082_v62  ;;  %v7119_v17 = vunpack.c.l.b16 %v5675_v6  ;;  %v5155_v13 = vld [vmem:[#allocation2 + $0x54] sm:$0xf] }
 0x326   : > { %5108 = vst [vmem:[#allocation2 + $0x90] sm:$0xf] %v5107_v12  ;;  %v4478_v26 = vpop.f32.mrf.mxu3  ;;  %8232 = vmatmul.bf16.gmra.mxu1 %v10305_v14  ;;  %v5371_v12 = vshrl.u32 %v12895_v30, 16  ;;  %v5358_v24 = vshrl.u32 %v5155_v13, 16  ;;  %v5361_v37 = vshll.u32 %v5155_v13, 16 }
 0x327   : > { %v4901_v44 = vshrl.u32 %v4642_v48, 16  ;;  %v4479_v51 = vadd.f32 %v4478_v26, %v4390_v56  ;;  %v4904_v54 = vshll.u32 %v4642_v48, 16  ;;  %v5341_v56 = vrot.slane %v5340_v15, 4 }
 0x328   : > { %v7146_v62 = vpack.c.b16 %v7120_v57, %v7119_v17  ;;  %v5373_v18 = vrot.slane %v5371_v12, 4  ;;  %v14467_v17 = vld [vmem:[#allocation15_spill] sm:$0xff] }
 0x329   : > { %v4903_v11 = vrot.slane %v4901_v44, 7  ;;  %v4568_v36 = vadd.f32 %v12820_v43, %v4479_v51  ;;  %v4394_v34 = vpop.f32.mrf.mxu2  ;;  %v5355_v43 = vrot.slane %v5353_v41, 5  ;;  %v5346_v26 = vsel %vm10806_vm5, %v5341_v56, %v12869_v46 }
 0x32a   : > { %v12907_v19 = vpop.f32.mrf.mxu0 }
 0x32b   : > { %v4906_v8 = vor.u32 %v4904_v54, %v4903_v11  ;;  %v4908_v7 = vrot.slane %v4903_v11, 4  ;;  %v4611_v60 = vmax.f32 %v4568_v36, 0.0  ;;  %v12897_v0 = vpop.f32.mrf.mxu1  ;;  %v5356_v50 = vsel %vm10806_vm5, %v5351_v59, %v5355_v43  ;;  %v14465_v54 = vld [vmem:[#allocation21_spill] sm:$0xff]  ;;  %v5579_v59 = vld [vmem:[#allocation2 + $0x48] sm:$0xe] }
 0x32c   : > { %v7058_v28 = vunpack.c.l.b16 %v5356_v50  ;;  %v4395_v46 = vadd.f32 %v4394_v34, %v14465_v54  ;;  %v7057_v36 = vunpack.c.l.b16 %v5346_v26  ;;  %v5374_v34 = vor.u32 %v5373_v18, %v12914_v35 }
 0x32d   : > { %v4907_v23 = vsel %vm10860_vm9, %v4899_v29, %v4906_v8  ;;  %v5111_v40 = vsel %vm12349_vm2, %v4908_v7, %v5110_v52  ;;  %v4643_v38 = vpack.c.bf16 %v4611_v60, %v4611_v60  ;;  %8474 = vmatmul.bf16.gmra.mxu0 %v10316_v61  ;;  %v5360_v29 = vrot.slane %v5358_v24, 4  ;;  %v12921_v8 = vld [vmem:[#allocation2 + $0x5c] sm:$0x1] }
 0x32e   : > { %5109 = vst [vmem:[#allocation2 + $0x94] sm:$0xf] %v4907_v23  ;;  %v4480_v1 = vpop.f32.mrf.mxu3  ;;  %v7083_v15 = vpack.c.b16 %v7058_v28, %v7057_v36  ;;  %v5363_v7 = vrot.slane %v5361_v37, 5  ;;  %v5377_v50 = vshll.u32 %v12921_v8, 16  ;;  %v5375_v37 = vrot.slane %v5374_v34, 4 }
 0x32f   : > { %5112 = vst [vmem:[#allocation2 + $0x98] sm:$0x1] %v5111_v40  ;;  %v4910_v48 = vshrl.u32 %v4643_v38, 16  ;;  %v4481_v14 = vadd.f32 %v4480_v1, %v4392_v21  ;;  %v4913_v44 = vshll.u32 %v4643_v38, 16  ;;  %v5684_v21 = vrot.slane %v12877_v5, 5  ;;  %v14466_v38 = vld [vmem:[#allocation16_spill] sm:$0xff] }
 0x330   : > { %v4308_v13 = vadd.f32 %v14467_v17, %v14466_v38  ;;  %v9649_v1 = vrot.slane %v5579_v59, 9  ;;  %v5364_v12 = vor.u32 %v5363_v7, %v5360_v29  ;;  %v5688_v7 = vrot.slane %v12895_v30, 5  ;;  %v14468_v30 = vld [vmem:[#allocation17_spill] sm:$0xff] }
 0x331   : > { %v4912_v39 = vrot.slane %v4910_v48, 7  ;;  %v4570_v51 = vadd.f32 %v12838_v9, %v4481_v14  ;;  %v4396_v22 = vpop.f32.mrf.mxu2  ;;  %v5685_v56 = vsel %vm11251_vm13, %v5683_v63, %v5684_v21  ;;  %v12933_v48 = vld [vmem:[#allocation2 + $0x64] sm:$0xf] }
 0x332   : > { %v12925_v40 = vpop.f32.mrf.mxu0  ;;  %v5682_v26 = vsel %vm11251_vm13, %v9649_v1, %v5681_v32  ;;  %v5395_v54 = vshrl.u32 %v12933_v48, 16  ;;  %v5365_v36 = vrot.slane %v5364_v12, 4  ;;  %v5120_v1 = vld [vmem:[#allocation2 + $0xa8] sm:$0xf] }
 0x333   : > { %v4915_v41 = vor.u32 %v4913_v44, %v4912_v39  ;;  %v4612_v11 = vmax.f32 %v4570_v51, 0.0  ;;  %8380 = vmatmul.bf16.gmra.mxu3 %v7146_v62  ;;  %v12917_v6 = vpop.f32.mrf.mxu1  ;;  %v4916_v14 = vrot.slane %v4912_v39, 4  ;;  %v5117_v62 = vld [vmem:[#allocation2 + $0xa4] sm:$0x1]  ;;  %v7121_v29 = vunpack.c.l.b16 %v5682_v26 }
 0x334   : > { %v5370_v59 = vsel %vm10806_vm5, %v5365_v36, %v12914_v35 }
 0x335   : > { %v5114_v52 = vsel %vm12319_vm15, %v4915_v41, %v5113_v27  ;;  %v4644_v9 = vpack.c.bf16 %v4612_v11, %v4612_v11  ;;  %v10306_v57 = vld [vmem:[#allocation2 + $0x90] sm:$0xff]  ;;  %8296 = vmatmul.bf16.gmra.mxu2 %v7083_v15  ;;  %v4397_v27 = vadd.f32 %v4396_v22, %v4308_v13  ;;  %v7122_v41 = vunpack.c.l.b16 %v5685_v56 }
 0x336   : > { %5115 = vst [vmem:[#allocation2 + $0x9c] sm:$0xf] %v5114_v52  ;;  %v4483_v60 = vpop.f32.mrf.mxu3  ;;  %8237 = vmatmul.bf16.gmra.mxu1 %v10306_v57  ;;  %v5379_v11 = vrot.slane %v5377_v50, 5  ;;  %v10317_v52 = vld [vmem:[#allocation2 + $0x60] sm:$0xff]  ;;  %v7059_v50 = vunpack.c.l.b16 %v5370_v59 }
 0x337   : > { %v4918_v43 = vshrl.u32 %v4644_v9, 16  ;;  %v4484_v23 = vadd.f32 %v4483_v60, %v4395_v46  ;;  %v4921_v47 = vshll.u32 %v4644_v9, 16  ;;  %v5157_v60 = vld [vmem:[#allocation2 + $0x60] sm:$0xf]  ;;  %v7147_v21 = vpack.c.b16 %v7122_v41, %v7121_v29 }
 0x338   : > { %v5380_v22 = vsel %vm10806_vm5, %v5375_v37, %v5379_v11  ;;  %v5580_v37 = vld [vmem:[#allocation2 + $0x54] sm:$0xe]  ;;  %v5691_v41 = vrot.slane %v12921_v8, 5  ;;  %v14469_v8 = vld [vmem:[#allocation22_spill] sm:$0xff] }
 0x339   : > { %v4920_v61 = vrot.slane %v4918_v43, 7  ;;  %v4573_v5 = vadd.f32 %v12861_v33, %v4484_v23  ;;  %v4399_v24 = vpop.f32.mrf.mxu2  ;;  %v5391_v33 = vshll.u32 %v12933_v48, 16  ;;  %v5397_v43 = vrot.slane %v5395_v54, 4 }
 0x33a   : > { %v12947_v15 = vpop.f32.mrf.mxu0  ;;  %v7060_v13 = vunpack.c.l.b16 %v5380_v22  ;;  %v4400_v12 = vadd.f32 %v4399_v24, %v14468_v30  ;;  %v10374_v24 = vld [vmem:[%s14385_s3 + $0x100] sm:$0xff]  ;;  %v9650_v36 = vrot.slane %v5580_v37, 9 }
 0x33b   : > { %v4923_v44 = vor.u32 %v4921_v47, %v4920_v61  ;;  %v4925_v51 = vrot.slane %v4920_v61, 4  ;;  %v4613_v28 = vmax.f32 %v4573_v5, 0.0  ;;  %v12937_v18 = vpop.f32.mrf.mxu1  ;;  %v12953_v34 = vrot.slane %v5391_v33, 5  ;;  %v14470_v22 = vld [vmem:[#allocation18_spill] sm:$0xff]  ;;  %8532 = vmatpush.bf16.msrb.mxu1 %v10374_v24 }
 0x33c   : > { %v5382_v61 = vshrl.u32 %v5157_v60, 16  ;;  %v5385_v47 = vshll.u32 %v5157_v60, 16 }
 0x33d   : > { %v4924_v39 = vsel %vm10860_vm9, %v4916_v14, %v4923_v44  ;;  %v5118_v32 = vsel %vm12349_vm2, %v4925_v51, %v5117_v62  ;;  %v4645_v46 = vpack.c.bf16 %v4613_v28, %v4613_v28  ;;  %8479 = vmatmul.bf16.gmra.mxu0 %v10317_v52  ;;  %v5690_v14 = vrot.slane %v5688_v7, 4  ;;  %v12957_v62 = vld [vmem:[#allocation2 + $0x68] sm:$0x1] }
 0x33e   : > { %5116 = vst [vmem:[#allocation2 + $0xa0] sm:$0xf] %v4924_v39  ;;  %v4485_v63 = vpop.f32.mrf.mxu3  ;;  %v5398_v44 = vor.u32 %v5397_v43, %v12953_v34  ;;  %v5384_v33 = vrot.slane %v5382_v61, 4  ;;  %v5387_v54 = vrot.slane %v5385_v47, 5  ;;  %v5401_v39 = vshll.u32 %v12957_v62, 16 }
 0x33f   : > { %5119 = vst [vmem:[#allocation2 + $0xa4] sm:$0x1] %v5118_v32  ;;  %v4927_v9 = vshrl.u32 %v4645_v46, 16  ;;  %v4486_v57 = vadd.f32 %v4485_v63, %v4397_v27  ;;  %v4930_v38 = vshll.u32 %v4645_v46, 16  ;;  %v7084_v27 = vpack.c.b16 %v7060_v13, %v7059_v50  ;;  %v12978_v43 = vld [vmem:[#allocation2 + $0x70] sm:$0xf] }
 0x340   : > { %v5692_v63 = vsel %vm11251_vm13, %v5690_v14, %v5691_v41  ;;  %v4313_v52 = vadd.f32 %v14470_v22, %v14469_v8  ;;  %v5388_v50 = vor.u32 %v5387_v54, %v5384_v33  ;;  %v5403_v61 = vrot.slane %v5401_v39, 5  ;;  %v10389_v54 = vld [vmem:[%s14385_s3 + $0x178] sm:$0xff] }
 0x341   : > { %v4929_v23 = vrot.slane %v4927_v9, 7  ;;  %v4575_v17 = vadd.f32 %v12885_v25, %v4486_v57  ;;  %v4401_v56 = vpop.f32.mrf.mxu2  ;;  %v5399_v9 = vrot.slane %v5398_v44, 4  ;;  %v7124_v13 = vunpack.c.l.b16 %v5692_v63  ;;  %v10397_v39 = vld [vmem:[%s14385_s3 + $0x1b8] sm:$0xff]  ;;  %8614 = vmatpush.bf16.msra.mxu2 %v10389_v54 }
 0x342   : > { %v12971_v29 = vpop.f32.mrf.mxu0  ;;  %v4402_v30 = vadd.f32 %v4401_v56, %v4313_v52  ;;  %v5389_v56 = vrot.slane %v5388_v50, 4  ;;  %v5695_v63 = vrot.slane %v12933_v48, 5  ;;  %8703 = vmatpush.bf16.msra.mxu3 %v10397_v39  ;;  %v14471_v48 = vld [vmem:[#allocation19_spill] sm:$0xff]  ;;  %v10405_v54 = vld [vmem:[%s14385_s3 + $0x1f8] sm:$0xff] }
 0x343   : > { %v4932_v5 = vor.u32 %v4930_v38, %v4929_v23  ;;  %v4614_v35 = vmax.f32 %v4575_v17, 0.0  ;;  %8385 = vmatmul.bf16.gmra.mxu3 %v7147_v21  ;;  %v12959_v26 = vpop.f32.mrf.mxu1  ;;  %v5689_v21 = vsel %vm11251_vm13, %v9650_v36, %v5688_v7  ;;  %v4933_v38 = vrot.slane %v4929_v23, 4  ;;  %v5124_v17 = vld [vmem:[#allocation2 + $0xb0] sm:$0x1]  ;;  %8792 = vmatpush.bf16.msra.mxu0 %v10405_v54  ;;  %v5161_v54 = vld [vmem:[#allocation2 + $0x78] sm:$0xf] }
 0x344   : > { %v7123_v14 = vunpack.c.l.b16 %v5689_v21  ;;  %v5415_v7 = vshll.u32 %v12978_v43, 16 }
 0x345   : > { %v5121_v25 = vsel %vm12319_vm15, %v4932_v5, %v5120_v1  ;;  %v4646_v51 = vpack.c.bf16 %v4614_v35, %v4614_v35  ;;  %v10307_v28 = vld [vmem:[#allocation2 + $0x9c] sm:$0xff]  ;;  %8301 = vmatmul.bf16.gmra.mxu2 %v7084_v27  ;;  %v5159_v27 = vld [vmem:[#allocation2 + $0x6c] sm:$0xf] }
 0x346   : > { %5122 = vst [vmem:[#allocation2 + $0xa8] sm:$0xf] %v5121_v25  ;;  %v4488_v11 = vpop.f32.mrf.mxu3  ;;  %8242 = vmatmul.bf16.gmra.mxu1 %v10307_v28  ;;  %v5419_v25 = vshrl.u32 %v12978_v43, 16  ;;  %v10318_v28 = vld [vmem:[#allocation2 + $0x6c] sm:$0xff]  ;;  %v7148_v24 = vpack.c.b16 %v7124_v13, %v7123_v14  ;;  %v13007_v8 = vrot.slane %v5415_v7, 5 }
 0x347   : > { %v4935_v32 = vshrl.u32 %v4646_v51, 16  ;;  %v4489_v46 = vadd.f32 %v4488_v11, %v4400_v12  ;;  %v4938_v59 = vshll.u32 %v4646_v51, 16  ;;  %v5749_v7 = vld [vmem:[#allocation2 + $0xc] sm:$0xf] }
 0x348   : > { %v5798_v39 = vshrl.u32 %v5749_v7, 16 }
 0x349   : > { %v4937_v57 = vrot.slane %v4935_v32, 7  ;;  %v4578_v60 = vadd.f32 %v12907_v19, %v4489_v46  ;;  %v4404_v1 = vpop.f32.mrf.mxu2  ;;  %v5404_v19 = vsel %vm10806_vm5, %v5399_v9, %v5403_v61  ;;  %v13001_v32 = vld [vmem:[%s14386_s4] ss:$0 sm:$0xff]  ;;  %v5394_v46 = vsel %vm10806_vm5, %v5389_v56, %v12953_v34 }
 0x34a   : > { %v12990_v33 = vpop.f32.mrf.mxu0  ;;  %v7062_v36 = vunpack.c.l.b16 %v5404_v19  ;;  %v4405_v50 = vadd.f32 %v4404_v1, %v14471_v48  ;;  %v7061_v61 = vunpack.c.l.b16 %v5394_v46  ;;  %v5697_v19 = vrot.slane %v5695_v63, 4 }
 0x34b   : > { %v4940_v47 = vor.u32 %v4938_v59, %v4937_v57  ;;  %v4942_v5 = vrot.slane %v4937_v57, 4  ;;  %v4615_v35 = vmax.f32 %v4578_v60, 0.0  ;;  %v12980_v12 = vpop.f32.mrf.mxu1  ;;  %v5581_v57 = vld [vmem:[#allocation2 + $0x60] sm:$0xe]  ;;  %v5421_v59 = vrot.slane %v5419_v25, 4 }
 0x34c   : > { %v5127_v60 = vld [vmem:[#allocation2 + $0xb4] sm:$0xf]  ;;  %v9651_v14 = vrot.slane %v5581_v57, 9  ;;  %v7085_v1 = vpack.c.b16 %v7062_v36, %v7061_v61  ;;  %v5698_v56 = vrot.slane %v12957_v62, 5  ;;  %v5801_v46 = vshll.u32 %v5749_v7, 16  ;;  %v10413_v62 = vld [vmem:[%s14385_s3 + $0x238] sm:$0xff] }
 0x34d   : > { %v4941_v23 = vsel %vm10860_vm9, %v4933_v38, %v4940_v47  ;;  %v5125_v37 = vsel %vm12349_vm2, %v4942_v5, %v5124_v17  ;;  %v4647_v44 = vpack.c.bf16 %v4615_v35, %v4615_v35  ;;  %8484 = vmatmul.bf16.gmra.mxu0 %v10318_v28  ;;  %v5406_v38 = vshrl.u32 %v5159_v27, 16  ;;  %v13014_v47 = vld [vmem:[#allocation2 + $0x74] sm:$0x1]  ;;  %v14472_v5 = vld [vmem:[#allocation23_spill] sm:$0xff]  ;;  %8881 = vmatpush.bf16.msra.mxu1 %v10413_v62 }
 0x34e   : > { %5123 = vst [vmem:[#allocation2 + $0xac] sm:$0xf] %v4941_v23  ;;  %v4490_v51 = vpop.f32.mrf.mxu3  ;;  %v5409_v17 = vshll.u32 %v5159_v27, 16  ;;  %v8179_v35 = vadd.f32 %v13001_v32, %v12744_v49  ;;  %v5422_v25 = vor.u32 %v5421_v59, %v13007_v8  ;;  %v5425_v27 = vshll.u32 %v13014_v47, 16 }
 0x34f   : > { %5126 = vst [vmem:[#allocation2 + $0xb0] sm:$0x1] %v5125_v37  ;;  %v4944_v41 = vshrl.u32 %v4647_v44, 16  ;;  %v4491_v11 = vadd.f32 %v4490_v51, %v4402_v30  ;;  %v4947_v52 = vshll.u32 %v4647_v44, 16  ;;  %v13025_v51 = vld [vmem:[#allocation2 + $0x10] sm:$0xf]  ;;  %v5696_v36 = vsel %vm11251_vm13, %v9651_v14, %v5695_v63 }
 0x350   : > { %v5408_v49 = vrot.slane %v5406_v38, 4  ;;  %v5411_v28 = vrot.slane %v5409_v17, 5  ;;  %v5811_v57 = vshrl.u32 %v13025_v51, 16  ;;  %v5423_v17 = vrot.slane %v5422_v25, 4 }
 0x351   : > { %v13009_v22 = vrot.slane %v4944_v41, 7  ;;  %v4580_v9 = vadd.f32 %v12925_v40, %v4491_v11  ;;  %v4406_v21 = vpop.f32.mrf.mxu2  ;;  %v4318_v40 = vadd.f32 %v12723_v2, %v14472_v5  ;;  %v5427_v61 = vrot.slane %v5425_v27, 5 }
 0x352   : > { %v5412_v63 = vor.u32 %v5411_v28, %v5408_v49  ;;  %v7125_v25 = vunpack.c.l.b16 %v5696_v36  ;;  %v13062_v36 = vld [vmem:[#allocation2 + $0x7c] sm:$0xf]  ;;  %v8184_v42 = vadd.f32 %v13001_v32, %v12787_v4  ;;  %v8186_v31 = vadd.f32 %v13001_v32, %v12810_v58 }
 0x353   : > { %v4949_v34 = vor.u32 %v4947_v52, %v13009_v22  ;;  %v4616_v13 = vmax.f32 %v4580_v9, 0.0  ;;  %8390 = vmatmul.bf16.gmra.mxu3 %v7148_v24  ;;  %v13020_v30 = vpop.f32.mrf.mxu1  ;;  %v13029_v24 = vpop.f32.mrf.mxu0  ;;  %v5699_v52 = vsel %vm11251_vm13, %v5697_v19, %v5698_v56  ;;  %v5807_v9 = vshll.u32 %v13025_v51, 16 }
 0x354   : > { %v4407_v48 = vadd.f32 %v4406_v21, %v4318_v40  ;;  %v5428_v21 = vsel %vm10806_vm5, %v5423_v17, %v5427_v61  ;;  %v5803_v56 = vrot.slane %v5801_v46, 5  ;;  %v5134_v17 = vld [vmem:[#allocation2 + $0xc0] sm:$0xf] }
 0x355   : > { %v5128_v23 = vsel %vm12319_vm15, %v4949_v34, %v5127_v60  ;;  %v4648_v37 = vpack.c.bf16 %v4616_v13, %v4616_v13  ;;  %v10308_v44 = vld [vmem:[#allocation2 + $0xa8] sm:$0xff]  ;;  %8306 = vmatmul.bf16.gmra.mxu2 %v7085_v1  ;;  %v4950_v34 = vrot.slane %v13009_v22, 4  ;;  %v5131_v13 = vld [vmem:[#allocation2 + $0xbc] sm:$0x1]  ;;  %v13055_v49 = vrot.slane %v5807_v9, 5 }
 0x356   : > { %5129 = vst [vmem:[#allocation2 + $0xb4] sm:$0xf] %v5128_v23  ;;  %v4493_v2 = vpop.f32.mrf.mxu3  ;;  %8247 = vmatmul.bf16.gmra.mxu1 %v10308_v44  ;;  %v7126_v44 = vunpack.c.l.b16 %v5699_v52 }
 0x357   : > { %v4952_v41 = vshrl.u32 %v4648_v37, 16  ;;  %v4494_v11 = vadd.f32 %v4493_v2, %v4405_v50  ;;  %v4955_v60 = vshll.u32 %v4648_v37, 16  ;;  %v13047_v37 = vrot.slane %v5798_v39, 4 }
 0x358   : > { %v5413_v2 = vrot.slane %v5412_v63, 4  ;;  %v7149_v62 = vpack.c.b16 %v7126_v44, %v7125_v25  ;;  %v13082_v25 = vld [vmem:[#allocation2 + $0x80] sm:$0x1] }
 0x359   : > { %v4954_v59 = vrot.slane %v4952_v41, 7  ;;  %v4583_v38 = vadd.f32 %v12947_v15, %v4494_v11  ;;  %v8267_v50 = vpop.f32.mrf.mxu2  ;;  %v5813_v11 = vrot.slane %v5811_v57, 4  ;;  %v5443_v57 = vshrl.u32 %v13062_v36, 16 }
 0x35a   : > { %v8268_v7 = vadd.f32 %v8267_v50, %v8179_v35  ;;  %v10319_v35 = vld [vmem:[#allocation2 + $0x78] sm:$0xff]  ;;  %v5418_v52 = vsel %vm10806_vm5, %v5413_v2, %v13007_v8  ;;  %v5433_v8 = vshll.u32 %v5161_v54, 16 }
 0x35b   : > { %v4957_v5 = vor.u32 %v4955_v60, %v4954_v59  ;;  %v4959_v14 = vrot.slane %v4954_v59, 4  ;;  %v4617_v19 = vmax.f32 %v4583_v38, 0.0  ;;  %v13045_v23 = vpop.f32.mrf.mxu1  ;;  %v13057_v41 = vpop.f32.mrf.mxu0  ;;  %v7064_v59 = vunpack.c.l.b16 %v5428_v21  ;;  %v13067_v60 = vld [vmem:[#allocation2 + $0x14] sm:$0x1]  ;;  %v5582_v21 = vld [vmem:[#allocation2 + $0x6c] sm:$0xe] }
 0x35c   : > { %v5439_v38 = vshll.u32 %v13062_v36, 16  ;;  %v7063_v61 = vunpack.c.l.b16 %v5418_v52  ;;  %v5445_v44 = vrot.slane %v5443_v57, 4  ;;  %v9652_v52 = vrot.slane %v5582_v21, 9 }
 0x35d   : > { %v4958_v15 = vsel %vm10860_vm9, %v4950_v34, %v4957_v5  ;;  %v5132_v22 = vsel %vm12349_vm2, %v4959_v14, %v5131_v13  ;;  %v4649_v1 = vpack.c.bf16 %v4617_v19, %v4617_v19  ;;  %8489 = vmatmul.bf16.gmra.mxu0 %v10319_v35  ;;  %v5702_v13 = vrot.slane %v12978_v43, 5 }
 0x35e   : > { %5130 = vst [vmem:[#allocation2 + $0xb8] sm:$0xf] %v4958_v15  ;;  %v4495_v40 = vpop.f32.mrf.mxu3  ;;  %v5817_v14 = vshll.u32 %v13067_v60, 16  ;;  %v13077_v19 = vrot.slane %v5439_v38, 5 }
 0x35f   : > { %5133 = vst [vmem:[#allocation2 + $0xbc] sm:$0x1] %v5132_v22  ;;  %v4961_v28 = vshrl.u32 %v4649_v1, 16  ;;  %v4496_v27 = vadd.f32 %v4495_v40, %v4407_v48  ;;  %v4964_v39 = vshll.u32 %v4649_v1, 16  ;;  %v5430_v48 = vshrl.u32 %v5161_v54, 16 }
 0x360   : > { %v7086_v1 = vpack.c.b16 %v7064_v59, %v7063_v61  ;;  %v5814_v40 = vor.u32 %v5813_v11, %v13055_v49  ;;  %v5704_v35 = vrot.slane %v5702_v13, 4  ;;  %v5705_v59 = vrot.slane %v13014_v47, 5 }
 0x361   : > { %v13064_v46 = vrot.slane %v4961_v28, 7  ;;  %v4585_v9 = vadd.f32 %v12971_v29, %v4496_v27  ;;  %v8269_v34 = vpop.f32.mrf.mxu2  ;;  %v5804_v29 = vor.u32 %v5803_v56, %v13047_v37  ;;  %v5432_v37 = vrot.slane %v5430_v48, 4 }
 0x362   : > { %v5435_v56 = vrot.slane %v5433_v8, 5  ;;  %v5446_v28 = vor.u32 %v5445_v44, %v13077_v19  ;;  %v8181_v27 = vadd.f32 %v13001_v32, %v12767_v20  ;;  %v5449_v20 = vshll.u32 %v13082_v25, 16  ;;  %v5138_v8 = vld [vmem:[#allocation2 + $0xc8] sm:$0x1] }
 0x363   : > { %v4966_v50 = vor.u32 %v4964_v39, %v13064_v46  ;;  %v4618_v63 = vmax.f32 %v4585_v9, 0.0  ;;  %8395 = vmatmul.bf16.gmra.mxu3 %v7149_v62  ;;  %v13073_v5 = vpop.f32.mrf.mxu1  ;;  %v13091_v11 = vpop.f32.mrf.mxu0  ;;  %v10388_v62 = vld [vmem:[%s14385_s3 + $0x170] sm:$0xff]  ;;  %v5805_v9 = vrot.slane %v5804_v29, 4  ;;  %v5815_v4 = vrot.slane %v5814_v40, 4 }
 0x364   : > { %8615 = vmatpush.bf16.msra.mxu2 %v10388_v62  ;;  %v4967_v48 = vrot.slane %v13064_v46, 4  ;;  %v5436_v61 = vor.u32 %v5435_v56, %v5432_v37  ;;  %v5447_v44 = vrot.slane %v5446_v28, 4  ;;  %v8270_v29 = vadd.f32 %v8269_v34, %v8181_v27 }
 0x365   : > { %v5135_v15 = vsel %vm12319_vm15, %v4966_v50, %v5134_v17  ;;  %v4650_v43 = vpack.c.bf16 %v4618_v63, %v4618_v63  ;;  %v10309_v22 = vld [vmem:[#allocation2 + $0xb4] sm:$0xff]  ;;  %8311 = vmatmul.bf16.gmra.mxu2 %v7086_v1  ;;  %v5819_v17 = vrot.slane %v5817_v14, 5  ;;  %v5706_v50 = vsel %vm11251_vm13, %v5704_v35, %v5705_v59 }
 0x366   : > { %5136 = vst [vmem:[#allocation2 + $0xc0] sm:$0xf] %v5135_v15  ;;  %v8356_v2 = vpop.f32.mrf.mxu3  ;;  %8252 = vmatmul.bf16.gmra.mxu1 %v10309_v22  ;;  %v5751_v1 = vld [vmem:[#allocation2 + $0x18] sm:$0xf]  ;;  %v5703_v14 = vsel %vm11251_vm13, %v9652_v52, %v5702_v13  ;;  %v7128_v37 = vunpack.c.l.b16 %v5706_v50  ;;  %v5810_v28 = vsel %vm10806_vm5, %v5805_v9, %v13055_v49  ;;  %v5437_v13 = vrot.slane %v5436_v61, 4  ;;  %v10396_v49 = vld [vmem:[%s14385_s3 + $0x1b0] sm:$0xff] }
 0x367   : > { %v4969_v54 = vshrl.u32 %v4650_v43, 16  ;;  %v13089_v39 = vadd.f32 %v8356_v2, %v8268_v7  ;;  %v4972_v57 = vshll.u32 %v4650_v43, 16  ;;  %v5752_v7 = vld [vmem:[#allocation2 + $0x1c] sm:$0xf]  ;;  %v5451_v43 = vrot.slane %v5449_v20, 5  ;;  %8704 = vmatpush.bf16.msra.mxu3 %v10396_v49  ;;  %v10412_v49 = vld [vmem:[%s14385_s3 + $0x230] sm:$0xff] }
 0x368   : > { %v5831_v40 = vshll.u32 %v5752_v7, 16  ;;  %v5835_v46 = vshrl.u32 %v5752_v7, 16  ;;  %v5820_v34 = vsel %vm10806_vm5, %v5815_v4, %v5819_v17  ;;  %v5822_v16 = vshrl.u32 %v5751_v1, 16  ;;  %v5163_v9 = vld [vmem:[#allocation2 + $0x84] sm:$0xf]  ;;  %8882 = vmatpush.bf16.msra.mxu1 %v10412_v49 }
 0x369   : > { %v4971_v38 = vrot.slane %v4969_v54, 7  ;;  %v8272_v63 = vpop.f32.mrf.mxu2  ;;  %v5452_v27 = vsel %vm10806_vm5, %v5447_v44, %v5451_v43  ;;  %v7127_v62 = vunpack.c.l.b16 %v5703_v14  ;;  %v5825_v59 = vshll.u32 %v5751_v1, 16  ;;  %v13130_v4 = vld [vmem:[#allocation2 + $0x88] sm:$0xf]  ;;  %v5782_v44 = vld [vmem:[#allocation2 + $0x20] sm:$0x1] }
 0x36a   : > { %v8273_v22 = vadd.f32 %v8272_v63, %v8184_v42  ;;  %v10320_v42 = vld [vmem:[#allocation2 + $0x84] sm:$0xff]  ;;  %v7254_v20 = vunpack.c.l.b16 %v5820_v34  ;;  %v5837_v58 = vrot.slane %v5835_v46, 4  ;;  %v7066_v7 = vunpack.c.l.b16 %v5452_v27 }
 0x36b   : > { %v4974_v15 = vor.u32 %v4972_v57, %v4971_v38  ;;  %v4976_v47 = vrot.slane %v4971_v38, 4  ;;  %v13101_v21 = vpop.f32.mrf.mxu1  ;;  %v13120_v52 = vpop.f32.mrf.mxu0  ;;  %v5442_v38 = vsel %vm10806_vm5, %v5437_v13, %v13077_v19  ;;  %v13128_v57 = vrot.slane %v5831_v40, 5 }
 0x36c   : > { %14473 = vst [vmem:[#allocation7_spill] sm:$0xff] %v13120_v52  ;;  %v7150_v17 = vpack.c.b16 %v7128_v37, %v7127_v62  ;;  %v7253_v50 = vunpack.c.l.b16 %v5810_v28  ;;  %v5709_v61 = vrot.slane %v13062_v36, 5  ;;  %v5457_v19 = vshll.u32 %v5163_v9, 16  ;;  %v5583_v62 = vld [vmem:[#allocation2 + $0x78] sm:$0xe] }
 0x36d   : > { %v4975_v2 = vsel %vm10860_vm9, %v4967_v48, %v4974_v15  ;;  %v5139_v35 = vsel %vm12349_vm2, %v4976_v47, %v5138_v8  ;;  %8494 = vmatmul.bf16.gmra.mxu0 %v10320_v42  ;;  %v5463_v48 = vshll.u32 %v13130_v4, 16  ;;  %v5467_v8 = vshrl.u32 %v13130_v4, 16 }
 0x36e   : > { %5137 = vst [vmem:[#allocation2 + $0xc4] sm:$0xf] %v4975_v2  ;;  %v8358_v56 = vpop.f32.mrf.mxu3  ;;  %v5454_v15 = vshrl.u32 %v5163_v9, 16  ;;  %v5824_v40 = vrot.slane %v5822_v16, 4  ;;  %v5838_v46 = vor.u32 %v5837_v58, %v13128_v57  ;;  %v7285_v2 = vpack.c.b16 %v7254_v20, %v7253_v50 }
 0x36f   : > { %5140 = vst [vmem:[#allocation2 + $0xc8] sm:$0x1] %v5139_v35  ;;  %v13118_v54 = vadd.f32 %v8358_v56, %v8270_v29  ;;  %v7065_v29 = vunpack.c.l.b16 %v5442_v38  ;;  %v13135_v1 = vrot.slane %v5463_v48, 5  ;;  %v5469_v14 = vrot.slane %v5467_v8, 4  ;;  %v13140_v56 = vld [vmem:[#allocation2 + $0x8c] sm:$0x1] }
 0x370   : > { %v5827_v37 = vrot.slane %v5825_v59, 5  ;;  %v5841_v34 = vshll.u32 %v5782_v44, 16  ;;  %v5711_v28 = vrot.slane %v5709_v61, 4  ;;  %v5456_v13 = vrot.slane %v5454_v15, 4  ;;  %v10404_v59 = vld [vmem:[%s14385_s3 + $0x1f0] sm:$0xff] }
 0x371   : > { %v8274_v63 = vpop.f32.mrf.mxu2  ;;  %v7087_v35 = vpack.c.b16 %v7066_v7, %v7065_v29  ;;  %v5459_v27 = vrot.slane %v5457_v19, 5  ;;  %v5470_v42 = vor.u32 %v5469_v14, %v13135_v1  ;;  %v5712_v9 = vrot.slane %v13082_v25, 5  ;;  %8793 = vmatpush.bf16.msra.mxu0 %v10404_v59  ;;  %v5754_v7 = vld [vmem:[#allocation2 + $0x28] sm:$0xf]  ;;  %v5753_v25 = vld [vmem:[#allocation2 + $0x24] sm:$0xf] }
 0x372   : > { %v8275_v47 = vadd.f32 %v8274_v63, %v8186_v31  ;;  %v5839_v20 = vrot.slane %v5838_v46, 4  ;;  %v5473_v38 = vshll.u32 %v13140_v56, 16  ;;  %v5828_v58 = vor.u32 %v5827_v37, %v5824_v40 }
 0x373   : > { %8400 = vmatmul.bf16.gmra.mxu3 %v7150_v17  ;;  %v13137_v43 = vpop.f32.mrf.mxu1  ;;  %v13145_v16 = vpop.f32.mrf.mxu0  ;;  %v5843_v17 = vrot.slane %v5841_v34, 5  ;;  %v9653_v48 = vrot.slane %v5583_v62, 9  ;;  %v5713_v8 = vsel %vm11251_vm13, %v5711_v28, %v5712_v9  ;;  %v5460_v63 = vor.u32 %v5459_v27, %v5456_v13  ;;  %v10321_v13 = vld [vmem:[#allocation2 + $0x90] sm:$0xff] }
 0x374   : > { %14474 = vst [vmem:[#allocation6_spill] sm:$0xff] %v13145_v16  ;;  %v5471_v44 = vrot.slane %v5470_v42, 4  ;;  %v5475_v14 = vrot.slane %v5473_v38, 5  ;;  %v5855_v40 = vshll.u32 %v5754_v7, 16  ;;  %v8191_v46 = vadd.f32 %v13001_v32, %v12850_v55  ;;  %v5165_v9 = vld [vmem:[#allocation2 + $0x90] sm:$0xf] }
 0x375   : > { %8316 = vmatmul.bf16.gmra.mxu2 %v7087_v35  ;;  %v5710_v29 = vsel %vm11251_vm13, %v9653_v48, %v5709_v61  ;;  %v5829_v35 = vrot.slane %v5828_v58, 4  ;;  %v5859_v37 = vshrl.u32 %v5754_v7, 16  ;;  %v5846_v27 = vshrl.u32 %v5753_v25, 16 }
 0x376   : > { %v8361_v36 = vpop.f32.mrf.mxu3  ;;  %8533 = vmatmul.bf16.vlgmr.msrb.gmra.mxu1 %v7285_v2  ;;  %v7130_v2 = vunpack.c.l.b16 %v5713_v8  ;;  %v5476_v28 = vsel %vm10806_vm5, %v5471_v44, %v5475_v14  ;;  %v5849_v42 = vshll.u32 %v5753_v25, 16  ;;  %v7129_v62 = vunpack.c.l.b16 %v5710_v29 }
 0x377   : > { %v13143_v31 = vadd.f32 %v8361_v36, %v8273_v22  ;;  %v8189_v22 = vadd.f32 %v13001_v32, %v12830_v10  ;;  %v5844_v10 = vsel %vm10806_vm5, %v5839_v20, %v5843_v17  ;;  %v5461_v36 = vrot.slane %v5460_v63, 4  ;;  %v13176_v20 = vld [vmem:[#allocation2 + $0x94] sm:$0xf] }
 0x378   : > { %v5834_v59 = vsel %vm10806_vm5, %v5829_v35, %v13128_v57  ;;  %v7256_v49 = vunpack.c.l.b16 %v5844_v10  ;;  %v5491_v58 = vshrl.u32 %v13176_v20, 16  ;;  %v7151_v17 = vpack.c.b16 %v7130_v2, %v7129_v62  ;;  %v5783_v2 = vld [vmem:[#allocation2 + $0x2c] sm:$0x1] }
 0x379   : > { %v8277_v50 = vpop.f32.mrf.mxu2  ;;  %v5466_v38 = vsel %vm10806_vm5, %v5461_v36, %v13135_v1  ;;  %v7068_v7 = vunpack.c.l.b16 %v5476_v28  ;;  %v5716_v57 = vrot.slane %v13130_v4, 5  ;;  %v5861_v48 = vrot.slane %v5859_v37, 4  ;;  %v13191_v37 = vld [vmem:[#allocation2 + $0x98] sm:$0x1] }
 0x37a   : > { %v8278_v15 = vadd.f32 %v8277_v50, %v8189_v22  ;;  %v13181_v22 = vrot.slane %v5855_v40, 5  ;;  %v5478_v50 = vshrl.u32 %v5165_v9, 16  ;;  %v5481_v63 = vshll.u32 %v5165_v9, 16 }
 0x37b   : > { %v13159_v19 = vpop.f32.mrf.mxu1  ;;  %v13174_v55 = vpop.f32.mrf.mxu0  ;;  %v5493_v25 = vrot.slane %v5491_v58, 4  ;;  %v7255_v1 = vunpack.c.l.b16 %v5834_v59  ;;  %v7067_v10 = vunpack.c.l.b16 %v5466_v38  ;;  %v5848_v40 = vrot.slane %v5846_v27, 4  ;;  %v13194_v59 = vld [vmem:[#allocation2 + $0x30] sm:$0xf]  ;;  %v5584_v27 = vld [vmem:[#allocation2 + $0x84] sm:$0xe] }
 0x37c   : > { %14475 = vst [vmem:[#allocation9_spill] sm:$0xff] %v13174_v55  ;;  %v5851_v36 = vrot.slane %v5849_v42, 5  ;;  %v5862_v4 = vor.u32 %v5861_v48, %v13181_v22  ;;  %v5480_v62 = vrot.slane %v5478_v50, 4  ;;  %v5483_v9 = vrot.slane %v5481_v63, 5  ;;  %v10387_v42 = vld [vmem:[%s14385_s3 + $0x168] sm:$0xff] }
 0x37d   : > { %8499 = vmatmul.bf16.gmra.mxu0 %v10321_v13  ;;  %v7286_v35 = vpack.c.b16 %v7256_v49, %v7255_v1  ;;  %v5718_v13 = vrot.slane %v5716_v57, 4  ;;  %v5719_v38 = vrot.slane %v13140_v56, 5  ;;  %v5865_v58 = vshll.u32 %v5783_v2, 16  ;;  %8616 = vmatpush.bf16.msra.mxu2 %v10387_v42 }
 0x37e   : > { %v8363_v34 = vpop.f32.mrf.mxu3  ;;  %v8194_v48 = vadd.f32 %v13001_v32, %v12872_v53  ;;  %v5870_v50 = vshrl.u32 %v13194_v59, 16  ;;  %v9654_v63 = vrot.slane %v5584_v27, 9 }
 0x37f   : > { %v13169_v61 = vadd.f32 %v8363_v34, %v8275_v47  ;;  %v5487_v47 = vshll.u32 %v13176_v20, 16  ;;  %v7088_v34 = vpack.c.b16 %v7068_v7, %v7067_v10  ;;  %v5756_v7 = vld [vmem:[#allocation2 + $0x34] sm:$0xf]  ;;  %v5484_v10 = vor.u32 %v5483_v9, %v5480_v62 }
 0x380   : > { %v5867_v53 = vrot.slane %v5865_v58, 5 }
 0x381   : > { %v8279_v8 = vpop.f32.mrf.mxu2  ;;  %v13186_v44 = vrot.slane %v5487_v47, 5  ;;  %v5485_v9 = vrot.slane %v5484_v10, 4 }
 0x382   : > { %v8280_v29 = vadd.f32 %v8279_v8, %v8191_v46  ;;  %v5863_v8 = vrot.slane %v5862_v4, 4  ;;  %v8196_v4 = vadd.f32 %v13001_v32, %v12897_v0 }
 0x383   : > { %8405 = vmatmul.bf16.gmra.mxu3 %v7151_v17  ;;  %v13188_v14 = vpop.f32.mrf.mxu1  ;;  %v5494_v47 = vor.u32 %v5493_v25, %v13186_v44  ;;  %v13198_v49 = vpop.f32.mrf.mxu0  ;;  %v5497_v17 = vshll.u32 %v13191_v37, 16  ;;  %v5720_v25 = vsel %vm11251_vm13, %v5718_v13, %v5719_v38  ;;  %v5873_v13 = vshll.u32 %v13194_v59, 16 }
 0x384   : > { %14477 = vst [vmem:[#allocation8_spill] sm:$0xff] %v13198_v49  ;;  %v7132_v27 = vunpack.c.l.b16 %v5720_v25  ;;  %v5868_v62 = vsel %vm10806_vm5, %v5863_v8, %v5867_v53  ;;  %v5167_v8 = vld [vmem:[#allocation2 + $0x9c] sm:$0xf]  ;;  %v5784_v53 = vld [vmem:[#allocation2 + $0x38] sm:$0x1] }
 0x385   : > { %8321 = vmatmul.bf16.gmra.mxu2 %v7088_v34  ;;  %v5879_v34 = vshll.u32 %v5756_v7, 16  ;;  %v7258_v10 = vunpack.c.l.b16 %v5868_v62 }
 0x386   : > { %v8366_v28 = vpop.f32.mrf.mxu3  ;;  %8538 = vmatmul.bf16.gmra.mxu1 %v7286_v35  ;;  %v5495_v35 = vrot.slane %v5494_v47, 4 }
 0x387   : > { %v13196_v46 = vadd.f32 %v8366_v28, %v8278_v15  ;;  %v5852_v15 = vor.u32 %v5851_v36, %v5848_v40  ;;  %v5717_v28 = vsel %vm11251_vm13, %v9654_v63, %v5716_v57  ;;  %v5499_v40 = vrot.slane %v5497_v17, 5  ;;  %v13235_v63 = vld [vmem:[#allocation2 + $0xa0] sm:$0xf] }
 0x388   : > { %v5883_v36 = vshrl.u32 %v5756_v7, 16  ;;  %v13221_v57 = vrot.slane %v5870_v50, 4  ;;  %v7131_v17 = vunpack.c.l.b16 %v5717_v28  ;;  %v13230_v59 = vrot.slane %v5879_v34, 5 }
 0x389   : > { %14476 = vst [vmem:[#allocation10_spill] sm:$0xff] %v13196_v46  ;;  %v8282_v1 = vpop.f32.mrf.mxu2  ;;  %v5853_v42 = vrot.slane %v5852_v15, 4  ;;  %v5500_v47 = vsel %vm10806_vm5, %v5495_v35, %v5499_v40  ;;  %v10395_v15 = vld [vmem:[%s14385_s3 + $0x1a8] sm:$0xff]  ;;  %v5511_v25 = vshll.u32 %v13235_v63, 16  ;;  %v5723_v34 = vrot.slane %v13176_v20, 5 }
 0x38a   : > { %v8283_v56 = vadd.f32 %v8282_v1, %v8194_v48  ;;  %v10322_v48 = vld [vmem:[#allocation2 + $0x9c] sm:$0xff]  ;;  %v5885_v50 = vrot.slane %v5883_v36, 4  ;;  %v7152_v1 = vpack.c.b16 %v7132_v27, %v7131_v17  ;;  %v7070_v35 = vunpack.c.l.b16 %v5500_v47  ;;  %8705 = vmatpush.bf16.msra.mxu3 %v10395_v15  ;;  %v13248_v17 = vld [vmem:[#allocation2 + $0xa4] sm:$0x1] }
 0x38b   : > { %v13210_v2 = vpop.f32.mrf.mxu1  ;;  %v5858_v0 = vsel %vm10806_vm5, %v5853_v42, %v13181_v22  ;;  %v13228_v7 = vpop.f32.mrf.mxu0  ;;  %v5515_v22 = vshrl.u32 %v13235_v63, 16  ;;  %v5502_v40 = vshrl.u32 %v5167_v8, 16  ;;  %v5505_v42 = vshll.u32 %v5167_v8, 16 }
 0x38c   : > { %14479 = vst [vmem:[#allocation20_spill] sm:$0xff] %v13228_v7  ;;  %v5886_v27 = vor.u32 %v5885_v50, %v13230_v59  ;;  %v5889_v20 = vshll.u32 %v5784_v53, 16  ;;  %v5725_v55 = vrot.slane %v5723_v34, 4  ;;  %v10411_v50 = vld [vmem:[%s14385_s3 + $0x228] sm:$0xff]  ;;  %v8199_v53 = vadd.f32 %v13001_v32, %v12917_v6 }
 0x38d   : > { %8504 = vmatmul.bf16.gmra.mxu0 %v10322_v48  ;;  %v5517_v7 = vrot.slane %v5515_v22, 4  ;;  %v5875_v48 = vrot.slane %v5873_v13, 5  ;;  %v5504_v8 = vrot.slane %v5502_v40, 4  ;;  %8883 = vmatpush.bf16.msra.mxu1 %v10411_v50  ;;  %v6250_v46 = vrot.slane %v13067_v60, 5 }
 0x38e   : > { %v8368_v38 = vpop.f32.mrf.mxu3 }
 0x38f   : > { %v13223_v58 = vadd.f32 %v8368_v38, %v8280_v29  ;;  %v5490_v29 = vsel %vm10806_vm5, %v5485_v9, %v13186_v44  ;;  %v13243_v38 = vrot.slane %v5511_v25, 5  ;;  %v7257_v44 = vunpack.c.l.b16 %v5858_v0 }
 0x390   : > { %v7069_v9 = vunpack.c.l.b16 %v5490_v29  ;;  %v5507_v25 = vrot.slane %v5505_v42, 5  ;;  %v5876_v13 = vor.u32 %v5875_v48, %v13221_v57  ;;  %v10403_v29 = vld [vmem:[%s14385_s3 + $0x1e8] sm:$0xff]  ;;  %v5891_v57 = vrot.slane %v5889_v20, 5 }
 0x391   : > { %14478 = vst [vmem:[#allocation11_spill] sm:$0xff] %v13223_v58  ;;  %v8284_v28 = vpop.f32.mrf.mxu2  ;;  %v7287_v62 = vpack.c.b16 %v7258_v10, %v7257_v44  ;;  %v5518_v22 = vor.u32 %v5517_v7, %v13243_v38  ;;  %v5726_v10 = vrot.slane %v13191_v37, 5  ;;  %v5887_v7 = vrot.slane %v5886_v27, 4  ;;  %8794 = vmatpush.bf16.msra.mxu0 %v10403_v29  ;;  %v5587_v58 = vld [vmem:[#allocation2 + $0xa8] sm:$0xe] }
 0x392   : > { %v8285_v36 = vadd.f32 %v8284_v28, %v8196_v4  ;;  %v7089_v47 = vpack.c.b16 %v7070_v35, %v7069_v9  ;;  %v5585_v4 = vld [vmem:[#allocation2 + $0x90] sm:$0xe]  ;;  %v5758_v28 = vld [vmem:[#allocation2 + $0x40] sm:$0xf]  ;;  %v5508_v37 = vor.u32 %v5507_v25, %v5504_v8  ;;  %v5877_v27 = vrot.slane %v5876_v13, 4  ;;  %v10323_v13 = vld [vmem:[#allocation2 + $0xa8] sm:$0xff] }
 0x393   : > { %8410 = vmatmul.bf16.gmra.mxu3 %v7152_v1  ;;  %v13245_v49 = vpop.f32.mrf.mxu1  ;;  %v5757_v1 = vld [vmem:[#allocation2 + $0x3c] sm:$0xf]  ;;  %v13261_v35 = vpop.f32.mrf.mxu0  ;;  %v9655_v44 = vrot.slane %v5585_v4, 9  ;;  %v5727_v9 = vsel %vm11251_vm13, %v5725_v55, %v5726_v10  ;;  %v5892_v20 = vsel %vm10806_vm5, %v5887_v7, %v5891_v57  ;;  %v5907_v29 = vshrl.u32 %v5758_v28, 16  ;;  %v13285_v57 = vld [vmem:[#allocation2 + $0xac] sm:$0xf] }
 0x394   : > { %14481 = vst [vmem:[#allocation14_spill] sm:$0xff] %v13261_v35  ;;  %v5894_v40 = vshrl.u32 %v5757_v1, 16  ;;  %v5897_v42 = vshll.u32 %v5757_v1, 16  ;;  %v7134_v4 = vunpack.c.l.b16 %v5727_v9  ;;  %v8201_v55 = vadd.f32 %v13001_v32, %v12937_v18 }
 0x395   : > { %8326 = vmatmul.bf16.gmra.mxu2 %v7089_v47  ;;  %v5724_v6 = vsel %vm11251_vm13, %v9655_v44, %v5723_v34  ;;  %v5882_v25 = vsel %vm10806_vm5, %v5877_v27, %v13230_v59  ;;  %v5785_v59 = vld [vmem:[#allocation2 + $0x44] sm:$0x1]  ;;  %v5539_v44 = vshrl.u32 %v13285_v57, 16 }
 0x396   : > { %v8371_v15 = vpop.f32.mrf.mxu3  ;;  %8543 = vmatmul.bf16.gmra.mxu1 %v7287_v62  ;;  %v5519_v62 = vrot.slane %v5518_v22, 4  ;;  %v5896_v50 = vrot.slane %v5894_v40, 4  ;;  %v5509_v22 = vrot.slane %v5508_v37, 4  ;;  %v7133_v7 = vunpack.c.l.b16 %v5724_v6 }
 0x397   : > { %v13251_v0 = vadd.f32 %v8371_v15, %v8283_v56  ;;  %v5521_v56 = vshll.u32 %v13248_v17, 16  ;;  %v5903_v15 = vshll.u32 %v5758_v28, 16  ;;  %v5909_v40 = vrot.slane %v5907_v29, 4 }
 0x398   : > { %v5514_v18 = vsel %vm10806_vm5, %v5509_v22, %v13243_v38  ;;  %v5541_v38 = vrot.slane %v5539_v44, 4  ;;  %v5913_v22 = vshll.u32 %v5785_v59, 16 }
 0x399   : > { %14480 = vst [vmem:[#allocation13_spill] sm:$0xff] %v13251_v0  ;;  %v8287_v48 = vpop.f32.mrf.mxu2  ;;  %v5523_v1 = vrot.slane %v5521_v56, 5  ;;  %v5899_v0 = vrot.slane %v5897_v42, 5  ;;  %v7260_v56 = vunpack.c.l.b16 %v5892_v20  ;;  %v13283_v28 = vrot.slane %v5903_v15, 5 }
 0x39a   : > { %v8288_v47 = vadd.f32 %v8287_v48, %v8199_v53  ;;  %v5169_v53 = vld [vmem:[#allocation2 + $0xa8] sm:$0xf]  ;;  %v5535_v42 = vshll.u32 %v13285_v57, 16  ;;  %v5730_v48 = vrot.slane %v13235_v63, 5  ;;  %v5915_v59 = vrot.slane %v5913_v22, 5 }
 0x39b   : > { %v13268_v35 = vpop.f32.mrf.mxu1  ;;  %v5524_v34 = vsel %vm10806_vm5, %v5519_v62, %v5523_v1  ;;  %v5900_v37 = vor.u32 %v5899_v0, %v5896_v50  ;;  %v13293_v27 = vpop.f32.mrf.mxu0  ;;  %v5526_v15 = vshrl.u32 %v5169_v53, 16  ;;  %v5529_v6 = vshll.u32 %v5169_v53, 16  ;;  %v13300_v50 = vld [vmem:[#allocation2 + $0xb0] sm:$0x1] }
 0x39c   : > { %v7072_v9 = vunpack.c.l.b16 %v5524_v34  ;;  %14483 = vst [vmem:[#allocation21_spill] sm:$0xff] %v13293_v27  ;;  %v13295_v20 = vrot.slane %v5535_v42, 5  ;;  %v7259_v1 = vunpack.c.l.b16 %v5882_v25  ;;  %v5732_v53 = vrot.slane %v5730_v48, 4  ;;  %v5760_v25 = vld [vmem:[#allocation2 + $0x4c] sm:$0xf] }
 0x39d   : > { %8509 = vmatmul.bf16.gmra.mxu0 %v10323_v13  ;;  %v5901_v0 = vrot.slane %v5900_v37, 4  ;;  %v5528_v42 = vrot.slane %v5526_v15, 4  ;;  %v5545_v37 = vshll.u32 %v13300_v50, 16  ;;  %v5927_v15 = vshll.u32 %v5760_v25, 16 }
 0x39e   : > { %v8373_v8 = vpop.f32.mrf.mxu3  ;;  %v7288_v34 = vpack.c.b16 %v7260_v56, %v7259_v1  ;;  %v5542_v44 = vor.u32 %v5541_v38, %v13295_v20  ;;  %v6181_v38 = vld [vmem:[#allocation2 + $0xc] sm:$0xe] }
 0x39f   : > { %v13281_v10 = vadd.f32 %v8373_v8, %v8285_v36  ;;  %v7153_v36 = vpack.c.b16 %v7134_v4, %v7133_v7  ;;  %v7071_v8 = vunpack.c.l.b16 %v5514_v18  ;;  %v5910_v4 = vor.u32 %v5909_v40, %v13283_v28  ;;  %v5759_v7 = vld [vmem:[#allocation2 + $0x48] sm:$0xf]  ;;  %v5586_v18 = vld [vmem:[#allocation2 + $0x9c] sm:$0xe]  ;;  %v10386_v40 = vld [vmem:[%s14385_s3 + $0x160] sm:$0xff] }
 0x3a0   : > { %v5906_v56 = vsel %vm10806_vm5, %v5901_v0, %v13283_v28  ;;  %8617 = vmatpush.bf16.msra.mxu2 %v10386_v40  ;;  %v9656_v28 = vrot.slane %v5586_v18, 9  ;;  %v9659_v18 = vrot.slane %v6181_v38, 9 }
 0x3a1   : > { %14482 = vst [vmem:[#allocation12_spill] sm:$0xff] %v13281_v10  ;;  %v8289_v62 = vpop.f32.mrf.mxu2  ;;  %v7090_v63 = vpack.c.b16 %v7072_v9, %v7071_v8  ;;  %v5531_v10 = vrot.slane %v5529_v6, 5  ;;  %v5911_v9 = vrot.slane %v5910_v4, 4  ;;  %v5931_v6 = vshrl.u32 %v5760_v25, 16 }
 0x3a2   : > { %v8290_v29 = vadd.f32 %v8289_v62, %v8201_v55  ;;  %v5918_v62 = vshrl.u32 %v5759_v7, 16  ;;  %v6247_v4 = vrot.slane %v13025_v51, 5  ;;  %v5547_v25 = vrot.slane %v5545_v37, 5 }
 0x3a3   : > { %8415 = vmatmul.bf16.gmra.mxu3 %v7153_v36  ;;  %v13297_v13 = vpop.f32.mrf.mxu1  ;;  %v5733_v36 = vrot.slane %v13248_v17, 5  ;;  %v5532_v22 = vor.u32 %v5531_v10, %v5528_v42  ;;  %v13324_v0 = vpop.f32.mrf.mxu0  ;;  %v13328_v40 = vunpack.c.l.b16 %v5906_v56  ;;  %v13330_v10 = vld [vmem:[#allocation2 + $0x50] sm:$0x1] }
 0x3a4   : > { %14486 = vst [vmem:[#allocation17_spill] sm:$0xff] %v13324_v0  ;;  %v13332_v42 = vrot.slane %v5918_v62, 4  ;;  %v10394_v62 = vld [vmem:[%s14385_s3 + $0x1a0] sm:$0xff]  ;;  %v13392_v0 = vld [vmem:[#allocation2 + $0xbc] sm:$0x1] }
 0x3a5   : > { %8331 = vmatmul.bf16.gmra.mxu2 %v7090_v63  ;;  %v5734_v1 = vsel %vm11251_vm13, %v5732_v53, %v5733_v36  ;;  %8706 = vmatpush.bf16.msra.mxu3 %v10394_v62  ;;  %v10385_v62 = vld [vmem:[%s14385_s3 + $0x158] sm:$0xff] }
 0x3a6   : > { %v8376_v27 = vpop.f32.mrf.mxu3  ;;  %8548 = vmatmul.bf16.gmra.mxu1 %v7288_v34  ;;  %v5543_v34 = vrot.slane %v5542_v44, 4  ;;  %v7136_v53 = vunpack.c.l.b16 %v5734_v1  ;;  %v13336_v44 = vld [vmem:[#allocation2 + $0x1c] sm:$0xf]  ;;  %v5171_v1 = vld [vmem:[#allocation2 + $0xb4] sm:$0xf]  ;;  %8618 = vmatpush.bf16.msra.mxu2 %v10385_v62  ;;  %v10410_v62 = vld [vmem:[%s14385_s3 + $0x220] sm:$0xff] }
 0x3a7   : > { %v13303_v55 = vadd.f32 %v8376_v27, %v8288_v47  ;;  %v8204_v47 = vadd.f32 %v13001_v32, %v12959_v26  ;;  %v5921_v27 = vshll.u32 %v5759_v7, 16  ;;  %v5731_v26 = vsel %vm11251_vm13, %v9656_v28, %v5730_v48  ;;  %v10324_v28 = vld [vmem:[#allocation2 + $0xb4] sm:$0xff]  ;;  %8884 = vmatpush.bf16.msra.mxu1 %v10410_v62 }
 0x3a8   : > { %v5916_v7 = vsel %vm10806_vm5, %v5911_v9, %v5915_v59  ;;  %v5533_v48 = vrot.slane %v5532_v22, 4  ;;  %v13340_v59 = vrot.slane %v5927_v15, 5  ;;  %v5933_v9 = vrot.slane %v5931_v6, 4  ;;  %v13360_v22 = vld [vmem:[#allocation2 + $0xb8] sm:$0xf] }
 0x3a9   : > { %14484 = vst [vmem:[#allocation16_spill] sm:$0xff] %v13303_v55  ;;  %v8292_v8 = vpop.f32.mrf.mxu2  ;;  %v13334_v51 = vrot.slane %v5921_v27, 5  ;;  %v7135_v56 = vunpack.c.l.b16 %v5731_v26  ;;  %v7262_v38 = vunpack.c.l.b16 %v5916_v7  ;;  %v10402_v27 = vld [vmem:[%s14385_s3 + $0x1e0] sm:$0xff]  ;;  %v8206_v15 = vadd.f32 %v13001_v32, %v12980_v12  ;;  %v13365_v12 = vld [vmem:[#allocation2 + $0x18] sm:$0xf] }
 0x3aa   : > { %v13317_v17 = vadd.f32 %v8292_v8, %v8204_v47  ;;  %v5548_v47 = vsel %vm10806_vm5, %v5543_v34, %v5547_v25  ;;  %v13352_v8 = vsel %vm11251_vm13, %v9659_v18, %v6247_v4  ;;  %v5937_v6 = vshll.u32 %v13330_v10, 16  ;;  %8795 = vmatpush.bf16.msra.mxu0 %v10402_v27  ;;  %v10401_v27 = vld [vmem:[%s14385_s3 + $0x1d8] sm:$0xff] }
 0x3ab   : > { %v13320_v63 = vpop.f32.mrf.mxu1  ;;  %v6415_v34 = vshll.u32 %v13336_v44, 16  ;;  %v7154_v26 = vpack.c.b16 %v7136_v53, %v7135_v56  ;;  %v7074_v7 = vunpack.c.l.b16 %v5548_v47  ;;  %v5559_v25 = vshll.u32 %v13360_v22, 16  ;;  %v5762_v55 = vld [vmem:[#allocation2 + $0x58] sm:$0xf]  ;;  %v13394_v16 = vpop.f32.mrf.mxu0 }
 0x3ac   : > { %14485 = vst [vmem:[#allocation15_spill] sm:$0xff] %v13320_v63  ;;  %v5563_v18 = vshrl.u32 %v13360_v22, 16  ;;  %v5550_v10 = vshrl.u32 %v5171_v1, 16 }
 0x3ad   : > { %8514 = vmatmul.bf16.gmra.mxu0 %v10324_v28  ;;  %v13371_v47 = vrot.slane %v5559_v25, 5  ;;  %v6419_v25 = vshrl.u32 %v13336_v44, 16  ;;  %14489 = vst [vmem:[#allocation19_spill] sm:$0xff] %v13394_v16 }
 0x3ae   : > { %v8378_v36 = vpop.f32.mrf.mxu3  ;;  %v5565_v56 = vrot.slane %v5563_v18, 4  ;;  %v7289_v18 = vpack.c.b16 %v7262_v38, %v13328_v40  ;;  %8796 = vmatpush.bf16.msra.mxu0 %v10401_v27  ;;  %v5552_v44 = vrot.slane %v5550_v10, 4  ;;  %v5939_v38 = vrot.slane %v5937_v6, 5  ;;  %v10392_v10 = vld [vmem:[%s14385_s3 + $0x190] sm:$0xff]  ;;  %v13421_v27 = vld [vmem:[%s14386_s4] ss:$0 sm:$0xff] }
 0x3af   : > { %v13342_v37 = vadd.f32 %v8378_v36, %v8290_v29  ;;  %v5538_v29 = vsel %vm10806_vm5, %v5533_v48, %v13295_v20  ;;  %v5934_v36 = vor.u32 %v5933_v9, %v13340_v59  ;;  %v5553_v48 = vshll.u32 %v5171_v1, 16  ;;  %v10393_v9 = vld [vmem:[%s14385_s3 + $0x198] sm:$0xff] }
 0x3b0   : > { %v7073_v53 = vunpack.c.l.b16 %v5538_v29  ;;  %v6406_v29 = vshrl.u32 %v13365_v12, 16  ;;  %v5924_v20 = vor.u32 %v13334_v51, %v13332_v42  ;;  %v5566_v40 = vor.u32 %v5565_v56, %v13371_v47  ;;  %8707 = vmatpush.bf16.msra.mxu3 %v10393_v9 }
 0x3b1   : > { %14487 = vst [vmem:[#allocation22_spill] sm:$0xff] %v13342_v37  ;;  %v8294_v32 = vpop.f32.mrf.mxu2  ;;  %v5761_v37 = vld [vmem:[#allocation2 + $0x54] sm:$0xf]  ;;  %v5555_v52 = vrot.slane %v5553_v48, 5  ;;  %v5935_v51 = vrot.slane %v5934_v36, 4  ;;  %v13411_v48 = vrot.slane %v6415_v34, 5  ;;  %v8209_v9 = vadd.f32 %v13421_v27, %v13020_v30 }
 0x3b2   : > { %v13369_v28 = vadd.f32 %v8294_v32, %v8206_v15  ;;  %v13384_v15 = vrot.slane %v6247_v4, 4  ;;  %v7091_v32 = vpack.c.b16 %v7074_v7, %v7073_v53  ;;  %v10384_v7 = vld [vmem:[%s14385_s3 + $0x150] sm:$0xff]  ;;  %v5569_v56 = vshll.u32 %v13392_v0, 16 }
 0x3b3   : > { %8420 = vmatmul.bf16.gmra.mxu3 %v7154_v26  ;;  %v13382_v1 = vpop.f32.mrf.mxu1  ;;  %v6409_v26 = vshll.u32 %v13365_v12, 16  ;;  %v14490_v12 = vrot.slane %v13285_v57, 5  ;;  %v10400_v53 = vld [vmem:[%s14385_s3 + $0x1d0] sm:$0xff]  ;;  %v5942_v36 = vshrl.u32 %v5761_v37, 16  ;;  %v5945_v6 = vshll.u32 %v5761_v37, 16  ;;  %8619 = vmatpush.bf16.msra.mxu2 %v10384_v7  ;;  %v10383_v37 = vld [vmem:[%s14385_s3 + $0x148] sm:$0xff] }
 0x3b4   : > { %14488 = vst [vmem:[#allocation18_spill] sm:$0xff] %v13382_v1  ;;  %8797 = vmatpush.bf16.msra.mxu0 %v10400_v53  ;;  %v5951_v34 = vshll.u32 %v5762_v55, 16  ;;  %v5567_v30 = vrot.slane %v5566_v40, 4  ;;  %8708 = vmatpush.bf16.msra.mxu3 %v10392_v10  ;;  %v5925_v53 = vrot.slane %v5924_v20, 4  ;;  %v6408_v63 = vrot.slane %v6406_v29, 4 }
 0x3b5   : > { %v5739_v1 = vrot.slane %v14490_v12, 4  ;;  %8336 = vmatmul.bf16.gmra.mxu2 %v7091_v32  ;;  %v6421_v32 = vrot.slane %v6419_v25, 4  ;;  %v6389_v40 = vld [vmem:[#allocation2 + $0x20] sm:$0x1]  ;;  %v6411_v10 = vrot.slane %v6409_v26, 5  ;;  %v5947_v62 = vrot.slane %v5945_v6, 5 }
 0x3b6   : > { %v8381_v4 = vpop.f32.mrf.mxu3  ;;  %8553 = vmatmul.bf16.gmra.mxu1 %v7289_v18  ;;  %v10399_v18 = vld [vmem:[%s14385_s3 + $0x1c8] sm:$0xff]  ;;  %v6425_v6 = vshll.u32 %v6389_v40, 16 }
 0x3b7   : > { %v13400_v42 = vadd.f32 %v8381_v4, %v13317_v17  ;;  %v5740_v17 = vrot.slane %v13300_v50, 5  ;;  %v5955_v50 = vshrl.u32 %v5762_v55, 16  ;;  %v9657_v4 = vrot.slane %v5587_v58, 9  ;;  %v10391_v55 = vld [vmem:[%s14385_s3 + $0x188] sm:$0xff]  ;;  %8620 = vmatpush.bf16.msra.mxu2 %v10383_v37 }
 0x3b8   : > { %v14492_v58 = vrot.slane %v13285_v57, 5  ;;  %8798 = vmatpush.bf16.msra.mxu0 %v10399_v18  ;;  %v6422_v60 = vor.u32 %v6421_v32, %v13411_v48  ;;  %8709 = vmatpush.bf16.msra.mxu3 %v10391_v55  ;;  %v6251_v37 = vsel %vm11251_vm13, %v13384_v15, %v6250_v46  ;;  %v6412_v18 = vor.u32 %v6411_v10, %v6408_v63  ;;  %v6360_v40 = vld [vmem:[#allocation2 + $0x28] sm:$0xf] }
 0x3b9   : > { %14491 = vst [vmem:[#allocation23_spill] sm:$0xff] %v13400_v42  ;;  %v5741_v12 = vsel %vm11251_vm13, %v5739_v1, %v5740_v17  ;;  %v8297_v16 = vpop.f32.mrf.mxu2  ;;  %v5556_v42 = vor.u32 %v5555_v52, %v5552_v44  ;;  %v5940_v1 = vsel %vm10806_vm5, %v5935_v51, %v5939_v38  ;;  %v5571_v44 = vrot.slane %v5569_v56, 5  ;;  %v10398_v56 = vld [vmem:[%s14385_s3 + $0x1c0] sm:$0xff] }
 0x3ba   : > { %v13436_v7 = vadd.f32 %v8297_v16, %v8209_v9  ;;  %v5738_v52 = vsel %vm11251_vm13, %v9657_v4, %v14492_v58  ;;  %v7138_v17 = vunpack.c.l.b16 %v5741_v12  ;;  %v5944_v16 = vrot.slane %v5942_v36, 4  ;;  %v10325_v9 = vld [vmem:[#allocation2 + $0xc0] sm:$0xff] }
 0x3bb   : > { %v13439_v25 = vpop.f32.mrf.mxu1  ;;  %v5557_v29 = vrot.slane %v5556_v42, 4  ;;  %v5572_v57 = vsel %vm10806_vm5, %v5567_v30, %v5571_v44  ;;  %v13450_v4 = vrot.slane %v5951_v34, 5  ;;  %v5957_v58 = vrot.slane %v5955_v50, 4  ;;  %v10382_v42 = vld [vmem:[%s14385_s3 + $0x140] sm:$0xff]  ;;  %v5787_v50 = vld [vmem:[#allocation2 + $0x5c] sm:$0x1] }
 0x3bc   : > { %v7137_v26 = vunpack.c.l.b16 %v5738_v52  ;;  %v5930_v38 = vsel %vm10806_vm5, %v5925_v53, %v13340_v59  ;;  %v10390_v36 = vld [vmem:[%s14385_s3 + $0x180] sm:$0xff]  ;;  %v7264_v34 = vunpack.c.l.b16 %v5940_v1  ;;  %v8211_v32 = vadd.f32 %v13421_v27, %v13045_v23  ;;  %8621 = vmatpush.bf16.msra.mxu2 %v10382_v42  ;;  %8799 = vmatpush.bf16.msra.mxu0 %v10398_v56  ;;  %v5588_v56 = vld [vmem:[#allocation2 + $0xb4] sm:$0xe] }
 0x3bd   : > { %v5562_v59 = vsel %vm10806_vm5, %v5557_v29, %v13371_v47  ;;  %8519 = vmatmul.bf16.gmra.mxu0 %v10325_v9  ;;  %v7076_v30 = vunpack.c.l.b16 %v5572_v57  ;;  %v6423_v55 = vrot.slane %v6422_v60, 4  ;;  %v7263_v53 = vunpack.c.l.b16 %v5930_v38  ;;  %8710 = vmatpush.bf16.msra.mxu3 %v10390_v36  ;;  %v6359_v57 = vld [vmem:[#allocation2 + $0x24] sm:$0xf] }
 0x3be   : > { %v8383_v20 = vpop.f32.mrf.mxu3  ;;  %v7155_v12 = vpack.c.b16 %v7138_v17, %v7137_v26  ;;  %v5744_v1 = vrot.slane %v13360_v22, 5  ;;  %v5948_v47 = vor.u32 %v5947_v62, %v5944_v16  ;;  %v5958_v44 = vor.u32 %v5957_v58, %v13450_v4 }
 0x3bf   : > { %v13453_v51 = vadd.f32 %v8383_v20, %v13369_v28  ;;  %v13467_v28 = vpop.f32.mrf.mxu0  ;;  %v7075_v63 = vunpack.c.l.b16 %v5562_v59  ;;  %v5961_v15 = vshll.u32 %v5787_v50, 16  ;;  %v6427_v10 = vrot.slane %v6425_v6, 5 }
 0x3c0   : > { %v7290_v17 = vpack.c.b16 %v7264_v34, %v7263_v53  ;;  %v6413_v20 = vrot.slane %v6412_v18, 4  ;;  %v6439_v22 = vshll.u32 %v6360_v40, 16  ;;  %v6443_v16 = vshrl.u32 %v6360_v40, 16 }
 0x3c1   : > { %v8299_v52 = vpop.f32.mrf.mxu2  ;;  %v7092_v29 = vpack.c.b16 %v7076_v30, %v7075_v63  ;;  %v6428_v60 = vsel %vm10806_vm5, %v6423_v55, %v6427_v10  ;;  %v5746_v9 = vrot.slane %v5744_v1, 4  ;;  %v5959_v58 = vrot.slane %v5958_v44, 4  ;;  %v5764_v44 = vld [vmem:[#allocation2 + $0x64] sm:$0xf]  ;;  %v6188_v63 = vld [vmem:[#allocation2 + $0x60] sm:$0xe] }
 0x3c2   : > { %v8300_v46 = vadd.f32 %v8299_v52, %v8211_v32  ;;  %v7317_v26 = vunpack.c.l.b16 %v13352_v8  ;;  %v7318_v38 = vunpack.c.l.b16 %v6251_v37  ;;  %v5949_v36 = vrot.slane %v5948_v47, 4 }
 0x3c3   : > { %8425 = vmatmul.bf16.gmra.mxu3 %v7155_v12  ;;  %v13479_v23 = vpop.f32.mrf.mxu1  ;;  %v5963_v6 = vrot.slane %v5961_v15, 5  ;;  %v6418_v34 = vsel %vm10806_vm5, %v6413_v20, %v13411_v48  ;;  %v5747_v59 = vrot.slane %v13392_v0, 5  ;;  %v7462_v50 = vunpack.c.l.b16 %v6428_v60  ;;  %v6390_v20 = vld [vmem:[#allocation2 + $0x2c] sm:$0x1] }
 0x3c4   : > { %v6430_v18 = vshrl.u32 %v6359_v57, 16  ;;  %v6433_v32 = vshll.u32 %v6359_v57, 16  ;;  %v8214_v8 = vadd.f32 %v13421_v27, %v13073_v5  ;;  %v13496_v37 = vrot.slane %v6439_v22, 5 }
 0x3c5   : > { %8341 = vmatmul.bf16.gmra.mxu2 %v7092_v29  ;;  %v6445_v12 = vrot.slane %v6443_v16, 4  ;;  %v9658_v55 = vrot.slane %v5588_v56, 9  ;;  %v5748_v48 = vsel %vm11251_vm13, %v5746_v9, %v5747_v59  ;;  %v5964_v53 = vsel %vm10806_vm5, %v5959_v58, %v5963_v6 }
 0x3c6   : > { %v8386_v62 = vpop.f32.mrf.mxu3  ;;  %8558 = vmatmul.bf16.gmra.mxu1 %v7290_v17  ;;  %v13506_v5 = vpack.c.b16 %v7318_v38, %v7317_v26  ;;  %v7461_v47 = vunpack.c.l.b16 %v6418_v34  ;;  %v6432_v29 = vrot.slane %v6430_v18, 4  ;;  %v6435_v60 = vrot.slane %v6433_v32, 5  ;;  %v5763_v26 = vld [vmem:[#allocation2 + $0x60] sm:$0xf] }
 0x3c7   : > { %v13485_v42 = vadd.f32 %v8386_v62, %v13436_v7  ;;  %v5954_v7 = vsel %vm10806_vm5, %v5949_v36, %v13450_v4  ;;  %v13498_v30 = vpop.f32.mrf.mxu0  ;;  %v13508_v4 = vld [vmem:[#allocation2 + $0x1c] sm:$0xf]  ;;  %v5745_v10 = vsel %vm11251_vm13, %v9658_v55, %v5744_v1  ;;  %v7140_v57 = vunpack.c.l.b16 %v5748_v48  ;;  %v13515_v62 = vld [vmem:[#allocation2 + $0x68] sm:$0x1] }
 0x3c8   : > { %14493 = vst [vmem:[#allocation24_spill] sm:$0xff] %v13498_v30  ;;  %v6254_v40 = vrot.slane %v13508_v4, 5  ;;  %v7265_v17 = vunpack.c.l.b16 %v5954_v7  ;;  %v7266_v22 = vunpack.c.l.b16 %v5964_v53  ;;  %v7493_v16 = vpack.c.b16 %v7462_v50, %v7461_v47 }
 0x3c9   : > { %v8302_v0 = vpop.f32.mrf.mxu2  ;;  %v6446_v9 = vor.u32 %v6445_v12, %v13496_v37  ;;  %v5975_v38 = vshll.u32 %v5764_v44, 16  ;;  %v5979_v56 = vshrl.u32 %v5764_v44, 16  ;;  %v9666_v36 = vrot.slane %v6188_v63, 9  ;;  %v6362_v63 = vld [vmem:[#allocation2 + $0x34] sm:$0xf] }
 0x3ca   : > { %v13504_v52 = vadd.f32 %v8302_v0, %v8214_v8  ;;  %v6296_v6 = vrot.slane %v5764_v44, 5  ;;  %v7139_v1 = vunpack.c.l.b16 %v5745_v10  ;;  %v6256_v59 = vrot.slane %v6254_v40, 4  ;;  %v6182_v0 = vld [vmem:[#allocation2 + $0x18] sm:$0xe] }
 0x3cb   : > { %v13511_v15 = vpop.f32.mrf.mxu1  ;;  %v6449_v8 = vshll.u32 %v6390_v20, 16  ;;  %v6436_v18 = vor.u32 %v6435_v60, %v6432_v29  ;;  %v6299_v7 = vrot.slane %v13515_v62, 5  ;;  %v8216_v12 = vadd.f32 %v13421_v27, %v13101_v21 }
 0x3cc   : > { %v6297_v50 = vsel %vm11251_vm13, %v9666_v36, %v6296_v6  ;;  %v6298_v32 = vrot.slane %v6296_v6, 4  ;;  %v7156_v55 = vpack.c.b16 %v7140_v57, %v7139_v1  ;;  %v5966_v48 = vshrl.u32 %v5763_v26, 16  ;;  %v6361_v6 = vld [vmem:[#allocation2 + $0x30] sm:$0xf] }
 0x3cd   : > { %8800 = vmatmul.bf16.vlgmr.msra.gmra.mxu0 %v7493_v16  ;;  %v6447_v53 = vrot.slane %v6446_v9, 4  ;;  %v5969_v47 = vshll.u32 %v5763_v26, 16  ;;  %v13525_v44 = vrot.slane %v5975_v38, 5  ;;  %v5981_v4 = vrot.slane %v5979_v56, 4  ;;  %v10500_v26 = vld [vmem:[#allocation2 + $0x20] sm:$0x1] }
 0x3ce   : > { %v8388_v58 = vpop.f32.mrf.mxu3  ;;  %v6300_v10 = vsel %vm11251_vm13, %v6298_v32, %v6299_v7  ;;  %v6451_v29 = vrot.slane %v6449_v8, 5  ;;  %v7331_v60 = vunpack.c.l.b16 %v6297_v50  ;;  %v7291_v9 = vpack.c.b16 %v7266_v22, %v7265_v17  ;;  %v13544_v22 = vld [vmem:[#allocation2 + $0x70] sm:$0xf] }
 0x3cf   : > { %v13518_v34 = vadd.f32 %v8388_v58, %v8300_v46  ;;  %v7332_v16 = vunpack.c.l.b16 %v6300_v10  ;;  %v13533_v57 = vpop.f32.mrf.mxu0  ;;  %v9660_v58 = vrot.slane %v6182_v0, 9  ;;  %v6257_v38 = vrot.slane %v10500_v26, 5 }
 0x3d0   : > { %14494 = vst [vmem:[#allocation25_spill] sm:$0xff] %v13533_v57  ;;  %v6437_v36 = vrot.slane %v6436_v18, 4  ;;  %v6452_v56 = vsel %vm10806_vm5, %v6447_v53, %v6451_v29  ;;  %v6463_v1 = vshll.u32 %v6362_v63, 16  ;;  %v6467_v32 = vshrl.u32 %v6362_v63, 16 }
 0x3d1   : > { %v8304_v46 = vpop.f32.mrf.mxu2  ;;  %v13537_v7 = vpack.c.b16 %v7332_v16, %v7331_v60  ;;  %v5968_v50 = vrot.slane %v5966_v48, 4  ;;  %v13542_v17 = vsel %vm11251_vm13, %v9660_v58, %v6254_v40  ;;  %v6258_v0 = vsel %vm11251_vm13, %v6256_v59, %v6257_v38  ;;  %v10409_v40 = vld [vmem:[%s14385_s3 + $0x218] sm:$0xff]  ;;  %v13569_v38 = vld [vmem:[#allocation2 + $0x28] sm:$0xf] }
 0x3d2   : > { %v13529_v20 = vadd.f32 %v8304_v46, %v8216_v12  ;;  %v5971_v12 = vrot.slane %v5969_v47, 5  ;;  %v6442_v48 = vsel %vm10806_vm5, %v6437_v36, %v13496_v37  ;;  %v5985_v53 = vshll.u32 %v13515_v62, 16  ;;  %8885 = vmatpush.bf16.msra.mxu1 %v10409_v40  ;;  %v13565_v62 = vld [vmem:[#allocation2 + $0x74] sm:$0x1] }
 0x3d3   : > { %8430 = vmatmul.bf16.gmra.mxu3 %v7156_v55  ;;  %v13531_v21 = vpop.f32.mrf.mxu1  ;;  %v5982_v55 = vor.u32 %v5981_v4, %v13525_v44  ;;  %v7464_v46 = vunpack.c.l.b16 %v6452_v56  ;;  %v6454_v47 = vshrl.u32 %v6361_v6, 16  ;;  %v6189_v4 = vld [vmem:[#allocation2 + $0x6c] sm:$0xe]  ;;  %v13561_v63 = vrot.slane %v6463_v1, 5 }
 0x3d4   : > { %v6469_v59 = vrot.slane %v6467_v32, 4  ;;  %v6303_v10 = vrot.slane %v13544_v22, 5  ;;  %v5972_v29 = vor.u32 %v5971_v12, %v5968_v50  ;;  %v7319_v16 = vunpack.c.l.b16 %v13542_v17  ;;  %v6391_v32 = vld [vmem:[#allocation2 + $0x38] sm:$0x1] }
 0x3d5   : > { %8622 = vmatmul.bf16.vlgmr.msra.gmra.mxu2 %v13506_v5  ;;  %v8219_v5 = vadd.f32 %v13421_v27, %v13137_v43  ;;  %v5983_v60 = vrot.slane %v5982_v55, 4  ;;  %v7320_v26 = vunpack.c.l.b16 %v6258_v0  ;;  %v9667_v36 = vrot.slane %v6189_v4, 9 }
 0x3d6   : > { %v8391_v8 = vpop.f32.mrf.mxu3  ;;  %8563 = vmatmul.bf16.gmra.mxu1 %v7291_v9  ;;  %v7463_v9 = vunpack.c.l.b16 %v6442_v48  ;;  %v6470_v12 = vor.u32 %v6469_v59, %v13561_v63  ;;  %v6305_v17 = vrot.slane %v6303_v10, 4  ;;  %v6306_v0 = vrot.slane %v13565_v62, 5 }
 0x3d7   : > { %v13547_v18 = vadd.f32 %v8391_v8, %v13504_v52  ;;  %v6457_v52 = vshll.u32 %v6361_v6, 16  ;;  %v5987_v6 = vrot.slane %v5985_v53, 5  ;;  %v6456_v8 = vrot.slane %v6454_v47, 4  ;;  %v13578_v40 = vpop.f32.mrf.mxu0  ;;  %v5765_v53 = vld [vmem:[#allocation2 + $0x6c] sm:$0xf] }
 0x3d8   : > { %v7494_v1 = vpack.c.b16 %v7464_v46, %v7463_v9  ;;  %v6304_v55 = vsel %vm11251_vm13, %v9667_v36, %v6303_v10  ;;  %14495 = vst [vmem:[#allocation26_spill] sm:$0xff] %v13578_v40  ;;  %v5999_v46 = vshll.u32 %v13544_v22, 16  ;;  %v6003_v47 = vshrl.u32 %v13544_v22, 16  ;;  %v10326_v22 = vld [vmem:[#allocation2 + $0x18] sm:$0xff] }
 0x3d9   : > { %v8307_v37 = vpop.f32.mrf.mxu2  ;;  %v6459_v50 = vrot.slane %v6457_v52, 5  ;;  %v5988_v4 = vsel %vm10806_vm5, %v5983_v60, %v5987_v6  ;;  %v8221_v52 = vadd.f32 %v13421_v27, %v13159_v19  ;;  %v6473_v10 = vshll.u32 %v6391_v32, 16  ;;  %v6183_v60 = vld [vmem:[#allocation2 + $0x24] sm:$0xe] }
 0x3da   : > { %v13567_v58 = vadd.f32 %v8307_v37, %v8219_v5  ;;  %v5973_v5 = vrot.slane %v5972_v29, 4  ;;  %v6307_v37 = vsel %vm11251_vm13, %v6305_v17, %v6306_v0  ;;  %v7333_v36 = vunpack.c.l.b16 %v6304_v55  ;;  %v6363_v55 = vld [vmem:[#allocation2 + $0x3c] sm:$0xf] }
 0x3db   : > { %v13572_v56 = vpop.f32.mrf.mxu1  ;;  %v6460_v9 = vor.u32 %v6459_v50, %v6456_v8  ;;  %v7334_v6 = vunpack.c.l.b16 %v6307_v37  ;;  %v7268_v43 = vunpack.c.l.b16 %v5988_v4  ;;  %v5990_v40 = vshrl.u32 %v5765_v53, 16  ;;  %v13598_v50 = vld [vmem:[#allocation2 + $0x7c] sm:$0xf] }
 0x3dc   : > { %v5978_v29 = vsel %vm10806_vm5, %v5973_v5, %v13525_v44  ;;  %v5993_v19 = vshll.u32 %v5765_v53, 16  ;;  %v6471_v57 = vrot.slane %v6470_v12, 4  ;;  %v7350_v32 = vpack.c.b16 %v7320_v26, %v7319_v16 }
 0x3dd   : > { %8805 = vmatmul.bf16.gmra.mxu0 %v7494_v1  ;;  %v6005_v17 = vrot.slane %v6003_v47, 4  ;;  %v13596_v0 = vpack.c.b16 %v7334_v6, %v7333_v36  ;;  %v7267_v44 = vunpack.c.l.b16 %v5978_v29  ;;  %v9661_v5 = vrot.slane %v6183_v60, 9 }
 0x3de   : > { %v8393_v48 = vpop.f32.mrf.mxu3  ;;  %v6475_v8 = vrot.slane %v6473_v10, 5  ;;  %v14497_v12 = vrot.slane %v13569_v38, 5  ;;  %v6461_v37 = vrot.slane %v6460_v9, 4  ;;  %v5992_v36 = vrot.slane %v5990_v40, 4  ;;  %v13612_v9 = vld [vmem:[#allocation2 + $0x80] sm:$0x1] }
 0x3df   : > { %v13587_v59 = vadd.f32 %v8393_v48, %v13529_v20  ;;  %v6364_v20 = vld [vmem:[#allocation2 + $0x40] sm:$0xf]  ;;  %v7292_v47 = vpack.c.b16 %v7268_v43, %v7267_v44  ;;  %v5995_v6 = vrot.slane %v5993_v19, 5  ;;  %v8224_v10 = vadd.f32 %v13421_v27, %v13188_v14  ;;  %v13618_v14 = vpop.f32.mrf.mxu0 }
 0x3e0   : > { %v6263_v53 = vrot.slane %v14497_v12, 4  ;;  %v6487_v16 = vshll.u32 %v6364_v20, 16  ;;  %v6491_v26 = vshrl.u32 %v6364_v20, 16  ;;  %v6310_v20 = vrot.slane %v13598_v50, 5  ;;  %14499 = vst [vmem:[#allocation29_spill] sm:$0xff] %v13618_v14 }
 0x3e1   : > { %14496 = vst [vmem:[#allocation27_spill] sm:$0xff] %v13587_v59  ;;  %v8309_v48 = vpop.f32.mrf.mxu2  ;;  %v13594_v59 = vrot.slane %v5999_v46, 5  ;;  %v6190_v46 = vld [vmem:[#allocation2 + $0x78] sm:$0xe]  ;;  %v6481_v40 = vshll.u32 %v6363_v55, 16 }
 0x3e2   : > { %v8310_v1 = vadd.f32 %v8309_v48, %v8221_v52  ;;  %v6476_v52 = vsel %vm10806_vm5, %v6471_v57, %v6475_v8  ;;  %v6478_v57 = vshrl.u32 %v6363_v55, 16  ;;  %v9668_v19 = vrot.slane %v6190_v46, 9 }
 0x3e3   : > { %8711 = vmatmul.bf16.vlgmr.msra.gmra.mxu3 %v10326_v22  ;;  %v13600_v4 = vpop.f32.mrf.mxu1  ;;  %v6006_v60 = vor.u32 %v6005_v17, %v13594_v59  ;;  %v6466_v22 = vsel %vm10806_vm5, %v6461_v37, %v13561_v63  ;;  %v6009_v48 = vshll.u32 %v13565_v62, 16  ;;  %v7466_v17 = vunpack.c.l.b16 %v6476_v52 }
 0x3e4   : > { %v13621_v44 = vrot.slane %v6487_v16, 5  ;;  %v6493_v63 = vrot.slane %v6491_v26, 4  ;;  %v5996_v8 = vor.u32 %v5995_v6, %v5992_v36  ;;  %v6311_v12 = vsel %vm11251_vm13, %v9668_v19, %v6310_v20 }
 0x3e5   : > { %8627 = vmatmul.bf16.gmra.mxu2 %v7350_v32  ;;  %v6312_v37 = vrot.slane %v6310_v20, 4  ;;  %v6007_v32 = vrot.slane %v6006_v60, 4  ;;  %v14500_v55 = vrot.slane %v13569_v38, 5  ;;  %v7465_v16 = vunpack.c.l.b16 %v6466_v22 }
 0x3e6   : > { %v8396_v29 = vpop.f32.mrf.mxu3  ;;  %8568 = vmatmul.bf16.gmra.mxu1 %v7292_v47  ;;  %v6480_v14 = vrot.slane %v6478_v57, 4  ;;  %v6011_v6 = vrot.slane %v6009_v48, 5  ;;  %v6483_v20 = vrot.slane %v6481_v40, 5  ;;  %v7335_v19 = vunpack.c.l.b16 %v6311_v12 }
 0x3e7   : > { %v13616_v43 = vadd.f32 %v8396_v29, %v13567_v58  ;;  %v6313_v58 = vrot.slane %v13612_v9, 5  ;;  %v6262_v46 = vsel %vm11251_vm13, %v9661_v5, %v14500_v55  ;;  %v10502_v29 = vld [vmem:[#allocation2 + $0x2c] sm:$0x1]  ;;  %v5997_v60 = vrot.slane %v5996_v8, 4  ;;  %v6392_v5 = vld [vmem:[#allocation2 + $0x44] sm:$0x1] }
 0x3e8   : > { %v6264_v62 = vrot.slane %v10502_v29, 5  ;;  %v7495_v30 = vpack.c.b16 %v7466_v17, %v7465_v16  ;;  %v6494_v55 = vor.u32 %v6493_v63, %v13621_v44  ;;  %v6012_v22 = vsel %vm10806_vm5, %v6007_v32, %v6011_v6  ;;  %v5767_v8 = vld [vmem:[#allocation2 + $0x78] sm:$0xf] }
 0x3e9   : > { %14498 = vst [vmem:[#allocation28_spill] sm:$0xff] %v13616_v43  ;;  %v8312_v47 = vpop.f32.mrf.mxu2  ;;  %v6314_v26 = vsel %vm11251_vm13, %v6312_v37, %v6313_v58  ;;  %v6023_v57 = vshll.u32 %v13598_v50, 16  ;;  %v6027_v37 = vshrl.u32 %v13598_v50, 16  ;;  %v6484_v63 = vor.u32 %v6483_v20, %v6480_v14 }
 0x3ea   : > { %v8313_v52 = vadd.f32 %v8312_v47, %v8224_v10  ;;  %v7336_v43 = vunpack.c.l.b16 %v6314_v26  ;;  %v6265_v38 = vsel %vm11251_vm13, %v6263_v53, %v6264_v62  ;;  %v6002_v53 = vsel %vm10806_vm5, %v5997_v60, %v13594_v59  ;;  %v10327_v47 = vld [vmem:[#allocation2 + $0x24] sm:$0xff]  ;;  %v6366_v59 = vld [vmem:[#allocation2 + $0x4c] sm:$0xf] }
 0x3eb   : > { %v13632_v36 = vpop.f32.mrf.mxu1  ;;  %v7322_v17 = vunpack.c.l.b16 %v6265_v38  ;;  %v6497_v12 = vshll.u32 %v6392_v5, 16  ;;  %v8226_v58 = vadd.f32 %v13421_v27, %v13210_v2  ;;  %v7270_v32 = vunpack.c.l.b16 %v6012_v22  ;;  %v10503_v2 = vld [vmem:[#allocation2 + $0x34] sm:$0xf]  ;;  %v6365_v22 = vld [vmem:[#allocation2 + $0x48] sm:$0xf] }
 0x3ec   : > { %v13641_v48 = vpack.c.b16 %v7336_v43, %v7335_v19  ;;  %v7321_v29 = vunpack.c.l.b16 %v6262_v46  ;;  %v6495_v50 = vrot.slane %v6494_v55, 4  ;;  %v13650_v43 = vpop.f32.mrf.mxu0  ;;  %v6014_v62 = vshrl.u32 %v5767_v8, 16 }
 0x3ed   : > { %8810 = vmatmul.bf16.gmra.mxu0 %v7495_v30  ;;  %14502 = vst [vmem:[#allocation31_spill] sm:$0xff] %v13650_v43  ;;  %v6017_v16 = vshll.u32 %v5767_v8, 16  ;;  %v13652_v26 = vrot.slane %v6023_v57, 5  ;;  %v6029_v6 = vrot.slane %v6027_v37, 4  ;;  %v8446_v30 = vadd.f32 %v12990_v33, %v13089_v39 }
 0x3ee   : > { %v8398_v10 = vpop.f32.mrf.mxu3  ;;  %v7269_v14 = vunpack.c.l.b16 %v6002_v53  ;;  %v6268_v19 = vrot.slane %v10503_v2, 5  ;;  %v7351_v46 = vpack.c.b16 %v7322_v17, %v7321_v29  ;;  %v6485_v38 = vrot.slane %v6484_v63, 4  ;;  %v6184_v53 = vld [vmem:[#allocation2 + $0x30] sm:$0xe]  ;;  %v10504_v2 = vld [vmem:[#allocation2 + $0x38] sm:$0x1] }
 0x3ef   : > { %v13643_v40 = vadd.f32 %v8398_v10, %v8310_v1  ;;  %v6499_v5 = vrot.slane %v6497_v12, 5  ;;  %v6511_v57 = vshll.u32 %v6366_v59, 16  ;;  %v6515_v8 = vshrl.u32 %v6366_v59, 16  ;;  %v10408_v63 = vld [vmem:[%s14385_s3 + $0x210] sm:$0xff] }
 0x3f0   : > { %v7293_v10 = vpack.c.b16 %v7270_v32, %v7269_v14  ;;  %v6016_v43 = vrot.slane %v6014_v62, 4  ;;  %v6270_v17 = vrot.slane %v6268_v19, 4  ;;  %v6033_v12 = vshll.u32 %v13612_v9, 16  ;;  %8886 = vmatpush.bf16.msra.mxu1 %v10408_v63 }
 0x3f1   : > { %14501 = vst [vmem:[#allocation30_spill] sm:$0xff] %v13643_v40  ;;  %v8314_v1 = vpop.f32.mrf.mxu2  ;;  %v6030_v40 = vor.u32 %v6029_v6, %v13652_v26  ;;  %v6500_v33 = vsel %vm10806_vm5, %v6495_v50, %v6499_v5  ;;  %v6502_v32 = vshrl.u32 %v6365_v22, 16  ;;  %v6505_v29 = vshll.u32 %v6365_v22, 16 }
 0x3f2   : > { %v8315_v20 = vadd.f32 %v8314_v1, %v8226_v58  ;;  %v6490_v58 = vsel %vm10806_vm5, %v6485_v38, %v13621_v44  ;;  %v7468_v50 = vunpack.c.l.b16 %v6500_v33  ;;  %v13672_v1 = vrot.slane %v6511_v57, 5  ;;  %v6393_v57 = vld [vmem:[#allocation2 + $0x50] sm:$0x1] }
 0x3f3   : > { %8716 = vmatmul.bf16.gmra.mxu3 %v10327_v47  ;;  %v8534_v60 = vpop.f32.mrf.mxu1  ;;  %v6019_v47 = vrot.slane %v6017_v16, 5  ;;  %v6517_v62 = vrot.slane %v6515_v8, 4  ;;  %v6031_v59 = vrot.slane %v6030_v40, 4  ;;  %v8448_v9 = vadd.f32 %v13029_v24, %v13118_v54 }
 0x3f4   : > { %v13656_v55 = vadd.f32 %v8534_v60, %v8446_v30  ;;  %v9662_v30 = vrot.slane %v6184_v53, 9  ;;  %v6271_v44 = vrot.slane %v10504_v2, 5  ;;  %v7467_v60 = vunpack.c.l.b16 %v6490_v58  ;;  %v13678_v38 = vpop.f32.mrf.mxu0 }
 0x3f5   : > { %8632 = vmatmul.bf16.gmra.mxu2 %v7351_v46  ;;  %v6020_v6 = vor.u32 %v6019_v47, %v6016_v43  ;;  %v13676_v46 = vld [vmem:[#allocation2 + $0x88] sm:$0xf]  ;;  %14503 = vst [vmem:[#allocation32_spill] sm:$0xff] %v13678_v38  ;;  %v6035_v5 = vrot.slane %v6033_v12, 5  ;;  %v6504_v22 = vrot.slane %v6502_v32, 4  ;;  %v6507_v43 = vrot.slane %v6505_v29, 5 }
 0x3f6   : > { %v8401_v37 = vpop.f32.mrf.mxu3  ;;  %8573 = vmatmul.bf16.gmra.mxu1 %v7293_v10  ;;  %v6269_v10 = vsel %vm11251_vm13, %v9662_v30, %v6268_v19  ;;  %v6272_v24 = vsel %vm11251_vm13, %v6270_v17, %v6271_v44  ;;  %v7496_v54 = vpack.c.b16 %v7468_v50, %v7467_v60  ;;  %v6518_v8 = vor.u32 %v6517_v62, %v13672_v1  ;;  %v5769_v12 = vld [vmem:[#allocation2 + $0x84] sm:$0xf]  ;;  %v10328_v50 = vld [vmem:[#allocation2 + $0x30] sm:$0xff]  ;;  %v6368_v44 = vld [vmem:[#allocation2 + $0x58] sm:$0xf] }
 0x3f7   : > { %v13661_v39 = vadd.f32 %v8401_v37, %v8313_v52  ;;  %v8229_v52 = vadd.f32 %v13421_v27, %v13245_v49  ;;  %v6021_v47 = vrot.slane %v6020_v6, 4  ;;  %v6036_v33 = vsel %vm10806_vm5, %v6031_v59, %v6035_v5  ;;  %v10505_v5 = vld [vmem:[#allocation2 + $0x40] sm:$0xf] }
 0x3f8   : > { %v6047_v53 = vshll.u32 %v13676_v46, 16  ;;  %v6051_v19 = vshrl.u32 %v13676_v46, 16  ;;  %v7324_v58 = vunpack.c.l.b16 %v6272_v24  ;;  %v6508_v32 = vor.u32 %v6507_v43, %v6504_v22 }
 0x3f9   : > { %v8317_v16 = vpop.f32.mrf.mxu2  ;;  %v6026_v17 = vsel %vm10806_vm5, %v6021_v47, %v13652_v26  ;;  %v6521_v29 = vshll.u32 %v6393_v57, 16  ;;  %v7272_v62 = vunpack.c.l.b16 %v6036_v33  ;;  %v6519_v6 = vrot.slane %v6518_v8, 4  ;;  %v13704_v8 = vld [vmem:[#allocation2 + $0x8c] sm:$0x1] }
 0x3fa   : > { %v8318_v14 = vadd.f32 %v8317_v16, %v8229_v52  ;;  %v8231_v52 = vadd.f32 %v13421_v27, %v13268_v35  ;;  %v7323_v16 = vunpack.c.l.b16 %v6269_v10  ;;  %v6038_v30 = vshrl.u32 %v5769_v12, 16 }
 0x3fb   : > { %v8536_v49 = vpop.f32.mrf.mxu1  ;;  %v6053_v2 = vrot.slane %v6051_v19, 4  ;;  %v8451_v26 = vadd.f32 %v13057_v41, %v13143_v31  ;;  %v7271_v60 = vunpack.c.l.b16 %v6026_v17  ;;  %v6275_v22 = vrot.slane %v10505_v5, 5 }
 0x3fc   : > { %v13682_v40 = vadd.f32 %v8536_v49, %v8448_v9  ;;  %v13698_v9 = vrot.slane %v6047_v53, 5  ;;  %v7352_v43 = vpack.c.b16 %v7324_v58, %v7323_v16  ;;  %v6509_v24 = vrot.slane %v6508_v32, 4  ;;  %v13706_v53 = vpop.f32.mrf.mxu0  ;;  %v6185_v32 = vld [vmem:[#allocation2 + $0x3c] sm:$0xe] }
 0x3fd   : > { %8815 = vmatmul.bf16.gmra.mxu0 %v7496_v54  ;;  %v6523_v10 = vrot.slane %v6521_v29, 5  ;;  %v7294_v57 = vpack.c.b16 %v7272_v62, %v7271_v60  ;;  %v6535_v47 = vshll.u32 %v6368_v44, 16  ;;  %v6539_v33 = vshrl.u32 %v6368_v44, 16  ;;  %14505 = vst [vmem:[#allocation34_spill] sm:$0xff] %v13706_v53 }
 0x3fe   : > { %v8403_v37 = vpop.f32.mrf.mxu3  ;;  %v6040_v41 = vrot.slane %v6038_v30, 4  ;;  %v6277_v29 = vrot.slane %v6275_v22, 4  ;;  %v8453_v60 = vadd.f32 %v13091_v11, %v13169_v61  ;;  %v6394_v11 = vld [vmem:[#allocation2 + $0x5c] sm:$0x1] }
 0x3ff   : > { %v13691_v63 = vadd.f32 %v8403_v37, %v8315_v20  ;;  %v6041_v20 = vshll.u32 %v5769_v12, 16  ;;  %v6367_v37 = vld [vmem:[#allocation2 + $0x54] sm:$0xf]  ;;  %v6054_v12 = vor.u32 %v6053_v2, %v13698_v9  ;;  %v6524_v17 = vsel %vm10806_vm5, %v6519_v6, %v6523_v10 }
 0x400   : > { %v6526_v62 = vshrl.u32 %v6367_v37, 16  ;;  %v6529_v16 = vshll.u32 %v6367_v37, 16  ;;  %v7470_v30 = vunpack.c.l.b16 %v6524_v17 }
 0x401   : > { %14504 = vst [vmem:[#allocation33_spill] sm:$0xff] %v13691_v63  ;;  %v8319_v59 = vpop.f32.mrf.mxu2  ;;  %v6043_v31 = vrot.slane %v6041_v20, 5  ;;  %v13719_v20 = vrot.slane %v6535_v47, 5  ;;  %v6055_v44 = vrot.slane %v6054_v12, 4 }
 0x402   : > { %v8320_v49 = vadd.f32 %v8319_v59, %v8231_v52  ;;  %v6057_v52 = vshll.u32 %v13704_v8, 16  ;;  %v8234_v59 = vadd.f32 %v13421_v27, %v13297_v13  ;;  %v6528_v37 = vrot.slane %v6526_v62, 4 }
 0x403   : > { %8721 = vmatmul.bf16.gmra.mxu3 %v10328_v50  ;;  %v8539_v35 = vpop.f32.mrf.mxu1  ;;  %v6514_v50 = vsel %vm10806_vm5, %v6509_v24, %v13672_v1  ;;  %v6044_v2 = vor.u32 %v6043_v31, %v6040_v41  ;;  %v13723_v24 = vld [vmem:[#allocation2 + $0x94] sm:$0xf]  ;;  %v6531_v47 = vrot.slane %v6529_v16, 5 }
 0x404   : > { %v13702_v54 = vadd.f32 %v8539_v35, %v8451_v26  ;;  %v9663_v26 = vrot.slane %v6185_v32, 9  ;;  %v10506_v35 = vld [vmem:[#allocation2 + $0x44] sm:$0x1]  ;;  %v7469_v1 = vunpack.c.l.b16 %v6514_v50  ;;  %v6071_v32 = vshll.u32 %v13723_v24, 16  ;;  %v5771_v50 = vld [vmem:[#allocation2 + $0x90] sm:$0xf]  ;;  %v13738_v62 = vpop.f32.mrf.mxu0 }
 0x405   : > { %8637 = vmatmul.bf16.gmra.mxu2 %v7352_v43  ;;  %v6278_v43 = vrot.slane %v10506_v35, 5  ;;  %v6045_v12 = vrot.slane %v6044_v2, 4  ;;  %14508 = vst [vmem:[#allocation37_spill] sm:$0xff] %v13738_v62  ;;  %v10329_v2 = vld [vmem:[#allocation2 + $0x3c] sm:$0xff]  ;;  %v6062_v35 = vshrl.u32 %v5771_v50, 16 }
 0x406   : > { %v8406_v19 = vpop.f32.mrf.mxu3  ;;  %8578 = vmatmul.bf16.gmra.mxu1 %v7294_v57  ;;  %v6059_v57 = vrot.slane %v6057_v52, 5  ;;  %v6276_v13 = vsel %vm11251_vm13, %v9663_v26, %v6275_v22  ;;  %v7497_v41 = vpack.c.b16 %v7470_v30, %v7469_v1  ;;  %v6075_v22 = vshrl.u32 %v13723_v24, 16 }
 0x407   : > { %v13711_v58 = vadd.f32 %v8406_v19, %v8318_v14  ;;  %v6541_v14 = vrot.slane %v6539_v33, 4  ;;  %v6279_v19 = vsel %vm11251_vm13, %v6277_v29, %v6278_v43  ;;  %v6050_v29 = vsel %vm10806_vm5, %v6045_v12, %v13698_v9  ;;  %v14510_v9 = vld [vmem:[#allocation10_spill] sm:$0xff]  ;;  %v10507_v12 = vld [vmem:[#allocation2 + $0x4c] sm:$0xf] }
 0x408   : > { %v6060_v17 = vsel %vm10806_vm5, %v6055_v44, %v6059_v57  ;;  %v7326_v16 = vunpack.c.l.b16 %v6279_v19  ;;  %v6545_v30 = vshll.u32 %v6394_v11, 16  ;;  %v7325_v26 = vunpack.c.l.b16 %v6276_v13  ;;  %v6370_v57 = vld [vmem:[#allocation2 + $0x64] sm:$0xf] }
 0x409   : > { %14506 = vst [vmem:[#allocation35_spill] sm:$0xff] %v13711_v58  ;;  %v8322_v6 = vpop.f32.mrf.mxu2  ;;  %v6542_v61 = vor.u32 %v6541_v14, %v13719_v20  ;;  %v14509_v14 = vld [vmem:[#allocation15_spill] sm:$0xff]  ;;  %v7274_v44 = vunpack.c.l.b16 %v6060_v17  ;;  %v6065_v43 = vshll.u32 %v5771_v50, 16  ;;  %v13745_v1 = vrot.slane %v6071_v32, 5  ;;  %v13751_v50 = vld [vmem:[#allocation2 + $0x98] sm:$0x1] }
 0x40a   : > { %v8323_v5 = vadd.f32 %v8322_v6, %v8234_v59  ;;  %v6532_v59 = vor.u32 %v6531_v47, %v6528_v37  ;;  %v8236_v6 = vadd.f32 %v13421_v27, %v14509_v14  ;;  %v14511_v19 = vld [vmem:[#allocation7_spill] sm:$0xff]  ;;  %v7273_v37 = vunpack.c.l.b16 %v6050_v29 }
 0x40b   : > { %v8541_v10 = vpop.f32.mrf.mxu1  ;;  %v6282_v14 = vrot.slane %v10507_v12, 5  ;;  %v6547_v13 = vrot.slane %v6545_v30, 5  ;;  %v6369_v32 = vld [vmem:[#allocation2 + $0x60] sm:$0xf]  ;;  %v6064_v53 = vrot.slane %v6062_v35, 4  ;;  %v6067_v58 = vrot.slane %v6065_v43, 5 }
 0x40c   : > { %v13727_v33 = vadd.f32 %v8541_v10, %v8453_v60  ;;  %v6543_v60 = vrot.slane %v6542_v61, 4  ;;  %v6077_v10 = vrot.slane %v6075_v22, 4  ;;  %v6533_v17 = vrot.slane %v6532_v59, 4  ;;  %v14515_v12 = vld [vmem:[#allocation11_spill] sm:$0xff] }
 0x40d   : > { %8820 = vmatmul.bf16.gmra.mxu0 %v7497_v41  ;;  %v8456_v41 = vadd.f32 %v14511_v19, %v14510_v9  ;;  %v7295_v62 = vpack.c.b16 %v7274_v44, %v7273_v37  ;;  %v6559_v22 = vshll.u32 %v6370_v57, 16  ;;  %v6186_v44 = vld [vmem:[#allocation2 + $0x48] sm:$0xe]  ;;  %v6284_v35 = vrot.slane %v6282_v14, 4 }
 0x40e   : > { %v8408_v31 = vpop.f32.mrf.mxu3  ;;  %v6078_v29 = vor.u32 %v6077_v10, %v13745_v1  ;;  %v6538_v43 = vsel %vm10806_vm5, %v6533_v17, %v13719_v20  ;;  %v6068_v19 = vor.u32 %v6067_v58, %v6064_v53  ;;  %v9664_v37 = vrot.slane %v6186_v44, 9  ;;  %v13773_v17 = vld [vmem:[#allocation2 + $0xa0] sm:$0xf]  ;;  %v6395_v44 = vld [vmem:[#allocation2 + $0x68] sm:$0x1] }
 0x40f   : > { %v13736_v52 = vadd.f32 %v8408_v31, %v8320_v49  ;;  %v7353_v31 = vpack.c.b16 %v7326_v16, %v7325_v26  ;;  %v6548_v16 = vsel %vm10806_vm5, %v6543_v60, %v6547_v13  ;;  %v10407_v26 = vld [vmem:[%s14385_s3 + $0x208] sm:$0xff]  ;;  %v6550_v60 = vshrl.u32 %v6369_v32, 16  ;;  %v14516_v13 = vld [vmem:[#allocation6_spill] sm:$0xff] }
 0x410   : > { %v7472_v10 = vunpack.c.l.b16 %v6548_v16  ;;  %8887 = vmatpush.bf16.msra.mxu1 %v10407_v26  ;;  %v7471_v20 = vunpack.c.l.b16 %v6538_v43  ;;  %v6069_v43 = vrot.slane %v6068_v19, 4  ;;  %v6569_v19 = vshll.u32 %v6395_v44, 16 }
 0x411   : > { %14507 = vst [vmem:[#allocation36_spill] sm:$0xff] %v13736_v52  ;;  %v8324_v49 = vpop.f32.mrf.mxu2  ;;  %v6563_v52 = vshrl.u32 %v6370_v57, 16  ;;  %v13769_v57 = vpop.f32.mrf.mxu0  ;;  %v6552_v53 = vrot.slane %v6550_v60, 4  ;;  %v13791_v60 = vld [vmem:[%s14386_s4] ss:$0 sm:$0xff] }
 0x412   : > { %v8325_v47 = vadd.f32 %v8324_v49, %v8236_v6  ;;  %v14512_v6 = vld [vmem:[#allocation18_spill] sm:$0xff]  ;;  %v6081_v49 = vshll.u32 %v13751_v50, 16  ;;  %14514 = vst [vmem:[#allocation10_spill] sm:$0xff] %v13769_v57  ;;  %v14519_v57 = vld [vmem:[#allocation9_spill] sm:$0xff] }
 0x413   : > { %8726 = vmatmul.bf16.gmra.mxu3 %v10329_v2  ;;  %v8544_v11 = vpop.f32.mrf.mxu1  ;;  %v8239_v59 = vadd.f32 %v13421_v27, %v14512_v6  ;;  %v6553_v27 = vshll.u32 %v6369_v32, 16 }
 0x414   : > { %v13749_v61 = vadd.f32 %v8544_v11, %v8456_v41  ;;  %v6079_v41 = vrot.slane %v6078_v29, 4  ;;  %v10508_v11 = vld [vmem:[#allocation2 + $0x50] sm:$0x1]  ;;  %v6083_v32 = vrot.slane %v6081_v49, 5  ;;  %v7498_v29 = vpack.c.b16 %v7472_v10, %v7471_v20 }
 0x415   : > { %8642 = vmatmul.bf16.gmra.mxu2 %v7353_v31  ;;  %v6285_v31 = vrot.slane %v10508_v11, 5  ;;  %v6555_v26 = vrot.slane %v6553_v27, 5  ;;  %v6095_v49 = vshll.u32 %v13773_v17, 16  ;;  %v8241_v10 = vadd.f32 %v13791_v60, %v13439_v25  ;;  %v14518_v25 = vld [vmem:[#allocation13_spill] sm:$0xff] }
 0x416   : > { %v8411_v2 = vpop.f32.mrf.mxu3  ;;  %8583 = vmatmul.bf16.gmra.mxu1 %v7295_v62  ;;  %v6565_v62 = vrot.slane %v6563_v52, 4  ;;  %v6283_v52 = vsel %vm11251_vm13, %v9664_v37, %v6282_v14  ;;  %v6099_v14 = vshrl.u32 %v13773_v17, 16  ;;  %v6074_v27 = vsel %vm10806_vm5, %v6069_v43, %v13745_v1 }
 0x417   : > { %v13758_v30 = vadd.f32 %v8411_v2, %v8323_v5  ;;  %v13767_v5 = vrot.slane %v6559_v22, 5  ;;  %v8458_v2 = vadd.f32 %v14516_v13, %v14515_v12  ;;  %v6286_v22 = vsel %vm11251_vm13, %v6284_v35, %v6285_v31  ;;  %v5773_v35 = vld [vmem:[#allocation2 + $0x9c] sm:$0xf] }
 0x418   : > { %v6556_v12 = vor.u32 %v6555_v26, %v6552_v53  ;;  %v7275_v1 = vunpack.c.l.b16 %v6074_v27  ;;  %v6371_v53 = vld [vmem:[#allocation2 + $0x6c] sm:$0xf] }
 0x419   : > { %14513 = vst [vmem:[#allocation15_spill] sm:$0xff] %v13758_v30  ;;  %v8327_v9 = vpop.f32.mrf.mxu2  ;;  %v6566_v11 = vor.u32 %v6565_v62, %v13767_v5  ;;  %v7328_v62 = vunpack.c.l.b16 %v6286_v22  ;;  %v8461_v30 = vadd.f32 %v14519_v57, %v14518_v25 }
 0x41a   : > { %v8328_v6 = vadd.f32 %v8327_v9, %v8239_v59  ;;  %v6084_v9 = vsel %vm10806_vm5, %v6079_v41, %v6083_v32  ;;  %v10330_v41 = vld [vmem:[#allocation2 + $0x48] sm:$0xff]  ;;  %v6089_v32 = vshll.u32 %v5773_v35, 16  ;;  %v6557_v38 = vrot.slane %v6556_v12, 4 }
 0x41b   : > { %v8546_v16 = vpop.f32.mrf.mxu1  ;;  %v7276_v31 = vunpack.c.l.b16 %v6084_v9  ;;  %v6567_v13 = vrot.slane %v6566_v11, 4  ;;  %v6577_v12 = vshll.u32 %v6371_v53, 16 }
 0x41c   : > { %v13779_v58 = vadd.f32 %v8546_v16, %v8458_v2  ;;  %v6372_v2 = vld [vmem:[#allocation2 + $0x70] sm:$0xf]  ;;  %v6086_v16 = vshrl.u32 %v5773_v35, 16  ;;  %v6091_v27 = vrot.slane %v6089_v32, 5 }
 0x41d   : > { %8825 = vmatmul.bf16.gmra.mxu0 %v7498_v29  ;;  %v13802_v29 = vpop.f32.mrf.mxu0  ;;  %v6583_v26 = vshll.u32 %v6372_v2, 16  ;;  %v6587_v11 = vshrl.u32 %v6372_v2, 16  ;;  %v7296_v35 = vpack.c.b16 %v7276_v31, %v7275_v1  ;;  %v6574_v31 = vshrl.u32 %v6371_v53, 16 }
 0x41e   : > { %v8413_v59 = vpop.f32.mrf.mxu3  ;;  %14520 = vst [vmem:[#allocation18_spill] sm:$0xff] %v13802_v29  ;;  %v6088_v57 = vrot.slane %v6086_v16, 4 }
 0x41f   : > { %v13786_v37 = vadd.f32 %v8413_v59, %v8325_v47  ;;  %v7327_v47 = vunpack.c.l.b16 %v6283_v52  ;;  %v13798_v59 = vrot.slane %v6095_v49, 5  ;;  %v6571_v52 = vrot.slane %v6569_v19, 5  ;;  %v13806_v49 = vld [vmem:[#allocation2 + $0xa4] sm:$0x1] }
 0x420   : > { %v13817_v2 = vrot.slane %v6583_v26, 5  ;;  %v6589_v16 = vrot.slane %v6587_v11, 4  ;;  %v6092_v25 = vor.u32 %v6091_v27, %v6088_v57  ;;  %v13825_v11 = vld [vmem:[#allocation2 + $0xac] sm:$0xf] }
 0x421   : > { %14517 = vst [vmem:[#allocation7_spill] sm:$0xff] %v13786_v37  ;;  %v8329_v20 = vpop.f32.mrf.mxu2  ;;  %v6101_v37 = vrot.slane %v6099_v14, 4  ;;  %v7354_v43 = vpack.c.b16 %v7328_v62, %v7327_v47  ;;  %v10510_v14 = vld [vmem:[#allocation2 + $0x58] sm:$0xf]  ;;  %v6572_v62 = vsel %vm10806_vm5, %v6567_v13, %v6571_v52  ;;  %v6105_v47 = vshll.u32 %v13806_v49, 16 }
 0x422   : > { %v8330_v22 = vadd.f32 %v8329_v20, %v8241_v10  ;;  %v6187_v20 = vld [vmem:[#allocation2 + $0x54] sm:$0xe]  ;;  %v6396_v52 = vld [vmem:[#allocation2 + $0x74] sm:$0x1]  ;;  %v6590_v57 = vor.u32 %v6589_v16, %v13817_v2  ;;  %v5775_v16 = vld [vmem:[#allocation2 + $0xa8] sm:$0xf] }
 0x423   : > { %8731 = vmatmul.bf16.gmra.mxu3 %v10330_v41  ;;  %v8549_v44 = vpop.f32.mrf.mxu1  ;;  %v6289_v41 = vrot.slane %v10510_v14, 5  ;;  %v6102_v10 = vor.u32 %v6101_v37, %v13798_v59  ;;  %v8244_v37 = vadd.f32 %v13791_v60, %v13479_v23  ;;  %v9665_v32 = vrot.slane %v6187_v20, 9 }
 0x424   : > { %v13804_v9 = vadd.f32 %v8549_v44, %v8461_v30  ;;  %v6562_v30 = vsel %vm10806_vm5, %v6557_v38, %v13767_v5  ;;  %v10511_v44 = vld [vmem:[#allocation2 + $0x5c] sm:$0x1]  ;;  %v14522_v38 = vld [vmem:[#allocation12_spill] sm:$0xff]  ;;  %v6107_v20 = vrot.slane %v6105_v47, 5  ;;  %v6119_v47 = vshll.u32 %v13825_v11, 16 }
 0x425   : > { %8647 = vmatmul.bf16.gmra.mxu2 %v7354_v43  ;;  %v6291_v13 = vrot.slane %v6289_v41, 4  ;;  %v6103_v1 = vrot.slane %v6102_v10, 4  ;;  %v6292_v43 = vrot.slane %v10511_v44, 5  ;;  %v14523_v5 = vld [vmem:[#allocation8_spill] sm:$0xff]  ;;  %v6290_v53 = vsel %vm11251_vm13, %v9665_v32, %v6289_v41 }
 0x426   : > { %v8416_v63 = vpop.f32.mrf.mxu3  ;;  %8588 = vmatmul.bf16.gmra.mxu1 %v7296_v35  ;;  %v8463_v35 = vadd.f32 %v14523_v5, %v14522_v38  ;;  %v7473_v26 = vunpack.c.l.b16 %v6562_v30  ;;  %v6593_v38 = vshll.u32 %v6396_v52, 16  ;;  %v6093_v41 = vrot.slane %v6092_v25, 4  ;;  %v10331_v52 = vld [vmem:[#allocation2 + $0x54] sm:$0xff] }
 0x427   : > { %v13811_v19 = vadd.f32 %v8416_v63, %v8328_v6  ;;  %v7474_v63 = vunpack.c.l.b16 %v6572_v62  ;;  %v6579_v62 = vrot.slane %v6577_v12, 5  ;;  %v6293_v10 = vsel %vm11251_vm13, %v6291_v13, %v6292_v43 }
 0x428   : > { %v6108_v30 = vsel %vm10806_vm5, %v6103_v1, %v6107_v20  ;;  %v6098_v32 = vsel %vm10806_vm5, %v6093_v41, %v13798_v59  ;;  %v7330_v13 = vunpack.c.l.b16 %v6293_v10  ;;  %v6591_v43 = vrot.slane %v6590_v57, 4  ;;  %v14526_v59 = vld [vmem:[#allocation16_spill] sm:$0xff] }
 0x429   : > { %14521 = vst [vmem:[#allocation11_spill] sm:$0xff] %v13811_v19  ;;  %v8332_v6 = vpop.f32.mrf.mxu2  ;;  %v6576_v19 = vrot.slane %v6574_v31, 4  ;;  %v7499_v44 = vpack.c.b16 %v7474_v63, %v7473_v26  ;;  %v6123_v31 = vshrl.u32 %v13825_v11, 16  ;;  %v8246_v25 = vadd.f32 %v13791_v60, %v13511_v15  ;;  %v14527_v10 = vld [vmem:[#allocation20_spill] sm:$0xff] }
 0x42a   : > { %v8333_v14 = vadd.f32 %v8332_v6, %v8244_v37  ;;  %v13832_v37 = vpop.f32.mrf.mxu0  ;;  %v7278_v1 = vunpack.c.l.b16 %v6108_v30  ;;  %v7329_v5 = vunpack.c.l.b16 %v6290_v53  ;;  %v13845_v20 = vrot.slane %v6119_v47, 5 }
 0x42b   : > { %v8551_v23 = vpop.f32.mrf.mxu1  ;;  %14524 = vst [vmem:[#allocation6_spill] sm:$0xff] %v13832_v37  ;;  %v6580_v63 = vor.u32 %v6579_v62, %v6576_v19  ;;  %v7277_v19 = vunpack.c.l.b16 %v6098_v32  ;;  %v6373_v32 = vld [vmem:[#allocation2 + $0x78] sm:$0xf] }
 0x42c   : > { %v13828_v27 = vadd.f32 %v8551_v23, %v8463_v35  ;;  %v6595_v35 = vrot.slane %v6593_v38, 5  ;;  %v6110_v23 = vshrl.u32 %v5775_v16, 16  ;;  %v7355_v41 = vpack.c.b16 %v7330_v13, %v7329_v5 }
 0x42d   : > { %8830 = vmatmul.bf16.gmra.mxu0 %v7499_v44  ;;  %v8466_v44 = vadd.f32 %v14527_v10, %v14526_v59  ;;  %v6581_v15 = vrot.slane %v6580_v63, 4  ;;  %v7297_v30 = vpack.c.b16 %v7278_v1, %v7277_v19  ;;  %v10406_v63 = vld [vmem:[%s14385_s3 + $0x200] sm:$0xff] }
 0x42e   : > { %v8418_v6 = vpop.f32.mrf.mxu3  ;;  %v6596_v53 = vsel %vm10806_vm5, %v6591_v43, %v6595_v35  ;;  %8888 = vmatpush.bf16.msra.mxu1 %v10406_v63  ;;  %v14529_v10 = vld [vmem:[#allocation22_spill] sm:$0xff] }
 0x42f   : > { %v13838_v12 = vadd.f32 %v8418_v6, %v8330_v22  ;;  %v6113_v22 = vshll.u32 %v5775_v16, 16  ;;  %v6125_v6 = vrot.slane %v6123_v31, 4  ;;  %v13853_v16 = vld [vmem:[#allocation2 + $0xb0] sm:$0x1]  ;;  %v6586_v13 = vsel %vm10806_vm5, %v6581_v15, %v13817_v2  ;;  %v6397_v63 = vld [vmem:[#allocation2 + $0x80] sm:$0x1] }
 0x430   : > { %v6129_v1 = vshll.u32 %v13853_v16, 16  ;;  %v7476_v5 = vunpack.c.l.b16 %v6596_v53 }
 0x431   : > { %14525 = vst [vmem:[#allocation13_spill] sm:$0xff] %v13838_v12  ;;  %v8334_v26 = vpop.f32.mrf.mxu2  ;;  %v6374_v12 = vld [vmem:[#allocation2 + $0x7c] sm:$0xf]  ;;  %v6115_v29 = vrot.slane %v6113_v22, 5  ;;  %v6126_v59 = vor.u32 %v6125_v6, %v13845_v20  ;;  %v7475_v6 = vunpack.c.l.b16 %v6586_v13 }
 0x432   : > { %v8335_v62 = vadd.f32 %v8334_v26, %v8246_v25  ;;  %v6607_v47 = vshll.u32 %v6374_v12, 16  ;;  %v6611_v31 = vshrl.u32 %v6374_v12, 16  ;;  %v8249_v12 = vadd.f32 %v13791_v60, %v13531_v21  ;;  %v13866_v43 = vpop.f32.mrf.mxu0  ;;  %v13873_v21 = vld [vmem:[#allocation2 + $0xb8] sm:$0xf] }
 0x433   : > { %8736 = vmatmul.bf16.gmra.mxu3 %v10331_v52  ;;  %v8554_v57 = vpop.f32.mrf.mxu1  ;;  %v6112_v52 = vrot.slane %v6110_v23, 4  ;;  %v6127_v22 = vrot.slane %v6126_v59, 4  ;;  %v6131_v15 = vrot.slane %v6129_v1, 5  ;;  %v6143_v59 = vshll.u32 %v13873_v21, 16  ;;  %v5777_v1 = vld [vmem:[#allocation2 + $0xb4] sm:$0xf] }
 0x434   : > { %v13851_v38 = vadd.f32 %v8554_v57, %v8466_v44  ;;  %v13869_v35 = vrot.slane %v6607_v47, 5  ;;  %v6613_v26 = vrot.slane %v6611_v31, 4  ;;  %v14530_v44 = vld [vmem:[#allocation14_spill] sm:$0xff]  ;;  %v6147_v13 = vshrl.u32 %v13873_v21, 16 }
 0x435   : > { %8652 = vmatmul.bf16.gmra.mxu2 %v7355_v41  ;;  %v6116_v2 = vor.u32 %v6115_v29, %v6112_v52  ;;  %v8468_v19 = vadd.f32 %v14530_v44, %v14529_v10  ;;  %v6132_v52 = vsel %vm10806_vm5, %v6127_v22, %v6131_v15  ;;  %v6134_v44 = vshrl.u32 %v5777_v1, 16 }
 0x436   : > { %v8421_v37 = vpop.f32.mrf.mxu3  ;;  %8593 = vmatmul.bf16.gmra.mxu1 %v7297_v30  ;;  %v7500_v30 = vpack.c.b16 %v7476_v5, %v7475_v6  ;;  %v6614_v31 = vor.u32 %v6613_v26, %v13869_v35  ;;  %v10332_v26 = vld [vmem:[#allocation2 + $0x60] sm:$0xff] }
 0x437   : > { %v13856_v25 = vadd.f32 %v8421_v37, %v8333_v14  ;;  %v6598_v14 = vshrl.u32 %v6373_v32, 16  ;;  %v6601_v37 = vshll.u32 %v6373_v32, 16  ;;  %v6117_v29 = vrot.slane %v6116_v2, 4 }
 0x438   : > { %v6615_v22 = vrot.slane %v6614_v31, 4 }
 0x439   : > { %14528 = vst [vmem:[#allocation9_spill] sm:$0xff] %v13856_v25  ;;  %v8337_v23 = vpop.f32.mrf.mxu2  ;;  %v6600_v32 = vrot.slane %v6598_v14, 4  ;;  %v6603_v47 = vrot.slane %v6601_v37, 5  ;;  %v6122_v5 = vsel %vm10806_vm5, %v6117_v29, %v13845_v20  ;;  %v6617_v14 = vshll.u32 %v6397_v63, 16  ;;  %v14534_v20 = vld [vmem:[#allocation21_spill] sm:$0xff] }
 0x43a   : > { %v8338_v57 = vadd.f32 %v8337_v23, %v8249_v12  ;;  %v8251_v37 = vadd.f32 %v13791_v60, %v13572_v56  ;;  %v7280_v23 = vunpack.c.l.b16 %v6132_v52  ;;  %v13889_v6 = vpop.f32.mrf.mxu0 }
 0x43b   : > { %v8556_v41 = vpop.f32.mrf.mxu1  ;;  %v6604_v2 = vor.u32 %v6603_v47, %v6600_v32  ;;  %14532 = vst [vmem:[#allocation8_spill] sm:$0xff] %v13889_v6  ;;  %v6619_v56 = vrot.slane %v6617_v14, 5  ;;  %v13897_v47 = vld [vmem:[#allocation2 + $0xbc] sm:$0x1] }
 0x43c   : > { %v13875_v53 = vadd.f32 %v8556_v41, %v8468_v19  ;;  %v6149_v19 = vrot.slane %v6147_v13, 4  ;;  %v14533_v41 = vld [vmem:[#allocation23_spill] sm:$0xff] }
 0x43d   : > { %8835 = vmatmul.bf16.gmra.mxu0 %v7500_v30  ;;  %v8471_v15 = vadd.f32 %v14534_v20, %v14533_v41  ;;  %v7279_v30 = vunpack.c.l.b16 %v6122_v5  ;;  %v6605_v31 = vrot.slane %v6604_v2, 4  ;;  %v6375_v41 = vld [vmem:[#allocation2 + $0x84] sm:$0xf]  ;;  %v6153_v2 = vshll.u32 %v13897_v47, 16 }
 0x43e   : > { %v8423_v25 = vpop.f32.mrf.mxu3 }
 0x43f   : > { %v13882_v12 = vadd.f32 %v8423_v25, %v8335_v62  ;;  %v6137_v62 = vshll.u32 %v5777_v1, 16  ;;  %v13891_v25 = vrot.slane %v6143_v59, 5  ;;  %v7298_v32 = vpack.c.b16 %v7280_v23, %v7279_v30 }
 0x440   : > { %v6136_v1 = vrot.slane %v6134_v44, 4  ;;  %v6610_v14 = vsel %vm10806_vm5, %v6605_v31, %v13869_v35  ;;  %v6155_v31 = vrot.slane %v6153_v2, 5 }
 0x441   : > { %14531 = vst [vmem:[#allocation12_spill] sm:$0xff] %v13882_v12  ;;  %v8339_v10 = vpop.f32.mrf.mxu2  ;;  %v6376_v12 = vld [vmem:[#allocation2 + $0x88] sm:$0xf]  ;;  %v6139_v59 = vrot.slane %v6137_v62, 5  ;;  %v6150_v13 = vor.u32 %v6149_v19, %v13891_v25  ;;  %v6622_v62 = vshrl.u32 %v6375_v41, 16  ;;  %v7477_v20 = vunpack.c.l.b16 %v6610_v14 }
 0x442   : > { %v8340_v63 = vadd.f32 %v8339_v10, %v8251_v37  ;;  %v6631_v37 = vshll.u32 %v6376_v12, 16  ;;  %v6635_v23 = vshrl.u32 %v6376_v12, 16  ;;  %v8254_v10 = vadd.f32 %v13791_v60, %v13600_v4 }
 0x443   : > { %8741 = vmatmul.bf16.gmra.mxu3 %v10332_v26  ;;  %v8559_v29 = vpop.f32.mrf.mxu1  ;;  %v6620_v26 = vsel %vm10806_vm5, %v6615_v22, %v6619_v56  ;;  %v6625_v22 = vshll.u32 %v6375_v41, 16  ;;  %v13915_v56 = vpop.f32.mrf.mxu0  ;;  %v6624_v41 = vrot.slane %v6622_v62, 4  ;;  %v10333_v62 = vld [vmem:[#allocation2 + $0x6c] sm:$0xff] }
 0x444   : > { %v13895_v52 = vadd.f32 %v8559_v29, %v8471_v15  ;;  %v7478_v44 = vunpack.c.l.b16 %v6620_v26  ;;  %v13913_v29 = vld [vmem:[#allocation2 + $0xc4] sm:$0xf]  ;;  %v6633_v35 = vrot.slane %v6631_v37, 5  ;;  %v6637_v12 = vrot.slane %v6635_v23, 4  ;;  %v6398_v37 = vld [vmem:[#allocation2 + $0x8c] sm:$0x1] }
 0x445   : > { %8657 = vmatmul.bf16.gmra.mxu2 %v13537_v7  ;;  %v14536_v7 = vld [vmem:[#allocation17_spill] sm:$0xff]  ;;  %v6171_v14 = vshrl.u32 %v13913_v29, 16 }
 0x446   : > { %v8426_v6 = vpop.f32.mrf.mxu3  ;;  %8598 = vmatmul.bf16.gmra.mxu1 %v7298_v32  ;;  %v8473_v15 = vadd.f32 %v14536_v7, %v13453_v51  ;;  %v7501_v26 = vpack.c.b16 %v7478_v44, %v7477_v20  ;;  %v6167_v51 = vshll.u32 %v13913_v29, 16  ;;  %v8256_v44 = vadd.f32 %v13791_v60, %v13632_v36  ;;  %v13934_v60 = vld [vmem:[#allocation2 + $0xc8] sm:$0x1] }
 0x447   : > { %v13902_v5 = vadd.f32 %v8426_v6, %v8338_v57  ;;  %v6140_v57 = vor.u32 %v6139_v59, %v6136_v1  ;;  %v6151_v6 = vrot.slane %v6150_v13, 4 }
 0x449   : > { %14535 = vst [vmem:[#allocation16_spill] sm:$0xff] %v13902_v5  ;;  %v8342_v19 = vpop.f32.mrf.mxu2  ;;  %v6627_v5 = vrot.slane %v6625_v22, 5  ;;  %v6141_v59 = vrot.slane %v6140_v57, 4  ;;  %v6156_v13 = vsel %vm10806_vm5, %v6151_v6, %v6155_v31  ;;  %v6641_v6 = vshll.u32 %v6398_v37, 16 }
 0x44a   : > { %v8343_v30 = vadd.f32 %v8342_v19, %v8254_v10  ;;  %v5779_v10 = vld [vmem:[#allocation2 + $0xc0] sm:$0xf]  ;;  %v6638_v19 = vor.u32 %v6637_v12, %v6633_v35  ;;  %v7282_v22 = vunpack.c.l.b16 %v6156_v13 }
 0x44b   : > { %v8561_v32 = vpop.f32.mrf.mxu1  ;;  %v6146_v2 = vsel %vm10806_vm5, %v6141_v59, %v13891_v25  ;;  %v6628_v57 = vor.u32 %v6627_v5, %v6624_v41  ;;  %v6158_v7 = vshrl.u32 %v5779_v10, 16  ;;  %v14538_v12 = vld [vmem:[#allocation19_spill] sm:$0xff]  ;;  %v6643_v5 = vrot.slane %v6641_v6, 5  ;;  %v13936_v41 = vpop.f32.mrf.mxu0 }
 0x44c   : > { %v13917_v4 = vadd.f32 %v8561_v32, %v8473_v15  ;;  %v6161_v15 = vshll.u32 %v5779_v10, 16  ;;  %v6169_v32 = vrot.slane %v6167_v51, 5  ;;  %v8476_v31 = vadd.f32 %v14538_v12, %v13485_v42 }
 0x44d   : > { %8840 = vmatmul.bf16.gmra.mxu0 %v7501_v26  ;;  %v6639_v25 = vrot.slane %v6638_v19, 4  ;;  %v6160_v37 = vrot.slane %v6158_v7, 4  ;;  %v6629_v42 = vrot.slane %v6628_v57, 4 }
 0x44e   : > { %v8428_v1 = vpop.f32.mrf.mxu3  ;;  %v6163_v51 = vrot.slane %v6161_v15, 5 }
 0x44f   : > { %v13923_v23 = vadd.f32 %v8428_v1, %v8340_v63  ;;  %v6173_v63 = vrot.slane %v6171_v14, 4  ;;  %v7281_v1 = vunpack.c.l.b16 %v6146_v2  ;;  %v6644_v19 = vsel %vm10806_vm5, %v6639_v25, %v6643_v5  ;;  %v10334_v5 = vld [vmem:[#allocation2 + $0x78] sm:$0xff] }
 0x450   : > { %v6177_v2 = vshll.u32 %v13934_v60, 16 }
 0x451   : > { %14537 = vst [vmem:[#allocation20_spill] sm:$0xff] %v13923_v23  ;;  %v8344_v20 = vpop.f32.mrf.mxu2  ;;  %v7299_v36 = vpack.c.b16 %v7282_v22, %v7281_v1  ;;  %v6174_v14 = vor.u32 %v6173_v63, %v6169_v32  ;;  %v6164_v22 = vor.u32 %v6163_v51, %v6160_v37  ;;  %v13961_v37 = vld [vmem:[#allocation2 + $0x98] sm:$0x1] }
 0x452   : > { %v8345_v23 = vadd.f32 %v8344_v20, %v8256_v44  ;;  %v6634_v44 = vsel %vm10806_vm5, %v6629_v42, %v6633_v35  ;;  %v7480_v20 = vunpack.c.l.b16 %v6644_v19 }
 0x453   : > { %8746 = vmatmul.bf16.gmra.mxu3 %v10333_v62  ;;  %v8564_v26 = vpop.f32.mrf.mxu1  ;;  %v6175_v6 = vrot.slane %v6174_v14, 4  ;;  %v7479_v57 = vunpack.c.l.b16 %v6634_v44 }
 0x454   : > { %v13932_v59 = vadd.f32 %v8564_v26, %v8476_v31  ;;  %v6165_v31 = vrot.slane %v6164_v22, 4  ;;  %v6377_v26 = vld [vmem:[#allocation2 + $0x90] sm:$0xf] }
 0x455   : > { %8662 = vmatmul.bf16.gmra.mxu2 %v13596_v0  ;;  %v6179_v0 = vrot.slane %v6177_v2, 5  ;;  %v7502_v35 = vpack.c.b16 %v7480_v20, %v7479_v57  ;;  %v6649_v51 = vshll.u32 %v6377_v26, 16  ;;  %v14540_v2 = vld [vmem:[#allocation24_spill] sm:$0xff] }
 0x456   : > { %v8431_v13 = vpop.f32.mrf.mxu3  ;;  %8603 = vmatmul.bf16.gmra.mxu1 %v7299_v36  ;;  %v13955_v36 = vpop.f32.mrf.mxu0  ;;  %v8481_v44 = vadd.f32 %v14540_v2, %v13547_v18  ;;  %v14543_v2 = vld [vmem:[#allocation25_spill] sm:$0xff] }
 0x457   : > { %v13938_v10 = vadd.f32 %v8431_v13, %v8343_v30  ;;  %v8478_v30 = vadd.f32 %v13467_v28, %v13518_v34  ;;  %v6180_v1 = vsel %vm10806_vm5, %v6175_v6, %v6179_v0  ;;  %v6170_v28 = vsel %vm10806_vm5, %v6165_v31, %v6169_v32  ;;  %v13959_v34 = vld [vmem:[#allocation2 + $0x94] sm:$0xf] }
 0x458   : > { %v7284_v13 = vunpack.c.l.b16 %v6180_v1  ;;  %v6655_v14 = vshll.u32 %v13959_v34, 16  ;;  %v7283_v32 = vunpack.c.l.b16 %v6170_v28  ;;  %v6651_v22 = vrot.slane %v6649_v51, 5 }
 0x459   : > { %v8623_v62 = vpop.f32.mrf.mxu2 }
 0x45a   : > { %v8624_v7 = vadd.f32 %v8623_v62, %v13656_v55  ;;  %v6646_v55 = vshrl.u32 %v6377_v26, 16  ;;  %v6657_v20 = vrot.slane %v6655_v14, 5  ;;  %v7300_v57 = vpack.c.b16 %v7284_v13, %v7283_v32  ;;  %v10513_v32 = vld [vmem:[#allocation2 + $0x20] sm:$0x1] }
 0x45b   : > { %v8566_v15 = vpop.f32.mrf.mxu1  ;;  %v6317_v26 = vrot.slane %v13676_v46, 5 }
 0x45c   : > { %v13949_v63 = vadd.f32 %v8566_v15, %v8478_v30  ;;  %v6648_v19 = vrot.slane %v6646_v55, 4  ;;  %v6665_v15 = vshll.u32 %v13961_v37, 16 }
 0x45d   : > { %8845 = vmatmul.bf16.gmra.mxu0 %v7502_v35 }
 0x45e   : > { %v8433_v12 = vpop.f32.mrf.mxu3  ;;  %v6652_v1 = vor.u32 %v6651_v22, %v6648_v19  ;;  %v13977_v13 = vpop.f32.mrf.mxu0  ;;  %v6319_v19 = vrot.slane %v6317_v26, 4  ;;  %v6858_v22 = vrot.slane %v10513_v32, 5 }
 0x45f   : > { %v13953_v25 = vadd.f32 %v8433_v12, %v8345_v23  ;;  %v6659_v23 = vshrl.u32 %v13959_v34, 16  ;;  %v10512_v12 = vld [vmem:[#allocation2 + $0x1c] sm:$0xf] }
 0x460   : > { %v6855_v31 = vrot.slane %v10512_v12, 5 }
 0x461   : > { %14539 = vst [vmem:[#allocation22_spill] sm:$0xff] %v13953_v25  ;;  %v8625_v42 = vpop.f32.mrf.mxu2  ;;  %v6661_v30 = vrot.slane %v6659_v23, 4  ;;  %v6799_v25 = vld [vmem:[#allocation2 + $0x90] sm:$0xe] }
 0x462   : > { %v8626_v62 = vadd.f32 %v8625_v42, %v13682_v40  ;;  %v6653_v40 = vrot.slane %v6652_v1, 4  ;;  %v6857_v51 = vrot.slane %v6855_v31, 4  ;;  %v6789_v42 = vld [vmem:[#allocation2 + $0x18] sm:$0xe] }
 0x463   : > { %8751 = vmatmul.bf16.gmra.mxu3 %v10334_v5  ;;  %v8569_v6 = vpop.f32.mrf.mxu1  ;;  %v6662_v55 = vor.u32 %v6661_v30, %v6657_v20  ;;  %v6667_v5 = vrot.slane %v6665_v15, 5  ;;  %v9675_v1 = vrot.slane %v6789_v42, 9  ;;  %v13997_v42 = vld [vmem:[#allocation2 + $0xa0] sm:$0xf] }
 0x464   : > { %v13969_v0 = vadd.f32 %v8569_v6, %v8481_v44  ;;  %v6658_v14 = vsel %vm10806_vm5, %v6653_v40, %v6657_v20  ;;  %v6191_v6 = vld [vmem:[#allocation2 + $0x84] sm:$0xe]  ;;  %v6320_v20 = vrot.slane %v13704_v8, 5  ;;  %v6683_v32 = vshrl.u32 %v13997_v42, 16 }
 0x465   : > { %8667 = vmatmul.bf16.gmra.mxu2 %v13641_v48  ;;  %v6663_v28 = vrot.slane %v6662_v55, 4  ;;  %v9669_v40 = vrot.slane %v6191_v6, 9  ;;  %v10514_v6 = vld [vmem:[#allocation2 + $0x28] sm:$0xf] }
 0x466   : > { %v8712_v35 = vpop.f32.mrf.mxu3  ;;  %8608 = vmatmul.bf16.gmra.mxu1 %v7300_v57  ;;  %v7481_v57 = vunpack.c.l.b16 %v6658_v14 }
 0x467   : > { %v13972_v18 = vadd.f32 %v8712_v35, %v8624_v7  ;;  %v6668_v46 = vsel %vm10806_vm5, %v6663_v28, %v6667_v5  ;;  %v14542_v7 = vld [vmem:[#allocation27_spill] sm:$0xff]  ;;  %v6859_v35 = vsel %vm11251_vm13, %v6857_v51, %v6858_v22  ;;  %v6321_v28 = vsel %vm11251_vm13, %v6319_v19, %v6320_v20  ;;  %v14546_v20 = vld [vmem:[#allocation26_spill] sm:$0xff] }
 0x468   : > { %v8483_v44 = vadd.f32 %v14543_v2, %v14542_v7  ;;  %v7482_v30 = vunpack.c.l.b16 %v6668_v46  ;;  %v6379_v46 = vld [vmem:[#allocation2 + $0x9c] sm:$0xf]  ;;  %v7526_v8 = vunpack.c.l.b16 %v6859_v35  ;;  %v6318_v14 = vsel %vm11251_vm13, %v9669_v40, %v6317_v26  ;;  %v10335_v7 = vld [vmem:[#allocation2 + $0x84] sm:$0xff]  ;;  %v14006_v40 = vpop.f32.mrf.mxu0 }
 0x469   : > { %14541 = vst [vmem:[#allocation14_spill] sm:$0xff] %v13972_v18  ;;  %v8628_v23 = vpop.f32.mrf.mxu2  ;;  %v6670_v51 = vshrl.u32 %v6379_v46, 16  ;;  %v7338_v2 = vunpack.c.l.b16 %v6321_v28  ;;  %v6673_v19 = vshll.u32 %v6379_v46, 16  ;;  %v14545_v26 = vld [vmem:[#allocation28_spill] sm:$0xff]  ;;  %v7337_v35 = vunpack.c.l.b16 %v6318_v14 }
 0x46a   : > { %v8629_v48 = vadd.f32 %v8628_v23, %v13702_v54  ;;  %v7503_v54 = vpack.c.b16 %v7482_v30, %v7481_v57  ;;  %v6856_v23 = vsel %vm11251_vm13, %v9675_v1, %v6855_v31  ;;  %v6862_v30 = vrot.slane %v10514_v6, 5 }
 0x46b   : > { %v8571_v15 = vpop.f32.mrf.mxu1  ;;  %v7525_v22 = vunpack.c.l.b16 %v6856_v23  ;;  %v8486_v57 = vadd.f32 %v14546_v20, %v14545_v26  ;;  %v7359_v6 = vpack.c.b16 %v7338_v2, %v7337_v35  ;;  %v6928_v35 = vrot.slane %v13961_v37, 5 }
 0x46c   : > { %v13985_v12 = vadd.f32 %v8571_v15, %v8483_v44  ;;  %v13999_v44 = vld [vmem:[#allocation2 + $0xa4] sm:$0x1]  ;;  %v6672_v15 = vrot.slane %v6670_v51, 4  ;;  %v6324_v51 = vrot.slane %v13723_v24, 5 }
 0x46d   : > { %8850 = vmatmul.bf16.gmra.mxu0 %v7503_v54  ;;  %v7557_v54 = vpack.c.b16 %v7526_v8, %v7525_v22  ;;  %v6689_v23 = vshll.u32 %v13999_v44, 16  ;;  %v6790_v22 = vld [vmem:[#allocation2 + $0x24] sm:$0xe] }
 0x46e   : > { %v8714_v55 = vpop.f32.mrf.mxu3 }
 0x46f   : > { %v13991_v5 = vadd.f32 %v8714_v55, %v8626_v62  ;;  %v6679_v62 = vshll.u32 %v13997_v42, 16  ;;  %v6675_v55 = vrot.slane %v6673_v19, 5  ;;  %v6691_v8 = vrot.slane %v6689_v23, 5 }
 0x471   : > { %14544 = vst [vmem:[#allocation23_spill] sm:$0xff] %v13991_v5  ;;  %v8630_v31 = vpop.f32.mrf.mxu2  ;;  %v6681_v46 = vrot.slane %v6679_v62, 5  ;;  %v6685_v5 = vrot.slane %v6683_v32, 4  ;;  %v9685_v62 = vrot.slane %v6799_v25, 9  ;;  %v6925_v32 = vrot.slane %v13959_v34, 5  ;;  %v14549_v25 = vld [vmem:[#allocation29_spill] sm:$0xff] }
 0x472   : > { %v8631_v1 = vadd.f32 %v8630_v31, %v13727_v33  ;;  %v6864_v31 = vrot.slane %v6862_v30, 4 }
 0x473   : > { %8756 = vmatmul.bf16.gmra.mxu3 %v10335_v7  ;;  %v8574_v28 = vpop.f32.mrf.mxu1  ;;  %v6676_v7 = vor.u32 %v6675_v55, %v6672_v15  ;;  %v6686_v20 = vor.u32 %v6685_v5, %v6681_v46  ;;  %v6927_v15 = vrot.slane %v6925_v32, 4  ;;  %v14548_v55 = vld [vmem:[#allocation30_spill] sm:$0xff] }
 0x474   : > { %v14009_v18 = vadd.f32 %v8574_v28, %v8486_v57  ;;  %v6326_v57 = vrot.slane %v6324_v51, 4  ;;  %v8488_v28 = vadd.f32 %v14549_v25, %v14548_v55 }
 0x475   : > { %8672 = vmatmul.bf16.gmra.mxu2 %v7359_v6  ;;  %v6677_v14 = vrot.slane %v6676_v7, 4  ;;  %v6687_v19 = vrot.slane %v6686_v20, 4  ;;  %v6192_v6 = vld [vmem:[#allocation2 + $0x90] sm:$0xe]  ;;  %v6327_v20 = vrot.slane %v13751_v50, 5 }
 0x476   : > { %v8717_v26 = vpop.f32.mrf.mxu3  ;;  %8889 = vmatmul.bf16.vlgmr.msra.gmra.mxu1 %v7557_v54  ;;  %v10515_v54 = vld [vmem:[#allocation2 + $0x2c] sm:$0x1]  ;;  %v9670_v55 = vrot.slane %v6192_v6, 9 }
 0x477   : > { %v14012_v33 = vadd.f32 %v8717_v26, %v8629_v48  ;;  %v6682_v24 = vsel %vm10806_vm5, %v6677_v14, %v6681_v46  ;;  %v6692_v5 = vsel %vm10806_vm5, %v6687_v19, %v6691_v8  ;;  %v6926_v48 = vsel %vm11251_vm13, %v9685_v62, %v6925_v32 }
 0x478   : > { %v6865_v23 = vrot.slane %v10515_v54, 5  ;;  %v7484_v7 = vunpack.c.l.b16 %v6692_v5  ;;  %v9676_v26 = vrot.slane %v6790_v22, 9  ;;  %v7483_v14 = vunpack.c.l.b16 %v6682_v24  ;;  %v10336_v54 = vld [vmem:[#allocation2 + $0x90] sm:$0xff] }
 0x479   : > { %14547 = vst [vmem:[#allocation21_spill] sm:$0xff] %v14012_v33  ;;  %v8633_v2 = vpop.f32.mrf.mxu2  ;;  %v6929_v19 = vsel %vm11251_vm13, %v6927_v15, %v6928_v35  ;;  %v7545_v62 = vunpack.c.l.b16 %v6926_v48  ;;  %v6328_v22 = vsel %vm11251_vm13, %v6326_v57, %v6327_v20  ;;  %v6381_v15 = vld [vmem:[#allocation2 + $0xa8] sm:$0xf]  ;;  %v14044_v48 = vld [vmem:[#allocation2 + $0xac] sm:$0xf] }
 0x47a   : > { %v8634_v34 = vadd.f32 %v8633_v2, %v13749_v61  ;;  %v6866_v37 = vsel %vm11251_vm13, %v6864_v31, %v6865_v23  ;;  %v7546_v32 = vunpack.c.l.b16 %v6929_v19  ;;  %v14032_v61 = vpop.f32.mrf.mxu0  ;;  %v7504_v5 = vpack.c.b16 %v7484_v7, %v7483_v14  ;;  %v14046_v57 = vld [vmem:[#allocation2 + $0xb0] sm:$0x1] }
 0x47b   : > { %v8576_v46 = vpop.f32.mrf.mxu1  ;;  %v6863_v24 = vsel %vm11251_vm13, %v9676_v26, %v6862_v30  ;;  %v7528_v25 = vunpack.c.l.b16 %v6866_v37  ;;  %v6325_v31 = vsel %vm11251_vm13, %v9670_v55, %v6324_v51  ;;  %v7340_v23 = vunpack.c.l.b16 %v6328_v22  ;;  %v10516_v26 = vld [vmem:[#allocation2 + $0x34] sm:$0xf]  ;;  %v14552_v51 = vld [vmem:[#allocation31_spill] sm:$0xff] }
 0x47c   : > { %v14028_v8 = vadd.f32 %v8576_v46, %v8488_v28  ;;  %v14040_v35 = vpack.c.b16 %v7546_v32, %v7545_v62  ;;  %v6694_v28 = vshrl.u32 %v6381_v15, 16  ;;  %v6703_v6 = vshll.u32 %v14044_v48, 16 }
 0x47d   : > { %8855 = vmatmul.bf16.gmra.mxu0 %v7504_v5  ;;  %v6707_v30 = vshrl.u32 %v14044_v48, 16  ;;  %v7527_v7 = vunpack.c.l.b16 %v6863_v24  ;;  %v6869_v20 = vrot.slane %v10516_v26, 5  ;;  %v8491_v19 = vadd.f32 %v14552_v51, %v13661_v39 }
 0x47e   : > { %v8719_v2 = vpop.f32.mrf.mxu3  ;;  %14551 = vst [vmem:[#allocation19_spill] sm:$0xff] %v14040_v35  ;;  %v6696_v14 = vrot.slane %v6694_v28, 4  ;;  %v7339_v62 = vunpack.c.l.b16 %v6325_v31  ;;  %v6705_v22 = vrot.slane %v6703_v6, 5  ;;  %v6331_v26 = vrot.slane %v13773_v17, 5 }
 0x47f   : > { %v14036_v50 = vadd.f32 %v8719_v2, %v8631_v1  ;;  %v6697_v1 = vshll.u32 %v6381_v15, 16  ;;  %v7558_v55 = vpack.c.b16 %v7528_v25, %v7527_v7  ;;  %v6709_v5 = vrot.slane %v6707_v30, 4  ;;  %v6791_v7 = vld [vmem:[#allocation2 + $0x30] sm:$0xe] }
 0x480   : > { %v6713_v15 = vshll.u32 %v14046_v57, 16  ;;  %v7360_v24 = vpack.c.b16 %v7340_v23, %v7339_v62  ;;  %v6932_v30 = vrot.slane %v13997_v42, 5  ;;  %v6871_v23 = vrot.slane %v6869_v20, 4  ;;  %v14555_v62 = vld [vmem:[#allocation32_spill] sm:$0xff] }
 0x481   : > { %14550 = vst [vmem:[#allocation17_spill] sm:$0xff] %v14036_v50  ;;  %v8635_v46 = vpop.f32.mrf.mxu2  ;;  %v6699_v32 = vrot.slane %v6697_v1, 5  ;;  %v6710_v33 = vor.u32 %v6709_v5, %v6705_v22  ;;  %v6193_v5 = vld [vmem:[#allocation2 + $0x9c] sm:$0xe] }
 0x482   : > { %v8636_v37 = vadd.f32 %v8635_v46, %v13779_v58  ;;  %v14059_v31 = vpop.f32.mrf.mxu0  ;;  %v6715_v1 = vrot.slane %v6713_v15, 5  ;;  %v6333_v46 = vrot.slane %v6331_v26, 4  ;;  %v6934_v51 = vrot.slane %v6932_v30, 4 }
 0x483   : > { %8761 = vmatmul.bf16.gmra.mxu3 %v10336_v54  ;;  %v8579_v2 = vpop.f32.mrf.mxu1  ;;  %v6700_v28 = vor.u32 %v6699_v32, %v6696_v14  ;;  %v6800_v54 = vld [vmem:[#allocation2 + $0x9c] sm:$0xe]  ;;  %v6711_v25 = vrot.slane %v6710_v33, 4  ;;  %v6935_v33 = vrot.slane %v13999_v44, 5 }
 0x484   : > { %v14054_v35 = vadd.f32 %v8579_v2, %v8491_v19  ;;  %v9686_v6 = vrot.slane %v6800_v54, 9  ;;  %v14554_v19 = vld [vmem:[#allocation33_spill] sm:$0xff] }
 0x485   : > { %8677 = vmatmul.bf16.gmra.mxu2 %v7360_v24  ;;  %v6701_v58 = vrot.slane %v6700_v28, 4  ;;  %v8493_v32 = vadd.f32 %v14555_v62, %v14554_v19  ;;  %v10517_v2 = vld [vmem:[#allocation2 + $0x38] sm:$0x1]  ;;  %v9677_v24 = vrot.slane %v6791_v7, 9  ;;  %v6334_v28 = vrot.slane %v13806_v49, 5  ;;  %v10337_v62 = vld [vmem:[#allocation2 + $0x9c] sm:$0xff] }
 0x486   : > { %v8722_v50 = vpop.f32.mrf.mxu3  ;;  %8894 = vmatmul.bf16.gmra.mxu1 %v7558_v55  ;;  %v6872_v55 = vrot.slane %v10517_v2, 5 }
 0x487   : > { %v14057_v39 = vadd.f32 %v8722_v50, %v8634_v34  ;;  %v6706_v17 = vsel %vm10806_vm5, %v6701_v58, %v6705_v22  ;;  %v6716_v34 = vsel %vm10806_vm5, %v6711_v25, %v6715_v1  ;;  %v6933_v50 = vsel %vm11251_vm13, %v9686_v6, %v6932_v30 }
 0x488   : > { %v7486_v15 = vunpack.c.l.b16 %v6716_v34  ;;  %v7485_v54 = vunpack.c.l.b16 %v6706_v17  ;;  %v6936_v58 = vsel %vm11251_vm13, %v6934_v51, %v6935_v33  ;;  %v6873_v44 = vsel %vm11251_vm13, %v6871_v23, %v6872_v55  ;;  %v6383_v17 = vld [vmem:[#allocation2 + $0xb4] sm:$0xf] }
 0x489   : > { %14553 = vst [vmem:[#allocation24_spill] sm:$0xff] %v14057_v39  ;;  %v8638_v14 = vpop.f32.mrf.mxu2  ;;  %v7547_v1 = vunpack.c.l.b16 %v6933_v50  ;;  %v7548_v6 = vunpack.c.l.b16 %v6936_v58  ;;  %v9671_v30 = vrot.slane %v6193_v5, 9  ;;  %v6870_v49 = vsel %vm11251_vm13, %v9677_v24, %v6869_v20  ;;  %v14089_v50 = vld [vmem:[#allocation2 + $0xb8] sm:$0xf]  ;;  %v6792_v39 = vld [vmem:[#allocation2 + $0x3c] sm:$0xe] }
 0x48a   : > { %v8639_v42 = vadd.f32 %v8638_v14, %v13804_v9  ;;  %v6335_v14 = vsel %vm11251_vm13, %v6333_v46, %v6334_v28  ;;  %v7505_v34 = vpack.c.b16 %v7486_v15, %v7485_v54  ;;  %v7530_v33 = vunpack.c.l.b16 %v6873_v44  ;;  %v14091_v46 = vld [vmem:[#allocation2 + $0xbc] sm:$0x1]  ;;  %v14095_v55 = vpop.f32.mrf.mxu0  ;;  %v14558_v28 = vld [vmem:[#allocation35_spill] sm:$0xff] }
 0x48b   : > { %v8581_v22 = vpop.f32.mrf.mxu1  ;;  %v14085_v51 = vpack.c.b16 %v7548_v6, %v7547_v1  ;;  %v6332_v23 = vsel %vm11251_vm13, %v9671_v30, %v6331_v26  ;;  %v6718_v19 = vshrl.u32 %v6383_v17, 16  ;;  %v6727_v2 = vshll.u32 %v14089_v50, 16  ;;  %v14559_v54 = vld [vmem:[#allocation34_spill] sm:$0xff] }
 0x48c   : > { %v14075_v25 = vadd.f32 %v8581_v22, %v8493_v32  ;;  %v7342_v32 = vunpack.c.l.b16 %v6335_v14  ;;  %v6731_v20 = vshrl.u32 %v14089_v50, 16  ;;  %v7529_v5 = vunpack.c.l.b16 %v6870_v49  ;;  %v10518_v22 = vld [vmem:[#allocation2 + $0x40] sm:$0xf] }
 0x48d   : > { %14557 = vst [vmem:[#allocation25_spill] sm:$0xff] %v14085_v51  ;;  %8860 = vmatmul.bf16.gmra.mxu0 %v7505_v34  ;;  %v6876_v24 = vrot.slane %v10518_v22, 5  ;;  %v6720_v26 = vrot.slane %v6718_v19, 4  ;;  %v8496_v58 = vadd.f32 %v14559_v54, %v14558_v28  ;;  %v7341_v1 = vunpack.c.l.b16 %v6332_v23 }
 0x48e   : > { %v8724_v9 = vpop.f32.mrf.mxu3  ;;  %v7559_v30 = vpack.c.b16 %v7530_v33, %v7529_v5  ;;  %v6729_v14 = vrot.slane %v6727_v2, 5  ;;  %v6733_v34 = vrot.slane %v6731_v20, 4  ;;  %v6338_v22 = vrot.slane %v13825_v11, 5 }
 0x48f   : > { %v14081_v7 = vadd.f32 %v8724_v9, %v8636_v37  ;;  %v6721_v37 = vshll.u32 %v6383_v17, 16  ;;  %v6737_v17 = vshll.u32 %v14091_v46, 16  ;;  %v7361_v49 = vpack.c.b16 %v7342_v32, %v7341_v1  ;;  %v10519_v32 = vld [vmem:[#allocation2 + $0x44] sm:$0x1] }
 0x490   : > { %v6734_v28 = vor.u32 %v6733_v34, %v6729_v14  ;;  %v6939_v20 = vrot.slane %v14044_v48, 5  ;;  %v9678_v5 = vrot.slane %v6792_v39, 9  ;;  %v6340_v11 = vrot.slane %v6338_v22, 4 }
 0x491   : > { %14556 = vst [vmem:[#allocation27_spill] sm:$0xff] %v14081_v7  ;;  %v8640_v15 = vpop.f32.mrf.mxu2  ;;  %v6723_v6 = vrot.slane %v6721_v37, 5  ;;  %v6739_v37 = vrot.slane %v6737_v17, 5  ;;  %v6194_v17 = vld [vmem:[#allocation2 + $0xa8] sm:$0xe] }
 0x492   : > { %v8641_v44 = vadd.f32 %v8640_v15, %v13828_v27  ;;  %v6878_v27 = vrot.slane %v6876_v24, 4  ;;  %v6735_v23 = vrot.slane %v6734_v28, 4  ;;  %v6879_v15 = vrot.slane %v10519_v32, 5 }
 0x493   : > { %8766 = vmatmul.bf16.gmra.mxu3 %v10337_v62  ;;  %v8584_v9 = vpop.f32.mrf.mxu1  ;;  %v6724_v19 = vor.u32 %v6723_v6, %v6720_v26  ;;  %v6801_v62 = vld [vmem:[#allocation2 + $0xa8] sm:$0xe]  ;;  %v6941_v1 = vrot.slane %v6939_v20, 4  ;;  %v6942_v6 = vrot.slane %v14046_v57, 5 }
 0x494   : > { %v14101_v51 = vadd.f32 %v8584_v9, %v8496_v58  ;;  %v9687_v2 = vrot.slane %v6801_v62, 9  ;;  %v14560_v9 = vld [vmem:[#allocation36_spill] sm:$0xff]  ;;  %v6880_v34 = vsel %vm11251_vm13, %v6878_v27, %v6879_v15  ;;  %v6341_v62 = vrot.slane %v13853_v16, 5  ;;  %v6385_v16 = vld [vmem:[#allocation2 + $0xc0] sm:$0xf] }
 0x495   : > { %8682 = vmatmul.bf16.gmra.mxu2 %v7361_v49  ;;  %v6725_v33 = vrot.slane %v6724_v19, 4  ;;  %v14119_v49 = vpop.f32.mrf.mxu0  ;;  %v7532_v27 = vunpack.c.l.b16 %v6880_v34 }
 0x496   : > { %v8727_v7 = vpop.f32.mrf.mxu3  ;;  %8899 = vmatmul.bf16.gmra.mxu1 %v7559_v30  ;;  %v14561_v30 = vld [vmem:[#allocation37_spill] sm:$0xff]  ;;  %v6342_v32 = vsel %vm11251_vm13, %v6340_v11, %v6341_v62 }
 0x497   : > { %v14104_v54 = vadd.f32 %v8727_v7, %v8639_v42  ;;  %v6730_v26 = vsel %vm10806_vm5, %v6725_v33, %v6729_v14  ;;  %v6740_v42 = vsel %vm10806_vm5, %v6735_v23, %v6739_v37  ;;  %v6940_v7 = vsel %vm11251_vm13, %v9687_v2, %v6939_v20 }
 0x498   : > { %v8498_v48 = vadd.f32 %v14561_v30, %v14560_v9  ;;  %v7488_v14 = vunpack.c.l.b16 %v6740_v42  ;;  %v7487_v28 = vunpack.c.l.b16 %v6730_v26  ;;  %v6943_v33 = vsel %vm11251_vm13, %v6941_v1, %v6942_v6  ;;  %v14138_v9 = vld [vmem:[#allocation2 + $0xc8] sm:$0x1] }
 0x499   : > { %v8643_v58 = vpop.f32.mrf.mxu2  ;;  %v6877_v23 = vsel %vm11251_vm13, %v9678_v5, %v6876_v24  ;;  %v7550_v37 = vunpack.c.l.b16 %v6943_v33  ;;  %v9672_v20 = vrot.slane %v6194_v17, 9  ;;  %v14136_v24 = vld [vmem:[#allocation2 + $0xc4] sm:$0xf]  ;;  %v6742_v5 = vshrl.u32 %v6385_v16, 16 }
 0x49a   : > { %v8644_v39 = vadd.f32 %v8643_v58, %v13851_v38  ;;  %v7549_v38 = vunpack.c.l.b16 %v6940_v7  ;;  %v7506_v15 = vpack.c.b16 %v7488_v14, %v7487_v28  ;;  %v7531_v42 = vunpack.c.l.b16 %v6877_v23  ;;  %v10338_v7 = vld [vmem:[#allocation2 + $0xa8] sm:$0xff] }
 0x49b   : > { %v8586_v19 = vpop.f32.mrf.mxu1  ;;  %v6339_v1 = vsel %vm11251_vm13, %v9672_v20, %v6338_v22  ;;  %v7344_v6 = vunpack.c.l.b16 %v6342_v32  ;;  %v6745_v30 = vshll.u32 %v6385_v16, 16  ;;  %v6751_v11 = vshll.u32 %v14136_v24, 16  ;;  %v14563_v14 = vld [vmem:[#allocation15_spill] sm:$0xff] }
 0x49c   : > { %v14124_v57 = vadd.f32 %v8586_v19, %v8498_v48  ;;  %v14132_v26 = vpack.c.b16 %v7550_v37, %v7549_v38  ;;  %v7560_v48 = vpack.c.b16 %v7532_v27, %v7531_v42  ;;  %v6744_v17 = vrot.slane %v6742_v5, 4  ;;  %v14564_v19 = vld [vmem:[#allocation10_spill] sm:$0xff]  ;;  %v10520_v38 = vld [vmem:[#allocation2 + $0x4c] sm:$0xf]  ;;  %v6802_v5 = vld [vmem:[#allocation2 + $0xb4] sm:$0xe] }
 0x49d   : > { %8865 = vmatmul.bf16.gmra.mxu0 %v7506_v15  ;;  %v8501_v22 = vadd.f32 %v14564_v19, %v14563_v14  ;;  %v7343_v28 = vunpack.c.l.b16 %v6339_v1  ;;  %v6747_v33 = vrot.slane %v6745_v30, 5  ;;  %v6883_v37 = vrot.slane %v10520_v38, 5  ;;  %v14566_v38 = vld [vmem:[#allocation7_spill] sm:$0xff] }
 0x49e   : > { %14562 = vst [vmem:[#allocation28_spill] sm:$0xff] %v14124_v57  ;;  %v8729_v2 = vpop.f32.mrf.mxu3  ;;  %v6761_v32 = vshll.u32 %v14138_v9, 16  ;;  %v6345_v16 = vrot.slane %v13873_v21, 5  ;;  %v6946_v19 = vrot.slane %v14089_v50, 5 }
 0x49f   : > { %v14130_v58 = vadd.f32 %v8729_v2, %v8641_v44  ;;  %v6755_v44 = vshrl.u32 %v14136_v24, 16  ;;  %v6753_v2 = vrot.slane %v6751_v11, 5  ;;  %v7362_v27 = vpack.c.b16 %v7344_v6, %v7343_v28  ;;  %v6793_v28 = vld [vmem:[#allocation2 + $0x48] sm:$0xe] }
 0x4a0   : > { %v6748_v42 = vor.u32 %v6747_v33, %v6744_v17  ;;  %v6347_v6 = vrot.slane %v6345_v16, 4 }
 0x4a1   : > { %v8645_v34 = vpop.f32.mrf.mxu2  ;;  %v6757_v20 = vrot.slane %v6755_v44, 4  ;;  %v6763_v44 = vrot.slane %v6761_v32, 5 }
 0x4a2   : > { %v8646_v62 = vadd.f32 %v8645_v34, %v13875_v53  ;;  %v6749_v30 = vrot.slane %v6748_v42, 4  ;;  %v9688_v34 = vrot.slane %v6802_v5, 9 }
 0x4a3   : > { %8771 = vmatmul.bf16.gmra.mxu3 %v10338_v7  ;;  %v8589_v23 = vpop.f32.mrf.mxu1  ;;  %v14149_v7 = vpop.f32.mrf.mxu0  ;;  %v6758_v53 = vor.u32 %v6757_v20, %v6753_v2  ;;  %v14567_v20 = vld [vmem:[#allocation18_spill] sm:$0xff] }
 0x4a4   : > { %v14146_v15 = vadd.f32 %v8589_v23, %v8501_v22  ;;  %v6885_v22 = vrot.slane %v6883_v37, 4  ;;  %v6754_v21 = vsel %vm10806_vm5, %v6749_v30, %v6753_v2  ;;  %v6949_v23 = vrot.slane %v14091_v46, 5  ;;  %v10521_v2 = vld [vmem:[#allocation2 + $0x50] sm:$0x1] }
 0x4a5   : > { %8687 = vmatmul.bf16.gmra.mxu2 %v7362_v27  ;;  %v6759_v11 = vrot.slane %v6758_v53, 4  ;;  %v8503_v32 = vadd.f32 %v14567_v20, %v14566_v38  ;;  %v6195_v27 = vld [vmem:[#allocation2 + $0xb4] sm:$0xe]  ;;  %v6348_v53 = vrot.slane %v13897_v47, 5  ;;  %v7489_v30 = vunpack.c.l.b16 %v6754_v21 }
 0x4a6   : > { %14565 = vst [vmem:[#allocation26_spill] sm:$0xff] %v14146_v15  ;;  %v8732_v14 = vpop.f32.mrf.mxu3  ;;  %8904 = vmatmul.bf16.gmra.mxu1 %v7560_v48  ;;  %v6948_v48 = vrot.slane %v6946_v19, 4 }
 0x4a7   : > { %v14151_v1 = vadd.f32 %v8732_v14, %v8644_v39  ;;  %v6764_v33 = vsel %vm10806_vm5, %v6759_v11, %v6763_v44  ;;  %v6947_v39 = vsel %vm11251_vm13, %v9688_v34, %v6946_v19  ;;  %v6886_v14 = vrot.slane %v10521_v2, 5 }
 0x4a8   : > { %v7490_v42 = vunpack.c.l.b16 %v6764_v33  ;;  %v6950_v11 = vsel %vm11251_vm13, %v6948_v48, %v6949_v23  ;;  %v9679_v34 = vrot.slane %v6793_v28, 9  ;;  %v7551_v46 = vunpack.c.l.b16 %v6947_v39  ;;  %v10339_v48 = vld [vmem:[#allocation2 + $0xb4] sm:$0xff] }
 0x4a9   : > { %v8648_v17 = vpop.f32.mrf.mxu2  ;;  %v7552_v19 = vunpack.c.l.b16 %v6950_v11  ;;  %v6349_v33 = vsel %vm11251_vm13, %v6347_v6, %v6348_v53  ;;  %v14570_v6 = vld [vmem:[#allocation6_spill] sm:$0xff] }
 0x4aa   : > { %v8649_v50 = vadd.f32 %v8648_v17, %v13895_v52  ;;  %v6887_v52 = vsel %vm11251_vm13, %v6885_v22, %v6886_v14  ;;  %v9673_v17 = vrot.slane %v6195_v27, 9  ;;  %v7507_v38 = vpack.c.b16 %v7490_v42, %v7489_v30  ;;  %v14183_v27 = vld [vmem:[#allocation2 + $0x58] sm:$0xf]  ;;  %v6794_v14 = vld [vmem:[#allocation2 + $0x54] sm:$0xe] }
 0x4ab   : > { %v8591_v5 = vpop.f32.mrf.mxu1  ;;  %v14175_v47 = vpack.c.b16 %v7552_v19, %v7551_v46  ;;  %v14177_v21 = vpop.f32.mrf.mxu0  ;;  %v6884_v28 = vsel %vm11251_vm13, %v9679_v34, %v6883_v37  ;;  %v7534_v22 = vunpack.c.l.b16 %v6887_v52  ;;  %v7346_v23 = vunpack.c.l.b16 %v6349_v33 }
 0x4ac   : > { %v14167_v44 = vadd.f32 %v8591_v5, %v8503_v32  ;;  %v6346_v39 = vsel %vm11251_vm13, %v9673_v17, %v6345_v16  ;;  %v7533_v5 = vunpack.c.l.b16 %v6884_v28  ;;  %v6352_v34 = vrot.slane %v13913_v29, 5  ;;  %v10523_v17 = vld [vmem:[#allocation2 + $0x5c] sm:$0x1] }
 0x4ad   : > { %8870 = vmatmul.bf16.gmra.mxu0 %v7507_v38  ;;  %v7345_v37 = vunpack.c.l.b16 %v6346_v39  ;;  %v9680_v19 = vrot.slane %v6794_v14, 9  ;;  %v6893_v33 = vrot.slane %v10523_v17, 5  ;;  %v6355_v38 = vrot.slane %v13934_v60, 5 }
 0x4ae   : > { %14568 = vst [vmem:[#allocation30_spill] sm:$0xff] %v14167_v44  ;;  %v8734_v15 = vpop.f32.mrf.mxu3  ;;  %v7561_v30 = vpack.c.b16 %v7534_v22, %v7533_v5  ;;  %v14197_v22 = vld [vmem:[#allocation2 + $0xd0] sm:$0xf]  ;;  %v6354_v60 = vrot.slane %v6352_v34, 4  ;;  %v6953_v5 = vrot.slane %v14136_v24, 5 }
 0x4af   : > { %v14173_v20 = vadd.f32 %v8734_v15, %v8646_v62  ;;  %v6890_v62 = vrot.slane %v14183_v27, 5  ;;  %v14569_v15 = vld [vmem:[#allocation11_spill] sm:$0xff]  ;;  %v7363_v11 = vpack.c.b16 %v7346_v23, %v7345_v37  ;;  %14573 = vst [vmem:[#allocation31_spill] sm:$0xff] %v14197_v22  ;;  %v14199_v23 = vld [vmem:[#allocation2 + $0xd4] sm:$0x1] }
 0x4b0   : > { %v8506_v42 = vadd.f32 %v14570_v6, %v14569_v15  ;;  %14574 = vst [vmem:[#allocation33_spill] sm:$0xff] %v14199_v23  ;;  %v6775_v15 = vshll.u32 %v14197_v22, 16  ;;  %v6779_v6 = vshrl.u32 %v14197_v22, 16 }
 0x4b1   : > { %v8650_v32 = vpop.f32.mrf.mxu2  ;;  %v6892_v52 = vrot.slane %v6890_v62, 4 }
 0x4b2   : > { %v8651_v2 = vadd.f32 %v8650_v32, %v13917_v4  ;;  %v14572_v4 = vld [vmem:[#allocation13_spill] sm:$0xff]  ;;  %v6387_v32 = vld [vmem:[#allocation2 + $0xcc] sm:$0xf] }
 0x4b3   : > { %8776 = vmatmul.bf16.gmra.mxu3 %v10339_v48  ;;  %v8594_v53 = vpop.f32.mrf.mxu1  ;;  %v6803_v48 = vld [vmem:[#allocation2 + $0xc0] sm:$0xe]  ;;  %v8508_v39 = vadd.f32 %v13866_v43, %v14572_v4  ;;  %v6766_v29 = vshrl.u32 %v6387_v32, 16  ;;  %v6769_v27 = vshll.u32 %v6387_v32, 16  ;;  %v6955_v32 = vrot.slane %v6953_v5, 4 }
 0x4b4   : > { %v14189_v16 = vadd.f32 %v8594_v53, %v8506_v42  ;;  %v9689_v42 = vrot.slane %v6803_v48, 9  ;;  %v6196_v43 = vld [vmem:[#allocation2 + $0xc0] sm:$0xe]  ;;  %v6894_v24 = vsel %vm11251_vm13, %v6892_v52, %v6893_v33  ;;  %v6891_v52 = vsel %vm11251_vm13, %v9680_v19, %v6890_v62  ;;  %v14575_v62 = vld [vmem:[#allocation9_spill] sm:$0xff]  ;;  %v14576_v19 = vld [vmem:[#allocation8_spill] sm:$0xff] }
 0x4b5   : > { %8692 = vmatmul.bf16.gmra.mxu2 %v7363_v11  ;;  %v6768_v14 = vrot.slane %v6766_v29, 4  ;;  %v6771_v53 = vrot.slane %v6769_v27, 5  ;;  %v6781_v11 = vrot.slane %v6779_v6, 4  ;;  %v6356_v6 = vsel %vm11251_vm13, %v6354_v60, %v6355_v38 }
 0x4b6   : > { %14571 = vst [vmem:[#allocation29_spill] sm:$0xff] %v14189_v16  ;;  %v8737_v46 = vpop.f32.mrf.mxu3  ;;  %8909 = vmatmul.bf16.gmra.mxu1 %v7561_v30  ;;  %v6777_v30 = vrot.slane %v6775_v15, 5  ;;  %v6954_v4 = vsel %vm11251_vm13, %v9689_v42, %v6953_v5  ;;  %v6956_v16 = vrot.slane %v14138_v9, 5  ;;  %v9674_v15 = vrot.slane %v6196_v43, 9 }
 0x4b7   : > { %v14193_v28 = vadd.f32 %v8737_v46, %v8649_v50  ;;  %v6785_v50 = vshll.u32 %v14199_v23, 16  ;;  %v14205_v46 = vpop.f32.mrf.mxu0  ;;  %v6772_v48 = vor.u32 %v6771_v53, %v6768_v14  ;;  %v7553_v9 = vunpack.c.l.b16 %v6954_v4 }
 0x4b8   : > { %v6782_v57 = vor.u32 %v6781_v11, %v6777_v30  ;;  %v7348_v60 = vunpack.c.l.b16 %v6356_v6  ;;  %v7535_v43 = vunpack.c.l.b16 %v6891_v52  ;;  %v8511_v53 = vadd.f32 %v14576_v19, %v14575_v62 }
 0x4b9   : > { %v8653_v37 = vpop.f32.mrf.mxu2  ;;  %v6787_v29 = vrot.slane %v6785_v50, 5  ;;  %v6773_v5 = vrot.slane %v6772_v48, 4 }
 0x4ba   : > { %v8654_v17 = vadd.f32 %v8653_v37, %v13932_v59  ;;  %v6957_v59 = vsel %vm11251_vm13, %v6955_v32, %v6956_v16  ;;  %v6783_v37 = vrot.slane %v6782_v57, 4  ;;  %v7536_v57 = vunpack.c.l.b16 %v6894_v24 }
 0x4bb   : > { %v8596_v44 = vpop.f32.mrf.mxu1  ;;  %v7554_v23 = vunpack.c.l.b16 %v6957_v59  ;;  %v6778_v33 = vsel %vm10806_vm5, %v6773_v5, %v6777_v30 }
 0x4bc   : > { %v14213_v27 = vadd.f32 %v8596_v44, %v8508_v39  ;;  %v6353_v44 = vsel %vm11251_vm13, %v9674_v15, %v6352_v34  ;;  %v6788_v38 = vsel %vm10806_vm5, %v6783_v37, %v6787_v29  ;;  %v10340_v39 = vld [vmem:[#allocation2 + $0xc0] sm:$0xff]  ;;  %v7491_v50 = vunpack.c.l.b16 %v6778_v33 }
 0x4bd   : > { %v14229_v16 = vpack.c.b16 %v7554_v23, %v7553_v9  ;;  %v7347_v11 = vunpack.c.l.b16 %v6353_v44  ;;  %v7562_v32 = vpack.c.b16 %v7536_v57, %v7535_v43  ;;  %v10524_v29 = vld [vmem:[#allocation2 + $0x64] sm:$0xf]  ;;  %v6795_v9 = vld [vmem:[#allocation2 + $0x60] sm:$0xe]  ;;  %v10525_v44 = vld [vmem:[#allocation2 + $0x68] sm:$0x1] }
 0x4be   : > { %v8739_v42 = vpop.f32.mrf.mxu3  ;;  %v6897_v15 = vrot.slane %v10524_v29, 5  ;;  %v6900_v33 = vrot.slane %v10525_v44, 5  ;;  %v9681_v57 = vrot.slane %v6795_v9, 9 }
 0x4bf   : > { %v14219_v22 = vadd.f32 %v8739_v42, %v8651_v2  ;;  %v7492_v2 = vunpack.c.l.b16 %v6788_v38  ;;  %v14234_v45 = vpop.f32.mrf.mxu0  ;;  %v7364_v24 = vpack.c.b16 %v7348_v60, %v7347_v11 }
 0x4c0   : > { %v6899_v42 = vrot.slane %v6897_v15, 4 }
 0x4c1   : > { %v8655_v14 = vpop.f32.mrf.mxu2  ;;  %v7508_v30 = vpack.c.b16 %v7492_v2, %v7491_v50  ;;  %v10341_v50 = vld [vmem:[#allocation2 + $0xcc] sm:$0xff]  ;;  %v6898_v2 = vsel %vm11251_vm13, %v9681_v57, %v6897_v15 }
 0x4c2   : > { %v8656_v34 = vadd.f32 %v8655_v14, %v13949_v63  ;;  %v14577_v63 = vld [vmem:[#allocation12_spill] sm:$0xff]  ;;  %v7537_v62 = vunpack.c.l.b16 %v6898_v2 }
 0x4c3   : > { %8781 = vmatmul.bf16.gmra.mxu3 %v10340_v39  ;;  %v8599_v4 = vpop.f32.mrf.mxu1  ;;  %8875 = vmatmul.bf16.gmra.mxu0 %v7508_v30  ;;  %v8513_v5 = vadd.f32 %v13915_v56, %v14577_v63  ;;  %v14579_v15 = vld [vmem:[#allocation20_spill] sm:$0xff] }
 0x4c4   : > { %v14236_v23 = vadd.f32 %v8599_v4, %v8511_v53 }
 0x4c5   : > { %8697 = vmatmul.bf16.gmra.mxu2 %v7364_v24 }
 0x4c6   : > { %v8742_v48 = vpop.f32.mrf.mxu3  ;;  %8914 = vmatmul.bf16.gmra.mxu1 %v7562_v32 }
 0x4c7   : > { %v14238_v6 = vadd.f32 %v8742_v48, %v8654_v17  ;;  %v6901_v17 = vsel %vm11251_vm13, %v6899_v42, %v6900_v33  ;;  %v6796_v42 = vld [vmem:[#allocation2 + $0x6c] sm:$0xe] }
 0x4c8   : > { %v7538_v56 = vunpack.c.l.b16 %v6901_v17  ;;  %v9682_v44 = vrot.slane %v6796_v42, 9 }
 0x4c9   : > { %v8658_v59 = vpop.f32.mrf.mxu2 }
 0x4ca   : > { %v8659_v37 = vadd.f32 %v8658_v59, %v13969_v0  ;;  %v14578_v0 = vld [vmem:[#allocation16_spill] sm:$0xff]  ;;  %v7563_v30 = vpack.c.b16 %v7538_v56, %v7537_v62  ;;  %v8518_v59 = vadd.f32 %v13955_v36, %v14579_v15 }
 0x4cb   : > { %v8601_v52 = vpop.f32.mrf.mxu1  ;;  %v8516_v14 = vadd.f32 %v13936_v41, %v14578_v0 }
 0x4cc   : > { %v14243_v38 = vadd.f32 %v8601_v52, %v8513_v5 }
 0x4ce   : > { %v8744_v39 = vpop.f32.mrf.mxu3 }
 0x4cf   : > { %v14247_v60 = vadd.f32 %v8744_v39, %v8656_v34  ;;  %v10526_v34 = vld [vmem:[#allocation2 + $0x70] sm:$0xf] }
 0x4d0   : > { %v6904_v32 = vrot.slane %v10526_v34, 5 }
 0x4d1   : > { %v8660_v43 = vpop.f32.mrf.mxu2 }
 0x4d2   : > { %v8661_v19 = vadd.f32 %v8660_v43, %v13985_v12  ;;  %v6906_v29 = vrot.slane %v6904_v32, 4  ;;  %v10527_v12 = vld [vmem:[#allocation2 + $0x74] sm:$0x1]  ;;  %v6905_v39 = vsel %vm11251_vm13, %v9682_v44, %v6904_v32 }
 0x4d3   : > { %8786 = vmatmul.bf16.gmra.mxu3 %v10341_v50  ;;  %v8604_v53 = vpop.f32.mrf.mxu1  ;;  %v6907_v5 = vrot.slane %v10527_v12, 5  ;;  %v7539_v17 = vunpack.c.l.b16 %v6905_v39 }
 0x4d4   : > { %v14254_v11 = vadd.f32 %v8604_v53, %v8516_v14  ;;  %v10528_v14 = vld [vmem:[#allocation2 + $0x7c] sm:$0xf] }
 0x4d5   : > { %v6911_v62 = vrot.slane %v10528_v14, 5  ;;  %v14582_v14 = vld [vmem:[#allocation23_spill] sm:$0xff] }
 0x4d6   : > { %v8747_v4 = vpop.f32.mrf.mxu3  ;;  %8919 = vmatmul.bf16.gmra.mxu1 %v7563_v30 }
 0x4d7   : > { %v14256_v24 = vadd.f32 %v8747_v4, %v8659_v37  ;;  %v6908_v37 = vsel %vm11251_vm13, %v6906_v29, %v6907_v5  ;;  %v6913_v30 = vrot.slane %v6911_v62, 4  ;;  %v14580_v4 = vld [vmem:[#allocation22_spill] sm:$0xff] }
 0x4d8   : > { %v7540_v57 = vunpack.c.l.b16 %v6908_v37  ;;  %v8523_v34 = vadd.f32 %v14006_v40, %v14580_v4  ;;  %v14581_v5 = vld [vmem:[#allocation14_spill] sm:$0xff] }
 0x4d9   : > { %v8663_v48 = vpop.f32.mrf.mxu2 }
 0x4da   : > { %v8664_v41 = vadd.f32 %v8663_v48, %v14009_v18  ;;  %v8521_v18 = vadd.f32 %v13977_v13, %v13938_v10  ;;  %v7564_v43 = vpack.c.b16 %v7540_v57, %v7539_v17  ;;  %v6797_v13 = vld [vmem:[#allocation2 + $0x78] sm:$0xe] }
 0x4db   : > { %v8606_v63 = vpop.f32.mrf.mxu1 }
 0x4dc   : > { %v14261_v9 = vadd.f32 %v8606_v63, %v8518_v59  ;;  %v9683_v59 = vrot.slane %v6797_v13, 9 }
 0x4de   : > { %v8749_v52 = vpop.f32.mrf.mxu3  ;;  %v6912_v63 = vsel %vm11251_vm13, %v9683_v59, %v6911_v62  ;;  %v8804_v62 = vadd.f32 %v14059_v31, %v14582_v14 }
 0x4df   : > { %v14265_v33 = vadd.f32 %v8749_v52, %v8661_v19  ;;  %v7541_v52 = vunpack.c.l.b16 %v6912_v63  ;;  %v14583_v63 = vld [vmem:[#allocation21_spill] sm:$0xff] }
 0x4e1   : > { %v8665_v36 = vpop.f32.mrf.mxu2 }
 0x4e2   : > { %v8666_v50 = vadd.f32 %v8665_v36, %v14028_v8  ;;  %v10529_v8 = vld [vmem:[#allocation2 + $0x80] sm:$0x1] }
 0x4e3   : > { %v8609_v2 = vpop.f32.mrf.mxu1  ;;  %v6914_v48 = vrot.slane %v10529_v8, 5 }
 0x4e4   : > { %v14272_v56 = vadd.f32 %v8609_v2, %v8521_v18  ;;  %v10530_v18 = vld [vmem:[#allocation2 + $0x88] sm:$0xf] }
 0x4e5   : > { %v6918_v17 = vrot.slane %v10530_v18, 5 }
 0x4e6   : > { %v8752_v0 = vpop.f32.mrf.mxu3  ;;  %8924 = vmatmul.bf16.gmra.mxu1 %v7564_v43 }
 0x4e7   : > { %v14274_v19 = vadd.f32 %v8752_v0, %v8664_v41  ;;  %v6915_v41 = vsel %vm11251_vm13, %v6913_v30, %v6914_v48  ;;  %v6920_v0 = vrot.slane %v6918_v17, 4 }
 0x4e8   : > { %v7542_v12 = vunpack.c.l.b16 %v6915_v41 }
 0x4e9   : > { %v8668_v53 = vpop.f32.mrf.mxu2 }
 0x4ea   : > { %v8669_v10 = vadd.f32 %v8668_v53, %v14054_v35  ;;  %v8802_v35 = vadd.f32 %v14032_v61, %v14581_v5  ;;  %v7565_v57 = vpack.c.b16 %v7542_v12, %v7541_v52  ;;  %v6798_v53 = vld [vmem:[#allocation2 + $0x84] sm:$0xe]  ;;  %v8807_v12 = vadd.f32 %v14095_v55, %v14583_v63 }
 0x4eb   : > { %v8611_v32 = vpop.f32.mrf.mxu1 }
 0x4ec   : > { %v14279_v29 = vadd.f32 %v8611_v32, %v8523_v34  ;;  %v9684_v32 = vrot.slane %v6798_v53, 9  ;;  %v14585_v53 = vld [vmem:[#allocation24_spill] sm:$0xff] }
 0x4ed   : > { %v8812_v55 = vadd.f32 %v14149_v7, %v14585_v53 }
 0x4ee   : > { %v8754_v15 = vpop.f32.mrf.mxu3  ;;  %v6919_v59 = vsel %vm11251_vm13, %v9684_v32, %v6918_v17  ;;  %v14587_v32 = vld [vmem:[#allocation27_spill] sm:$0xff] }
 0x4ef   : > { %v14283_v42 = vadd.f32 %v8754_v15, %v8666_v50  ;;  %v8821_v50 = vpop.f32.mrf.mxu0 }
 0x4f1   : > { %v8670_v40 = vpop.f32.mrf.mxu2 }
 0x4f2   : > { %v8671_v44 = vadd.f32 %v8670_v40, %v14075_v25  ;;  %v10531_v25 = vld [vmem:[#allocation2 + $0x8c] sm:$0x1]  ;;  %v7543_v40 = vunpack.c.l.b16 %v6919_v59 }
 0x4f3   : > { %v8890_v37 = vpop.f32.mrf.mxu1  ;;  %v6921_v4 = vrot.slane %v10531_v25, 5 }
 0x4f4   : > { %v8891_v39 = vadd.f32 %v8890_v37, %v8802_v35 }
 0x4f6   : > { %v8757_v36 = vpop.f32.mrf.mxu3  ;;  %8929 = vmatmul.bf16.gmra.mxu1 %v7565_v57  ;;  %v8970_v8 = vmax.f32 %v8891_v39, 0.0 }
 0x4f7   : > { %v14290_v2 = vadd.f32 %v8757_v36, %v8669_v10  ;;  %v6922_v10 = vsel %vm11251_vm13, %v6920_v0, %v6921_v4  ;;  %v14584_v36 = vld [vmem:[#allocation17_spill] sm:$0xff] }
 0x4f8   : > { %v7544_v41 = vunpack.c.l.b16 %v6922_v10  ;;  %v8809_v18 = vadd.f32 %v14119_v49, %v14584_v36  ;;  %v8814_v10 = vadd.f32 %v14177_v21, %v14587_v32  ;;  %v8822_v36 = vadd.f32 %v8821_v50, %v14151_v1 }
 0x4f9   : > { %v8673_v43 = vpop.f32.mrf.mxu2 }
 0x4fa   : > { %v8674_v61 = vadd.f32 %v8673_v43, %v14101_v51  ;;  %v8823_v51 = vpop.f32.mrf.mxu0  ;;  %v7566_v52 = vpack.c.b16 %v7544_v41, %v7543_v40  ;;  %v8817_v41 = vadd.f32 %v14205_v46, %v14104_v54  ;;  %v14588_v40 = vld [vmem:[#allocation25_spill] sm:$0xff] }
 0x4fb   : > { %v8892_v30 = vpop.f32.mrf.mxu1 }
 0x4fc   : > { %v8893_v34 = vadd.f32 %v8892_v30, %v8804_v62 }
 0x4fe   : > { %v8759_v13 = vpop.f32.mrf.mxu3  ;;  %v8971_v15 = vmax.f32 %v8893_v34, 0.0 }
 0x4ff   : > { %v14297_v48 = vadd.f32 %v8759_v13, %v8671_v44 }
 0x500   : > { %v9002_v31 = vadd.f32 %v8971_v15, %v8970_v8 }
 0x502   : > { %v8826_v17 = vpop.f32.mrf.mxu0 }
 0x503   : > { %v8895_v5 = vpop.f32.mrf.mxu1 }
 0x504   : > { %v8896_v35 = vadd.f32 %v8895_v5, %v8807_v12 }
 0x506   : > { %v8762_v37 = vpop.f32.mrf.mxu3  ;;  %v8972_v39 = vmax.f32 %v8896_v35, 0.0  ;;  %8934 = vmatmul.bf16.gmra.mxu1 %v7566_v52  ;;  %v8819_v52 = vadd.f32 %v14234_v45, %v14130_v58  ;;  %v8827_v45 = vadd.f32 %v8826_v17, %v14193_v28  ;;  %v6804_v17 = vld [vmem:[#allocation2 + $0xcc] sm:$0xe] }
 0x507   : > { %v14303_v57 = vadd.f32 %v8762_v37, %v8674_v61  ;;  %v14586_v61 = vld [vmem:[#allocation19_spill] sm:$0xff] }
 0x508   : > { %v9003_v44 = vadd.f32 %v9002_v31, %v8972_v39 }
 0x50a   : > { %v8828_v4 = vpop.f32.mrf.mxu0 }
 0x50b   : > { %v8897_v43 = vpop.f32.mrf.mxu1 }
 0x50c   : > { %v8898_v0 = vadd.f32 %v8897_v43, %v8809_v18 }
 0x50e   : > { %v8973_v14 = vmax.f32 %v8898_v0, 0.0 }
 0x510   : > { %v9004_v62 = vadd.f32 %v9003_v44, %v8973_v14  ;;  %v8824_v14 = vadd.f32 %v8823_v51, %v14173_v20 }
 0x512   : > { %v8831_v59 = vpop.f32.mrf.mxu0 }
 0x513   : > { %v8900_v30 = vpop.f32.mrf.mxu1 }
 0x514   : > { %v8901_v25 = vadd.f32 %v8900_v30, %v8812_v55 }
 0x516   : > { %v8974_v34 = vmax.f32 %v8901_v25, 0.0  ;;  %8939 = vmatmul.bf16.gmra.mxu1 %v14586_v61 }
 0x518   : > { %v9005_v13 = vadd.f32 %v9004_v62, %v8974_v34 }
 0x51a   : > { %v8833_v35 = vpop.f32.mrf.mxu0 }
 0x51b   : > { %v8902_v8 = vpop.f32.mrf.mxu1 }
 0x51c   : > { %v8903_v49 = vadd.f32 %v8902_v8, %v8814_v10  ;;  %v8832_v8 = vadd.f32 %v8831_v59, %v14238_v6 }
 0x51e   : > { %v8975_v15 = vmax.f32 %v8903_v49, 0.0 }
 0x520   : > { %v9006_v31 = vadd.f32 %v9005_v13, %v8975_v15  ;;  %v8829_v13 = vadd.f32 %v8828_v4, %v14219_v22  ;;  %v14589_v15 = vld [vmem:[#allocation31_spill] sm:$0xff]  ;;  %v8834_v4 = vadd.f32 %v8833_v35, %v14247_v60 }
 0x522   : > { %v8836_v18 = vpop.f32.mrf.mxu0 }
 0x523   : > { %v8905_v63 = vpop.f32.mrf.mxu1 }
 0x524   : > { %v8906_v7 = vadd.f32 %v8905_v63, %v8817_v41 }
 0x526   : > { %v8976_v12 = vmax.f32 %v8906_v7, 0.0  ;;  %8944 = vmatmul.bf16.gmra.mxu1 %v14588_v40  ;;  %v14590_v7 = vld [vmem:[#allocation33_spill] sm:$0xff] }
 0x528   : > { %v9007_v5 = vadd.f32 %v9006_v31, %v8976_v12  ;;  %v6960_v31 = vrot.slane %v14589_v15, 5  ;;  %v6963_v12 = vrot.slane %v14590_v7, 5 }
 0x52a   : > { %v8838_v55 = vpop.f32.mrf.mxu0  ;;  %v6962_v63 = vrot.slane %v6960_v31, 4 }
 0x52b   : > { %v8907_v37 = vpop.f32.mrf.mxu1 }
 0x52c   : > { %v8908_v21 = vadd.f32 %v8907_v37, %v8819_v52  ;;  %v6964_v59 = vsel %vm11251_vm13, %v6962_v63, %v6963_v12  ;;  %v14591_v63 = vld [vmem:[#allocation28_spill] sm:$0xff] }
 0x52e   : > { %v8977_v39 = vmax.f32 %v8908_v21, 0.0 }
 0x530   : > { %v9008_v44 = vadd.f32 %v9007_v5, %v8977_v39  ;;  %v7556_v39 = vunpack.c.l.b16 %v6964_v59 }
 0x532   : > { %v8841_v1 = vpop.f32.mrf.mxu0 }
 0x533   : > { %v8910_v43 = vpop.f32.mrf.mxu1 }
 0x534   : > { %v8911_v0 = vadd.f32 %v8910_v43, %v8822_v36 }
 0x536   : > { %v8978_v54 = vmax.f32 %v8911_v0, 0.0  ;;  %8949 = vmatmul.bf16.gmra.mxu1 %v14132_v26 }
 0x538   : > { %v9009_v46 = vadd.f32 %v9008_v44, %v8978_v54  ;;  %v8837_v44 = vadd.f32 %v8836_v18, %v14256_v24 }
 0x53a   : > { %v8843_v51 = vpop.f32.mrf.mxu0 }
 0x53b   : > { %v8912_v62 = vpop.f32.mrf.mxu1 }
 0x53c   : > { %v8913_v53 = vadd.f32 %v8912_v62, %v8824_v14 }
 0x53e   : > { %v8979_v30 = vmax.f32 %v8913_v53, 0.0 }
 0x540   : > { %v9010_v58 = vadd.f32 %v9009_v46, %v8979_v30  ;;  %v8839_v46 = vadd.f32 %v8838_v55, %v14265_v33  ;;  %v8764_v33 = vpop.f32.mrf.mxu3 }
 0x542   : > { %v8846_v40 = vpop.f32.mrf.mxu0 }
 0x543   : > { %v8915_v25 = vpop.f32.mrf.mxu1 }
 0x544   : > { %v8916_v34 = vadd.f32 %v8915_v25, %v8827_v45  ;;  %v8842_v45 = vadd.f32 %v8841_v1, %v14274_v19 }
 0x546   : > { %v8980_v61 = vmax.f32 %v8916_v34, 0.0  ;;  %8954 = vmatmul.bf16.gmra.mxu1 %v14175_v47  ;;  %v9690_v47 = vrot.slane %v6804_v17, 9 }
 0x548   : > { %v9011_v50 = vadd.f32 %v9010_v58, %v8980_v61  ;;  %v6961_v6 = vsel %vm11251_vm13, %v9690_v47, %v6960_v31  ;;  %v8844_v61 = vadd.f32 %v8843_v51, %v14283_v42  ;;  %v8767_v1 = vpop.f32.mrf.mxu3 }
 0x549   : > { %v7555_v21 = vunpack.c.l.b16 %v6961_v6 }
 0x54a   : > { %v8848_v54 = vpop.f32.mrf.mxu0 }
 0x54b   : > { %v8917_v26 = vpop.f32.mrf.mxu1  ;;  %v7572_v36 = vpack.c.b16 %v7556_v39, %v7555_v21  ;;  %v8849_v31 = vadd.f32 %v8848_v54, %v14297_v48 }
 0x54c   : > { %v8918_v32 = vadd.f32 %v8917_v26, %v8829_v13 }
 0x54e   : > { %v8981_v10 = vmax.f32 %v8918_v32, 0.0 }
 0x550   : > { %v9012_v20 = vadd.f32 %v9011_v50, %v8981_v10  ;;  %v8675_v50 = vpop.f32.mrf.mxu2  ;;  %v8847_v10 = vadd.f32 %v8846_v40, %v14290_v2  ;;  %v8769_v12 = vpop.f32.mrf.mxu3 }
 0x551   : > { %v8676_v7 = vadd.f32 %v8675_v50, %v14591_v63 }
 0x552   : > { %v8851_v53 = vpop.f32.mrf.mxu0 }
 0x553   : > { %v8920_v49 = vpop.f32.mrf.mxu1  ;;  %v8852_v58 = vadd.f32 %v8851_v53, %v14303_v57 }
 0x554   : > { %v8921_v28 = vadd.f32 %v8920_v49, %v8832_v8 }
 0x556   : > { %v8982_v41 = vmax.f32 %v8921_v28, 0.0  ;;  %8959 = vmatmul.bf16.gmra.mxu1 %v14229_v16 }
 0x558   : > { %v9013_v22 = vadd.f32 %v9012_v20, %v8982_v41  ;;  %v8678_v57 = vpop.f32.mrf.mxu2 }
 0x55a   : > { %v8853_v8 = vpop.f32.mrf.mxu0 }
 0x55b   : > { %v8922_v5 = vpop.f32.mrf.mxu1 }
 0x55c   : > { %v8923_v52 = vadd.f32 %v8922_v5, %v8834_v4  ;;  %v8765_v4 = vadd.f32 %v8764_v33, %v8676_v7 }
 0x55e   : > { %v8983_v37 = vmax.f32 %v8923_v52, 0.0  ;;  %v14592_v52 = vld [vmem:[#allocation26_spill] sm:$0xff]  ;;  %v8854_v21 = vadd.f32 %v8853_v8, %v8765_v4 }
 0x560   : > { %v9014_v16 = vadd.f32 %v9013_v22, %v8983_v37  ;;  %v8680_v41 = vpop.f32.mrf.mxu2  ;;  %v8679_v37 = vadd.f32 %v8678_v57, %v14592_v52 }
 0x562   : > { %v8856_v42 = vpop.f32.mrf.mxu0 }
 0x563   : > { %v8925_v43 = vpop.f32.mrf.mxu1 }
 0x564   : > { %v8926_v0 = vadd.f32 %v8925_v43, %v8837_v44  ;;  %v8768_v44 = vadd.f32 %v8767_v1, %v8679_v37 }
 0x566   : > { %v8984_v60 = vmax.f32 %v8926_v0, 0.0  ;;  %8964 = vmatmul.bf16.gmra.mxu1 %v7572_v36  ;;  %v14593_v0 = vld [vmem:[#allocation30_spill] sm:$0xff] }
 0x567   : > { %v8681_v54 = vadd.f32 %v8680_v41, %v14593_v0 }
 0x568   : > { %v9015_v35 = vadd.f32 %v9014_v16, %v8984_v60  ;;  %v8683_v59 = vpop.f32.mrf.mxu2  ;;  %v8772_v16 = vpop.f32.mrf.mxu3 }
 0x56a   : > { %v8858_v5 = vpop.f32.mrf.mxu0 }
 0x56b   : > { %v8927_v14 = vpop.f32.mrf.mxu1 }
 0x56c   : > { %v8928_v62 = vadd.f32 %v8927_v14, %v8839_v46 }
 0x56e   : > { %v8985_v3 = vmax.f32 %v8928_v62, 0.0 }
 0x570   : > { %v9016_v30 = vadd.f32 %v9015_v35, %v8985_v3  ;;  %v8857_v35 = vadd.f32 %v8856_v42, %v8768_v44  ;;  %v8685_v46 = vpop.f32.mrf.mxu2  ;;  %v8770_v3 = vadd.f32 %v8769_v12, %v8681_v54 }
 0x572   : > { %v8861_v60 = vpop.f32.mrf.mxu0 }
 0x573   : > { %v8930_v25 = vpop.f32.mrf.mxu1 }
 0x574   : > { %v8931_v24 = vadd.f32 %v8930_v25, %v8842_v45  ;;  %v14594_v45 = vld [vmem:[#allocation29_spill] sm:$0xff] }
 0x575   : > { %v8684_v25 = vadd.f32 %v8683_v59, %v14594_v45 }
 0x576   : > { %v8986_v18 = vmax.f32 %v8931_v24, 0.0  ;;  %v8859_v24 = vadd.f32 %v8858_v5, %v8770_v3 }
 0x578   : > { %v9017_v34 = vadd.f32 %v9016_v30, %v8986_v18  ;;  %v8774_v30 = vpop.f32.mrf.mxu3  ;;  %v8688_v50 = vpop.f32.mrf.mxu2 }
 0x57b   : > { %v8932_v13 = vpop.f32.mrf.mxu1 }
 0x57c   : > { %v8933_v26 = vadd.f32 %v8932_v13, %v8844_v61  ;;  %v8773_v13 = vadd.f32 %v8772_v16, %v8684_v25 }
 0x57e   : > { %v8987_v32 = vmax.f32 %v8933_v26, 0.0 }
 0x580   : > { %v9018_v55 = vadd.f32 %v9017_v34, %v8987_v32  ;;  %v8863_v34 = vpop.f32.mrf.mxu0  ;;  %v8777_v33 = vpop.f32.mrf.mxu3 }
 0x583   : > { %v8935_v20 = vpop.f32.mrf.mxu1 }
 0x584   : > { %v8936_v49 = vadd.f32 %v8935_v20, %v8847_v10  ;;  %v8862_v10 = vadd.f32 %v8861_v60, %v8773_v13 }
 0x586   : > { %v8988_v15 = vmax.f32 %v8936_v49, 0.0 }
 0x588   : > { %v9019_v19 = vadd.f32 %v9018_v55, %v8988_v15  ;;  %v8686_v55 = vadd.f32 %v8685_v46, %v14213_v27  ;;  %v8866_v57 = vpop.f32.mrf.mxu0 }
 0x58a   : > { %v8775_v49 = vadd.f32 %v8774_v30, %v8686_v55 }
 0x58b   : > { %v8937_v28 = vpop.f32.mrf.mxu1 }
 0x58c   : > { %v8938_v17 = vadd.f32 %v8937_v28, %v8849_v31  ;;  %v8689_v31 = vadd.f32 %v8688_v50, %v14236_v23  ;;  %v8864_v28 = vadd.f32 %v8863_v34, %v8775_v49 }
 0x58e   : > { %v8989_v51 = vmax.f32 %v8938_v17, 0.0  ;;  %v8779_v17 = vpop.f32.mrf.mxu3  ;;  %v8778_v41 = vadd.f32 %v8777_v33, %v8689_v31 }
 0x590   : > { %v9020_v47 = vadd.f32 %v9019_v19, %v8989_v51  ;;  %v8690_v19 = vpop.f32.mrf.mxu2  ;;  %v8868_v63 = vpop.f32.mrf.mxu0 }
 0x591   : > { %v8691_v27 = vadd.f32 %v8690_v19, %v14243_v38 }
 0x593   : > { %v8940_v22 = vpop.f32.mrf.mxu1  ;;  %v8780_v5 = vadd.f32 %v8779_v17, %v8691_v27 }
 0x594   : > { %v8941_v2 = vadd.f32 %v8940_v22, %v8852_v58  ;;  %v8867_v22 = vadd.f32 %v8866_v57, %v8778_v41 }
 0x595   : > { %v8869_v37 = vadd.f32 %v8868_v63, %v8780_v5 }
 0x596   : > { %v8990_v40 = vmax.f32 %v8941_v2, 0.0 }
 0x598   : > { %v9021_v6 = vadd.f32 %v9020_v47, %v8990_v40  ;;  %v8693_v12 = vpop.f32.mrf.mxu2  ;;  %v8782_v40 = vpop.f32.mrf.mxu3 }
 0x599   : > { %v8871_v52 = vpop.f32.mrf.mxu0  ;;  %v8694_v23 = vadd.f32 %v8693_v12, %v14254_v11 }
 0x59b   : > { %v8942_v48 = vpop.f32.mrf.mxu1  ;;  %v8783_v16 = vadd.f32 %v8782_v40, %v8694_v23 }
 0x59c   : > { %v8943_v39 = vadd.f32 %v8942_v48, %v8854_v21 }
 0x59d   : > { %v8872_v0 = vadd.f32 %v8871_v52, %v8783_v16 }
 0x59e   : > { %v8991_v36 = vmax.f32 %v8943_v39, 0.0 }
 0x5a0   : > { %v9022_v43 = vadd.f32 %v9021_v6, %v8991_v36  ;;  %v8695_v21 = vpop.f32.mrf.mxu2  ;;  %v8784_v36 = vpop.f32.mrf.mxu3 }
 0x5a1   : > { %v8696_v38 = vadd.f32 %v8695_v21, %v14261_v9 }
 0x5a3   : > { %v8945_v14 = vpop.f32.mrf.mxu1 }
 0x5a4   : > { %v8946_v62 = vadd.f32 %v8945_v14, %v8857_v35  ;;  %v8873_v35 = vpop.f32.mrf.mxu0  ;;  %v8785_v14 = vadd.f32 %v8784_v36, %v8696_v38 }
 0x5a6   : > { %v8992_v53 = vmax.f32 %v8946_v62, 0.0  ;;  %v8874_v30 = vadd.f32 %v8873_v35, %v8785_v14 }
 0x5a8   : > { %v9023_v58 = vadd.f32 %v9022_v43, %v8992_v53  ;;  %v8698_v46 = vpop.f32.mrf.mxu2  ;;  %v8787_v53 = vpop.f32.mrf.mxu3 }
 0x5a9   : > { %v8699_v11 = vadd.f32 %v8698_v46, %v14272_v56 }
 0x5ab   : > { %v8947_v18 = vpop.f32.mrf.mxu1 }
 0x5ac   : > { %v8948_v61 = vadd.f32 %v8947_v18, %v8859_v24  ;;  %v8876_v25 = vpop.f32.mrf.mxu0  ;;  %v8788_v24 = vadd.f32 %v8787_v53, %v8699_v11 }
 0x5ae   : > { %v8993_v26 = vmax.f32 %v8948_v61, 0.0  ;;  %v8877_v9 = vadd.f32 %v8876_v25, %v8788_v24 }
 0x5b0   : > { %v9024_v32 = vadd.f32 %v9023_v58, %v8993_v26  ;;  %v8700_v34 = vpop.f32.mrf.mxu2  ;;  %v8789_v13 = vpop.f32.mrf.mxu3 }
 0x5b1   : > { %v8701_v50 = vadd.f32 %v8700_v34, %v14279_v29 }
 0x5b3   : > { %v8950_v20 = vpop.f32.mrf.mxu1  ;;  %v8790_v33 = vadd.f32 %v8789_v13, %v8701_v50 }
 0x5b4   : > { %v8951_v8 = vadd.f32 %v8950_v20, %v8862_v10  ;;  %v8878_v10 = vpop.f32.mrf.mxu0 }
 0x5b5   : > { %v8879_v20 = vadd.f32 %v8878_v10, %v8790_v33 }
 0x5b6   : > { %v8994_v15 = vmax.f32 %v8951_v8, 0.0 }
 0x5b8   : > { %v9025_v1 = vadd.f32 %v9024_v32, %v8994_v15 }
 0x5bb   : > { %v8952_v42 = vpop.f32.mrf.mxu1 }
 0x5bc   : > { %v8953_v51 = vadd.f32 %v8952_v42, %v8864_v28 }
 0x5be   : > { %v8995_v47 = vmax.f32 %v8953_v51, 0.0 }
 0x5c0   : > { %v9026_v7 = vadd.f32 %v9025_v1, %v8995_v47 }
 0x5c3   : > { %v8955_v2 = vpop.f32.mrf.mxu1 }
 0x5c4   : > { %v8956_v4 = vadd.f32 %v8955_v2, %v8867_v22 }
 0x5c6   : > { %v8996_v6 = vmax.f32 %v8956_v4, 0.0 }
 0x5c8   : > { %v9027_v59 = vadd.f32 %v9026_v7, %v8996_v6 }
 0x5cb   : > { %v8957_v48 = vpop.f32.mrf.mxu1 }
 0x5cc   : > { %v8958_v39 = vadd.f32 %v8957_v48, %v8869_v37 }
 0x5ce   : > { %v8997_v44 = vmax.f32 %v8958_v39, 0.0 }
 0x5d0   : > { %v9028_v43 = vadd.f32 %v9027_v59, %v8997_v44 }
 0x5d3   : > { %v8960_v54 = vpop.f32.mrf.mxu1 }
 0x5d4   : > { %v8961_v60 = vadd.f32 %v8960_v54, %v8872_v0 }
 0x5d6   : > { %v8998_v62 = vmax.f32 %v8961_v60, 0.0 }
 0x5d8   : > { %v9029_v3 = vadd.f32 %v9028_v43, %v8998_v62 }
 0x5db   : > { %v8962_v58 = vpop.f32.mrf.mxu1 }
 0x5dc   : > { %v8963_v45 = vadd.f32 %v8962_v58, %v8874_v30 }
 0x5de   : > { %v8999_v18 = vmax.f32 %v8963_v45, 0.0 }
 0x5e0   : > { %v9030_v61 = vadd.f32 %v9029_v3, %v8999_v18 }
 0x5e3   : > { %v8965_v26 = vpop.f32.mrf.mxu1 }
 0x5e4   : > { %v8966_v32 = vadd.f32 %v8965_v26, %v8877_v9 }
 0x5e6   : > { %v9000_v55 = vmax.f32 %v8966_v32, 0.0 }
 0x5e8   : > { %v9031_v56 = vadd.f32 %v9030_v61, %v9000_v55 }
 0x5eb   : > { %v8967_v8 = vpop.f32.mrf.mxu1 }
 0x5ec   : > { %v8968_v49 = vadd.f32 %v8967_v8, %v8879_v20 }
 0x5ee   : > { %v9001_v57 = vmax.f32 %v8968_v49, 0.0 }
 0x5f0   : > { %v9032_v15 = vadd.f32 %v9031_v56, %v9001_v57 }
 0x5f2   : > { %v9033_v19 = vrot.slane %v9032_v15, 4 }
 0x5f4   : > { %v9034_v1 = vadd.f32 %v9033_v19, %v9032_v15 }
 0x5f6   : > { %v9035_v31 = vrot.slane %v9034_v1, 2 }
 0x5f8   : > { %v9036_v28 = vadd.f32 %v9035_v31, %v9034_v1 }
 0x5fa   : > { %v9037_v29 = vrot.slane %v9036_v28, 1 }
 0x5fc   : > { %v9038_v17 = vadd.f32 %v9037_v29, %v9036_v28 }
 0x5fe   : > { %v9039_v42 = vmul.f32 0.00390625, %v9038_v17 }
 0x600   : > { %9040 = vst [vmem:[%s216_s15] sm:$0x1] %v9039_v42 }
 0x601   : > { %10559 = shalt.err (!%p10556_p3)
}
 0x602   : > { %10430 = dma.vmem_to_hbm [thread:$0]  (%p10665_p5), %s9053_s16, 16, %s9055_s17, %s9042_s23  }
 0x603 PF: > { %p10436_p4 = scmp.ge.s32.totalorder %s10594_s21, 2  ;;  %s9066_s8 = sand.u32 1, %s10582_s18  }
 0x604   : > { %s9067_s10 = scalar_lea.sflag [#allocation4], %s9066_s8 }
 0x605   : > { %p10433_p7 = pnand %p10436_p4, %p10669_p6 }
 0x607   : > { %p10434_p8 = pneg %p10433_p7 }
 0x609   : > { %10577 = dma.done.wait (%p10434_p8), %s9067_s10, 16  }
 0x60a   : > { %10579 = vsyncadd (%p10434_p8), %s9067_s10, 4294967280  ;;  %p15_p9 = scmp.ge.s32.totalorder %s10652_s24, 4   ;;  %s14595_s18 = smov %s10586_s19 }
 0x60b   : > { %s14596_s19 = smov %s10590_s20  ;;  %s14597_s20 = smov %s10663_s27 }
 0x60c   : > { %s14598_s21 = smov %s10652_s24  ;;  %17 = sbr.rel (!%p15_p9) target bundleno = 3 (0x3), region = 77 }
 0x611   :  { %9072 = vsyncpa [#allocation4], 1 }
 0x612   :  { %9074 = vsyncpa [#allocation4 + $0x1], 1 }

</bundles_post_ra>
